<compile_context>
chip_gen: v6e
topology: v6e:2x2x1
jax: 0.10.0
libtpu: 0.0.40
codegen_flags: <defaults>
</compile_context>

<pallas_src>
import jax
import jax.numpy as jnp
from jax import lax
from jax.experimental import pallas as pl
from jax.experimental.pallas import tpu as pltpu


def _mgd_kernel(s_ref, t_ref, mask_ref, wal_ref, bal_ref,
                w1_ref, b1_ref, w2_ref, b2_ref,
                out_ref, pad_ref):
    _, H, W, Cs = s_ref.shape
    Ct = t_ref.shape[3]
    Hp, Wp = H + 2, W + 2
    HW = H * W

    # ---- zero-halo maintenance (done every step so each grid iteration is
    # self-contained / megacore-safe).  Only top & bottom halo rows need
    # explicit zeroing: the left/right halo columns are rewritten together with
    # the interior by the aligned row-band stores below.
    zrow = jnp.zeros((1, Wp, Ct), dtype=pad_ref.dtype)
    pad_ref[pl.ds(0, 1), :, :] = zrow
    pad_ref[pl.ds(Hp - 1, 1), :, :] = zrow

    zcol = jnp.zeros((H, 1, Ct), dtype=pad_ref.dtype)

    def store_padded(x_f32):
        # (HW, Ct) f32 -> bf16, fold the L/R halo columns in-register, then ONE
        # aligned (H, Wp, Ct) store (sublane offset 0, full lane width).
        x = x_f32.astype(pad_ref.dtype).reshape(H, W, Ct)
        pad_ref[pl.ds(1, H), :, :] = jnp.concatenate([zcol, x, zcol], axis=1)

    # ---- 1x1 align conv: bf16 MXU matmul, f32 accumulation; bias + per-(n,c)
    # channel mask applied on the VPU in f32.
    # TODO(synk): for tiny Cs (demo Cs=4) a VPU broadcast-FMA would avoid a
    # K=4 MXU matmul; kept as a matmul since the MXU is not the bottleneck.
    xs = s_ref[0].reshape(HW, Cs)                                    # bf16
    aligned = jnp.dot(xs, wal_ref[...], preferred_element_type=jnp.float32)
    masked = (aligned + bal_ref[...]) * mask_ref[0]                  # f32
    store_padded(masked)

    def conv3x3(w_ref, b_ref):
        # 3x3 conv (padding=1) as 9 per-tap (HW,Ct)@(Ct,Ct) bf16 MXU matmuls
        # accumulated in f32.  No (HW, 9*Ct) im2col, no concat, no cast pass:
        # the pad scratch is already bf16.  One aligned (H, Wp, Ct) band load
        # per dy; the dx taps are in-register slices of that loaded value.
        acc = jnp.broadcast_to(b_ref[...], (HW, Ct))                 # bias, hoisted
        for dy in range(3):
            band = pad_ref[pl.ds(dy, H), :, :]                       # (H, Wp, Ct) bf16
            for dx in range(3):
                slab = band[:, dx:dx + W, :].reshape(HW, Ct)
                acc = acc + jnp.dot(slab, w_ref[3 * dy + dx],
                                    preferred_element_type=jnp.float32)
        return acc                                                   # f32

    h1 = jnp.maximum(conv3x3(w1_ref, b1_ref), 0.0)                   # f32 ReLU
    store_padded(h1)
    h2 = conv3x3(w2_ref, b2_ref)

    # ---- squared error vs teacher, partially reduced to one (8,128) vreg tile
    # per batch element (cheap VPU adds only); the scalar cross-lane reduction
    # happens once in the wrapper on the lane-dense per-batch partials.
    diff = h2 - t_ref[0].reshape(HW, Ct).astype(jnp.float32)
    dsq = diff * diff
    if Ct % 128 == 0 and HW % 8 == 0:
        partial = (dsq.reshape(HW // 8, 8, Ct // 128, 128)
                   .sum(axis=2)
                   .sum(axis=0))                                     # (8, 128)
    else:
        partial = jnp.broadcast_to(jnp.sum(dsq) / float(8 * 128), (8, 128))
    out_ref[...] = partial.reshape(1, 8, 128)


def _align_w_to_mat(w_oihw):
    # PyTorch 1x1 conv weight (Cout, Cin, 1, 1) -> (Cin, Cout) matmul operand.
    return jnp.transpose(w_oihw[:, :, 0, 0], (1, 0))


def _gen_w_to_taps(w_oihw):
    # PyTorch 3x3 conv weight OIHW (Cout, Cin, 3, 3) -> tap-major (9, Cin, Cout).
    # NOTE: transpose to (ky, kx, Cin, Cout) BEFORE flattening; a raw reshape of
    # OIHW would silently be the wrong layout for the per-tap matmuls.
    cout, cin = w_oihw.shape[0], w_oihw.shape[1]
    return jnp.transpose(w_oihw, (2, 3, 1, 0)).reshape(9, cin, cout)


def mgd_loss_pallas_nhwc(s_nhwc, t_nhwc, params, mask_nc, alpha_mgd=7e-5):
    """Core entry point: NHWC student/teacher (cast to bf16 here if needed)."""
    N, H, W, Cs = s_nhwc.shape
    Ct = t_nhwc.shape[3]

    s = s_nhwc.astype(jnp.bfloat16)
    t = t_nhwc.astype(jnp.bfloat16)
    mask = mask_nc.reshape(N, 1, Ct).astype(jnp.float32)

    wal = _align_w_to_mat(params["align_w"]).astype(jnp.bfloat16)    # (Cs, Ct)
    bal = params["align_b"].reshape(1, Ct).astype(jnp.float32)
    w1 = _gen_w_to_taps(params["gen1_w"]).astype(jnp.bfloat16)       # (9, Ct, Ct)
    b1 = params["gen1_b"].reshape(1, Ct).astype(jnp.float32)
    w2 = _gen_w_to_taps(params["gen2_w"]).astype(jnp.bfloat16)
    b2 = params["gen2_b"].reshape(1, Ct).astype(jnp.float32)

    # Constant-index-map operands (weights / biases, fetched once).
    # TODO(synk): mark these pipeline_mode=pl.Buffered(1) (single-buffered) once
    # verified on the deployed jaxlib — pure VMEM reclaim, matters on v7x.
    def const_spec(shape):
        nd = len(shape)
        return pl.BlockSpec(shape, lambda n, _nd=nd: (0,) * _nd)

    per_batch = pl.pallas_call(
        _mgd_kernel,
        out_shape=jax.ShapeDtypeStruct((N, 8, 128), jnp.float32),
        grid_spec=pltpu.PrefetchScalarGridSpec(
            num_scalar_prefetch=0,
            grid=(N,),
            in_specs=[
                pl.BlockSpec((1, H, W, Cs), lambda n: (n, 0, 0, 0)),   # student bf16
                pl.BlockSpec((1, H, W, Ct), lambda n: (n, 0, 0, 0)),   # teacher bf16
                pl.BlockSpec((1, 1, Ct), lambda n: (n, 0, 0)),         # channel mask
                const_spec((Cs, Ct)),                                  # align weight
                const_spec((1, Ct)),                                   # align bias
                const_spec((9, Ct, Ct)),                               # gen conv1 taps
                const_spec((1, Ct)),                                   # gen conv1 bias
                const_spec((9, Ct, Ct)),                               # gen conv2 taps
                const_spec((1, Ct)),                                   # gen conv2 bias
            ],
            out_specs=pl.BlockSpec((1, 8, 128), lambda n: (n, 0, 0)),  # per-batch partials
            # bf16 zero-halo pad scratch: half the VMEM / slab traffic of f32.
            # TODO(synk): for production H,W large enough that per-batch maps
            # don't fit VMEM, add a spatial row-block grid axis with 1-row halos.
            scratch_shapes=[pltpu.VMEM((H + 2, W + 2, Ct), jnp.bfloat16)],
        ),
        compiler_params=pltpu.CompilerParams(
            # TODO(synk): switch the batch axis to pltpu.CORE_PARALLEL for v7x's
            # two TensorCores once verified on the deployed jaxlib; "parallel"
            # is always safe and a no-op on single-TC v5e/v6e.
            dimension_semantics=("parallel",),
            # 48 MiB fits v7x's 64 MiB physical VMEM with headroom; raise toward
            # 64-100 MiB on v5e/v6e when enlarging spatial tiles.
            vmem_limit_bytes=48 * 1024 * 1024,
        ),
    )(s, t, mask, wal, bal, w1, b1, w2, b2)

    # Final cross-lane reduction + MSE(sum)/N * alpha_mgd scaling.
    return jnp.sum(per_batch) * (alpha_mgd / N)


def mgd_loss_pallas(preds_S_nchw, preds_T_nchw, params, mask_nc, alpha_mgd=7e-5):
    """PyTorch-convention NCHW convenience wrapper."""
    # TODO(synk): this transpose+cast is an extra HBM pass over the two largest
    # tensors; producers should hand over NHWC bf16 and call *_nhwc directly.
    s = jnp.transpose(preds_S_nchw, (0, 2, 3, 1)).astype(jnp.bfloat16)
    t = jnp.transpose(preds_T_nchw, (0, 2, 3, 1)).astype(jnp.bfloat16)
    return mgd_loss_pallas_nhwc(s, t, params, mask_nc, alpha_mgd)


def mgd_loss_ref(preds_S_nchw, preds_T_nchw, params, mask_nc, alpha_mgd=7e-5):
    """Pure-JAX reference mirroring the kernel's bf16 rounding points."""
    # NOTE: student/teacher/weights are rounded to bf16 (MXU operands); this
    # matches the kernel but differs slightly from a pure-f32 PyTorch MGDLoss.
    N = preds_S_nchw.shape[0]

    def b16(x):
        return x.astype(jnp.bfloat16).astype(jnp.float32)

    s = b16(jnp.transpose(preds_S_nchw, (0, 2, 3, 1)))
    t = b16(jnp.transpose(preds_T_nchw, (0, 2, 3, 1)))
    wal = b16(_align_w_to_mat(params["align_w"]))

    aligned = jnp.einsum("nhwc,cd->nhwd", s, wal,
                         precision=lax.Precision.HIGHEST) + params["align_b"]
    masked = b16(aligned * mask_nc[:, None, None, :])

    def conv(x, w_oihw, b):
        w = b16(jnp.transpose(w_oihw, (2, 3, 1, 0)))                 # HWIO
        y = lax.conv_general_dilated(
            x, w, window_strides=(1, 1), padding="SAME",
            dimension_numbers=("NHWC", "HWIO", "NHWC"),
            precision=lax.Precision.HIGHEST)
        return y + b

    h1 = b16(jnp.maximum(conv(masked, params["gen1_w"], params["gen1_b"]), 0.0))
    h2 = conv(h1, params["gen2_w"], params["gen2_b"])
    return jnp.sum((h2 - t) ** 2) / N * alpha_mgd


if __name__ == "__main__":
    # student_channels != teacher_channels -> the 1x1 align conv path is used.
    # Ct=128 keeps lanes fully used at demo size (production should prefer
    # Ct a multiple of 256 for the 256-wide MXUs on v6e/v7x).
    N, Cs, Ct, H, W = 2, 4, 128, 16, 16
    lambda_mgd = 0.15
    alpha_mgd = 7e-5

    key = jax.random.PRNGKey(0)
    ks = jax.random.split(key, 9)

    preds_S = jax.random.normal(ks[0], (N, Cs, H, W), jnp.float32)   # NCHW (PyTorch)
    preds_T = jax.random.normal(ks[1], (N, Ct, H, W), jnp.float32)   # NCHW

    # Parameters in native PyTorch layouts (OIHW conv weights, flat biases).
    params = {
        "align_w": 0.1 * jax.random.normal(ks[2], (Ct, Cs, 1, 1), jnp.float32),
        "align_b": 0.1 * jax.random.normal(ks[3], (Ct,), jnp.float32),
        "gen1_w": 0.1 * jax.random.normal(ks[4], (Ct, Ct, 3, 3), jnp.float32),
        "gen1_b": 0.1 * jax.random.normal(ks[5], (Ct,), jnp.float32),
        "gen2_w": 0.1 * jax.random.normal(ks[6], (Ct, Ct, 3, 3), jnp.float32),
        "gen2_b": 0.1 * jax.random.normal(ks[7], (Ct,), jnp.float32),
    }

    # torch.rand((N, C, 1, 1)); where(< lambda_mgd, 0, 1) — generated host-side
    # deterministically with jax.random (torch RNG itself is not reproducible).
    u = jax.random.uniform(ks[8], (N, Ct))
    mask_nc = jnp.where(u < lambda_mgd, 0.0, 1.0).astype(jnp.float32)

    loss_fn = jax.jit(lambda s, t, p, m: mgd_loss_pallas(s, t, p, m, alpha_mgd))
    loss = jax.block_until_ready(loss_fn(preds_S, preds_T, params, mask_nc))

    ref = jax.block_until_ready(
        mgd_loss_ref(preds_S, preds_T, params, mask_nc, alpha_mgd))

    assert jnp.allclose(loss, ref, rtol=5e-3, atol=1e-9), (float(loss), float(ref))
    print("KERNEL_OK")
</pallas_src>

<mosaic_0001>
module attributes {stable_mosaic.version = 11 : i64} {
  func.func @_mgd_kernel(%arg0: i32, %arg1: memref<1x16x16x4xbf16, #tpu.memory_space<vmem>>, %arg2: memref<1x16x16x128xbf16, #tpu.memory_space<vmem>>, %arg3: memref<1x1x128xf32, #tpu.memory_space<vmem>>, %arg4: memref<4x128xbf16, #tpu.memory_space<vmem>>, %arg5: memref<1x128xf32, #tpu.memory_space<vmem>>, %arg6: memref<9x128x128xbf16, #tpu.memory_space<vmem>>, %arg7: memref<1x128xf32, #tpu.memory_space<vmem>>, %arg8: memref<9x128x128xbf16, #tpu.memory_space<vmem>>, %arg9: memref<1x128xf32, #tpu.memory_space<vmem>>, %arg10: memref<1x8x128xf32, #tpu.memory_space<vmem>>, %arg11: memref<18x18x128xbf16, #tpu.memory_space<vmem>>) attributes {dimension_semantics = [#tpu.dimension_semantics<parallel>], iteration_bounds = array<i64: 2>, scalar_prefetch = 0 : i64, scratch_operands = 1 : i64, tpu.core_type = #tpu.core_type<tc>, window_params = [{transform_indices = @transform_0, window_bounds = array<i64: 1, 16, 16, 4>}, {transform_indices = @transform_1, window_bounds = array<i64: 1, 16, 16, 128>}, {transform_indices = @transform_2, window_bounds = array<i64: 1, 1, 128>}, {pipeline_mode = #tpu.pipeline_mode<synchronous>, transform_indices = @transform_3, window_bounds = array<i64: 4, 128>}, {pipeline_mode = #tpu.pipeline_mode<synchronous>, transform_indices = @transform_4, window_bounds = array<i64: 1, 128>}, {pipeline_mode = #tpu.pipeline_mode<synchronous>, transform_indices = @transform_5, window_bounds = array<i64: 9, 128, 128>}, {pipeline_mode = #tpu.pipeline_mode<synchronous>, transform_indices = @transform_6, window_bounds = array<i64: 1, 128>}, {pipeline_mode = #tpu.pipeline_mode<synchronous>, transform_indices = @transform_7, window_bounds = array<i64: 9, 128, 128>}, {pipeline_mode = #tpu.pipeline_mode<synchronous>, transform_indices = @transform_8, window_bounds = array<i64: 1, 128>}, {transform_indices = @transform_9, window_bounds = array<i64: 1, 8, 128>}]} {
    %cst = arith.constant 0.000000e+00 : bf16
    %0 = vector.broadcast %cst : bf16 to vector<1x18x128xbf16>
    %c0 = arith.constant 0 : index
    %c0_0 = arith.constant 0 : index
    %c0_1 = arith.constant 0 : index
    %1 = vector.load %arg11[%c0, %c0_0, %c0_1] : memref<18x18x128xbf16, #tpu.memory_space<vmem>>, vector<1x18x128xbf16>
    tpu.vector_store %arg11[%c0, %c0_0, %c0_1], %0 {strides = array<i32>} : memref<18x18x128xbf16, #tpu.memory_space<vmem>>, vector<1x18x128xbf16>,
    %c17 = arith.constant 17 : index
    %c0_2 = arith.constant 0 : index
    %c0_3 = arith.constant 0 : index
    %2 = vector.load %arg11[%c17, %c0_2, %c0_3] : memref<18x18x128xbf16, #tpu.memory_space<vmem>>, vector<1x18x128xbf16>
    tpu.vector_store %arg11[%c17, %c0_2, %c0_3], %0 {strides = array<i32>} : memref<18x18x128xbf16, #tpu.memory_space<vmem>>, vector<1x18x128xbf16>,
    %cst_4 = arith.constant 0.000000e+00 : bf16
    %3 = vector.broadcast %cst_4 : bf16 to vector<16x1x128xbf16>
    %c0_5 = arith.constant 0 : index
    %c0_6 = arith.constant 0 : index
    %c0_7 = arith.constant 0 : index
    %c0_8 = arith.constant 0 : index
    %4 = vector.load %arg1[%c0_5, %c0_6, %c0_7, %c0_8] : memref<1x16x16x4xbf16, #tpu.memory_space<vmem>>, vector<1x16x16x4xbf16>
    %5 = vector.shape_cast %4 : vector<1x16x16x4xbf16> to vector<16x16x4xbf16>
    %6 = vector.shape_cast %5 : vector<16x16x4xbf16> to vector<256x4xbf16>
    %c0_9 = arith.constant 0 : index
    %c0_10 = arith.constant 0 : index
    %7 = vector.load %arg4[%c0_9, %c0_10] : memref<4x128xbf16, #tpu.memory_space<vmem>>, vector<4x128xbf16>
    %cst_11 = arith.constant dense<0.000000e+00> : vector<256x128xf32>
    %8 = tpu.matmul %6, %7, %cst_11 {dimension_numbers = #tpu.dot_dimension_numbers<[1], [0], [0], [1], [0, 0, 1, 1], [], []>} : vector<256x4xbf16>, vector<4x128xbf16>, vector<256x128xf32> -> vector<256x128xf32>
    %c0_12 = arith.constant 0 : index
    %c0_13 = arith.constant 0 : index
    %9 = vector.load %arg5[%c0_12, %c0_13] : memref<1x128xf32, #tpu.memory_space<vmem>>, vector<1x128xf32>
    %10 = vector.broadcast %9 : vector<1x128xf32> to vector<256x128xf32>
    %11 = arith.addf %8, %10 : vector<256x128xf32>
    %c0_14 = arith.constant 0 : index
    %c0_15 = arith.constant 0 : index
    %c0_16 = arith.constant 0 : index
    %12 = vector.load %arg3[%c0_14, %c0_15, %c0_16] : memref<1x1x128xf32, #tpu.memory_space<vmem>>, vector<1x1x128xf32>
    %13 = vector.shape_cast %12 : vector<1x1x128xf32> to vector<1x128xf32>
    %14 = vector.broadcast %13 : vector<1x128xf32> to vector<256x128xf32>
    %15 = arith.mulf %11, %14 : vector<256x128xf32>
    %16 = arith.truncf %15 : vector<256x128xf32> to vector<256x128xbf16>
    %17 = vector.shape_cast %16 : vector<256x128xbf16> to vector<16x16x128xbf16>
    %18 = tpu.concatenate %3, %17, %3 in 1 : vector<16x1x128xbf16>, vector<16x16x128xbf16>, vector<16x1x128xbf16> -> vector<16x18x128xbf16>
    %c1 = arith.constant 1 : index
    %c0_17 = arith.constant 0 : index
    %c0_18 = arith.constant 0 : index
    %19 = vector.load %arg11[%c1, %c0_17, %c0_18] : memref<18x18x128xbf16, #tpu.memory_space<vmem>>, vector<16x18x128xbf16>
    tpu.vector_store %arg11[%c1, %c0_17, %c0_18], %18 {strides = array<i32>} : memref<18x18x128xbf16, #tpu.memory_space<vmem>>, vector<16x18x128xbf16>,
    %c0_19 = arith.constant 0 : index
    %c0_20 = arith.constant 0 : index
    %20 = vector.load %arg7[%c0_19, %c0_20] : memref<1x128xf32, #tpu.memory_space<vmem>>, vector<1x128xf32>
    %21 = vector.shape_cast %20 : vector<1x128xf32> to vector<1x128xf32>
    %22 = vector.broadcast %21 : vector<1x128xf32> to vector<256x128xf32>
    %c0_21 = arith.constant 0 : index
    %c0_22 = arith.constant 0 : index
    %c0_23 = arith.constant 0 : index
    %23 = vector.load %arg11[%c0_21, %c0_22, %c0_23] : memref<18x18x128xbf16, #tpu.memory_space<vmem>>, vector<16x18x128xbf16>
    %24 = vector.extract_strided_slice %23 {offsets = [0, 0, 0], sizes = [16, 16, 128], strides = [1, 1, 1]} : vector<16x18x128xbf16> to vector<16x16x128xbf16>
    %25 = vector.shape_cast %24 : vector<16x16x128xbf16> to vector<256x128xbf16>
    %c0_24 = arith.constant 0 : index
    %c0_25 = arith.constant 0 : index
    %c0_26 = arith.constant 0 : index
    %26 = vector.load %arg6[%c0_24, %c0_25, %c0_26] : memref<9x128x128xbf16, #tpu.memory_space<vmem>>, vector<1x128x128xbf16>
    %27 = vector.shape_cast %26 : vector<1x128x128xbf16> to vector<128x128xbf16>
    %cst_27 = arith.constant dense<0.000000e+00> : vector<256x128xf32>
    %28 = tpu.matmul %25, %27, %cst_27 {dimension_numbers = #tpu.dot_dimension_numbers<[1], [0], [0], [1], [0, 0, 1, 1], [], []>} : vector<256x128xbf16>, vector<128x128xbf16>, vector<256x128xf32> -> vector<256x128xf32>
    %29 = arith.addf %22, %28 : vector<256x128xf32>
    %30 = vector.extract_strided_slice %23 {offsets = [0, 1, 0], sizes = [16, 16, 128], strides = [1, 1, 1]} : vector<16x18x128xbf16> to vector<16x16x128xbf16>
    %31 = vector.shape_cast %30 : vector<16x16x128xbf16> to vector<256x128xbf16>
    %c1_28 = arith.constant 1 : index
    %c0_29 = arith.constant 0 : index
    %c0_30 = arith.constant 0 : index
    %32 = vector.load %arg6[%c1_28, %c0_29, %c0_30] : memref<9x128x128xbf16, #tpu.memory_space<vmem>>, vector<1x128x128xbf16>
    %33 = vector.shape_cast %32 : vector<1x128x128xbf16> to vector<128x128xbf16>
    %cst_31 = arith.constant dense<0.000000e+00> : vector<256x128xf32>
    %34 = tpu.matmul %31, %33, %cst_31 {dimension_numbers = #tpu.dot_dimension_numbers<[1], [0], [0], [1], [0, 0, 1, 1], [], []>} : vector<256x128xbf16>, vector<128x128xbf16>, vector<256x128xf32> -> vector<256x128xf32>
    %35 = arith.addf %29, %34 : vector<256x128xf32>
    %36 = vector.extract_strided_slice %23 {offsets = [0, 2, 0], sizes = [16, 16, 128], strides = [1, 1, 1]} : vector<16x18x128xbf16> to vector<16x16x128xbf16>
    %37 = vector.shape_cast %36 : vector<16x16x128xbf16> to vector<256x128xbf16>
    %c2 = arith.constant 2 : index
    %c0_32 = arith.constant 0 : index
    %c0_33 = arith.constant 0 : index
    %38 = vector.load %arg6[%c2, %c0_32, %c0_33] : memref<9x128x128xbf16, #tpu.memory_space<vmem>>, vector<1x128x128xbf16>
    %39 = vector.shape_cast %38 : vector<1x128x128xbf16> to vector<128x128xbf16>
    %cst_34 = arith.constant dense<0.000000e+00> : vector<256x128xf32>
    %40 = tpu.matmul %37, %39, %cst_34 {dimension_numbers = #tpu.dot_dimension_numbers<[1], [0], [0], [1], [0, 0, 1, 1], [], []>} : vector<256x128xbf16>, vector<128x128xbf16>, vector<256x128xf32> -> vector<256x128xf32>
    %41 = arith.addf %35, %40 : vector<256x128xf32>
    %c1_35 = arith.constant 1 : index
    %c0_36 = arith.constant 0 : index
    %c0_37 = arith.constant 0 : index
    %42 = vector.load %arg11[%c1_35, %c0_36, %c0_37] : memref<18x18x128xbf16, #tpu.memory_space<vmem>>, vector<16x18x128xbf16>
    %43 = vector.extract_strided_slice %42 {offsets = [0, 0, 0], sizes = [16, 16, 128], strides = [1, 1, 1]} : vector<16x18x128xbf16> to vector<16x16x128xbf16>
    %44 = vector.shape_cast %43 : vector<16x16x128xbf16> to vector<256x128xbf16>
    %c3 = arith.constant 3 : index
    %c0_38 = arith.constant 0 : index
    %c0_39 = arith.constant 0 : index
    %45 = vector.load %arg6[%c3, %c0_38, %c0_39] : memref<9x128x128xbf16, #tpu.memory_space<vmem>>, vector<1x128x128xbf16>
    %46 = vector.shape_cast %45 : vector<1x128x128xbf16> to vector<128x128xbf16>
    %cst_40 = arith.constant dense<0.000000e+00> : vector<256x128xf32>
    %47 = tpu.matmul %44, %46, %cst_40 {dimension_numbers = #tpu.dot_dimension_numbers<[1], [0], [0], [1], [0, 0, 1, 1], [], []>} : vector<256x128xbf16>, vector<128x128xbf16>, vector<256x128xf32> -> vector<256x128xf32>
    %48 = arith.addf %41, %47 : vector<256x128xf32>
    %49 = vector.extract_strided_slice %42 {offsets = [0, 1, 0], sizes = [16, 16, 128], strides = [1, 1, 1]} : vector<16x18x128xbf16> to vector<16x16x128xbf16>
    %50 = vector.shape_cast %49 : vector<16x16x128xbf16> to vector<256x128xbf16>
    %c4 = arith.constant 4 : index
    %c0_41 = arith.constant 0 : index
    %c0_42 = arith.constant 0 : index
    %51 = vector.load %arg6[%c4, %c0_41, %c0_42] : memref<9x128x128xbf16, #tpu.memory_space<vmem>>, vector<1x128x128xbf16>
    %52 = vector.shape_cast %51 : vector<1x128x128xbf16> to vector<128x128xbf16>
    %cst_43 = arith.constant dense<0.000000e+00> : vector<256x128xf32>
    %53 = tpu.matmul %50, %52, %cst_43 {dimension_numbers = #tpu.dot_dimension_numbers<[1], [0], [0], [1], [0, 0, 1, 1], [], []>} : vector<256x128xbf16>, vector<128x128xbf16>, vector<256x128xf32> -> vector<256x128xf32>
    %54 = arith.addf %48, %53 : vector<256x128xf32>
    %55 = vector.extract_strided_slice %42 {offsets = [0, 2, 0], sizes = [16, 16, 128], strides = [1, 1, 1]} : vector<16x18x128xbf16> to vector<16x16x128xbf16>
    %56 = vector.shape_cast %55 : vector<16x16x128xbf16> to vector<256x128xbf16>
    %c5 = arith.constant 5 : index
    %c0_44 = arith.constant 0 : index
    %c0_45 = arith.constant 0 : index
    %57 = vector.load %arg6[%c5, %c0_44, %c0_45] : memref<9x128x128xbf16, #tpu.memory_space<vmem>>, vector<1x128x128xbf16>
    %58 = vector.shape_cast %57 : vector<1x128x128xbf16> to vector<128x128xbf16>
    %cst_46 = arith.constant dense<0.000000e+00> : vector<256x128xf32>
    %59 = tpu.matmul %56, %58, %cst_46 {dimension_numbers = #tpu.dot_dimension_numbers<[1], [0], [0], [1], [0, 0, 1, 1], [], []>} : vector<256x128xbf16>, vector<128x128xbf16>, vector<256x128xf32> -> vector<256x128xf32>
    %60 = arith.addf %54, %59 : vector<256x128xf32>
    %c2_47 = arith.constant 2 : index
    %c0_48 = arith.constant 0 : index
    %c0_49 = arith.constant 0 : index
    %61 = vector.load %arg11[%c2_47, %c0_48, %c0_49] : memref<18x18x128xbf16, #tpu.memory_space<vmem>>, vector<16x18x128xbf16>
    %62 = vector.extract_strided_slice %61 {offsets = [0, 0, 0], sizes = [16, 16, 128], strides = [1, 1, 1]} : vector<16x18x128xbf16> to vector<16x16x128xbf16>
    %63 = vector.shape_cast %62 : vector<16x16x128xbf16> to vector<256x128xbf16>
    %c6 = arith.constant 6 : index
    %c0_50 = arith.constant 0 : index
    %c0_51 = arith.constant 0 : index
    %64 = vector.load %arg6[%c6, %c0_50, %c0_51] : memref<9x128x128xbf16, #tpu.memory_space<vmem>>, vector<1x128x128xbf16>
    %65 = vector.shape_cast %64 : vector<1x128x128xbf16> to vector<128x128xbf16>
    %cst_52 = arith.constant dense<0.000000e+00> : vector<256x128xf32>
    %66 = tpu.matmul %63, %65, %cst_52 {dimension_numbers = #tpu.dot_dimension_numbers<[1], [0], [0], [1], [0, 0, 1, 1], [], []>} : vector<256x128xbf16>, vector<128x128xbf16>, vector<256x128xf32> -> vector<256x128xf32>
    %67 = arith.addf %60, %66 : vector<256x128xf32>
    %68 = vector.extract_strided_slice %61 {offsets = [0, 1, 0], sizes = [16, 16, 128], strides = [1, 1, 1]} : vector<16x18x128xbf16> to vector<16x16x128xbf16>
    %69 = vector.shape_cast %68 : vector<16x16x128xbf16> to vector<256x128xbf16>
    %c7 = arith.constant 7 : index
    %c0_53 = arith.constant 0 : index
    %c0_54 = arith.constant 0 : index
    %70 = vector.load %arg6[%c7, %c0_53, %c0_54] : memref<9x128x128xbf16, #tpu.memory_space<vmem>>, vector<1x128x128xbf16>
    %71 = vector.shape_cast %70 : vector<1x128x128xbf16> to vector<128x128xbf16>
    %cst_55 = arith.constant dense<0.000000e+00> : vector<256x128xf32>
    %72 = tpu.matmul %69, %71, %cst_55 {dimension_numbers = #tpu.dot_dimension_numbers<[1], [0], [0], [1], [0, 0, 1, 1], [], []>} : vector<256x128xbf16>, vector<128x128xbf16>, vector<256x128xf32> -> vector<256x128xf32>
    %73 = arith.addf %67, %72 : vector<256x128xf32>
    %74 = vector.extract_strided_slice %61 {offsets = [0, 2, 0], sizes = [16, 16, 128], strides = [1, 1, 1]} : vector<16x18x128xbf16> to vector<16x16x128xbf16>
    %75 = vector.shape_cast %74 : vector<16x16x128xbf16> to vector<256x128xbf16>
    %c8 = arith.constant 8 : index
    %c0_56 = arith.constant 0 : index
    %c0_57 = arith.constant 0 : index
    %76 = vector.load %arg6[%c8, %c0_56, %c0_57] : memref<9x128x128xbf16, #tpu.memory_space<vmem>>, vector<1x128x128xbf16>
    %77 = vector.shape_cast %76 : vector<1x128x128xbf16> to vector<128x128xbf16>
    %cst_58 = arith.constant dense<0.000000e+00> : vector<256x128xf32>
    %78 = tpu.matmul %75, %77, %cst_58 {dimension_numbers = #tpu.dot_dimension_numbers<[1], [0], [0], [1], [0, 0, 1, 1], [], []>} : vector<256x128xbf16>, vector<128x128xbf16>, vector<256x128xf32> -> vector<256x128xf32>
    %79 = arith.addf %73, %78 : vector<256x128xf32>
    %cst_59 = arith.constant 0.000000e+00 : f32
    %80 = vector.broadcast %cst_59 : f32 to vector<256x128xf32>
    %81 = arith.maximumf %79, %80 : vector<256x128xf32>
    %82 = arith.truncf %81 : vector<256x128xf32> to vector<256x128xbf16>
    %83 = vector.shape_cast %82 : vector<256x128xbf16> to vector<16x16x128xbf16>
    %84 = tpu.concatenate %3, %83, %3 in 1 : vector<16x1x128xbf16>, vector<16x16x128xbf16>, vector<16x1x128xbf16> -> vector<16x18x128xbf16>
    %c1_60 = arith.constant 1 : index
    %c0_61 = arith.constant 0 : index
    %c0_62 = arith.constant 0 : index
    %85 = vector.load %arg11[%c1_60, %c0_61, %c0_62] : memref<18x18x128xbf16, #tpu.memory_space<vmem>>, vector<16x18x128xbf16>
    tpu.vector_store %arg11[%c1_60, %c0_61, %c0_62], %84 {strides = array<i32>} : memref<18x18x128xbf16, #tpu.memory_space<vmem>>, vector<16x18x128xbf16>,
    %c0_63 = arith.constant 0 : index
    %c0_64 = arith.constant 0 : index
    %86 = vector.load %arg9[%c0_63, %c0_64] : memref<1x128xf32, #tpu.memory_space<vmem>>, vector<1x128xf32>
    %87 = vector.shape_cast %86 : vector<1x128xf32> to vector<1x128xf32>
    %88 = vector.broadcast %87 : vector<1x128xf32> to vector<256x128xf32>
    %c0_65 = arith.constant 0 : index
    %c0_66 = arith.constant 0 : index
    %c0_67 = arith.constant 0 : index
    %89 = vector.load %arg11[%c0_65, %c0_66, %c0_67] : memref<18x18x128xbf16, #tpu.memory_space<vmem>>, vector<16x18x128xbf16>
    %90 = vector.extract_strided_slice %89 {offsets = [0, 0, 0], sizes = [16, 16, 128], strides = [1, 1, 1]} : vector<16x18x128xbf16> to vector<16x16x128xbf16>
    %91 = vector.shape_cast %90 : vector<16x16x128xbf16> to vector<256x128xbf16>
    %c0_68 = arith.constant 0 : index
    %c0_69 = arith.constant 0 : index
    %c0_70 = arith.constant 0 : index
    %92 = vector.load %arg8[%c0_68, %c0_69, %c0_70] : memref<9x128x128xbf16, #tpu.memory_space<vmem>>, vector<1x128x128xbf16>
    %93 = vector.shape_cast %92 : vector<1x128x128xbf16> to vector<128x128xbf16>
    %cst_71 = arith.constant dense<0.000000e+00> : vector<256x128xf32>
    %94 = tpu.matmul %91, %93, %cst_71 {dimension_numbers = #tpu.dot_dimension_numbers<[1], [0], [0], [1], [0, 0, 1, 1], [], []>} : vector<256x128xbf16>, vector<128x128xbf16>, vector<256x128xf32> -> vector<256x128xf32>
    %95 = arith.addf %88, %94 : vector<256x128xf32>
    %96 = vector.extract_strided_slice %89 {offsets = [0, 1, 0], sizes = [16, 16, 128], strides = [1, 1, 1]} : vector<16x18x128xbf16> to vector<16x16x128xbf16>
    %97 = vector.shape_cast %96 : vector<16x16x128xbf16> to vector<256x128xbf16>
    %c1_72 = arith.constant 1 : index
    %c0_73 = arith.constant 0 : index
    %c0_74 = arith.constant 0 : index
    %98 = vector.load %arg8[%c1_72, %c0_73, %c0_74] : memref<9x128x128xbf16, #tpu.memory_space<vmem>>, vector<1x128x128xbf16>
    %99 = vector.shape_cast %98 : vector<1x128x128xbf16> to vector<128x128xbf16>
    %cst_75 = arith.constant dense<0.000000e+00> : vector<256x128xf32>
    %100 = tpu.matmul %97, %99, %cst_75 {dimension_numbers = #tpu.dot_dimension_numbers<[1], [0], [0], [1], [0, 0, 1, 1], [], []>} : vector<256x128xbf16>, vector<128x128xbf16>, vector<256x128xf32> -> vector<256x128xf32>
    %101 = arith.addf %95, %100 : vector<256x128xf32>
    %102 = vector.extract_strided_slice %89 {offsets = [0, 2, 0], sizes = [16, 16, 128], strides = [1, 1, 1]} : vector<16x18x128xbf16> to vector<16x16x128xbf16>
    %103 = vector.shape_cast %102 : vector<16x16x128xbf16> to vector<256x128xbf16>
    %c2_76 = arith.constant 2 : index
    %c0_77 = arith.constant 0 : index
    %c0_78 = arith.constant 0 : index
    %104 = vector.load %arg8[%c2_76, %c0_77, %c0_78] : memref<9x128x128xbf16, #tpu.memory_space<vmem>>, vector<1x128x128xbf16>
    %105 = vector.shape_cast %104 : vector<1x128x128xbf16> to vector<128x128xbf16>
    %cst_79 = arith.constant dense<0.000000e+00> : vector<256x128xf32>
    %106 = tpu.matmul %103, %105, %cst_79 {dimension_numbers = #tpu.dot_dimension_numbers<[1], [0], [0], [1], [0, 0, 1, 1], [], []>} : vector<256x128xbf16>, vector<128x128xbf16>, vector<256x128xf32> -> vector<256x128xf32>
    %107 = arith.addf %101, %106 : vector<256x128xf32>
    %c1_80 = arith.constant 1 : index
    %c0_81 = arith.constant 0 : index
    %c0_82 = arith.constant 0 : index
    %108 = vector.load %arg11[%c1_80, %c0_81, %c0_82] : memref<18x18x128xbf16, #tpu.memory_space<vmem>>, vector<16x18x128xbf16>
    %109 = vector.extract_strided_slice %108 {offsets = [0, 0, 0], sizes = [16, 16, 128], strides = [1, 1, 1]} : vector<16x18x128xbf16> to vector<16x16x128xbf16>
    %110 = vector.shape_cast %109 : vector<16x16x128xbf16> to vector<256x128xbf16>
    %c3_83 = arith.constant 3 : index
    %c0_84 = arith.constant 0 : index
    %c0_85 = arith.constant 0 : index
    %111 = vector.load %arg8[%c3_83, %c0_84, %c0_85] : memref<9x128x128xbf16, #tpu.memory_space<vmem>>, vector<1x128x128xbf16>
    %112 = vector.shape_cast %111 : vector<1x128x128xbf16> to vector<128x128xbf16>
    %cst_86 = arith.constant dense<0.000000e+00> : vector<256x128xf32>
    %113 = tpu.matmul %110, %112, %cst_86 {dimension_numbers = #tpu.dot_dimension_numbers<[1], [0], [0], [1], [0, 0, 1, 1], [], []>} : vector<256x128xbf16>, vector<128x128xbf16>, vector<256x128xf32> -> vector<256x128xf32>
    %114 = arith.addf %107, %113 : vector<256x128xf32>
    %115 = vector.extract_strided_slice %108 {offsets = [0, 1, 0], sizes = [16, 16, 128], strides = [1, 1, 1]} : vector<16x18x128xbf16> to vector<16x16x128xbf16>
    %116 = vector.shape_cast %115 : vector<16x16x128xbf16> to vector<256x128xbf16>
    %c4_87 = arith.constant 4 : index
    %c0_88 = arith.constant 0 : index
    %c0_89 = arith.constant 0 : index
    %117 = vector.load %arg8[%c4_87, %c0_88, %c0_89] : memref<9x128x128xbf16, #tpu.memory_space<vmem>>, vector<1x128x128xbf16>
    %118 = vector.shape_cast %117 : vector<1x128x128xbf16> to vector<128x128xbf16>
    %cst_90 = arith.constant dense<0.000000e+00> : vector<256x128xf32>
    %119 = tpu.matmul %116, %118, %cst_90 {dimension_numbers = #tpu.dot_dimension_numbers<[1], [0], [0], [1], [0, 0, 1, 1], [], []>} : vector<256x128xbf16>, vector<128x128xbf16>, vector<256x128xf32> -> vector<256x128xf32>
    %120 = arith.addf %114, %119 : vector<256x128xf32>
    %121 = vector.extract_strided_slice %108 {offsets = [0, 2, 0], sizes = [16, 16, 128], strides = [1, 1, 1]} : vector<16x18x128xbf16> to vector<16x16x128xbf16>
    %122 = vector.shape_cast %121 : vector<16x16x128xbf16> to vector<256x128xbf16>
    %c5_91 = arith.constant 5 : index
    %c0_92 = arith.constant 0 : index
    %c0_93 = arith.constant 0 : index
    %123 = vector.load %arg8[%c5_91, %c0_92, %c0_93] : memref<9x128x128xbf16, #tpu.memory_space<vmem>>, vector<1x128x128xbf16>
    %124 = vector.shape_cast %123 : vector<1x128x128xbf16> to vector<128x128xbf16>
    %cst_94 = arith.constant dense<0.000000e+00> : vector<256x128xf32>
    %125 = tpu.matmul %122, %124, %cst_94 {dimension_numbers = #tpu.dot_dimension_numbers<[1], [0], [0], [1], [0, 0, 1, 1], [], []>} : vector<256x128xbf16>, vector<128x128xbf16>, vector<256x128xf32> -> vector<256x128xf32>
    %126 = arith.addf %120, %125 : vector<256x128xf32>
    %c2_95 = arith.constant 2 : index
    %c0_96 = arith.constant 0 : index
    %c0_97 = arith.constant 0 : index
    %127 = vector.load %arg11[%c2_95, %c0_96, %c0_97] : memref<18x18x128xbf16, #tpu.memory_space<vmem>>, vector<16x18x128xbf16>
    %128 = vector.extract_strided_slice %127 {offsets = [0, 0, 0], sizes = [16, 16, 128], strides = [1, 1, 1]} : vector<16x18x128xbf16> to vector<16x16x128xbf16>
    %129 = vector.shape_cast %128 : vector<16x16x128xbf16> to vector<256x128xbf16>
    %c6_98 = arith.constant 6 : index
    %c0_99 = arith.constant 0 : index
    %c0_100 = arith.constant 0 : index
    %130 = vector.load %arg8[%c6_98, %c0_99, %c0_100] : memref<9x128x128xbf16, #tpu.memory_space<vmem>>, vector<1x128x128xbf16>
    %131 = vector.shape_cast %130 : vector<1x128x128xbf16> to vector<128x128xbf16>
    %cst_101 = arith.constant dense<0.000000e+00> : vector<256x128xf32>
    %132 = tpu.matmul %129, %131, %cst_101 {dimension_numbers = #tpu.dot_dimension_numbers<[1], [0], [0], [1], [0, 0, 1, 1], [], []>} : vector<256x128xbf16>, vector<128x128xbf16>, vector<256x128xf32> -> vector<256x128xf32>
    %133 = arith.addf %126, %132 : vector<256x128xf32>
    %134 = vector.extract_strided_slice %127 {offsets = [0, 1, 0], sizes = [16, 16, 128], strides = [1, 1, 1]} : vector<16x18x128xbf16> to vector<16x16x128xbf16>
    %135 = vector.shape_cast %134 : vector<16x16x128xbf16> to vector<256x128xbf16>
    %c7_102 = arith.constant 7 : index
    %c0_103 = arith.constant 0 : index
    %c0_104 = arith.constant 0 : index
    %136 = vector.load %arg8[%c7_102, %c0_103, %c0_104] : memref<9x128x128xbf16, #tpu.memory_space<vmem>>, vector<1x128x128xbf16>
    %137 = vector.shape_cast %136 : vector<1x128x128xbf16> to vector<128x128xbf16>
    %cst_105 = arith.constant dense<0.000000e+00> : vector<256x128xf32>
    %138 = tpu.matmul %135, %137, %cst_105 {dimension_numbers = #tpu.dot_dimension_numbers<[1], [0], [0], [1], [0, 0, 1, 1], [], []>} : vector<256x128xbf16>, vector<128x128xbf16>, vector<256x128xf32> -> vector<256x128xf32>
    %139 = arith.addf %133, %138 : vector<256x128xf32>
    %140 = vector.extract_strided_slice %127 {offsets = [0, 2, 0], sizes = [16, 16, 128], strides = [1, 1, 1]} : vector<16x18x128xbf16> to vector<16x16x128xbf16>
    %141 = vector.shape_cast %140 : vector<16x16x128xbf16> to vector<256x128xbf16>
    %c8_106 = arith.constant 8 : index
    %c0_107 = arith.constant 0 : index
    %c0_108 = arith.constant 0 : index
    %142 = vector.load %arg8[%c8_106, %c0_107, %c0_108] : memref<9x128x128xbf16, #tpu.memory_space<vmem>>, vector<1x128x128xbf16>
    %143 = vector.shape_cast %142 : vector<1x128x128xbf16> to vector<128x128xbf16>
    %cst_109 = arith.constant dense<0.000000e+00> : vector<256x128xf32>
    %144 = tpu.matmul %141, %143, %cst_109 {dimension_numbers = #tpu.dot_dimension_numbers<[1], [0], [0], [1], [0, 0, 1, 1], [], []>} : vector<256x128xbf16>, vector<128x128xbf16>, vector<256x128xf32> -> vector<256x128xf32>
    %145 = arith.addf %139, %144 : vector<256x128xf32>
    %c0_110 = arith.constant 0 : index
    %c0_111 = arith.constant 0 : index
    %c0_112 = arith.constant 0 : index
    %c0_113 = arith.constant 0 : index
    %146 = vector.load %arg2[%c0_110, %c0_111, %c0_112, %c0_113] : memref<1x16x16x128xbf16, #tpu.memory_space<vmem>>, vector<1x16x16x128xbf16>
    %147 = vector.shape_cast %146 : vector<1x16x16x128xbf16> to vector<16x16x128xbf16>
    %148 = vector.shape_cast %147 : vector<16x16x128xbf16> to vector<256x128xbf16>
    %149 = arith.extf %148 : vector<256x128xbf16> to vector<256x128xf32>
    %150 = arith.subf %145, %149 : vector<256x128xf32>
    %151 = arith.mulf %150, %150 : vector<256x128xf32>
    %152 = vector.shape_cast %151 : vector<256x128xf32> to vector<32x8x1x128xf32>
    %cst_114 = arith.constant dense<0.000000e+00> : vector<32x8x128xf32>
    %153 = vector.multi_reduction <add>, %152, %cst_114 [2] : vector<32x8x1x128xf32> to vector<32x8x128xf32>
    %cst_115 = arith.constant dense<0.000000e+00> : vector<8x128xf32>
    %154 = vector.multi_reduction <add>, %153, %cst_115 [0] : vector<32x8x128xf32> to vector<8x128xf32>
    %155 = vector.shape_cast %154 : vector<8x128xf32> to vector<1x8x128xf32>
    %c0_116 = arith.constant 0 : index
    %c0_117 = arith.constant 0 : index
    %c0_118 = arith.constant 0 : index
    %156 = vector.load %arg10[%c0_116, %c0_117, %c0_118] : memref<1x8x128xf32, #tpu.memory_space<vmem>>, vector<1x8x128xf32>
    tpu.vector_store %arg10[%c0_116, %c0_117, %c0_118], %155 {strides = array<i32>} : memref<1x8x128xf32, #tpu.memory_space<vmem>>, vector<1x8x128xf32>,
    return
  }
  func.func @transform_0(%arg0: i32) -> (i32, i32, i32, i32) {
    %c0_i32 = arith.constant 0 : i32
    %c0_i32_0 = arith.constant 0 : i32
    %c0_i32_1 = arith.constant 0 : i32
    %c0_i32_2 = arith.constant 0 : i32
    return %arg0, %c0_i32, %c0_i32_0, %c0_i32_1 : i32, i32, i32, i32
  }
  func.func @transform_1(%arg0: i32) -> (i32, i32, i32, i32) {
    %c0_i32 = arith.constant 0 : i32
    %c0_i32_0 = arith.constant 0 : i32
    %c0_i32_1 = arith.constant 0 : i32
    %c0_i32_2 = arith.constant 0 : i32
    return %arg0, %c0_i32, %c0_i32_0, %c0_i32_1 : i32, i32, i32, i32
  }
  func.func @transform_2(%arg0: i32) -> (i32, i32, i32) {
    %c0_i32 = arith.constant 0 : i32
    %c0_i32_0 = arith.constant 0 : i32
    %c0_i32_1 = arith.constant 0 : i32
    return %arg0, %c0_i32, %c0_i32_0 : i32, i32, i32
  }
  func.func @transform_3(%arg0: i32) -> (i32, i32) {
    %c0_i32 = arith.constant 0 : i32
    %c0_i32_0 = arith.constant 0 : i32
    %c0_i32_1 = arith.constant 0 : i32
    return %c0_i32, %c0_i32_0 : i32, i32
  }
  func.func @transform_4(%arg0: i32) -> (i32, i32) {
    %c0_i32 = arith.constant 0 : i32
    %c0_i32_0 = arith.constant 0 : i32
    %c0_i32_1 = arith.constant 0 : i32
    return %c0_i32, %c0_i32_0 : i32, i32
  }
  func.func @transform_5(%arg0: i32) -> (i32, i32, i32) {
    %c0_i32 = arith.constant 0 : i32
    %c0_i32_0 = arith.constant 0 : i32
    %c0_i32_1 = arith.constant 0 : i32
    %c0_i32_2 = arith.constant 0 : i32
    return %c0_i32, %c0_i32_0, %c0_i32_1 : i32, i32, i32
  }
  func.func @transform_6(%arg0: i32) -> (i32, i32) {
    %c0_i32 = arith.constant 0 : i32
    %c0_i32_0 = arith.constant 0 : i32
    %c0_i32_1 = arith.constant 0 : i32
    return %c0_i32, %c0_i32_0 : i32, i32
  }
  func.func @transform_7(%arg0: i32) -> (i32, i32, i32) {
    %c0_i32 = arith.constant 0 : i32
    %c0_i32_0 = arith.constant 0 : i32
    %c0_i32_1 = arith.constant 0 : i32
    %c0_i32_2 = arith.constant 0 : i32
    return %c0_i32, %c0_i32_0, %c0_i32_1 : i32, i32, i32
  }
  func.func @transform_8(%arg0: i32) -> (i32, i32) {
    %c0_i32 = arith.constant 0 : i32
    %c0_i32_0 = arith.constant 0 : i32
    %c0_i32_1 = arith.constant 0 : i32
    return %c0_i32, %c0_i32_0 : i32, i32
  }
  func.func @transform_9(%arg0: i32) -> (i32, i32, i32) {
    %c0_i32 = arith.constant 0 : i32
    %c0_i32_0 = arith.constant 0 : i32
    %c0_i32_1 = arith.constant 0 : i32
    return %arg0, %c0_i32, %c0_i32_0 : i32, i32, i32
  }
}

</mosaic_0001>

<bundles_post_ra>
// kernel: _lambda_.1
= control target key start
LH: loop header
LB: loop body
LE: loop exit
PB: predicated region body
PF: predicated region fallthrough
CT: control target
= control target key end

     0   :  { %s13957_s30 = smov 0   ;;  %s19358_s0 = inlined_call_operand.vmem [shape: bf16[2,16,16,4], index: 0, kind: input, shape index: {}]   ;;  %s19359_s1 = inlined_call_operand.vmem [shape: bf16[2,16,16,128], index: 1, kind: input, shape index: {}]   ;;  %s19360_s2 = inlined_call_operand.vmem [shape: f32[2,1,128], index: 2, kind: input, shape index: {}]   ;;  %s19361_s3 = inlined_call_operand.vmem [shape: bf16[4,128], index: 3, kind: input, shape index: {}]   ;;  %s19362_s4 = inlined_call_operand.vmem [shape: f32[1,128], index: 4, kind: input, shape index: {}]   ;;  %s19363_s5 = inlined_call_operand.vmem [shape: bf16[9,128,128], index: 5, kind: input, shape index: {}]   ;;  %s19364_s6 = inlined_call_operand.vmem [shape: f32[1,128], index: 6, kind: input, shape index: {}]   ;;  %s19365_s7 = inlined_call_operand.vmem [shape: bf16[9,128,128], index: 7, kind: input, shape index: {}]   ;;  %s19366_s8 = inlined_call_operand.vmem [shape: f32[1,128], index: 8, kind: input, shape index: {}]   ;;  %s19367_s9 = inlined_call_operand.vmem [shape: f32[2,8,128], index: 9, kind: output, shape index: {}]  }
   0x1 LB: > { %s11247_s10 = sadd.s32 4294967295, %s13904_s30   ;;  %p11251_p0 = scmp.ge.s32.totalorder %s13904_s30, 1  ;;  %s13904_s30 = sphi %s13957_s30, %s19_s30  }
   0x2   : > { %p305_p1 = scmp.lt.s32.totalorder %s13904_s30, 3 }
   0x4   : > { %p306_p2 = pnand %p11251_p0, %p305_p1 }
   0x6   : > { %309 = sbr.rel (%p306_p2) target bundleno = 1384 (0x568), region = 56 }
   0xb   : > { %v405_v0 = vld [vmem:[%s19361_s3] sm:$0x3]  ;;  %vm542_vm0 = vcmask 1041408   ;;  %p348_p3 = scmp.lt.s32.totalorder %s11247_s10, 1  ;;  %v13632_v1 = vld [vmem:[%s19363_s5 + $0x38] sm:$0xff]   ;;  %vm493_vm1 = vcmask 31744  }
   0xc   : > { %13605 = vmatprep.subr.msk.bf16.mxu0 %vm542_vm0, %v405_v0  ;;  %v544_v2 = vsel %vm542_vm0, %v405_v0, 0  ;;  %13606 = vmatprep.subr.msk.bf16.mxu1 %vm542_vm0, %v405_v0  ;;  %v13633_v19 = vld [vmem:[%s19363_s5 + $0x30] sm:$0xff]   ;;  %v13634_v20 = vld [vmem:[%s19363_s5 + $0x28] sm:$0xff]   ;;  %v13635_v21 = vld [vmem:[%s19363_s5 + $0x78] sm:$0xff]   ;;  %v13906_v30 = vmov 0   ;;  %v19471_v50 = vmov 0 }
   0xd   : > { %12706 = vmatpush3.bf16.msra.mxu0 %v544_v2  ;;  %s20003_s10 = smov (!%p348_p3, %s11247_s10), 1  ;;  %13604 = vmatpush3.bf16.msra.mxu1 %v544_v2  ;;  %v13636_v22 = vld [vmem:[%s19363_s5 + $0x20] sm:$0xff]   ;;  %v13637_v23 = vld [vmem:[%s19363_s5 + $0x70] sm:$0xff]   ;;  %v13638_v24 = vld [vmem:[%s19363_s5 + $0x18] sm:$0xff]   ;;  %366 = vst [vmem:[#allocation2] sm:$0xf] %v13906_v30 }
   0xe   : > { %12739 = vmatprep.subr.bf16.mxu1 %v13632_v1  ;;  %s12175_s15 = sshll.u32 %s20003_s10, 7  ;;  %12787 = vmatprep.subr.bf16.mxu0 %v13635_v21  ;;  %v13639_v25 = vld [vmem:[%s19363_s5 + $0x68] sm:$0xff]   ;;  %v13640_v26 = vld [vmem:[%s19363_s5 + $0x10] sm:$0xff]   ;;  %v13641_v27 = vld [vmem:[%s19363_s5 + $0x60] sm:$0xff]   ;;  %367 = vst [vmem:[#allocation2 + $0x4] sm:$0xf] %v13906_v30  ;;  %s360_s21 = scalar_lea.vmem %s19360_s2, %s20003_s10 }
   0xf   : > { %s13979_s18 = scalar_lea.vmem %s19358_s0, %s12175_s15  ;;  %v13642_v28 = vld [vmem:[%s19363_s5 + $0x8] sm:$0xff]   ;;  %v13643_v29 = vld [vmem:[%s19363_s5 + $0x58] sm:$0xff]   ;;  %368 = vst [vmem:[#allocation2 + $0x8] sm:$0x1] %v13906_v30  ;;  %370 = vst [vmem:[#allocation2 + $0xcc] sm:$0xf] %v13906_v30  ;;  %s19228_s13 = scalar_lea.vmem %s19359_s1, %s12175_s15 }
  0x10   : > { %v13616_v3 = vld [vmem:[%s13979_s18] sm:$0xff]   ;;  %v13617_v4 = vld [vmem:[%s13979_s18 + $0x8] sm:$0xff]   ;;  %v13618_v5 = vld [vmem:[%s13979_s18 + $0x10] sm:$0xff]   ;;  %371 = vst [vmem:[#allocation2 + $0xd0] sm:$0xf] %v13906_v30  ;;  %vm2299_vm5 = vcmask 1042432  }
  0x11   : > { %12707 = vmatprep.mubr.msk.bf16.mxu0 %vm493_vm1, %v13616_v3  ;;  %v13619_v6 = vld [vmem:[%s13979_s18 + $0x18] sm:$0xff]   ;;  %v13622_v7 = vld [vmem:[%s13979_s18 + $0x40] sm:$0xff]   ;;  %v13623_v8 = vld [vmem:[%s13979_s18 + $0x48] sm:$0xff]   ;;  %372 = vst [vmem:[#allocation2 + $0xd4] sm:$0x1] %v13906_v30  ;;  %vm2300_vm6 = vcmask 1046532  }
  0x12   : > { %12708 = vmatmul.mubr.msk.bf16.vlgmr.msra.gmra.mxu0 %vm493_vm1, %v13617_v4  ;;  %v13620_v9 = vld [vmem:[%s13979_s18 + $0x20] sm:$0xff]   ;;  %12723 = vmatprep.mubr.msk.bf16.mxu1 %vm493_vm1, %v13622_v7  ;;  %v13626_v10 = vld [vmem:[%s13979_s18 + $0x50] sm:$0xff]   ;;  %v13621_v11 = vld [vmem:[%s13979_s18 + $0x28] sm:$0xff]   ;;  %vm1574_vm2 = vsmask.f32 3328  ;;  %vm906_vm7 = vcmask 1040384  }
  0x13   : > { %12711 = vmatprep.mubr.msk.bf16.mxu0 %vm493_vm1, %v13618_v5  ;;  %12724 = vmatmul.mubr.msk.bf16.vlgmr.msra.gmra.mxu1 %vm493_vm1, %v13623_v8  ;;  %v13627_v12 = vld [vmem:[%s13979_s18 + $0x58] sm:$0xff]   ;;  %v13628_v13 = vld [vmem:[%s13979_s18 + $0x60] sm:$0xff]   ;;  %v13624_v14 = vld [vmem:[%s13979_s18 + $0x30] sm:$0xff]   ;;  %vm1575_vm3 = vsmask.f32 7440  ;;  %s11256_s15 = sshll.u32 %s20003_s10, 3 }
  0x14   : > { %12740 = vmatpush3.bf16.msra.mxu1 %v13632_v1  ;;  %12727 = vmatprep.mubr.msk.bf16.mxu1 %vm493_vm1, %v13626_v10  ;;  %v13629_v15 = vld [vmem:[%s13979_s18 + $0x68] sm:$0xff]   ;;  %v13630_v16 = vld [vmem:[%s13979_s18 + $0x70] sm:$0xff]   ;;  %v13625_v17 = vld [vmem:[%s13979_s18 + $0x38] sm:$0xff]   ;;  %vm907_vm8 = vsmask.f32 256  ;;  %s364_s17 = scalar_lea.vmem %s19367_s9, %s11256_s15 }
  0x15   : > { %v13631_v18 = vld [vmem:[%s13979_s18 + $0x78] sm:$0xff]   ;;  %12741 = vmatprep.subr.bf16.mxu1 %v13633_v19  ;;  %12788 = vmatpush3.bf16.msra.mxu0 %v13635_v21  ;;  %v13644_v31 = vld [vmem:[%s19363_s5] sm:$0xff]   ;;  %v13645_v32 = vld [vmem:[%s19363_s5 + $0x50] sm:$0xff]  }
  0x16   : > { %12789 = vmatprep.subr.bf16.mxu0 %v13637_v23  ;;  %v14052_v33 = vld [vmem:[#allocation2] sm:$0xf]  ;;  %v14054_v34 = vld [vmem:[#allocation2 + $0x4] sm:$0xf]  ;;  %v13650_v40 = vld [vmem:[%s19363_s5 + $0x48] sm:$0xff]  }
  0x17   : > { %v11340_v35 = vcombine.low %v14052_v33, %v14054_v34  ;;  %v1578_v36 = vshrl.u32 %v14052_v33, 16  ;;  %v1581_v37 = vshll.u32 %v14052_v33, 16  ;;  %v1591_v38 = vshrl.u32 %v14054_v34, 16  ;;  %v1175_v45 = vld [vmem:[#allocation2 + $0x8] sm:$0x1]  ;;  %v13651_v49 = vld [vmem:[%s19363_s5 + $0x40] sm:$0xff]   ;;  %vm14068_vm4 = vmor %vm1574_vm2, %vm1575_vm3 }
  0x18   : > { %12742 = vmatpush3.bf16.msra.mxu1 %v13633_v19  ;;  %v1587_v39 = vshll.u32 %v14054_v34, 16  ;;  %v1597_v48 = vshll.u32 %v1175_v45, 16  ;;  %v19472_v50 = vsel %vm14068_vm4, 4294967295, %v19471_v50  ;;  %v14079_v56 = vld [vmem:[%s19363_s5 + $0xb8] sm:$0xff]   ;;  %v14091_v60 = vld [vmem:[%s19362_s4] ss:$0 sm:$0xff]  ;;  %vm14113_vm9 = vmor %vm2299_vm5, %vm2300_vm6 }
  0x19   : > { %12743 = vmatprep.subr.bf16.mxu1 %v13634_v20  ;;  %12790 = vmatpush3.bf16.msra.mxu0 %v13637_v23  ;;  %v1580_v41 = vrot.slane %v1578_v36, 4  ;;  %v1583_v42 = vrot.slane %v1581_v37, 5  ;;  %v1593_v44 = vrot.slane %v1591_v38, 4  ;;  %19473 = vst [vmem:[#allocation3_spill] sm:$0xff] %v19472_v50  ;;  %v14085_v58 = vld [vmem:[%s19363_s5 + $0xf8] sm:$0xff]   ;;  %v2304_v3 = vrot.slane %v14054_v34, 5  ;;  %vm14129_vm10 = vmand %vm906_vm7, %vm907_vm8 }
  0x1a   : > { %12712 = vmatmul.mubr.msk.bf16.gmra.mxu0 %vm493_vm1, %v13619_v6  ;;  %12791 = vmatprep.subr.bf16.mxu0 %v13639_v25  ;;  %v1589_v43 = vrot.slane %v1587_v39, 5  ;;  %v1599_v53 = vrot.slane %v1597_v48, 5  ;;  %v14098_v63 = vld [vmem:[%s360_s21] ss:$0 sm:$0xff]  ;;  %v11404_v6 = vrot.slane %v14052_v33, 9  ;;  %v2307_v7 = vrot.slane %v1175_v45, 5 }
  0x1b   : > { %12715 = vmatprep.mubr.msk.bf16.mxu0 %vm493_vm1, %v13620_v9  ;;  %12728 = vmatmul.mubr.msk.bf16.gmra.mxu1 %vm493_vm1, %v13627_v12  ;;  %v1584_v46 = vor.u32 %v1583_v42, %v1580_v41  ;;  %v19474_v19 = vmov 0 }
  0x1c   : > { %12731 = vmatprep.mubr.msk.bf16.mxu1 %vm493_vm1, %v13628_v13  ;;  %12744 = vmatpush3.bf16.msra.mxu1 %v13634_v20  ;;  %v1594_v47 = vor.u32 %v1593_v44, %v1589_v43  ;;  %v19475_v19 = vsel %vm14113_vm9, 4294967295, %v19474_v19  ;;  %v14120_v23 = vsel %vm14113_vm9, %v11404_v6, %v2304_v3 }
  0x1d   : > { %12745 = vmatprep.subr.bf16.mxu1 %v13636_v22  ;;  %12792 = vmatpush3.bf16.msra.mxu0 %v13639_v25  ;;  %v1585_v51 = vrot.slane %v1584_v46, 4  ;;  %19476 = vst [vmem:[#allocation4_spill] sm:$0xff] %v19475_v19 }
  0x1e   : > { %12793 = vmatprep.subr.bf16.mxu0 %v13641_v27  ;;  %v1595_v52 = vrot.slane %v1594_v47, 4 }
  0x1f   : > { %v1590_v54 = vsel %vm14068_vm4, %v1585_v51, %v1589_v43 }
  0x20   : > { %12746 = vmatpush3.bf16.msra.mxu1 %v13636_v22  ;;  %v1600_v55 = vsel %vm14068_vm4, %v1595_v52, %v1599_v53 }
  0x21   : > { %12747 = vmatprep.subr.bf16.mxu1 %v13638_v24  ;;  %12794 = vmatpush3.bf16.msra.mxu0 %v13641_v27  ;;  %v11380_v57 = vcombine.low %v1590_v54, %v1600_v55 }
  0x22   : > { %12716 = vmatmul.mubr.msk.bf16.gmra.mxu0 %vm493_vm1, %v13621_v11  ;;  %12795 = vmatprep.subr.bf16.mxu0 %v13643_v29 }
  0x23   : > { %12719 = vmatprep.mubr.msk.bf16.mxu0 %vm493_vm1, %v13624_v14  ;;  %12732 = vmatmul.mubr.msk.bf16.gmra.mxu1 %vm493_vm1, %v13629_v15  ;;  %v2306_v14 = vrot.slane %v2304_v3, 4 }
  0x24   : > { %12735 = vmatprep.mubr.msk.bf16.mxu1 %vm493_vm1, %v13630_v16  ;;  %12748 = vmatpush3.bf16.msra.mxu1 %v13638_v24 }
  0x25   : > { %12749 = vmatprep.subr.bf16.mxu1 %v13640_v26  ;;  %12796 = vmatpush3.bf16.msra.mxu0 %v13643_v29  ;;  %v14124_v24 = vsel %vm14113_vm9, %v2306_v14, %v2307_v7  ;;  %v19477_v29 = vmov 0 }
  0x26   : > { %12797 = vmatprep.subr.bf16.mxu0 %v13645_v32  ;;  %v19478_v29 = vsel %vm14129_vm10, 4294967295, %v19477_v29 }
  0x27   : > { %19479 = vst [vmem:[#allocation5_spill] sm:$0xff] %v19478_v29 }
  0x28   : > { %12750 = vmatpush3.bf16.msra.mxu1 %v13640_v26 }
  0x29   : > { %12751 = vmatprep.subr.bf16.mxu1 %v13642_v28  ;;  %12798 = vmatpush3.bf16.msra.mxu0 %v13645_v32 }
  0x2a   : > { %12720 = vmatmul.mubr.msk.bf16.gmra.mxu0 %vm493_vm1, %v13625_v17  ;;  %12799 = vmatprep.subr.bf16.mxu0 %v13650_v40 }
  0x2b   : > { %12736 = vmatmul.mubr.msk.bf16.gmra.mxu1 %vm493_vm1, %v13631_v18  ;;  %12803 = vmatprep.mubr.bf16.mxu0 %v11380_v57 }
  0x2c   : > { %12752 = vmatpush3.bf16.msra.mxu1 %v13642_v28  ;;  %12755 = vmatprep.mubr.bf16.mxu1 %v11340_v35 }
  0x2d   : > { %12753 = vmatprep.subr.bf16.mxu1 %v13644_v31  ;;  %12800 = vmatpush3.bf16.msra.mxu0 %v13650_v40 }
  0x2e   : > { %12801 = vmatprep.subr.bf16.mxu0 %v13651_v49 }
  0x30   : > { %12754 = vmatpush3.bf16.msra.mxu1 %v13644_v31 }
  0x31   : > { %12802 = vmatpush3.bf16.msra.mxu0 %v13651_v49  ;;  %12835 = vmatprep.subr.bf16.mxu1 %v14079_v56 }
  0x32   : > { %12883 = vmatprep.subr.bf16.mxu0 %v14085_v58 }
  0xd2   : > { %v12709_v59 = vpop.f32.mrf.mxu0 }
  0xd3   : > { %v589_v62 = vadd.f32 %v12709_v59, %v14091_v60  ;;  %v12725_v5 = vpop.f32.mrf.mxu1 }
  0xd4   : > { %v580_v61 = vpop.f32.mrf.mxu0  ;;  %v653_v11 = vadd.f32 %v12725_v5, %v14091_v60 }
  0xd5   : > { %v581_v1 = vadd.f32 %v14091_v60, %v580_v61  ;;  %v716_v8 = vmul.f32 %v14098_v63, %v589_v62  ;;  %v644_v13 = vpop.f32.mrf.mxu1 }
  0xd6   : > { %v12710_v0 = vpop.f32.mrf.mxu0  ;;  %v645_v21 = vadd.f32 %v14091_v60, %v644_v13  ;;  %v732_v28 = vmul.f32 %v14098_v63, %v653_v11 }
  0xd7   : > { %v592_v2 = vadd.f32 %v12710_v0, %v14091_v60  ;;  %v714_v15 = vmul.f32 %v14098_v63, %v581_v1  ;;  %v12726_v22 = vpop.f32.mrf.mxu1 }
  0xd8   : > { %v583_v4 = vpop.f32.mrf.mxu0  ;;  %v14136_v33 = vmul.f32 %v14098_v63, %v645_v21  ;;  %v656_v34 = vadd.f32 %v12726_v22, %v14091_v60 }
  0xd9   : > { %v717_v9 = vmul.f32 %v14098_v63, %v592_v2  ;;  %v584_v10 = vadd.f32 %v14091_v60, %v583_v4  ;;  %v647_v35 = vpop.f32.mrf.mxu1 }
  0xda   : > { %v12713_v12 = vpop.f32.mrf.mxu0  ;;  %v733_v43 = vmul.f32 %v14098_v63, %v656_v34  ;;  %v648_v44 = vadd.f32 %v14091_v60, %v647_v35 }
  0xdb   : > { %v747_v16 = vpack.c.bf16 %v717_v9, %v716_v8  ;;  %v715_v17 = vmul.f32 %v14098_v63, %v584_v10  ;;  %v605_v18 = vadd.f32 %v12713_v12, %v14091_v60  ;;  %v14157_v4 = vpop.f32.mrf.mxu1 }
  0xdc   : > { %v596_v20 = vpop.f32.mrf.mxu0  ;;  %v14149_v53 = vpack.c.bf16 %v733_v43, %v732_v28  ;;  %v731_v54 = vmul.f32 %v14098_v63, %v648_v44 }
  0xdd   : > { %v770_v25 = vshrl.u32 %v747_v16, 16  ;;  %v773_v26 = vshll.u32 %v747_v16, 16  ;;  %v746_v27 = vpack.c.bf16 %v715_v17, %v714_v15  ;;  %v720_v30 = vmul.f32 %v14098_v63, %v605_v18 }
  0xde   : > { %v597_v31 = vadd.f32 %v14091_v60, %v596_v20  ;;  %v12714_v32 = vpop.f32.mrf.mxu0  ;;  %v826_v17 = vshrl.u32 %v14149_v53, 16 }
  0xdf   : > { %v772_v36 = vrot.slane %v770_v25, 7  ;;  %v763_v37 = vshrl.u32 %v746_v27, 16  ;;  %v608_v38 = vadd.f32 %v12714_v32, %v14091_v60  ;;  %v766_v40 = vshll.u32 %v746_v27, 16 }
  0xe0   : > { %v718_v41 = vmul.f32 %v14098_v63, %v597_v31  ;;  %v599_v42 = vpop.f32.mrf.mxu0  ;;  %v829_v25 = vshll.u32 %v14149_v53, 16 }
  0xe1   : > { %v775_v45 = vor.u32 %v773_v26, %v772_v36  ;;  %v926_v46 = vsel %vm14129_vm10, %v772_v36, 0  ;;  %v765_v47 = vrot.slane %v763_v37, 7  ;;  %v721_v48 = vmul.f32 %v14098_v63, %v608_v38  ;;  %v14168_v26 = vpop.f32.mrf.mxu1 }
  0xe2   : > { %v11296_v49 = vcombine.low %v926_v46, %v926_v46  ;;  %v600_v51 = vadd.f32 %v14091_v60, %v599_v42  ;;  %v12717_v52 = vpop.f32.mrf.mxu0  ;;  %v828_v36 = vrot.slane %v826_v17, 7  ;;  %v14175_v37 = vpack.c.bf16 %v731_v54, %v14136_v33 }
  0xe3   : > { %v910_v55 = vsel %vm14129_vm10, 0, %v775_v45  ;;  %v768_v57 = vor.u32 %v766_v40, %v765_v47  ;;  %v925_v59 = vsel %vm14129_vm10, %v765_v47, 0  ;;  %v749_v61 = vpack.c.bf16 %v721_v48, %v720_v30  ;;  %v14183_v48 = vpop.f32.mrf.mxu1 }
  0xe4   : > { %v11294_v62 = vcombine.low %v910_v55, %v910_v55  ;;  %v11295_v0 = vcombine.high %v910_v55, %v910_v55  ;;  %1123 = vst [vmem:[#allocation2 + $0x20] sm:$0x1] %v11296_v49  ;;  %v11293_v1 = vcombine.low %v925_v59, %v925_v59  ;;  %v719_v2 = vmul.f32 %v14098_v63, %v600_v51  ;;  %v612_v3 = vpop.f32.mrf.mxu0 }
  0xe5   : > { %v909_v5 = vsel %vm14129_vm10, 0, %v768_v57  ;;  %v784_v6 = vshrl.u32 %v749_v61, 16  ;;  %v787_v7 = vshll.u32 %v749_v61, 16  ;;  %v621_v8 = vadd.f32 %v12717_v52, %v14091_v60 }
  0xe6   : > { %1121 = vst [vmem:[#allocation2 + $0x18] sm:$0xf] %v11294_v62  ;;  %1122 = vst [vmem:[#allocation2 + $0x1c] sm:$0xf] %v11295_v0  ;;  %v11291_v9 = vcombine.low %v909_v5, %v909_v5  ;;  %v11292_v10 = vcombine.high %v909_v5, %v909_v5  ;;  %v748_v11 = vpack.c.bf16 %v719_v2, %v718_v41  ;;  %v12718_v13 = vpop.f32.mrf.mxu0  ;;  %v934_v57 = vsel %vm14129_vm10, %v828_v36, 0 }
  0xe7   : > { %1120 = vst [vmem:[#allocation2 + $0x14] sm:$0x1] %v11293_v1  ;;  %v613_v12 = vadd.f32 %v14091_v60, %v612_v3  ;;  %v786_v14 = vrot.slane %v784_v6, 7  ;;  %v724_v15 = vmul.f32 %v14098_v63, %v621_v8  ;;  %v624_v16 = vadd.f32 %v12718_v13, %v14091_v60 }
  0xe8   : > { %1118 = vst [vmem:[#allocation2 + $0xc] sm:$0xf] %v11291_v9  ;;  %1119 = vst [vmem:[#allocation2 + $0x10] sm:$0xf] %v11292_v10  ;;  %v777_v18 = vshrl.u32 %v748_v11, 16  ;;  %v780_v20 = vshll.u32 %v748_v11, 16  ;;  %v615_v22 = vpop.f32.mrf.mxu0  ;;  %v831_v55 = vor.u32 %v829_v25, %v828_v36  ;;  %v11320_v5 = vcombine.low %v934_v57, %v934_v57 }
  0xe9   : > { %v722_v21 = vmul.f32 %v14098_v63, %v613_v12  ;;  %v789_v27 = vor.u32 %v787_v7, %v786_v14  ;;  %v928_v28 = vsel %vm14129_vm10, %v786_v14, 0  ;;  %v725_v30 = vmul.f32 %v14098_v63, %v624_v16  ;;  %v663_v7 = vpop.f32.mrf.mxu1 }
  0xea   : > { %v616_v31 = vadd.f32 %v14091_v60, %v615_v22  ;;  %v11302_v32 = vcombine.low %v928_v28, %v928_v28  ;;  %v779_v34 = vrot.slane %v777_v18, 7  ;;  %v12721_v35 = vpop.f32.mrf.mxu0  ;;  %v918_v3 = vsel %vm14129_vm10, 0, %v831_v55  ;;  %1147 = vst [vmem:[#allocation2 + $0x80] sm:$0x1] %v11320_v5 }
  0xeb   : > { %v912_v38 = vsel %vm14129_vm10, 0, %v789_v27  ;;  %v751_v40 = vpack.c.bf16 %v725_v30, %v724_v15  ;;  %v637_v42 = vadd.f32 %v12721_v35, %v14091_v60  ;;  %v11318_v11 = vcombine.low %v918_v3, %v918_v3  ;;  %v12733_v30 = vpop.f32.mrf.mxu1 }
  0xec   : > { %v723_v41 = vmul.f32 %v14098_v63, %v616_v31  ;;  %v11300_v43 = vcombine.low %v912_v38, %v912_v38  ;;  %v11301_v44 = vcombine.high %v912_v38, %v912_v38  ;;  %1129 = vst [vmem:[#allocation2 + $0x38] sm:$0x1] %v11302_v32  ;;  %v782_v45 = vor.u32 %v780_v20, %v779_v34  ;;  %v628_v47 = vpop.f32.mrf.mxu0 }
  0xed   : > { %v927_v46 = vsel %vm14129_vm10, %v779_v34, 0  ;;  %v798_v49 = vshrl.u32 %v751_v40, 16  ;;  %v801_v51 = vshll.u32 %v751_v40, 16  ;;  %v14188_v54 = vmul.f32 %v14098_v63, %v637_v42  ;;  %1145 = vst [vmem:[#allocation2 + $0x78] sm:$0xf] %v11318_v11 }
  0xee   : > { %v11299_v33 = vcombine.low %v927_v46, %v927_v46  ;;  %v750_v52 = vpack.c.bf16 %v723_v41, %v722_v21  ;;  %1127 = vst [vmem:[#allocation2 + $0x30] sm:$0xf] %v11300_v43  ;;  %1128 = vst [vmem:[#allocation2 + $0x34] sm:$0xf] %v11301_v44  ;;  %v911_v53 = vsel %vm14129_vm10, 0, %v782_v45  ;;  %v12722_v59 = vpop.f32.mrf.mxu0  ;;  %v629_v6 = vadd.f32 %v14091_v60, %v628_v47 }
  0xef   : > { %v11297_v61 = vcombine.low %v911_v53, %v911_v53  ;;  %v11298_v62 = vcombine.high %v911_v53, %v911_v53  ;;  %v800_v0 = vrot.slane %v798_v49, 7  ;;  %v11319_v13 = vcombine.high %v918_v3, %v918_v3  ;;  %v14210_v36 = vld [vmem:[#allocation2 + $0xc] sm:$0xf]  ;;  %v14219_v46 = vld [vmem:[#allocation2 + $0x18] sm:$0xf]  ;;  %v676_v53 = vpop.f32.mrf.mxu1 }
  0xf0   : > { %1126 = vst [vmem:[#allocation2 + $0x2c] sm:$0x1] %v11299_v33  ;;  %v791_v1 = vshrl.u32 %v750_v52, 16  ;;  %v794_v2 = vshll.u32 %v750_v52, 16  ;;  %v726_v14 = vmul.f32 %v14098_v63, %v629_v6  ;;  %v819_v15 = vshrl.u32 %v14175_v37, 16  ;;  %v631_v16 = vpop.f32.mrf.mxu0 }
  0xf1   : > { %1124 = vst [vmem:[#allocation2 + $0x24] sm:$0xf] %v11297_v61  ;;  %1125 = vst [vmem:[#allocation2 + $0x28] sm:$0xf] %v11298_v62  ;;  %v803_v8 = vor.u32 %v801_v51, %v800_v0  ;;  %v930_v9 = vsel %vm14129_vm10, %v800_v0, 0  ;;  %v822_v21 = vshll.u32 %v14175_v37, 16  ;;  %v640_v32 = vadd.f32 %v12722_v59, %v14091_v60 }
  0xf2   : > { %v793_v10 = vrot.slane %v791_v1, 7  ;;  %v11308_v12 = vcombine.low %v930_v9, %v930_v9  ;;  %1146 = vst [vmem:[#allocation2 + $0x7c] sm:$0xf] %v11319_v13  ;;  %v821_v28 = vrot.slane %v819_v15, 7  ;;  %v669_v34 = vadd.f32 %v14157_v4, %v14091_v60  ;;  %v14212_v37 = vld [vmem:[#allocation2 + $0x10] sm:$0xf] }
  0xf3   : > { %v914_v17 = vsel %vm14129_vm10, 0, %v803_v8  ;;  %v632_v35 = vadd.f32 %v14091_v60, %v631_v16  ;;  %v729_v44 = vmul.f32 %v14098_v63, %v640_v32  ;;  %v14221_v47 = vld [vmem:[#allocation2 + $0x1c] sm:$0xf]  ;;  %v661_v49 = vadd.f32 %v14091_v60, %v14168_v26  ;;  %v13652_v62 = vld [vmem:[%s19363_s5 + $0xb0] sm:$0xff]   ;;  %v13655_v13 = vld [vmem:[%s19363_s5 + $0xa8] sm:$0xff]  }
  0xf4   : > { %v796_v18 = vor.u32 %v794_v2, %v793_v10  ;;  %v929_v20 = vsel %vm14129_vm10, %v793_v10, 0  ;;  %v11306_v22 = vcombine.low %v914_v17, %v914_v17  ;;  %v11307_v25 = vcombine.high %v914_v17, %v914_v17  ;;  %1135 = vst [vmem:[#allocation2 + $0x50] sm:$0x1] %v11308_v12  ;;  %v12734_v12 = vpop.f32.mrf.mxu1 }
  0xf5   : > { %v11305_v27 = vcombine.low %v929_v20, %v929_v20  ;;  %v824_v41 = vor.u32 %v822_v21, %v821_v28  ;;  %v933_v42 = vsel %vm14129_vm10, %v821_v28, 0  ;;  %v736_v4 = vmul.f32 %v14098_v63, %v669_v34 }
  0xf6   : > { %v913_v31 = vsel %vm14129_vm10, 0, %v796_v18  ;;  %1133 = vst [vmem:[#allocation2 + $0x48] sm:$0xf] %v11306_v22  ;;  %1134 = vst [vmem:[#allocation2 + $0x4c] sm:$0xf] %v11307_v25  ;;  %v11317_v43 = vcombine.low %v933_v42, %v933_v42  ;;  %v727_v45 = vmul.f32 %v14098_v63, %v632_v35  ;;  %v672_v51 = vadd.f32 %v14183_v48, %v14091_v60 }
  0xf7   : > { %v11303_v38 = vcombine.low %v913_v31, %v913_v31  ;;  %v11304_v40 = vcombine.high %v913_v31, %v913_v31  ;;  %1132 = vst [vmem:[#allocation2 + $0x44] sm:$0x1] %v11305_v27  ;;  %v917_v33 = vsel %vm14129_vm10, 0, %v824_v41  ;;  %v11341_v52 = vcombine.low %v14210_v36, %v14212_v37  ;;  %v14259_v35 = vld [vmem:[#allocation2 + $0x30] sm:$0xf] }
  0xf8   : > { %v11315_v55 = vcombine.low %v917_v33, %v917_v33  ;;  %v11316_v57 = vcombine.high %v917_v33, %v917_v33  ;;  %1144 = vst [vmem:[#allocation2 + $0x74] sm:$0x1] %v11317_v43  ;;  %v753_v59 = vpack.c.bf16 %v729_v44, %v14188_v54  ;;  %v752_v61 = vpack.c.bf16 %v727_v45, %v726_v14  ;;  %v14240_v2 = vld [vmem:[#allocation2 + $0x24] sm:$0xf]  ;;  %v14242_v3 = vld [vmem:[#allocation2 + $0x28] sm:$0xf] }
  0xf9   : > { %1130 = vst [vmem:[#allocation2 + $0x3c] sm:$0xf] %v11303_v38  ;;  %1131 = vst [vmem:[#allocation2 + $0x40] sm:$0xf] %v11304_v40  ;;  %v734_v0 = vmul.f32 %v14098_v63, %v661_v49  ;;  %v737_v26 = vmul.f32 %v14098_v63, %v672_v51  ;;  %12756 = vmatmul.mubr.bf16.vlgmr.msra.gmra.mxu1 %v11341_v52  ;;  %v11342_v48 = vcombine.low %v14219_v46, %v14221_v47  ;;  %v13658_v38 = vld [vmem:[%s19363_s5 + $0xa0] sm:$0xff]  }
  0xfa   : > { %v664_v1 = vadd.f32 %v14091_v60, %v663_v7  ;;  %1142 = vst [vmem:[#allocation2 + $0x6c] sm:$0xf] %v11315_v55  ;;  %1143 = vst [vmem:[#allocation2 + $0x70] sm:$0xf] %v11316_v57  ;;  %v812_v54 = vshrl.u32 %v753_v59, 16  ;;  %v815_v5 = vshll.u32 %v753_v59, 16  ;;  %12836 = vmatpush3.bf16.msra.mxu1 %v14079_v56  ;;  %v685_v11 = vadd.f32 %v12733_v30, %v14091_v60 }
  0xfb   : > { %v805_v6 = vshrl.u32 %v752_v61, 16  ;;  %v808_v8 = vshll.u32 %v752_v61, 16  ;;  %v757_v9 = vpack.c.bf16 %v737_v26, %v736_v4  ;;  %12759 = vmatprep.mubr.bf16.mxu1 %v11342_v48  ;;  %v677_v7 = vadd.f32 %v14091_v60, %v676_v53  ;;  %12837 = vmatprep.subr.bf16.mxu1 %v13652_v62  ;;  %v14271_v44 = vld [vmem:[#allocation2 + $0x34] sm:$0xf] }
  0xfc   : > { %v735_v10 = vmul.f32 %v14098_v63, %v664_v1  ;;  %v814_v14 = vrot.slane %v812_v54, 7  ;;  %v688_v16 = vadd.f32 %v12734_v12, %v14091_v60  ;;  %v11343_v56 = vcombine.low %v14240_v2, %v14242_v3 }
  0xfd   : > { %v807_v15 = vrot.slane %v805_v6, 7  ;;  %v840_v17 = vshrl.u32 %v757_v9, 16  ;;  %v843_v18 = vshll.u32 %v757_v9, 16  ;;  %v740_v21 = vmul.f32 %v14098_v63, %v685_v11 }
  0xfe   : > { %v756_v20 = vpack.c.bf16 %v735_v10, %v734_v0  ;;  %v817_v22 = vor.u32 %v815_v5, %v814_v14  ;;  %v932_v25 = vsel %vm14129_vm10, %v814_v14, 0  ;;  %12838 = vmatpush3.bf16.msra.mxu1 %v13652_v62  ;;  %v14269_v43 = vmul.f32 %v14098_v63, %v677_v7  ;;  %v13661_v0 = vld [vmem:[%s19363_s5 + $0x98] sm:$0xff]   ;;  %v679_v5 = vpop.f32.mrf.mxu1 }
  0xff   : > { %v810_v27 = vor.u32 %v808_v8, %v807_v15  ;;  %v931_v28 = vsel %vm14129_vm10, %v807_v15, 0  ;;  %v11314_v30 = vcombine.low %v932_v25, %v932_v25  ;;  %v842_v32 = vrot.slane %v840_v17, 7  ;;  %12839 = vmatprep.subr.bf16.mxu1 %v13655_v13  ;;  %v13664_v17 = vld [vmem:[%s19363_s5 + $0x90] sm:$0xff]  }
 0x100   : > { %v11311_v31 = vcombine.low %v931_v28, %v931_v28  ;;  %v833_v34 = vshrl.u32 %v756_v20, 16  ;;  %v916_v40 = vsel %vm14129_vm10, 0, %v817_v22  ;;  %v836_v42 = vshll.u32 %v756_v20, 16  ;;  %v12737_v25 = vpop.f32.mrf.mxu1 }
 0x101   : > { %v915_v41 = vsel %vm14129_vm10, 0, %v810_v27  ;;  %v11312_v4 = vcombine.low %v916_v40, %v916_v40  ;;  %v11313_v45 = vcombine.high %v916_v40, %v916_v40  ;;  %1141 = vst [vmem:[#allocation2 + $0x68] sm:$0x1] %v11314_v30  ;;  %12760 = vmatmul.mubr.bf16.gmra.mxu1 %v11343_v56  ;;  %v845_v51 = vor.u32 %v843_v18, %v842_v32 }
 0x102   : > { %v11309_v33 = vcombine.low %v915_v41, %v915_v41  ;;  %v11310_v49 = vcombine.high %v915_v41, %v915_v41  ;;  %1138 = vst [vmem:[#allocation2 + $0x5c] sm:$0x1] %v11311_v31  ;;  %v936_v52 = vsel %vm14129_vm10, %v842_v32, 0  ;;  %v835_v53 = vrot.slane %v833_v34, 7  ;;  %12840 = vmatpush3.bf16.msra.mxu1 %v13655_v13 }
 0x103   : > { %v741_v55 = vmul.f32 %v14098_v63, %v688_v16  ;;  %1139 = vst [vmem:[#allocation2 + $0x60] sm:$0xf] %v11312_v4  ;;  %1140 = vst [vmem:[#allocation2 + $0x64] sm:$0xf] %v11313_v45  ;;  %v11326_v57 = vcombine.low %v936_v52, %v936_v52  ;;  %v11344_v59 = vcombine.low %v14259_v35, %v14271_v44  ;;  %v1602_v61 = vshrl.u32 %v14210_v36, 16 }
 0x104   : > { %1136 = vst [vmem:[#allocation2 + $0x54] sm:$0xf] %v11309_v33  ;;  %1137 = vst [vmem:[#allocation2 + $0x58] sm:$0xf] %v11310_v49  ;;  %v1605_v62 = vshll.u32 %v14210_v36, 16  ;;  %12841 = vmatprep.subr.bf16.mxu1 %v13658_v38  ;;  %v920_v26 = vsel %vm14129_vm10, 0, %v845_v51  ;;  %v838_v48 = vor.u32 %v836_v42, %v835_v53  ;;  %v680_v22 = vadd.f32 %v14091_v60, %v679_v5 }
 0x105   : > { %v935_v1 = vsel %vm14129_vm10, %v835_v53, 0  ;;  %v759_v54 = vpack.c.bf16 %v741_v55, %v740_v21  ;;  %v11324_v6 = vcombine.low %v920_v26, %v920_v26  ;;  %v11325_v8 = vcombine.high %v920_v26, %v920_v26  ;;  %1153 = vst [vmem:[#allocation2 + $0x98] sm:$0x1] %v11326_v57  ;;  %12763 = vmatprep.mubr.bf16.mxu1 %v11344_v59  ;;  %v14287_v36 = vld [vmem:[#allocation2 + $0x14] sm:$0x1]  ;;  %v13669_v33 = vld [vmem:[%s19363_s5 + $0x88] sm:$0xff]   ;;  %v692_v53 = vpop.f32.mrf.mxu1 }
 0x106   : > { %v11323_v9 = vcombine.low %v935_v1, %v935_v1  ;;  %v1604_v10 = vrot.slane %v1602_v61, 4  ;;  %v919_v11 = vsel %vm14129_vm10, 0, %v838_v48  ;;  %v1607_v13 = vrot.slane %v1605_v62, 5  ;;  %12842 = vmatpush3.bf16.msra.mxu1 %v13658_v38  ;;  %v14303_v4 = vld [vmem:[#allocation2 + $0x20] sm:$0x1] }
 0x107   : > { %v854_v7 = vshrl.u32 %v759_v54, 16  ;;  %v857_v12 = vshll.u32 %v759_v54, 16  ;;  %1151 = vst [vmem:[#allocation2 + $0x90] sm:$0xf] %v11324_v6  ;;  %1152 = vst [vmem:[#allocation2 + $0x94] sm:$0xf] %v11325_v8  ;;  %v11321_v14 = vcombine.low %v919_v11, %v919_v11  ;;  %v11322_v15 = vcombine.high %v919_v11, %v919_v11  ;;  %12843 = vmatprep.subr.bf16.mxu1 %v13661_v0 }
 0x108   : > { %1150 = vst [vmem:[#allocation2 + $0x8c] sm:$0x1] %v11323_v9  ;;  %v1611_v16 = vshll.u32 %v14212_v37, 16  ;;  %v1615_v56 = vshrl.u32 %v14212_v37, 16  ;;  %v1608_v20 = vor.u32 %v1607_v13, %v1604_v10  ;;  %v1621_v21 = vshll.u32 %v14287_v36, 16  ;;  %v12738_v13 = vpop.f32.mrf.mxu1 }
 0x109   : > { %v856_v18 = vrot.slane %v854_v7, 7  ;;  %1148 = vst [vmem:[#allocation2 + $0x84] sm:$0xf] %v11321_v14  ;;  %1149 = vst [vmem:[#allocation2 + $0x88] sm:$0xf] %v11322_v15  ;;  %v1626_v30 = vshrl.u32 %v14219_v46, 16  ;;  %v739_v42 = vmul.f32 %v14098_v63, %v680_v22 }
 0x10a   : > { %v1613_v27 = vrot.slane %v1611_v16, 5  ;;  %v1617_v28 = vrot.slane %v1615_v56, 4  ;;  %v1629_v37 = vshll.u32 %v14219_v46, 16  ;;  %v1609_v34 = vrot.slane %v1608_v20, 4  ;;  %12844 = vmatpush3.bf16.msra.mxu1 %v13661_v0  ;;  %v14314_v62 = vld [vmem:[#allocation2 + $0x48] sm:$0xf] }
 0x10b   : > { %v859_v31 = vor.u32 %v857_v12, %v856_v18  ;;  %v938_v32 = vsel %vm14129_vm10, %v856_v18, 0  ;;  %v1623_v38 = vrot.slane %v1621_v21, 5  ;;  %v1628_v45 = vrot.slane %v1626_v30, 4  ;;  %12845 = vmatprep.subr.bf16.mxu1 %v13664_v17  ;;  %v14318_v54 = vld [vmem:[#allocation2 + $0x4c] sm:$0xf]  ;;  %v13668_v14 = vld [vmem:[%s19363_s5 + $0xf0] sm:$0xff]  }
 0x10c   : > { %v11332_v40 = vcombine.low %v938_v32, %v938_v32  ;;  %v1618_v41 = vor.u32 %v1617_v28, %v1613_v27  ;;  %v1614_v49 = vsel %vm14068_vm4, %v1609_v34, %v1613_v27  ;;  %v1631_v51 = vrot.slane %v1629_v37, 5  ;;  %v14323_v9 = vld [vmem:[#allocation2 + $0x3c] sm:$0xf]  ;;  %v14325_v10 = vld [vmem:[#allocation2 + $0x40] sm:$0xf] }
 0x10d   : > { %v922_v46 = vsel %vm14129_vm10, 0, %v859_v31  ;;  %v1635_v52 = vshll.u32 %v14221_v47, 16  ;;  %v758_v61 = vpack.c.bf16 %v739_v42, %v14269_v43  ;;  %v1639_v48 = vshrl.u32 %v14221_v47, 16  ;;  %v13674_v18 = vld [vmem:[%s19363_s5 + $0x80] sm:$0xff]  }
 0x10e   : > { %v11330_v55 = vcombine.low %v922_v46, %v922_v46  ;;  %v11331_v57 = vcombine.high %v922_v46, %v922_v46  ;;  %1159 = vst [vmem:[#allocation2 + $0xb0] sm:$0x1] %v11332_v40  ;;  %v1619_v59 = vrot.slane %v1618_v41, 4  ;;  %v1632_v0 = vor.u32 %v1631_v51, %v1628_v45  ;;  %12846 = vmatpush3.bf16.msra.mxu1 %v13664_v17  ;;  %v13672_v40 = vld [vmem:[%s19363_s5 + $0xe8] sm:$0xff]   ;;  %v14355_v41 = vld [vmem:[%s19363_s5 + $0x138] sm:$0xff]   ;;  %v695_v46 = vpop.f32.mrf.mxu1 }
 0x10f   : > { %v1637_v26 = vrot.slane %v1635_v52, 5  ;;  %v1645_v1 = vshll.u32 %v14303_v4, 16  ;;  %v847_v6 = vshrl.u32 %v758_v61, 16  ;;  %v850_v8 = vshll.u32 %v758_v61, 16  ;;  %12847 = vmatprep.subr.bf16.mxu1 %v13669_v33  ;;  %v14359_v45 = vld [vmem:[#allocation2 + $0x2c] sm:$0x1] }
 0x110   : > { %1157 = vst [vmem:[#allocation2 + $0xa8] sm:$0xf] %v11330_v55  ;;  %1158 = vst [vmem:[#allocation2 + $0xac] sm:$0xf] %v11331_v57  ;;  %v1624_v5 = vsel %vm14068_vm4, %v1619_v59, %v1623_v38  ;;  %v701_v43 = vadd.f32 %v12737_v25, %v14091_v60  ;;  %v1633_v11 = vrot.slane %v1632_v0, 4  ;;  %v1641_v7 = vrot.slane %v1639_v48, 4 }
 0x111   : > { %v11381_v47 = vcombine.low %v1614_v49, %v1624_v5  ;;  %v1647_v12 = vrot.slane %v1645_v1, 5  ;;  %v849_v15 = vrot.slane %v847_v6, 7  ;;  %v693_v56 = vadd.f32 %v14091_v60, %v692_v53  ;;  %v13673_v1 = vld [vmem:[%s19363_s5 + $0xe0] sm:$0xff]  }
 0x112   : > { %v744_v16 = vmul.f32 %v14098_v63, %v701_v43  ;;  %v704_v17 = vadd.f32 %v12738_v13, %v14091_v60  ;;  %v1638_v20 = vsel %vm14068_vm4, %v1633_v11, %v1637_v26  ;;  %v1642_v21 = vor.u32 %v1641_v7, %v1637_v26  ;;  %12848 = vmatpush3.bf16.msra.mxu1 %v13669_v33 }
 0x113   : > { %12804 = vmatmul.mubr.bf16.vlgmr.msra.gmra.mxu0 %v11381_v47  ;;  %v11345_v22 = vcombine.low %v14323_v9, %v14325_v10  ;;  %v11346_v25 = vcombine.low %v14314_v62, %v14318_v54  ;;  %v852_v27 = vor.u32 %v850_v8, %v849_v15  ;;  %v937_v28 = vsel %vm14129_vm10, %v849_v15, 0  ;;  %12849 = vmatprep.subr.bf16.mxu1 %v13674_v18  ;;  %v14377_v15 = vld [vmem:[#allocation2 + $0x38] sm:$0x1] }
 0x114   : > { %v742_v30 = vmul.f32 %v14098_v63, %v693_v56  ;;  %v745_v37 = vmul.f32 %v14098_v63, %v704_v17  ;;  %12884 = vmatpush3.bf16.msra.mxu0 %v14085_v58  ;;  %v11329_v31 = vcombine.low %v937_v28, %v937_v28  ;;  %v1643_v32 = vrot.slane %v1642_v21, 4  ;;  %v14379_v56 = vld [vmem:[#allocation2 + $0x54] sm:$0xf]  ;;  %v13676_v17 = vld [vmem:[%s19363_s5 + $0xd8] sm:$0xff]  }
 0x115   : > { %12764 = vmatmul.mubr.bf16.gmra.mxu1 %v11345_v22  ;;  %v1650_v34 = vshrl.u32 %v14240_v2, 16  ;;  %v1653_v38 = vshll.u32 %v14240_v2, 16  ;;  %12885 = vmatprep.subr.bf16.mxu0 %v13668_v14  ;;  %v921_v58 = vsel %vm14129_vm10, 0, %v852_v27  ;;  %v1659_v33 = vshll.u32 %v14242_v3, 16  ;;  %v14384_v22 = vld [vmem:[#allocation2 + $0x58] sm:$0xf] }
 0x116   : > { %v761_v42 = vpack.c.bf16 %v745_v37, %v744_v16  ;;  %12767 = vmatprep.mubr.bf16.mxu1 %v11346_v25  ;;  %v1663_v2 = vshrl.u32 %v14242_v3, 16  ;;  %v11327_v49 = vcombine.low %v921_v58, %v921_v58  ;;  %v11328_v51 = vcombine.high %v921_v58, %v921_v58  ;;  %1156 = vst [vmem:[#allocation2 + $0xa4] sm:$0x1] %v11329_v31  ;;  %v14386_v25 = vld [vmem:[#allocation2 + $0x60] sm:$0xf] }
 0x117   : > { %v1648_v52 = vsel %vm14068_vm4, %v1643_v32, %v1647_v12  ;;  %v1652_v53 = vrot.slane %v1650_v34, 4  ;;  %v1655_v61 = vrot.slane %v1653_v38, 5  ;;  %12850 = vmatpush3.bf16.msra.mxu1 %v13674_v18  ;;  %v1661_v0 = vrot.slane %v1659_v33, 5  ;;  %v14393_v32 = vld [vmem:[#allocation2 + $0x64] sm:$0xf] }
 0x118   : > { %v11382_v55 = vcombine.low %v1638_v20, %v1648_v52  ;;  %v868_v57 = vshrl.u32 %v761_v42, 16  ;;  %v871_v59 = vshll.u32 %v761_v42, 16  ;;  %12886 = vmatpush3.bf16.msra.mxu0 %v13668_v14  ;;  %1154 = vst [vmem:[#allocation2 + $0x9c] sm:$0xf] %v11327_v49  ;;  %1155 = vst [vmem:[#allocation2 + $0xa0] sm:$0xf] %v11328_v51  ;;  %v696_v48 = vadd.f32 %v14091_v60, %v695_v46 }
 0x119   : > { %v1665_v26 = vrot.slane %v1663_v2, 4  ;;  %v1669_v3 = vshll.u32 %v14359_v45, 16  ;;  %12887 = vmatprep.subr.bf16.mxu0 %v13672_v40  ;;  %12931 = vmatprep.subr.bf16.mxu1 %v14355_v41  ;;  %v1656_v6 = vor.u32 %v1655_v61, %v1652_v53  ;;  %v1674_v8 = vshrl.u32 %v14259_v35, 16  ;;  %v13677_v53 = vld [vmem:[%s19363_s5 + $0xd0] sm:$0xff]  }
 0x11a   : > { %12807 = vmatprep.mubr.bf16.mxu0 %v11382_v55  ;;  %v870_v5 = vrot.slane %v868_v57, 7  ;;  %v1677_v43 = vshll.u32 %v14259_v35, 16  ;;  %v743_v7 = vmul.f32 %v14098_v63, %v696_v48  ;;  %v1683_v60 = vshll.u32 %v14271_v44, 16  ;;  %v14409_v48 = vld [vmem:[#allocation2 + $0x44] sm:$0x1] }
 0x11b   : > { %v1666_v47 = vor.u32 %v1665_v26, %v1661_v0  ;;  %v1671_v11 = vrot.slane %v1669_v3, 5  ;;  %v1657_v14 = vrot.slane %v1656_v6, 4  ;;  %v1676_v16 = vrot.slane %v1674_v8, 4 }
 0x11c   : > { %v873_v12 = vor.u32 %v871_v59, %v870_v5  ;;  %v940_v13 = vsel %vm14129_vm10, %v870_v5, 0  ;;  %12888 = vmatpush3.bf16.msra.mxu0 %v13672_v40  ;;  %v760_v63 = vpack.c.bf16 %v743_v7, %v742_v30  ;;  %v1679_v21 = vrot.slane %v1677_v43, 5 }
 0x11d   : > { %v11338_v18 = vcombine.low %v940_v13, %v940_v13  ;;  %v1667_v20 = vrot.slane %v1666_v47, 4  ;;  %12889 = vmatprep.subr.bf16.mxu0 %v13673_v1  ;;  %v1662_v28 = vsel %vm14068_vm4, %v1657_v14, %v1661_v0  ;;  %v1685_v37 = vrot.slane %v1683_v60, 5 }
 0x11e   : > { %v924_v27 = vsel %vm14129_vm10, 0, %v873_v12  ;;  %v1687_v31 = vshrl.u32 %v14271_v44, 16  ;;  %v861_v40 = vshrl.u32 %v760_v63, 16  ;;  %v864_v42 = vshll.u32 %v760_v63, 16  ;;  %v13679_v12 = vld [vmem:[%s19363_s5 + $0xc8] sm:$0xff]  }
 0x11f   : > { %v11336_v34 = vcombine.low %v924_v27, %v924_v27  ;;  %v11337_v38 = vcombine.high %v924_v27, %v924_v27  ;;  %1165 = vst [vmem:[#allocation2 + $0xc8] sm:$0x1] %v11338_v18  ;;  %v1672_v30 = vsel %vm14068_vm4, %v1667_v20, %v1671_v11  ;;  %v1680_v33 = vor.u32 %v1679_v21, %v1676_v16  ;;  %v14423_v18 = vld [vmem:[#allocation2 + $0x50] sm:$0x1] }
 0x120   : > { %v11383_v58 = vcombine.low %v1662_v28, %v1672_v30  ;;  %v1689_v2 = vrot.slane %v1687_v31, 4  ;;  %12890 = vmatpush3.bf16.msra.mxu0 %v13673_v1  ;;  %v863_v46 = vrot.slane %v861_v40, 7  ;;  %v1693_v49 = vshll.u32 %v14377_v15, 16  ;;  %v14431_v30 = vld [vmem:[#allocation2 + $0x78] sm:$0xf] }
 0x121   : > { %1163 = vst [vmem:[#allocation2 + $0xc0] sm:$0xf] %v11336_v34  ;;  %1164 = vst [vmem:[#allocation2 + $0xc4] sm:$0xf] %v11337_v38  ;;  %v11347_v51 = vcombine.low %v14379_v56, %v14384_v22  ;;  %v11348_v52 = vcombine.low %v14386_v25, %v14393_v32  ;;  %12891 = vmatprep.subr.bf16.mxu0 %v13676_v17  ;;  %v1681_v55 = vrot.slane %v1680_v33, 4  ;;  %v1698_v59 = vshrl.u32 %v14323_v9, 16 }
 0x122   : > { %12808 = vmatmul.mubr.bf16.gmra.mxu0 %v11383_v58  ;;  %v1690_v57 = vor.u32 %v1689_v2, %v1685_v37  ;;  %v1701_v61 = vshll.u32 %v14323_v9, 16  ;;  %v866_v0 = vor.u32 %v864_v42, %v863_v46  ;;  %v939_v26 = vsel %vm14129_vm10, %v863_v46, 0  ;;  %v14429_v38 = vld [vmem:[#allocation2 + $0x6c] sm:$0xf]  ;;  %v14433_v40 = vld [vmem:[#allocation2 + $0x7c] sm:$0xf] }
 0x123   : > { %v1695_v3 = vrot.slane %v1693_v49, 5  ;;  %12768 = vmatmul.mubr.bf16.gmra.mxu1 %v11347_v51  ;;  %v1707_v1 = vshll.u32 %v14325_v10, 16  ;;  %v11335_v5 = vcombine.low %v939_v26, %v939_v26  ;;  %v1686_v6 = vsel %vm14068_vm4, %v1681_v55, %v1685_v37  ;;  %v14436_v46 = vld [vmem:[#allocation2 + $0x70] sm:$0xf]  ;;  %v13681_v49 = vld [vmem:[%s19363_s5 + $0xc0] sm:$0xff]  }
 0x124   : > { %v1691_v8 = vrot.slane %v1690_v57, 4  ;;  %12771 = vmatprep.mubr.bf16.mxu1 %v11348_v52  ;;  %v1700_v43 = vrot.slane %v1698_v59, 4  ;;  %12892 = vmatpush3.bf16.msra.mxu0 %v13676_v17  ;;  %v923_v47 = vsel %vm14129_vm10, 0, %v866_v0  ;;  %v1703_v11 = vrot.slane %v1701_v61, 5 }
 0x125   : > { %v1709_v7 = vrot.slane %v1707_v1, 5  ;;  %v1711_v60 = vshrl.u32 %v14325_v10, 16  ;;  %12893 = vmatprep.subr.bf16.mxu0 %v13677_v53  ;;  %v11333_v13 = vcombine.low %v923_v47, %v923_v47  ;;  %v11334_v14 = vcombine.high %v923_v47, %v923_v47  ;;  %1162 = vst [vmem:[#allocation2 + $0xbc] sm:$0x1] %v11335_v5 }
 0x126   : > { %v1696_v16 = vsel %vm14068_vm4, %v1691_v8, %v1695_v3  ;;  %v1717_v17 = vshll.u32 %v14409_v48, 16  ;;  %v1704_v63 = vor.u32 %v1703_v11, %v1700_v43  ;;  %v1722_v27 = vshrl.u32 %v14314_v62, 16 }
 0x127   : > { %v11384_v20 = vcombine.low %v1686_v6, %v1696_v16  ;;  %v1713_v21 = vrot.slane %v1711_v60, 4  ;;  %1160 = vst [vmem:[#allocation2 + $0xb4] sm:$0xf] %v11333_v13  ;;  %1161 = vst [vmem:[#allocation2 + $0xb8] sm:$0xf] %v11334_v14  ;;  %v1725_v37 = vshll.u32 %v14314_v62, 16  ;;  %v11349_v57 = vcombine.low %v14429_v38, %v14436_v46 }
 0x128   : > { %v1719_v28 = vrot.slane %v1717_v17, 5  ;;  %v1731_v31 = vshll.u32 %v14318_v54, 16  ;;  %v1735_v34 = vshrl.u32 %v14318_v54, 16  ;;  %12894 = vmatpush3.bf16.msra.mxu0 %v13677_v53  ;;  %v1705_v58 = vrot.slane %v1704_v63, 4  ;;  %v14443_v53 = vld [vmem:[#allocation2 + $0x5c] sm:$0x1] }
 0x129   : > { %12811 = vmatprep.mubr.bf16.mxu0 %v11384_v20  ;;  %v1714_v42 = vor.u32 %v1713_v21, %v1709_v7  ;;  %v1724_v33 = vrot.slane %v1722_v27, 4  ;;  %v1741_v2 = vshll.u32 %v14423_v18, 16  ;;  %12895 = vmatprep.subr.bf16.mxu0 %v13679_v12  ;;  %v1727_v51 = vrot.slane %v1725_v37, 5  ;;  %v14459_v16 = vld [vmem:[%s19363_s5 + $0x178] sm:$0xff]   ;;  %v14461_v21 = vld [vmem:[#allocation2 + $0x68] sm:$0x1] }
 0x12a   : > { %v1733_v52 = vrot.slane %v1731_v31, 5  ;;  %v1737_v55 = vrot.slane %v1735_v34, 4  ;;  %v1710_v59 = vsel %vm14068_vm4, %v1705_v58, %v1709_v7  ;;  %v11350_v26 = vcombine.low %v14431_v30, %v14433_v40 }
 0x12b   : > { %v1715_v61 = vrot.slane %v1714_v42, 4  ;;  %v1743_v0 = vrot.slane %v1741_v2, 5  ;;  %v1728_v3 = vor.u32 %v1727_v51, %v1724_v33  ;;  %12772 = vmatmul.mubr.bf16.gmra.mxu1 %v11349_v57  ;;  %v1746_v5 = vshrl.u32 %v14379_v56, 16  ;;  %v14470_v2 = vld [vmem:[#allocation2 + $0x84] sm:$0xf] }
 0x12c   : > { %v1738_v1 = vor.u32 %v1737_v55, %v1733_v52  ;;  %v1749_v6 = vshll.u32 %v14379_v56, 16  ;;  %12896 = vmatpush3.bf16.msra.mxu0 %v13679_v12  ;;  %12775 = vmatprep.mubr.bf16.mxu1 %v11350_v26  ;;  %v1755_v43 = vshll.u32 %v14384_v22, 16  ;;  %v1759_v47 = vshrl.u32 %v14384_v22, 16  ;;  %v14472_v51 = vld [vmem:[#allocation2 + $0x90] sm:$0xf] }
 0x12d   : > { %v1720_v8 = vsel %vm14068_vm4, %v1715_v61, %v1719_v28  ;;  %v1765_v11 = vshll.u32 %v14443_v53, 16  ;;  %12897 = vmatprep.subr.bf16.mxu0 %v13681_v49  ;;  %v1729_v60 = vrot.slane %v1728_v3, 4  ;;  %v1748_v14 = vrot.slane %v1746_v5, 4  ;;  %v14476_v61 = vld [vmem:[#allocation2 + $0x88] sm:$0xf] }
 0x12e   : > { %v11385_v7 = vcombine.low %v1710_v59, %v1720_v8  ;;  %v1739_v13 = vrot.slane %v1738_v1, 4  ;;  %v1751_v12 = vrot.slane %v1749_v6, 5  ;;  %v1757_v17 = vrot.slane %v1755_v43, 5  ;;  %v14481_v5 = vld [vmem:[#allocation2 + $0x94] sm:$0xf] }
 0x12f   : > { %v1761_v20 = vrot.slane %v1759_v47, 4  ;;  %v1767_v63 = vrot.slane %v1765_v11, 5  ;;  %v1734_v27 = vsel %vm14068_vm4, %v1729_v60, %v1733_v52  ;;  %v1770_v37 = vshrl.u32 %v14386_v25, 16  ;;  %v14485_v47 = vld [vmem:[#allocation2 + $0x74] sm:$0x1] }
 0x130   : > { %12812 = vmatmul.mubr.bf16.gmra.mxu0 %v11385_v7  ;;  %v1744_v28 = vsel %vm14068_vm4, %v1739_v13, %v1743_v0  ;;  %v1773_v31 = vshll.u32 %v14386_v25, 16  ;;  %v1752_v58 = vor.u32 %v1751_v12, %v1748_v14  ;;  %v1779_v33 = vshll.u32 %v14393_v32, 16 }
 0x131   : > { %v11386_v34 = vcombine.low %v1734_v27, %v1744_v28  ;;  %v1762_v42 = vor.u32 %v1761_v20, %v1757_v17  ;;  %12898 = vmatpush3.bf16.msra.mxu0 %v13681_v49  ;;  %v1772_v55 = vrot.slane %v1770_v37, 4  ;;  %v1783_v52 = vshrl.u32 %v14393_v32, 16 }
 0x132   : > { %v1775_v57 = vrot.slane %v1773_v31, 5  ;;  %v1789_v59 = vshll.u32 %v14461_v21, 16  ;;  %12979 = vmatprep.subr.bf16.mxu0 %v14459_v16  ;;  %v1753_v0 = vrot.slane %v1752_v58, 4  ;;  %v1781_v3 = vrot.slane %v1779_v33, 5 }
 0x133   : > { %12815 = vmatprep.mubr.bf16.mxu0 %v11386_v34  ;;  %v1763_v26 = vrot.slane %v1762_v42, 4  ;;  %v11351_v1 = vcombine.low %v14470_v2, %v14476_v61  ;;  %v1785_v6 = vrot.slane %v1783_v52, 4  ;;  %v11352_v43 = vcombine.low %v14472_v51, %v14481_v5  ;;  %v14499_v52 = vld [vmem:[#allocation2 + $0x80] sm:$0x1] }
 0x134   : > { %v1776_v49 = vor.u32 %v1775_v57, %v1772_v55  ;;  %v1791_v8 = vrot.slane %v1789_v59, 5  ;;  %v1758_v11 = vsel %vm14068_vm4, %v1753_v0, %v1757_v17  ;;  %v1794_v60 = vshrl.u32 %v14429_v38, 16 }
 0x135   : > { %v1768_v7 = vsel %vm14068_vm4, %v1763_v26, %v1767_v63  ;;  %12776 = vmatmul.mubr.bf16.gmra.mxu1 %v11351_v1  ;;  %v1797_v13 = vshll.u32 %v14429_v38, 16  ;;  %v1786_v20 = vor.u32 %v1785_v6, %v1781_v3  ;;  %v1803_v27 = vshll.u32 %v14436_v46, 16 }
 0x136   : > { %v11387_v14 = vcombine.low %v1758_v11, %v1768_v7  ;;  %v1777_v12 = vrot.slane %v1776_v49, 4  ;;  %12779 = vmatprep.mubr.bf16.mxu1 %v11352_v43  ;;  %v1796_v28 = vrot.slane %v1794_v60, 4  ;;  %v1807_v31 = vshrl.u32 %v14436_v46, 16  ;;  %v14508_v60 = vld [vmem:[#allocation2 + $0x9c] sm:$0xf] }
 0x137   : > { %v1799_v37 = vrot.slane %v1797_v13, 5  ;;  %v1813_v17 = vshll.u32 %v14485_v47, 16  ;;  %v1787_v34 = vrot.slane %v1786_v20, 4  ;;  %v1805_v58 = vrot.slane %v1803_v27, 5  ;;  %v14510_v13 = vld [vmem:[#allocation2 + $0xa0] sm:$0xf] }
 0x138   : > { %12816 = vmatmul.mubr.bf16.gmra.mxu0 %v11387_v14  ;;  %v1782_v63 = vsel %vm14068_vm4, %v1777_v12, %v1781_v3  ;;  %v1818_v42 = vshrl.u32 %v14431_v30, 16  ;;  %v1809_v55 = vrot.slane %v1807_v31, 4  ;;  %v1821_v59 = vshll.u32 %v14431_v30, 16  ;;  %v14506_v3 = vld [vmem:[#allocation2 + $0xa8] sm:$0xf] }
 0x139   : > { %v1800_v33 = vor.u32 %v1799_v37, %v1796_v28  ;;  %v1815_v57 = vrot.slane %v1813_v17, 5  ;;  %v1792_v0 = vsel %vm14068_vm4, %v1787_v34, %v1791_v8  ;;  %v1827_v1 = vshll.u32 %v14433_v40, 16  ;;  %19480 = vst [vmem:[#allocation6_spill] sm:$0xff] %v14506_v3  ;;  %v14515_v27 = vld [vmem:[#allocation2 + $0xac] sm:$0xf] }
 0x13a   : > { %v1820_v26 = vrot.slane %v1818_v42, 4  ;;  %v1831_v49 = vshrl.u32 %v14433_v40, 16  ;;  %v11388_v6 = vcombine.low %v1782_v63, %v1792_v0  ;;  %v1810_v11 = vor.u32 %v1809_v55, %v1805_v58  ;;  %v14521_v42 = vld [vmem:[#allocation2 + $0x8c] sm:$0x1] }
 0x13b   : > { %v1801_v43 = vrot.slane %v1800_v33, 4  ;;  %v1823_v7 = vrot.slane %v1821_v59, 5  ;;  %v1829_v14 = vrot.slane %v1827_v1, 5  ;;  %v1837_v20 = vshll.u32 %v14499_v52, 16 }
 0x13c   : > { %v1833_v12 = vrot.slane %v1831_v49, 4  ;;  %v11353_v8 = vcombine.low %v14508_v60, %v14510_v13  ;;  %12819 = vmatprep.mubr.bf16.mxu0 %v11388_v6  ;;  %v1811_v37 = vrot.slane %v1810_v11, 4  ;;  %v11354_v17 = vcombine.low %v14506_v3, %v14515_v27 }
 0x13d   : > { %v1806_v28 = vsel %vm14068_vm4, %v1801_v43, %v1805_v58  ;;  %v1824_v31 = vor.u32 %v1823_v7, %v1820_v26  ;;  %v1839_v34 = vrot.slane %v1837_v20, 5  ;;  %v1842_v33 = vshrl.u32 %v14470_v2, 16 }
 0x13e   : > { %v1834_v63 = vor.u32 %v1833_v12, %v1829_v14  ;;  %12780 = vmatmul.mubr.bf16.gmra.mxu1 %v11353_v8  ;;  %v1845_v55 = vshll.u32 %v14470_v2, 16  ;;  %v1816_v59 = vsel %vm14068_vm4, %v1811_v37, %v1815_v57  ;;  %v1851_v58 = vshll.u32 %v14476_v61, 16  ;;  %v14534_v37 = vld [vmem:[#allocation2 + $0x98] sm:$0x1] }
 0x13f   : > { %v1825_v0 = vrot.slane %v1824_v31, 4  ;;  %12783 = vmatprep.mubr.bf16.mxu1 %v11354_v17  ;;  %v1855_v26 = vshrl.u32 %v14476_v61, 16  ;;  %v11389_v1 = vcombine.low %v1806_v28, %v1816_v59  ;;  %v1844_v6 = vrot.slane %v1842_v33, 4  ;;  %19481 = vst [vmem:[#allocation7_spill] sm:$0xff] %v14534_v37 }
 0x140   : > { %v1835_v49 = vrot.slane %v1834_v63, 4  ;;  %v1847_v43 = vrot.slane %v1845_v55, 5  ;;  %v1853_v7 = vrot.slane %v1851_v58, 5  ;;  %v1861_v20 = vshll.u32 %v14521_v42, 16  ;;  %v14539_v55 = vld [vmem:[#allocation2 + $0xb4] sm:$0xf] }
 0x141   : > { %v1830_v11 = vsel %vm14068_vm4, %v1825_v0, %v1829_v14  ;;  %v1857_v12 = vrot.slane %v1855_v26, 4  ;;  %12820 = vmatmul.mubr.bf16.gmra.mxu0 %v11389_v1  ;;  %v1866_v31 = vshrl.u32 %v14472_v51, 16  ;;  %v1869_v28 = vshll.u32 %v14472_v51, 16 }
 0x142   : > { %v1840_v57 = vsel %vm14068_vm4, %v1835_v49, %v1839_v34  ;;  %v1848_v8 = vor.u32 %v1847_v43, %v1844_v6  ;;  %v1863_v33 = vrot.slane %v1861_v20, 5  ;;  %v1875_v14 = vshll.u32 %v14481_v5, 16  ;;  %v14542_v34 = vld [vmem:[#allocation2 + $0xb8] sm:$0xf] }
 0x143   : > { %v11390_v17 = vcombine.low %v1830_v11, %v1840_v57  ;;  %v1858_v63 = vor.u32 %v1857_v12, %v1853_v7  ;;  %v1868_v0 = vrot.slane %v1866_v31, 4  ;;  %v1871_v58 = vrot.slane %v1869_v28, 5  ;;  %v14549_v57 = vld [vmem:[#allocation2 + $0xa4] sm:$0x1] }
 0x144   : > { %v1849_v59 = vrot.slane %v1848_v8, 4  ;;  %v1879_v26 = vshrl.u32 %v14481_v5, 16  ;;  %v1877_v49 = vrot.slane %v1875_v14, 5  ;;  %v1885_v6 = vshll.u32 %v14534_v37, 16  ;;  %19482 = vst [vmem:[#allocation8_spill] sm:$0xff] %v14549_v57 }
 0x145   : > { %12823 = vmatprep.mubr.bf16.mxu0 %v11390_v17  ;;  %v1859_v1 = vrot.slane %v1858_v63, 4  ;;  %v11355_v43 = vcombine.low %v14539_v55, %v14542_v34  ;;  %v1872_v12 = vor.u32 %v1871_v58, %v1868_v0  ;;  %v1890_v8 = vshrl.u32 %v14508_v60, 16 }
 0x146   : > { %v1854_v11 = vsel %vm14068_vm4, %v1849_v59, %v1853_v7  ;;  %v1881_v20 = vrot.slane %v1879_v26, 4  ;;  %v1887_v28 = vrot.slane %v1885_v6, 5  ;;  %v1893_v17 = vshll.u32 %v14508_v60, 16 }
 0x147   : > { %v1864_v31 = vsel %vm14068_vm4, %v1859_v1, %v1863_v33  ;;  %12784 = vmatmul.mubr.bf16.gmra.mxu1 %v11355_v43  ;;  %v1899_v63 = vshll.u32 %v14510_v13, 16  ;;  %v1873_v39 = vrot.slane %v1872_v12, 4  ;;  %v1892_v37 = vrot.slane %v1890_v8, 4 }
 0x148   : > { %v11391_v14 = vcombine.low %v1854_v11, %v1864_v31  ;;  %v1882_v29 = vor.u32 %v1881_v20, %v1877_v49  ;;  %v19483_v7 = vcombine.low %v14120_v23, %v14124_v24  ;;  %v1895_v59 = vrot.slane %v1893_v17, 5  ;;  %v14565_v23 = vld [vmem:[#allocation2 + $0xb0] sm:$0x1] }
 0x149   : > { %v1901_v0 = vrot.slane %v1899_v63, 5  ;;  %v1903_v58 = vshrl.u32 %v14510_v13, 16  ;;  %v1909_v33 = vshll.u32 %v14549_v57, 16  ;;  %v1878_v26 = vsel %vm14068_vm4, %v1873_v39, %v1877_v49 }
 0x14a   : > { %12851 = vmatprep.mubr.bf16.mxu1 %v19483_v7  ;;  %12824 = vmatmul.mubr.bf16.gmra.mxu0 %v11391_v14  ;;  %v1883_v1 = vrot.slane %v1882_v29, 4  ;;  %v1914_v6 = vshrl.u32 %v14506_v3, 16  ;;  %v1917_v43 = vshll.u32 %v14506_v3, 16  ;;  %v1896_v11 = vor.u32 %v1895_v59, %v1892_v37  ;;  %v13872_v59 = vld [vmem:[#allocation2 + $0xc] sm:$0xf] }
 0x14b   : > { %v1905_v12 = vrot.slane %v1903_v58, 4  ;;  %v1911_v20 = vrot.slane %v1909_v33, 5  ;;  %v1923_v24 = vshll.u32 %v14515_v27, 16  ;;  %v1927_v63 = vshrl.u32 %v14515_v27, 16 }
 0x14c   : > { %v1888_v8 = vsel %vm14068_vm4, %v1883_v1, %v1887_v28  ;;  %v1916_v31 = vrot.slane %v1914_v6, 4  ;;  %v1919_v17 = vrot.slane %v1917_v43, 5  ;;  %v1897_v29 = vrot.slane %v1896_v11, 4  ;;  %v13873_v28 = vld [vmem:[#allocation2 + $0x10] sm:$0xf] }
 0x14d   : > { %v11392_v39 = vcombine.low %v1878_v26, %v1888_v8  ;;  %v1906_v49 = vor.u32 %v1905_v12, %v1901_v0  ;;  %v1925_v14 = vrot.slane %v1923_v24, 5  ;;  %v1929_v3 = vrot.slane %v1927_v63, 4 }
 0x14e   : > { %v1920_v7 = vor.u32 %v1919_v17, %v1916_v31  ;;  %v1933_v37 = vshll.u32 %v14565_v23, 16  ;;  %v11405_v58 = vrot.slane %v13872_v59, 9  ;;  %v1902_v33 = vsel %vm14068_vm4, %v1897_v29, %v1901_v0  ;;  %v14580_v17 = vld [vmem:[#allocation2 + $0xbc] sm:$0x1] }
 0x14f   : > { %12827 = vmatprep.mubr.bf16.mxu0 %v11392_v39  ;;  %v1907_v57 = vrot.slane %v1906_v49, 4  ;;  %v2311_v1 = vrot.slane %v13873_v28, 5  ;;  %v2314_v6 = vrot.slane %v14287_v36, 5  ;;  %v1930_v26 = vor.u32 %v1929_v3, %v1925_v14 }
 0x150   : > { %v1921_v43 = vrot.slane %v1920_v7, 4  ;;  %v1935_v11 = vrot.slane %v1933_v37, 5  ;;  %v1938_v12 = vshrl.u32 %v14539_v55, 16  ;;  %v1941_v0 = vshll.u32 %v14539_v55, 16 }
 0x151   : > { %v1912_v24 = vsel %vm14068_vm4, %v1907_v57, %v1911_v20  ;;  %v2312_v8 = vsel %vm14113_vm9, %v11405_v58, %v2311_v1  ;;  %v2313_v31 = vrot.slane %v2311_v1, 4  ;;  %v1931_v39 = vrot.slane %v1930_v26, 4  ;;  %v13874_v58 = vld [vmem:[#allocation2 + $0x18] sm:$0xf]  ;;  %v14595_v26 = vld [vmem:[#allocation2 + $0xc] sm:$0xf] }
 0x152   : > { %v11393_v63 = vcombine.low %v1902_v33, %v1912_v24  ;;  %v1926_v36 = vsel %vm14068_vm4, %v1921_v43, %v1925_v14  ;;  %v1940_v3 = vrot.slane %v1938_v12, 4  ;;  %v1943_v49 = vrot.slane %v1941_v0, 5  ;;  %v13682_v14 = vld [vmem:[%s19363_s5 + $0x130] sm:$0xff]  }
 0x153   : > { %v2315_v29 = vsel %vm14113_vm9, %v2313_v31, %v2314_v6  ;;  %v1947_v57 = vshll.u32 %v14542_v34, 16  ;;  %v1951_v20 = vshrl.u32 %v14542_v34, 16  ;;  %v1936_v7 = vsel %vm14068_vm4, %v1931_v39, %v1935_v11  ;;  %v14597_v12 = vld [vmem:[#allocation2 + $0x10] sm:$0xf]  ;;  %v13875_v11 = vld [vmem:[#allocation2 + $0x1c] sm:$0xf] }
 0x154   : > { %12828 = vmatmul.mubr.bf16.gmra.mxu0 %v11393_v63  ;;  %v11437_v37 = vcombine.low %v2312_v8, %v2315_v29  ;;  %v1957_v59 = vshll.u32 %v14580_v17, 16  ;;  %v11406_v33 = vrot.slane %v13874_v58, 9  ;;  %v11394_v28 = vcombine.low %v1926_v36, %v1936_v7  ;;  %v13876_v39 = vld [vmem:[#allocation2 + $0x24] sm:$0xf] }
 0x155   : > { %v1944_v1 = vor.u32 %v1943_v49, %v1940_v3  ;;  %v1949_v6 = vrot.slane %v1947_v57, 5  ;;  %v1953_v43 = vrot.slane %v1951_v20, 4  ;;  %v2318_v8 = vrot.slane %v13875_v11, 5  ;;  %v13877_v3 = vld [vmem:[#allocation2 + $0x28] sm:$0xf] }
 0x156   : > { %12852 = vmatmul.mubr.bf16.vlgmr.msra.gmra.mxu1 %v11437_v37  ;;  %v1959_v24 = vrot.slane %v1957_v59, 5  ;;  %v2321_v31 = vrot.slane %v14303_v4, 5  ;;  %12831 = vmatprep.mubr.bf16.mxu0 %v11394_v28  ;;  %v11407_v36 = vrot.slane %v13876_v39, 9  ;;  %v2325_v29 = vrot.slane %v13877_v3, 5  ;;  %v14601_v49 = vld [vmem:[#allocation2 + $0x18] sm:$0xf] }
 0x157   : > { %12932 = vmatpush3.bf16.msra.mxu1 %v14355_v41  ;;  %v1945_v0 = vrot.slane %v1944_v1, 4  ;;  %v1954_v63 = vor.u32 %v1953_v43, %v1949_v6  ;;  %v13685_v57 = vld [vmem:[%s19363_s5 + $0x128] sm:$0xff]   ;;  %v2319_v20 = vsel %vm14113_vm9, %v11406_v33, %v2318_v8  ;;  %v2320_v7 = vrot.slane %v2318_v8, 4  ;;  %v14611_v37 = vld [vmem:[#allocation2 + $0x1c] sm:$0xf] }
 0x158   : > { %v11476_v4 = vcombine.low %v14595_v26, %v14597_v12  ;;  %12933 = vmatprep.subr.bf16.mxu1 %v13682_v14  ;;  %v2328_v41 = vrot.slane %v14359_v45, 5  ;;  %v14613_v59 = vld [vmem:[#allocation2 + $0x24] sm:$0xf]  ;;  %v2327_v1 = vrot.slane %v2325_v29, 4  ;;  %v11408_v43 = vrot.slane %v14259_v35, 9 }
 0x159   : > { %v1950_v58 = vsel %vm14068_vm4, %v1945_v0, %v1949_v6  ;;  %v1955_v28 = vrot.slane %v1954_v63, 4  ;;  %v14618_v11 = vld [vmem:[#allocation2 + $0x28] sm:$0xf]  ;;  %v2322_v33 = vsel %vm14113_vm9, %v2320_v7, %v2321_v31  ;;  %v2326_v8 = vsel %vm14113_vm9, %v11407_v36, %v2325_v29  ;;  %v14632_v63 = vld [vmem:[#allocation2 + $0x30] sm:$0xf] }
 0x15a   : > { %v2332_v45 = vrot.slane %v14271_v44, 5  ;;  %v2335_v39 = vrot.slane %v14377_v15, 5  ;;  %v11438_v6 = vcombine.low %v2319_v20, %v2322_v33  ;;  %v2329_v0 = vsel %vm14113_vm9, %v2327_v1, %v2328_v41  ;;  %v14636_v15 = vld [vmem:[#allocation2 + $0x34] sm:$0xf] }
 0x15b   : > { %v1960_v3 = vsel %vm14068_vm4, %v1955_v28, %v1959_v24  ;;  %12934 = vmatpush3.bf16.msra.mxu1 %v13682_v14  ;;  %v11477_v35 = vcombine.low %v14601_v49, %v14611_v37  ;;  %v11439_v7 = vcombine.low %v2326_v8, %v2329_v0  ;;  %v11478_v44 = vcombine.low %v14613_v59, %v14618_v11  ;;  %v14638_v24 = vld [vmem:[#allocation2 + $0x3c] sm:$0xf]  ;;  %v13688_v14 = vld [vmem:[%s19363_s5 + $0x120] sm:$0xff]  }
 0x15c   : > { %v11395_v31 = vcombine.low %v1950_v58, %v1960_v3  ;;  %v2334_v36 = vrot.slane %v2332_v45, 4  ;;  %12935 = vmatprep.subr.bf16.mxu1 %v13685_v57  ;;  %12855 = vmatprep.mubr.bf16.mxu1 %v11438_v6  ;;  %v2333_v29 = vsel %vm14113_vm9, %v11408_v43, %v2332_v45  ;;  %v11409_v20 = vrot.slane %v14323_v9, 9  ;;  %v14648_v28 = vld [vmem:[#allocation2 + $0x40] sm:$0xf] }
 0x15d   : > { %v2339_v41 = vrot.slane %v14325_v10, 5  ;;  %v11410_v58 = vrot.slane %v14314_v62, 9  ;;  %v2342_v33 = vrot.slane %v14409_v48, 5  ;;  %v2346_v8 = vrot.slane %v14318_v54, 5 }
 0x15e   : > { %12832 = vmatmul.mubr.bf16.gmra.mxu0 %v11395_v31  ;;  %12856 = vmatmul.mubr.bf16.gmra.mxu1 %v11439_v7  ;;  %v2336_v1 = vsel %vm14113_vm9, %v2334_v36, %v2335_v39  ;;  %v2349_v3 = vrot.slane %v14423_v18, 5  ;;  %v11479_v62 = vcombine.low %v14632_v63, %v14636_v15  ;;  %v11480_v39 = vcombine.low %v14638_v24, %v14648_v28  ;;  %v13691_v18 = vld [vmem:[%s19363_s5 + $0x118] sm:$0xff]   ;;  %v14672_v31 = vld [vmem:[#allocation2 + $0x48] sm:$0xf] }
 0x15f   : > { %12899 = vmatprep.mubr.bf16.mxu0 %v11476_v4  ;;  %v11440_v43 = vcombine.low %v2333_v29, %v2336_v1  ;;  %v2340_v9 = vsel %vm14113_vm9, %v11409_v20, %v2339_v41  ;;  %v2341_v10 = vrot.slane %v2339_v41, 4  ;;  %12936 = vmatpush3.bf16.msra.mxu1 %v13685_v57  ;;  %v2348_v45 = vrot.slane %v2346_v8, 4  ;;  %v14679_v20 = vld [vmem:[#allocation2 + $0x54] sm:$0xf]  ;;  %v14681_v41 = vld [vmem:[#allocation2 + $0x58] sm:$0xf] }
 0x160   : > { %12937 = vmatprep.subr.bf16.mxu1 %v13688_v14  ;;  %v11411_v48 = vrot.slane %v14379_v56, 9  ;;  %v2353_v54 = vrot.slane %v14384_v22, 5  ;;  %v2347_v4 = vsel %vm14113_vm9, %v11410_v58, %v2346_v8  ;;  %v11412_v6 = vrot.slane %v14386_v25, 9  ;;  %v14674_v56 = vld [vmem:[#allocation2 + $0x4c] sm:$0xf]  ;;  %19484 = vst [vmem:[#allocation9_spill] sm:$0xff] %v14679_v20 }
 0x161   : > { %12859 = vmatprep.mubr.bf16.mxu1 %v11440_v43  ;;  %v2343_v57 = vsel %vm14113_vm9, %v2341_v10, %v2342_v33  ;;  %v2360_v0 = vrot.slane %v14393_v32, 5  ;;  %v2350_v7 = vsel %vm14113_vm9, %v2348_v45, %v2349_v3  ;;  %v2356_v29 = vrot.slane %v14443_v53, 5  ;;  %19485 = vst [vmem:[#allocation10_spill] sm:$0xff] %v14681_v41  ;;  %v14699_v43 = vld [vmem:[#allocation2 + $0x60] sm:$0xf] }
 0x162   : > { %v11441_v22 = vcombine.low %v2340_v9, %v2343_v57  ;;  %v2355_v36 = vrot.slane %v2353_v54, 4  ;;  %v11442_v58 = vcombine.low %v2347_v4, %v2350_v7  ;;  %v14685_v25 = vsel %vm14113_vm9, %v11411_v48, %v2353_v54  ;;  %v13694_v48 = vld [vmem:[%s19363_s5 + $0x110] sm:$0xff]  }
 0x163   : > { %12938 = vmatpush3.bf16.msra.mxu1 %v13688_v14  ;;  %v2362_v32 = vrot.slane %v2360_v0, 4  ;;  %v2363_v1 = vrot.slane %v14461_v21, 5  ;;  %v14694_v53 = vsel %vm14113_vm9, %v11412_v6, %v2360_v0  ;;  %v11481_v8 = vcombine.low %v14672_v31, %v14674_v56  ;;  %v14701_v14 = vld [vmem:[#allocation2 + $0x64] sm:$0xf]  ;;  %v14736_v0 = vld [vmem:[#allocation2 + $0x6c] sm:$0xf] }
 0x164   : > { %v14690_v33 = vsel %vm14113_vm9, %v2355_v36, %v2356_v29  ;;  %12939 = vmatprep.subr.bf16.mxu1 %v13691_v18  ;;  %v11413_v3 = vrot.slane %v14429_v38, 9  ;;  %v11482_v9 = vcombine.low %v14679_v20, %v14681_v41  ;;  %v2367_v10 = vrot.slane %v14436_v46, 5  ;;  %v13698_v38 = vld [vmem:[%s19363_s5 + $0x170] sm:$0xff]  }
 0x165   : > { %v14705_v21 = vsel %vm14113_vm9, %v2362_v32, %v2363_v1  ;;  %v2370_v45 = vrot.slane %v14485_v47, 5  ;;  %v11443_v54 = vcombine.low %v14685_v25, %v14690_v33  ;;  %v11414_v46 = vrot.slane %v14431_v30, 9  ;;  %v19486_v33 = vld [vmem:[#allocation7_spill] sm:$0xff] }
 0x166   : > { %12900 = vmatmul.mubr.bf16.vlgmr.msra.gmra.mxu0 %v11477_v35  ;;  %12860 = vmatmul.mubr.bf16.gmra.mxu1 %v11441_v22  ;;  %v2374_v47 = vrot.slane %v14433_v40, 5  ;;  %v2377_v57 = vrot.slane %v14499_v52, 5  ;;  %v11444_v4 = vcombine.low %v14694_v53, %v14705_v21  ;;  %v14732_v35 = vsel %vm14113_vm9, %v11413_v3, %v2367_v10  ;;  %v14775_v3 = vld [vmem:[#allocation2 + $0x78] sm:$0xf]  ;;  %v14777_v21 = vld [vmem:[#allocation2 + $0x7c] sm:$0xf] }
 0x167   : > { %12903 = vmatprep.mubr.bf16.mxu0 %v11478_v44  ;;  %12863 = vmatprep.mubr.bf16.mxu1 %v11442_v58  ;;  %v2369_v6 = vrot.slane %v2367_v10, 4  ;;  %v14742_v44 = vld [vmem:[#allocation2 + $0x70] sm:$0xf]  ;;  %v11415_v22 = vrot.slane %v14470_v2, 9  ;;  %v2381_v7 = vrot.slane %v14476_v61, 5  ;;  %v11416_v29 = vrot.slane %v14472_v51, 9 }
 0x168   : > { %12940 = vmatpush3.bf16.msra.mxu1 %v13691_v18  ;;  %v14740_v40 = vsel %vm14113_vm9, %v11414_v46, %v2374_v47  ;;  %v2376_v52 = vrot.slane %v2374_v47, 4  ;;  %12980 = vmatpush3.bf16.msra.mxu0 %v14459_v16  ;;  %v2384_v18 = vrot.slane %v14521_v42, 5  ;;  %v2388_v58 = vrot.slane %v14481_v5, 5  ;;  %v13699_v2 = vld [vmem:[%s19363_s5 + $0x108] sm:$0xff]   ;;  %v14789_v47 = vld [vmem:[#allocation2 + $0x84] sm:$0xf] }
 0x169   : > { %v14749_v36 = vsel %vm14113_vm9, %v2369_v6, %v2370_v45  ;;  %12941 = vmatprep.subr.bf16.mxu1 %v13694_v48  ;;  %12981 = vmatprep.subr.bf16.mxu0 %v13698_v38  ;;  %v13701_v16 = vld [vmem:[%s19363_s5 + $0x168] sm:$0xff]   ;;  %v2383_v5 = vrot.slane %v2381_v7, 4  ;;  %v14772_v32 = vsel %vm14113_vm9, %v11415_v22, %v2381_v7  ;;  %v2391_v53 = vrot.slane %v19486_v33, 5  ;;  %v19487_v7 = vld [vmem:[#allocation8_spill] sm:$0xff] }
 0x16a   : > { %v11445_v61 = vcombine.low %v14732_v35, %v14749_v36  ;;  %v14764_v25 = vsel %vm14113_vm9, %v2376_v52, %v2377_v57  ;;  %v2390_v1 = vrot.slane %v2388_v58, 4  ;;  %v14785_v45 = vsel %vm14113_vm9, %v11416_v29, %v2388_v58  ;;  %v14791_v57 = vld [vmem:[#allocation2 + $0x88] sm:$0xf]  ;;  %v14802_v29 = vld [vmem:[#allocation2 + $0x90] sm:$0xf] }
 0x16b   : > { %v14781_v10 = vsel %vm14113_vm9, %v2383_v5, %v2384_v18  ;;  %v11417_v6 = vrot.slane %v14508_v60, 9  ;;  %v2395_v22 = vrot.slane %v14510_v13, 5  ;;  %v2398_v18 = vrot.slane %v19487_v7, 5  ;;  %v13704_v60 = vld [vmem:[%s19363_s5 + $0x100] sm:$0xff]   ;;  %v19488_v58 = vld [vmem:[#allocation6_spill] sm:$0xff] }
 0x16c   : > { %12942 = vmatpush3.bf16.msra.mxu1 %v13694_v48  ;;  %12982 = vmatpush3.bf16.msra.mxu0 %v13698_v38  ;;  %v14796_v52 = vsel %vm14113_vm9, %v2390_v1, %v2391_v53  ;;  %v13703_v38 = vld [vmem:[%s19363_s5 + $0x160] sm:$0xff]   ;;  %v11418_v5 = vrot.slane %v19488_v58, 9  ;;  %v2402_v1 = vrot.slane %v14515_v27, 5  ;;  %v2405_v33 = vrot.slane %v14565_v23, 5  ;;  %v14818_v53 = vld [vmem:[#allocation2 + $0x94] sm:$0xf] }
 0x16d   : > { %12943 = vmatprep.subr.bf16.mxu1 %v13699_v2  ;;  %12983 = vmatprep.subr.bf16.mxu0 %v13701_v16  ;;  %v2397_v7 = vrot.slane %v2395_v22, 4  ;;  %v14831_v58 = vld [vmem:[#allocation2 + $0x9c] sm:$0xf]  ;;  %v14833_v23 = vld [vmem:[#allocation2 + $0xa0] sm:$0xf]  ;;  %v11419_v46 = vrot.slane %v14539_v55, 9 }
 0x16e   : > { %12904 = vmatmul.mubr.bf16.gmra.mxu0 %v11479_v62  ;;  %12864 = vmatmul.mubr.bf16.gmra.mxu1 %v11443_v54  ;;  %v14827_v54 = vsel %vm14113_vm9, %v11417_v6, %v2395_v22  ;;  %v14835_v48 = vld [vmem:[#allocation2 + $0x14] sm:$0x1]  ;;  %v2409_v6 = vrot.slane %v14542_v34, 5  ;;  %v14841_v22 = vld [vmem:[#allocation2 + $0xa8] sm:$0xf]  ;;  %v14849_v62 = vsel %vm14113_vm9, %v11418_v5, %v2402_v1  ;;  %v3139_v55 = vshrl.u32 %v14595_v26, 16 }
 0x16f   : > { %12907 = vmatprep.mubr.bf16.mxu0 %v11480_v39  ;;  %12867 = vmatprep.mubr.bf16.mxu1 %v11444_v4  ;;  %v2404_v39 = vrot.slane %v2402_v1, 4  ;;  %19489 = vst [vmem:[#allocation7_spill] sm:$0xff] %v14841_v22  ;;  %v14845_v27 = vsel %vm14113_vm9, %v2397_v7, %v2398_v18  ;;  %v14852_v4 = vld [vmem:[#allocation2 + $0xac] sm:$0xf]  ;;  %v13706_v34 = vld [vmem:[%s19363_s5 + $0x158] sm:$0xff]   ;;  %v3142_v13 = vshll.u32 %v14595_v26, 16 }
 0x170   : > { %12944 = vmatpush3.bf16.msra.mxu1 %v13699_v2  ;;  %12984 = vmatpush3.bf16.msra.mxu0 %v13701_v16  ;;  %v2412_v2 = vrot.slane %v14580_v17, 5  ;;  %19490 = vst [vmem:[#allocation8_spill] sm:$0xff] %v14852_v4  ;;  %v14861_v16 = vld [vmem:[%s19363_s5 + $0x1b8] sm:$0xff]   ;;  %v2411_v17 = vrot.slane %v2409_v6, 4  ;;  %v14873_v7 = vsel %vm14113_vm9, %v11419_v46, %v2409_v6  ;;  %v3141_v51 = vrot.slane %v3139_v55, 4 }
 0x171   : > { %12985 = vmatprep.subr.bf16.mxu0 %v13703_v38  ;;  %12945 = vmatprep.subr.bf16.mxu1 %v13704_v60  ;;  %19491 = vst [vmem:[#allocation6_spill] sm:$0xff] %v14861_v16  ;;  %v14867_v5 = vsel %vm14113_vm9, %v2404_v39, %v2405_v33  ;;  %v3148_v30 = vshll.u32 %v14597_v12, 16  ;;  %v3152_v39 = vshrl.u32 %v14597_v12, 16  ;;  %v3158_v1 = vshll.u32 %v14835_v48, 16  ;;  %v14885_v46 = vld [vmem:[#allocation2 + $0xb4] sm:$0xf] }
 0x172   : > { %v14881_v33 = vsel %vm14113_vm9, %v2411_v17, %v2412_v2  ;;  %19492 = vst [vmem:[#allocation11_spill] sm:$0xff] %v14885_v46  ;;  %v14887_v6 = vld [vmem:[#allocation2 + $0xb8] sm:$0xf]  ;;  %v3144_v55 = vrot.slane %v3142_v13, 5  ;;  %v3163_v2 = vshrl.u32 %v14601_v49, 16  ;;  %v3166_v17 = vshll.u32 %v14601_v49, 16 }
 0x173   : > { %19493 = vst [vmem:[#allocation12_spill] sm:$0xff] %v14887_v6  ;;  %v3150_v42 = vrot.slane %v3148_v30, 5  ;;  %v3154_v13 = vrot.slane %v3152_v39, 4  ;;  %v3172_v18 = vshll.u32 %v14611_v37, 16  ;;  %v3160_v6 = vrot.slane %v3158_v1, 5 }
 0x174   : > { %12986 = vmatpush3.bf16.msra.mxu0 %v13703_v38  ;;  %12946 = vmatpush3.bf16.msra.mxu1 %v13704_v60  ;;  %v13708_v38 = vld [vmem:[%s19363_s5 + $0x150] sm:$0xff]   ;;  %v14895_v60 = vld [vmem:[#allocation2 + $0x20] sm:$0x1]  ;;  %v3165_v35 = vrot.slane %v3163_v2, 4  ;;  %v3176_v36 = vshrl.u32 %v14611_v37, 16  ;;  %v3168_v30 = vrot.slane %v3166_v17, 5 }
 0x175   : > { %12987 = vmatprep.subr.bf16.mxu0 %v13706_v34  ;;  %13027 = vmatprep.subr.bf16.mxu1 %v14861_v16  ;;  %v19494_v16 = vcombine.low %v14740_v40, %v14764_v25  ;;  %v3155_v39 = vor.u32 %v3154_v13, %v3150_v42  ;;  %v3174_v46 = vrot.slane %v3172_v18, 5  ;;  %v3182_v4 = vshll.u32 %v14895_v60, 16  ;;  %v14918_v22 = vld [vmem:[#allocation2 + $0xc4] sm:$0xf]  ;;  %v14926_v1 = vld [vmem:[#allocation2 + $0x2c] sm:$0x1] }
 0x176   : > { %12908 = vmatmul.mubr.bf16.gmra.mxu0 %v11481_v8  ;;  %12868 = vmatmul.mubr.bf16.gmra.mxu1 %v11445_v61  ;;  %v3145_v8 = vor.u32 %v3144_v55, %v3141_v51  ;;  %v14915_v61 = vld [vmem:[#allocation2 + $0xc0] sm:$0xf]  ;;  %19496 = vst [vmem:[#allocation14_spill] sm:$0xff] %v14918_v22  ;;  %v3178_v41 = vrot.slane %v3176_v36, 4  ;;  %v3187_v25 = vshrl.u32 %v14613_v59, 16  ;;  %v13711_v51 = vld [vmem:[%s19363_s5 + $0x148] sm:$0xff]  }
 0x177   : > { %12911 = vmatprep.mubr.bf16.mxu0 %v11482_v9  ;;  %12871 = vmatprep.mubr.bf16.mxu1 %v19494_v16  ;;  %19495 = vst [vmem:[#allocation13_spill] sm:$0xff] %v14915_v61  ;;  %v3156_v16 = vrot.slane %v3155_v39, 4  ;;  %v3190_v18 = vshll.u32 %v14613_v59, 16  ;;  %v3196_v55 = vshll.u32 %v14618_v11, 16  ;;  %v3184_v22 = vrot.slane %v3182_v4, 5 }
 0x178   : > { %12988 = vmatpush3.bf16.msra.mxu0 %v13706_v34  ;;  %v3146_v9 = vrot.slane %v3145_v8, 4  ;;  %v3169_v34 = vor.u32 %v3168_v30, %v3165_v35  ;;  %v3179_v13 = vor.u32 %v3178_v41, %v3174_v46  ;;  %v3189_v17 = vrot.slane %v3187_v25, 4  ;;  %v13712_v41 = vld [vmem:[%s19363_s5 + $0x140] sm:$0xff]  }
 0x179   : > { %12989 = vmatprep.subr.bf16.mxu0 %v13708_v38  ;;  %v3200_v8 = vshrl.u32 %v14618_v11, 16  ;;  %v3161_v36 = vsel %vm14068_vm4, %v3156_v16, %v3160_v6  ;;  %v3192_v39 = vrot.slane %v3190_v18, 5  ;;  %v3198_v30 = vrot.slane %v3196_v55, 5 }
 0x17a   : > { %v3151_v2 = vsel %vm14068_vm4, %v3146_v9, %v3150_v42  ;;  %v3170_v40 = vrot.slane %v3169_v34, 4  ;;  %v3180_v35 = vrot.slane %v3179_v13, 4  ;;  %v3206_v20 = vshll.u32 %v14926_v1, 16  ;;  %v14962_v13 = vld [vmem:[#allocation2 + $0x38] sm:$0x1] }
 0x17b   : > { %v3202_v61 = vrot.slane %v3200_v8, 4  ;;  %v19497_v42 = vcombine.low %v14699_v43, %v14701_v14  ;;  %v19498_v6 = vcombine.low %v14772_v32, %v14781_v10  ;;  %v3193_v4 = vor.u32 %v3192_v39, %v3189_v17 }
 0x17c   : > { %12990 = vmatpush3.bf16.msra.mxu0 %v13708_v38  ;;  %v3175_v38 = vsel %vm14068_vm4, %v3170_v40, %v3174_v46  ;;  %v11540_v9 = vrot.slane %v14595_v26, 9  ;;  %v3862_v25 = vrot.slane %v14597_v12, 5  ;;  %v19499_v16 = vcombine.low %v14736_v0, %v14742_v44 }
 0x17d   : > { %12991 = vmatprep.subr.bf16.mxu0 %v13711_v51  ;;  %v19500_v34 = vcombine.low %v14785_v45, %v14796_v52  ;;  %v14955_v18 = vcombine.low %v3151_v2, %v3161_v36  ;;  %v3185_v32 = vsel %vm14068_vm4, %v3180_v35, %v3184_v22  ;;  %v3203_v10 = vor.u32 %v3202_v61, %v3198_v30 }
 0x17e   : > { %12912 = vmatmul.mubr.bf16.gmra.mxu0 %v19497_v42  ;;  %12872 = vmatmul.mubr.bf16.gmra.mxu1 %v19498_v6  ;;  %v3208_v46 = vrot.slane %v3206_v20, 5  ;;  %v14959_v40 = vcombine.low %v3175_v38, %v3185_v32  ;;  %v3194_v26 = vrot.slane %v3193_v4, 4  ;;  %v3864_v12 = vrot.slane %v3862_v25, 4  ;;  %v14970_v20 = vld [vmem:[%s19363_s5 + $0x1f8] sm:$0xff]   ;;  %v14986_v42 = vld [vmem:[#allocation2 + $0x44] sm:$0x1] }
 0x17f   : > { %12915 = vmatprep.mubr.bf16.mxu0 %v19499_v16  ;;  %12875 = vmatprep.mubr.bf16.mxu1 %v19500_v34  ;;  %v3865_v55 = vrot.slane %v14835_v48, 5  ;;  %v3204_v17 = vrot.slane %v3203_v10, 4  ;;  %v3211_v45 = vshrl.u32 %v14632_v63, 16  ;;  %v3214_v52 = vshll.u32 %v14632_v63, 16 }
 0x180   : > { %12992 = vmatpush3.bf16.msra.mxu0 %v13711_v51  ;;  %v3220_v2 = vshll.u32 %v14636_v15, 16  ;;  %v3199_v22 = vsel %vm14068_vm4, %v3194_v26, %v3198_v30  ;;  %v14976_v48 = vsel %vm14113_vm9, %v11540_v9, %v3862_v25  ;;  %v3224_v51 = vshrl.u32 %v14636_v15, 16 }
 0x181   : > { %12993 = vmatprep.subr.bf16.mxu0 %v13712_v41  ;;  %v14980_v61 = vsel %vm14113_vm9, %v3864_v12, %v3865_v55  ;;  %v3209_v8 = vsel %vm14068_vm4, %v3204_v17, %v3208_v46  ;;  %v3213_v36 = vrot.slane %v3211_v45, 4  ;;  %v3216_v39 = vrot.slane %v3214_v52, 5 }
 0x182   : > { %v3230_v35 = vshll.u32 %v14962_v13, 16  ;;  %v14988_v30 = vcombine.low %v3199_v22, %v3209_v8  ;;  %v11572_v6 = vcombine.low %v14976_v48, %v14980_v61  ;;  %v3222_v38 = vrot.slane %v3220_v2, 5  ;;  %v13716_v61 = vld [vmem:[%s19363_s5 + $0x198] sm:$0xff]  }
 0x183   : > { %v3226_v4 = vrot.slane %v3224_v51, 4  ;;  %v3217_v9 = vor.u32 %v3216_v39, %v3213_v36  ;;  %v3235_v25 = vshrl.u32 %v14638_v24, 16  ;;  %v3238_v16 = vshll.u32 %v14638_v24, 16 }
 0x184   : > { %12994 = vmatpush3.bf16.msra.mxu0 %v13712_v41  ;;  %v3244_v34 = vshll.u32 %v14648_v28, 16  ;;  %v19501_v32 = vcombine.low %v14775_v3, %v14777_v21  ;;  %v19502_v10 = vcombine.low %v14827_v54, %v14845_v27  ;;  %v3248_v46 = vshrl.u32 %v14648_v28, 16 }
 0x185   : > { %13075 = vmatprep.subr.bf16.mxu0 %v14970_v20  ;;  %v3227_v41 = vor.u32 %v3226_v4, %v3222_v38  ;;  %v3254_v26 = vshll.u32 %v14986_v42, 16  ;;  %v11541_v12 = vrot.slane %v14601_v49, 9  ;;  %v19503_v55 = vcombine.low %v14789_v47, %v14791_v57 }
 0x186   : > { %12916 = vmatmul.mubr.bf16.gmra.mxu0 %v19501_v32  ;;  %12876 = vmatmul.mubr.bf16.gmra.mxu1 %v19502_v10  ;;  %v19504_v17 = vcombine.low %v14849_v62, %v14867_v5  ;;  %v3218_v45 = vrot.slane %v3217_v9, 4  ;;  %v3237_v52 = vrot.slane %v3235_v25, 4  ;;  %v3240_v2 = vrot.slane %v3238_v16, 5 }
 0x187   : > { %12919 = vmatprep.mubr.bf16.mxu0 %v19503_v55  ;;  %v3246_v54 = vrot.slane %v3244_v34, 5  ;;  %v3228_v27 = vrot.slane %v3227_v41, 4  ;;  %v3232_v22 = vrot.slane %v3230_v35, 5  ;;  %v3250_v51 = vrot.slane %v3248_v46, 4 }
 0x188   : > { %12879 = vmatprep.mubr.bf16.mxu1 %v19504_v17  ;;  %v3869_v8 = vrot.slane %v14611_v37, 5  ;;  %v3223_v49 = vsel %vm14068_vm4, %v3218_v45, %v3222_v38  ;;  %v3241_v36 = vor.u32 %v3240_v2, %v3237_v52  ;;  %v3256_v39 = vrot.slane %v3254_v26, 5 }
 0x189   : > { %v3872_v4 = vrot.slane %v14895_v60, 5  ;;  %v3233_v62 = vsel %vm14068_vm4, %v3228_v27, %v3232_v22  ;;  %v3251_v5 = vor.u32 %v3250_v51, %v3246_v54  ;;  %v11542_v25 = vrot.slane %v14613_v59, 9  ;;  %v15062_v22 = vld [vmem:[#allocation2 + $0x5c] sm:$0x1] }
 0x18a   : > { %v3871_v9 = vrot.slane %v3869_v8, 4  ;;  %v15018_v16 = vcombine.low %v3223_v49, %v3233_v62  ;;  %v3242_v35 = vrot.slane %v3241_v36, 4  ;;  %v15022_v37 = vsel %vm14113_vm9, %v11541_v12, %v3869_v8  ;;  %v15036_v12 = vld [vmem:[#allocation2 + $0x50] sm:$0x1]  ;;  %v19508_v36 = vld [vmem:[#allocation9_spill] sm:$0xff] }
 0x18b   : > { %v3876_v38 = vrot.slane %v14618_v11, 5  ;;  %v3252_v34 = vrot.slane %v3251_v5, 4  ;;  %v3259_v32 = vshrl.u32 %v14672_v31, 16  ;;  %v3262_v10 = vshll.u32 %v14672_v31, 16  ;;  %v19509_v5 = vld [vmem:[#allocation10_spill] sm:$0xff] }
 0x18c   : > { %v15027_v60 = vsel %vm14113_vm9, %v3871_v9, %v3872_v4  ;;  %v3247_v59 = vsel %vm14068_vm4, %v3242_v35, %v3246_v54  ;;  %v3879_v26 = vrot.slane %v14926_v1, 5  ;;  %v19505_v11 = vcombine.low %v14802_v29, %v14818_v53 }
 0x18d   : > { %v3878_v46 = vrot.slane %v3876_v38, 4  ;;  %v19506_v55 = vcombine.low %v14873_v7, %v14881_v33  ;;  %v3257_v17 = vsel %vm14068_vm4, %v3252_v34, %v3256_v39  ;;  %v3261_v45 = vrot.slane %v3259_v32, 4 }
 0x18e   : > { %12920 = vmatmul.mubr.bf16.gmra.mxu0 %v19505_v11  ;;  %v3264_v52 = vrot.slane %v3262_v10, 5  ;;  %v3268_v2 = vshll.u32 %v14674_v56, 16  ;;  %v19507_v1 = vcombine.low %v14831_v58, %v14833_v23  ;;  %v15051_v54 = vcombine.low %v3247_v59, %v3257_v17 }
 0x18f   : > { %12880 = vmatmul.mubr.bf16.gmra.mxu1 %v19506_v55  ;;  %v15055_v27 = vsel %vm14113_vm9, %v11542_v25, %v3876_v38  ;;  %v15059_v7 = vsel %vm14113_vm9, %v3878_v46, %v3879_v26  ;;  %v3272_v33 = vshrl.u32 %v14674_v56, 16  ;;  %v3278_v49 = vshll.u32 %v15036_v12, 16  ;;  %v13713_v26 = vld [vmem:[%s19363_s5 + $0x1b0] sm:$0xff]  }
 0x190   : > { %12923 = vmatprep.mubr.bf16.mxu0 %v19507_v1  ;;  %12947 = vmatprep.mubr.bf16.mxu1 %v14955_v18  ;;  %v3265_v51 = vor.u32 %v3264_v52, %v3261_v45  ;;  %v3270_v8 = vrot.slane %v3268_v2, 5  ;;  %v3283_v18 = vshrl.u32 %v19508_v36, 16  ;;  %v3286_v62 = vshll.u32 %v19508_v36, 16 }
 0x191   : > { %v3274_v4 = vrot.slane %v3272_v33, 4  ;;  %v3292_v9 = vshll.u32 %v19509_v5, 16  ;;  %v3296_v38 = vshrl.u32 %v19509_v5, 16  ;;  %v3302_v34 = vshll.u32 %v15062_v22, 16 }
 0x192   : > { %v3266_v25 = vrot.slane %v3265_v51, 4  ;;  %v3285_v35 = vrot.slane %v3283_v18, 4  ;;  %v3288_v10 = vrot.slane %v3286_v62, 5  ;;  %v11543_v46 = vrot.slane %v14632_v63, 9  ;;  %v19510_v51 = vld [vmem:[#allocation7_spill] sm:$0xff]  ;;  %v19511_v18 = vld [vmem:[#allocation8_spill] sm:$0xff] }
 0x193   : > { %v3275_v32 = vor.u32 %v3274_v4, %v3270_v8  ;;  %v3294_v59 = vrot.slane %v3292_v9, 5  ;;  %v3280_v55 = vrot.slane %v3278_v49, 5  ;;  %v3298_v17 = vrot.slane %v3296_v38, 4  ;;  %v19513_v49 = vld [vmem:[#allocation11_spill] sm:$0xff] }
 0x194   : > { %v3271_v11 = vsel %vm14068_vm4, %v3266_v25, %v3270_v8  ;;  %v3883_v45 = vrot.slane %v14636_v15, 5  ;;  %v3289_v2 = vor.u32 %v3288_v10, %v3285_v35  ;;  %v3304_v1 = vrot.slane %v3302_v34, 5  ;;  %v19514_v25 = vld [vmem:[#allocation12_spill] sm:$0xff]  ;;  %v19516_v35 = vld [vmem:[#allocation6_spill] sm:$0xff] }
 0x195   : > { %v3276_v52 = vrot.slane %v3275_v32, 4  ;;  %v11544_v33 = vrot.slane %v14638_v24, 9  ;;  %v19512_v4 = vcombine.low %v19510_v51, %v19511_v18  ;;  %v3299_v63 = vor.u32 %v3298_v17, %v3294_v59 }
 0x196   : > { %v3885_v62 = vrot.slane %v3883_v45, 4  ;;  %v3886_v9 = vrot.slane %v14962_v13, 5  ;;  %v3890_v8 = vrot.slane %v14648_v28, 5  ;;  %v19515_v15 = vcombine.low %v19513_v49, %v19514_v25  ;;  %v13714_v28 = vld [vmem:[%s19363_s5 + $0x1a8] sm:$0xff]  }
 0x197   : > { %12924 = vmatmul.mubr.bf16.gmra.mxu0 %v19512_v4  ;;  %12948 = vmatmul.mubr.bf16.vlgmr.msra.gmra.mxu1 %v14959_v40  ;;  %v3281_v24 = vsel %vm14068_vm4, %v3276_v52, %v3280_v55  ;;  %v3290_v38 = vrot.slane %v3289_v2, 4  ;;  %v15094_v34 = vsel %vm14113_vm9, %v11543_v46, %v3883_v45  ;;  %v3307_v40 = vshrl.u32 %v14699_v43, 16  ;;  %v15114_v45 = vld [vmem:[#allocation2 + $0x68] sm:$0x1] }
 0x198   : > { %12927 = vmatprep.mubr.bf16.mxu0 %v19515_v15  ;;  %13028 = vmatpush3.bf16.msra.mxu1 %v19516_v35  ;;  %v15101_v13 = vcombine.low %v3271_v11, %v3281_v24  ;;  %v3300_v32 = vrot.slane %v3299_v63, 4  ;;  %v15105_v10 = vsel %vm14113_vm9, %v3885_v62, %v3886_v9  ;;  %v3893_v55 = vrot.slane %v14986_v42, 5  ;;  %v15129_v62 = vld [vmem:[#allocation2 + $0x74] sm:$0x1]  ;;  %v13715_v24 = vld [vmem:[%s19363_s5 + $0x1a0] sm:$0xff]  }
 0x199   : > { %12951 = vmatprep.mubr.bf16.mxu1 %v14988_v30  ;;  %13029 = vmatprep.subr.bf16.mxu1 %v13713_v26  ;;  %v3295_v46 = vsel %vm14068_vm4, %v3290_v38, %v3294_v59  ;;  %v15112_v30 = vsel %vm14113_vm9, %v11544_v33, %v3890_v8  ;;  %v3892_v17 = vrot.slane %v3890_v8, 4  ;;  %v3309_v52 = vrot.slane %v3307_v40, 4 }
 0x19a   : > { %v3305_v11 = vsel %vm14068_vm4, %v3300_v32, %v3304_v1  ;;  %v3310_v2 = vshll.u32 %v14699_v43, 16  ;;  %v3316_v4 = vshll.u32 %v14701_v14, 16  ;;  %v3320_v42 = vshrl.u32 %v14701_v14, 16 }
 0x19b   : > { %v15121_v63 = vcombine.low %v3295_v46, %v3305_v11  ;;  %v15127_v33 = vsel %vm14113_vm9, %v3892_v17, %v3893_v55  ;;  %v3331_v1 = vshrl.u32 %v14736_v0, 16  ;;  %v3326_v35 = vshll.u32 %v15114_v45, 16  ;;  %v19517_v55 = vld [vmem:[#allocation13_spill] sm:$0xff]  ;;  %v19518_v46 = vld [vmem:[#allocation14_spill] sm:$0xff] }
 0x19c   : > { %13030 = vmatpush3.bf16.msra.mxu1 %v13713_v26  ;;  %v3312_v9 = vrot.slane %v3310_v2, 5  ;;  %v3318_v8 = vrot.slane %v3316_v4, 5  ;;  %v3322_v15 = vrot.slane %v3320_v42, 4  ;;  %v3334_v40 = vshll.u32 %v14736_v0, 16 }
 0x19d   : > { %13031 = vmatprep.subr.bf16.mxu1 %v13714_v28  ;;  %v3333_v38 = vrot.slane %v3331_v1, 4  ;;  %v3340_v32 = vshll.u32 %v14742_v44, 16  ;;  %v19519_v17 = vcombine.low %v19517_v55, %v19518_v46  ;;  %v3344_v4 = vshrl.u32 %v14742_v44, 16 }
 0x19e   : > { %v3313_v11 = vor.u32 %v3312_v9, %v3309_v52  ;;  %v3323_v2 = vor.u32 %v3322_v15, %v3318_v8  ;;  %v3350_v42 = vshll.u32 %v15129_v62, 16  ;;  %v3336_v1 = vrot.slane %v3334_v40, 5 }
 0x19f   : > { %12928 = vmatmul.mubr.bf16.gmra.mxu0 %v19519_v17  ;;  %12952 = vmatmul.mubr.bf16.gmra.mxu1 %v15018_v16  ;;  %v3342_v26 = vrot.slane %v3340_v32, 5  ;;  %v11545_v59 = vrot.slane %v14672_v31, 9  ;;  %v3897_v17 = vrot.slane %v14674_v56, 5  ;;  %v3328_v9 = vrot.slane %v3326_v35, 5 }
 0x1a0   : > { %12995 = vmatprep.mubr.bf16.mxu0 %v11572_v6  ;;  %12955 = vmatprep.mubr.bf16.mxu1 %v15051_v54  ;;  %v3314_v16 = vrot.slane %v3313_v11, 4  ;;  %v3324_v52 = vrot.slane %v3323_v2, 4  ;;  %v3346_v15 = vrot.slane %v3344_v4, 4  ;;  %v3337_v39 = vor.u32 %v3336_v1, %v3333_v38  ;;  %v15172_v11 = vld [vmem:[#allocation2 + $0x80] sm:$0x1] }
 0x1a1   : > { %13032 = vmatpush3.bf16.msra.mxu1 %v13714_v28  ;;  %v3352_v41 = vrot.slane %v3350_v42, 5  ;;  %v3899_v46 = vrot.slane %v3897_v17, 4  ;;  %v3900_v48 = vrot.slane %v15036_v12, 5  ;;  %v15162_v54 = vsel %vm14113_vm9, %v11545_v59, %v3897_v17 }
 0x1a2   : > { %13033 = vmatprep.subr.bf16.mxu1 %v13715_v24  ;;  %v3319_v31 = vsel %vm14068_vm4, %v3314_v16, %v3318_v8  ;;  %v3329_v56 = vsel %vm14068_vm4, %v3324_v52, %v3328_v9  ;;  %v3347_v6 = vor.u32 %v3346_v15, %v3342_v26  ;;  %v3338_v28 = vrot.slane %v3337_v39, 4 }
 0x1a3   : > { %v15166_v35 = vsel %vm14113_vm9, %v3899_v46, %v3900_v48  ;;  %v11546_v12 = vrot.slane %v19508_v36, 9  ;;  %v3904_v38 = vrot.slane %v19509_v5, 5  ;;  %v11523_v40 = vcombine.low %v3319_v31, %v3329_v56  ;;  %v13717_v5 = vld [vmem:[%s19363_s5 + $0x190] sm:$0xff]   ;;  %v13720_v56 = vld [vmem:[%s19363_s5 + $0x188] sm:$0xff]  }
 0x1a4   : > { %v3348_v8 = vrot.slane %v3347_v6, 4  ;;  %v11577_v32 = vcombine.low %v15162_v54, %v15166_v35  ;;  %v3355_v59 = vshrl.u32 %v14775_v3, 16  ;;  %v3343_v39 = vsel %vm14068_vm4, %v3338_v28, %v3342_v26 }
 0x1a5   : > { %13034 = vmatpush3.bf16.msra.mxu1 %v13715_v24  ;;  %v3906_v2 = vrot.slane %v3904_v38, 4  ;;  %v3907_v46 = vrot.slane %v15062_v22, 5  ;;  %v3358_v36 = vshll.u32 %v14775_v3, 16  ;;  %v13719_v24 = vld [vmem:[%s19363_s5 + $0x1f0] sm:$0xff]   ;;  %v19520_v4 = vcombine.low %v15022_v37, %v15027_v60 }
 0x1a6   : > { %13035 = vmatprep.subr.bf16.mxu1 %v13716_v61  ;;  %v3353_v22 = vsel %vm14068_vm4, %v3348_v8, %v3352_v41  ;;  %v3357_v26 = vrot.slane %v3355_v59, 4  ;;  %v3364_v42 = vshll.u32 %v14777_v21, 16  ;;  %v3368_v1 = vshrl.u32 %v14777_v21, 16  ;;  %v15202_v41 = vld [vmem:[#allocation2 + $0x8c] sm:$0x1] }
 0x1a7   : > { %12996 = vmatmul.mubr.bf16.vlgmr.msra.gmra.mxu0 %v19520_v4  ;;  %12956 = vmatmul.mubr.bf16.gmra.mxu1 %v15101_v13  ;;  %v19521_v17 = vcombine.low %v15055_v27, %v15059_v7  ;;  %v11524_v16 = vcombine.low %v3343_v39, %v3353_v22  ;;  %v15199_v37 = vsel %vm14113_vm9, %v11546_v12, %v3904_v38  ;;  %v3360_v60 = vrot.slane %v3358_v36, 5 }
 0x1a8   : > { %12959 = vmatprep.mubr.bf16.mxu1 %v15121_v63  ;;  %v3374_v13 = vshll.u32 %v15172_v11, 16  ;;  %v15206_v52 = vsel %vm14113_vm9, %v3906_v2, %v3907_v46  ;;  %v3366_v9 = vrot.slane %v3364_v42, 5  ;;  %v3370_v15 = vrot.slane %v3368_v1, 4  ;;  %13076 = vmatpush3.bf16.msra.mxu0 %v14970_v20 }
 0x1a9   : > { %12999 = vmatprep.mubr.bf16.mxu0 %v19521_v17  ;;  %13036 = vmatpush3.bf16.msra.mxu1 %v13716_v61  ;;  %v3379_v27 = vshrl.u32 %v14789_v47, 16  ;;  %v3361_v7 = vor.u32 %v3360_v60, %v3357_v26  ;;  %v3382_v48 = vshll.u32 %v14789_v47, 16  ;;  %v3388_v31 = vshll.u32 %v14791_v57, 16  ;;  %v13721_v61 = vld [vmem:[%s19363_s5 + $0x1e8] sm:$0xff]   ;;  %v13723_v17 = vld [vmem:[%s19363_s5 + $0x180] sm:$0xff]  }
 0x1aa   : > { %v3376_v63 = vrot.slane %v3374_v13, 5  ;;  %13037 = vmatprep.subr.bf16.mxu1 %v13717_v5  ;;  %13077 = vmatprep.subr.bf16.mxu0 %v13719_v24  ;;  %v3371_v6 = vor.u32 %v3370_v15, %v3366_v9  ;;  %v3392_v20 = vshrl.u32 %v14791_v57, 16  ;;  %v3398_v12 = vshll.u32 %v15202_v41, 16 }
 0x1ab   : > { %v3381_v28 = vrot.slane %v3379_v27, 4  ;;  %v3362_v38 = vrot.slane %v3361_v7, 4  ;;  %v3384_v8 = vrot.slane %v3382_v48, 5  ;;  %v3390_v59 = vrot.slane %v3388_v31, 5  ;;  %v15266_v48 = vld [vmem:[%s19363_s5 + $0x238] sm:$0xff]  }
 0x1ac   : > { %v11547_v39 = vrot.slane %v14699_v43, 9  ;;  %v11578_v2 = vcombine.low %v15199_v37, %v15206_v52  ;;  %v3372_v46 = vrot.slane %v3371_v6, 4  ;;  %v3394_v36 = vrot.slane %v3392_v20, 4  ;;  %13078 = vmatpush3.bf16.msra.mxu0 %v13719_v24  ;;  %v13722_v43 = vld [vmem:[%s19363_s5 + $0x1e0] sm:$0xff]  }
 0x1ad   : > { %v3911_v4 = vrot.slane %v14701_v14, 5  ;;  %13038 = vmatpush3.bf16.msra.mxu1 %v13717_v5  ;;  %v3367_v22 = vsel %vm14068_vm4, %v3362_v38, %v3366_v9  ;;  %v3385_v26 = vor.u32 %v3384_v8, %v3381_v28  ;;  %v3400_v42 = vrot.slane %v3398_v12, 5  ;;  %13079 = vmatprep.subr.bf16.mxu0 %v13721_v61  ;;  %v15277_v8 = vld [vmem:[#allocation2 + $0xa4] sm:$0x1] }
 0x1ae   : > { %v3914_v1 = vrot.slane %v15114_v45, 5  ;;  %13039 = vmatprep.subr.bf16.mxu1 %v13720_v56  ;;  %v19522_v14 = vcombine.low %v15094_v34, %v15105_v10  ;;  %v3377_v5 = vsel %vm14068_vm4, %v3372_v46, %v3376_v63  ;;  %v3395_v24 = vor.u32 %v3394_v36, %v3390_v59  ;;  %v13725_v63 = vld [vmem:[%s19363_s5 + $0x1d8] sm:$0xff]  }
 0x1af   : > { %12960 = vmatmul.mubr.bf16.gmra.mxu1 %v11523_v40  ;;  %v3913_v45 = vrot.slane %v3911_v4, 4  ;;  %v11548_v60 = vrot.slane %v14736_v0, 9  ;;  %v19523_v13 = vcombine.low %v15112_v30, %v15127_v33  ;;  %v3386_v9 = vrot.slane %v3385_v26, 4  ;;  %v15252_v0 = vld [vmem:[#allocation2 + $0x98] sm:$0x1] }
 0x1b0   : > { %13000 = vmatmul.mubr.bf16.gmra.mxu0 %v19522_v14  ;;  %12963 = vmatprep.mubr.bf16.mxu1 %v11524_v16  ;;  %v15244_v15 = vsel %vm14113_vm9, %v11547_v39, %v3911_v4  ;;  %v3918_v34 = vrot.slane %v14742_v44, 5  ;;  %v3921_v10 = vrot.slane %v15129_v62, 5  ;;  %v3396_v40 = vrot.slane %v3395_v24, 4 }
 0x1b1   : > { %13003 = vmatprep.mubr.bf16.mxu0 %v19523_v13  ;;  %v15250_v27 = vsel %vm14113_vm9, %v3913_v45, %v3914_v1  ;;  %v3403_v30 = vshrl.u32 %v14802_v29, 16  ;;  %v3406_v33 = vshll.u32 %v14802_v29, 16  ;;  %13040 = vmatpush3.bf16.msra.mxu1 %v13720_v56  ;;  %v11525_v16 = vcombine.low %v3367_v22, %v3377_v5  ;;  %v13726_v1 = vld [vmem:[%s19363_s5 + $0x1d0] sm:$0xff]  }
 0x1b2   : > { %13080 = vmatpush3.bf16.msra.mxu0 %v13721_v61  ;;  %v3391_v7 = vsel %vm14068_vm4, %v3386_v9, %v3390_v59  ;;  %v11579_v44 = vcombine.low %v15244_v15, %v15250_v27  ;;  %v3920_v62 = vrot.slane %v3918_v34, 4  ;;  %13041 = vmatprep.subr.bf16.mxu1 %v13723_v17  ;;  %v3401_v31 = vsel %vm14068_vm4, %v3396_v40, %v3400_v42 }
 0x1b3   : > { %13081 = vmatprep.subr.bf16.mxu0 %v13722_v43  ;;  %v3405_v56 = vrot.slane %v3403_v30, 4  ;;  %v3408_v61 = vrot.slane %v3406_v33, 5  ;;  %v3412_v6 = vshll.u32 %v14818_v53, 16  ;;  %v11526_v28 = vcombine.low %v3391_v7, %v3401_v31 }
 0x1b4   : > { %v15273_v20 = vsel %vm14113_vm9, %v11548_v60, %v3918_v34  ;;  %v3416_v12 = vshrl.u32 %v14818_v53, 16  ;;  %v3422_v38 = vshll.u32 %v15252_v0, 16  ;;  %v15281_v59 = vsel %vm14113_vm9, %v3920_v62, %v3921_v10 }
 0x1b5   : > { %v3409_v39 = vor.u32 %v3408_v61, %v3405_v56  ;;  %v3414_v46 = vrot.slane %v3412_v6, 5  ;;  %v3427_v36 = vshrl.u32 %v14831_v58, 16  ;;  %13042 = vmatpush3.bf16.msra.mxu1 %v13723_v17  ;;  %v3430_v26 = vshll.u32 %v14831_v58, 16  ;;  %v15320_v61 = vld [vmem:[#allocation2 + $0xb0] sm:$0x1] }
 0x1b6   : > { %13082 = vmatpush3.bf16.msra.mxu0 %v13722_v43  ;;  %v3418_v4 = vrot.slane %v3416_v12, 4  ;;  %v3424_v22 = vrot.slane %v3422_v38, 5  ;;  %v3436_v42 = vshll.u32 %v14833_v23, 16  ;;  %13123 = vmatprep.subr.bf16.mxu1 %v15266_v48  ;;  %v3440_v14 = vshrl.u32 %v14833_v23, 16  ;;  %v13731_v38 = vld [vmem:[%s19363_s5 + $0x1c0] sm:$0xff]  }
 0x1b7   : > { %13083 = vmatprep.subr.bf16.mxu0 %v13725_v63  ;;  %12964 = vmatmul.mubr.bf16.gmra.mxu1 %v11525_v16  ;;  %v3410_v43 = vrot.slane %v3409_v39, 4  ;;  %v3429_v17 = vrot.slane %v3427_v36, 4  ;;  %v3446_v5 = vshll.u32 %v15277_v8, 16  ;;  %v3432_v45 = vrot.slane %v3430_v26, 5 }
 0x1b8   : > { %13004 = vmatmul.mubr.bf16.gmra.mxu0 %v11577_v32  ;;  %12967 = vmatprep.mubr.bf16.mxu1 %v11526_v28  ;;  %v3419_v24 = vor.u32 %v3418_v4, %v3414_v46  ;;  %v3438_v60 = vrot.slane %v3436_v42, 5  ;;  %v11549_v13 = vrot.slane %v14775_v3, 9  ;;  %v11580_v54 = vcombine.low %v15273_v20, %v15281_v59  ;;  %v13730_v3 = vld [vmem:[%s19363_s5 + $0x1c8] sm:$0xff]   ;;  %v15342_v42 = vld [vmem:[#allocation2 + $0xbc] sm:$0x1] }
 0x1b9   : > { %13007 = vmatprep.mubr.bf16.mxu0 %v11578_v2  ;;  %v3415_v35 = vsel %vm14068_vm4, %v3410_v43, %v3414_v46  ;;  %v3442_v32 = vrot.slane %v3440_v14, 4  ;;  %v3925_v9 = vrot.slane %v14777_v21, 5  ;;  %v3433_v10 = vor.u32 %v3432_v45, %v3429_v17  ;;  %v15310_v16 = vpop.f32.mrf.mxu1 }
 0x1ba   : > { %13084 = vmatpush3.bf16.msra.mxu0 %v13725_v63  ;;  %v3420_v34 = vrot.slane %v3419_v24, 4  ;;  %v3928_v37 = vrot.slane %v15172_v11, 5  ;;  %v11550_v52 = vrot.slane %v14789_v47, 9  ;;  %v3448_v40 = vrot.slane %v3446_v5, 5 }
 0x1bb   : > { %13085 = vmatprep.subr.bf16.mxu0 %v13726_v1  ;;  %v3443_v2 = vor.u32 %v3442_v32, %v3438_v60  ;;  %v3927_v30 = vrot.slane %v3925_v9, 4  ;;  %v3932_v33 = vrot.slane %v14791_v57, 5  ;;  %v3434_v7 = vrot.slane %v3433_v10, 4  ;;  %v15322_v57 = vpop.f32.mrf.mxu1 }
 0x1bc   : > { %v3425_v21 = vsel %vm14068_vm4, %v3420_v34, %v3424_v22  ;;  %v3926_v11 = vsel %vm14113_vm9, %v11549_v13, %v3925_v9  ;;  %v3451_v47 = vshrl.u32 %v19510_v51, 16  ;;  %v3935_v56 = vrot.slane %v15202_v41, 5 }
 0x1bd   : > { %v11527_v62 = vcombine.low %v3415_v35, %v3425_v21  ;;  %v3444_v63 = vrot.slane %v3443_v2, 4  ;;  %v3929_v31 = vsel %vm14113_vm9, %v3927_v30, %v3928_v37  ;;  %v3439_v6 = vsel %vm14068_vm4, %v3434_v7, %v3438_v60  ;;  %v15339_v36 = vpop.f32.mrf.mxu1 }
 0x1be   : > { %13086 = vmatpush3.bf16.msra.mxu0 %v13726_v1  ;;  %v3933_v28 = vsel %vm14113_vm9, %v11550_v52, %v3932_v33  ;;  %v3934_v20 = vrot.slane %v3932_v33, 4  ;;  %v3453_v12 = vrot.slane %v3451_v47, 4  ;;  %v3454_v59 = vshll.u32 %v19510_v51, 16 }
 0x1bf   : > { %13087 = vmatprep.subr.bf16.mxu0 %v13730_v3  ;;  %12968 = vmatmul.mubr.bf16.gmra.mxu1 %v11527_v62  ;;  %v3449_v41 = vsel %vm14068_vm4, %v3444_v63, %v3448_v40  ;;  %v3460_v39 = vshll.u32 %v19511_v18, 16  ;;  %v3464_v46 = vshrl.u32 %v19511_v18, 16  ;;  %v11581_v22 = vcombine.low %v3926_v11, %v3929_v31  ;;  %v15349_v45 = vpop.f32.mrf.mxu1 }
 0x1c0   : > { %13008 = vmatmul.mubr.bf16.gmra.mxu0 %v11579_v44  ;;  %v11528_v4 = vcombine.low %v3439_v6, %v3449_v41  ;;  %v3470_v26 = vshll.u32 %v15320_v61, 16  ;;  %v3475_v15 = vshrl.u32 %v19513_v49, 16  ;;  %v3936_v27 = vsel %vm14113_vm9, %v3934_v20, %v3935_v56  ;;  %v15369_v20 = vld [vmem:[#allocation2 + $0xc8] sm:$0x1] }
 0x1c1   : > { %13011 = vmatprep.mubr.bf16.mxu0 %v11580_v54  ;;  %v3456_v44 = vrot.slane %v3454_v59, 5  ;;  %v3462_v1 = vrot.slane %v3460_v39, 5  ;;  %v3466_v43 = vrot.slane %v3464_v46, 4  ;;  %v3478_v5 = vshll.u32 %v19513_v49, 16  ;;  %v15356_v7 = vpop.f32.mrf.mxu1  ;;  %v19524_v46 = vld [vmem:[#allocation14_spill] sm:$0xff] }
 0x1c2   : > { %13088 = vmatpush3.bf16.msra.mxu0 %v13730_v3  ;;  %12971 = vmatprep.mubr.bf16.mxu1 %v11528_v4  ;;  %v3472_v17 = vrot.slane %v3470_v26, 5  ;;  %v3477_v14 = vrot.slane %v3475_v15, 4  ;;  %v3484_v24 = vshll.u32 %v19514_v25, 16  ;;  %v3488_v54 = vshrl.u32 %v19514_v25, 16 }
 0x1c3   : > { %13089 = vmatprep.subr.bf16.mxu0 %v13731_v38  ;;  %v3457_v60 = vor.u32 %v3456_v44, %v3453_v12  ;;  %v3467_v13 = vor.u32 %v3466_v43, %v3462_v1  ;;  %v3494_v35 = vshll.u32 %v15342_v42, 16  ;;  %v3480_v32 = vrot.slane %v3478_v5, 5  ;;  %v15377_v59 = vpop.f32.mrf.mxu1 }
 0x1c4   : > { %v3486_v9 = vrot.slane %v3484_v24, 5  ;;  %v11551_v34 = vrot.slane %v14802_v29, 9  ;;  %v3939_v10 = vrot.slane %v14818_v53, 5  ;;  %v11582_v37 = vcombine.low %v3933_v28, %v3936_v27 }
 0x1c5   : > { %v3458_v52 = vrot.slane %v3457_v60, 4  ;;  %v3468_v3 = vrot.slane %v3467_v13, 4  ;;  %v3490_v2 = vrot.slane %v3488_v54, 4  ;;  %v3481_v40 = vor.u32 %v3480_v32, %v3477_v14  ;;  %v15389_v54 = vpop.f32.mrf.mxu1 }
 0x1c6   : > { %13090 = vmatpush3.bf16.msra.mxu0 %v13731_v38  ;;  %v3496_v30 = vrot.slane %v3494_v35, 5  ;;  %v3941_v33 = vrot.slane %v3939_v10, 4  ;;  %v3942_v21 = vrot.slane %v15252_v0, 5  ;;  %v11552_v47 = vrot.slane %v14831_v58, 9 }
 0x1c7   : > { %v3463_v11 = vsel %vm14068_vm4, %v3458_v52, %v3462_v1  ;;  %v3473_v29 = vsel %vm14068_vm4, %v3468_v3, %v3472_v17  ;;  %v3491_v53 = vor.u32 %v3490_v2, %v3486_v9  ;;  %v3482_v63 = vrot.slane %v3481_v40, 4  ;;  %v15395_v52 = vld [vmem:[#allocation2 + $0x1c] sm:$0xf]  ;;  %v15403_v40 = vld [vmem:[%s19364_s6] ss:$0 sm:$0xff] }
 0x1c8   : > { %13012 = vmatmul.mubr.bf16.gmra.mxu0 %v11581_v22  ;;  %v11529_v62 = vcombine.low %v3463_v11, %v3473_v29  ;;  %v3940_v31 = vsel %vm14113_vm9, %v11551_v34, %v3939_v10  ;;  %v3946_v0 = vrot.slane %v14833_v23, 5  ;;  %v3943_v6 = vsel %vm14113_vm9, %v3941_v33, %v3942_v21  ;;  %v15412_v33 = vld [vmem:[#allocation2 + $0x20] sm:$0x1]  ;;  %v15414_v21 = vpop.f32.mrf.mxu1 }
 0x1c9   : > { %13015 = vmatprep.mubr.bf16.mxu0 %v11582_v37  ;;  %v3492_v56 = vrot.slane %v3491_v53, 4  ;;  %v3949_v28 = vrot.slane %v15277_v8, 5  ;;  %v3499_v12 = vshrl.u32 %v19517_v55, 16  ;;  %v3487_v58 = vsel %vm14068_vm4, %v3482_v63, %v3486_v9  ;;  %v15391_v9 = vld [vmem:[#allocation2 + $0x18] sm:$0xf] }
 0x1ca   : > { %12972 = vmatmul.mubr.bf16.gmra.mxu1 %v11529_v62  ;;  %v3947_v38 = vsel %vm14113_vm9, %v11552_v47, %v3946_v0  ;;  %v3948_v41 = vrot.slane %v3946_v0, 4  ;;  %v3502_v23 = vshll.u32 %v19517_v55, 16  ;;  %v3508_v4 = vshll.u32 %v19524_v46, 16  ;;  %v15423_v62 = vld [vmem:[#allocation2 + $0x30] sm:$0xf] }
 0x1cb   : > { %v3497_v39 = vsel %vm14068_vm4, %v3492_v56, %v3496_v30  ;;  %v3501_v8 = vrot.slane %v3499_v12, 4  ;;  %v3512_v22 = vshrl.u32 %v19524_v46, 16  ;;  %v3518_v44 = vshll.u32 %v15369_v20, 16  ;;  %v15425_v63 = vld [vmem:[#allocation2 + $0x34] sm:$0xf] }
 0x1cc   : > { %v11530_v26 = vcombine.low %v3487_v58, %v3497_v39  ;;  %v3950_v15 = vsel %vm14113_vm9, %v3948_v41, %v3949_v28  ;;  %v3504_v27 = vrot.slane %v3502_v23, 5  ;;  %v11583_v1 = vcombine.low %v3940_v31, %v3943_v6  ;;  %v15429_v56 = vld [vmem:[#allocation2 + $0x24] sm:$0xf]  ;;  %v15431_v6 = vld [vmem:[#allocation2 + $0x28] sm:$0xf] }
 0x1cd   : > { %v3510_v43 = vrot.slane %v3508_v4, 5  ;;  %v3514_v17 = vrot.slane %v3512_v22, 4  ;;  %v11553_v14 = vrot.slane %v19510_v51, 9  ;;  %v11584_v5 = vcombine.low %v3947_v38, %v3950_v15 }
 0x1ce   : > { %12975 = vmatprep.mubr.bf16.mxu1 %v11530_v26  ;;  %v3505_v24 = vor.u32 %v3504_v27, %v3501_v8  ;;  %v3953_v60 = vrot.slane %v19511_v18, 5  ;;  %v3956_v13 = vrot.slane %v15320_v61, 5  ;;  %v3520_v32 = vrot.slane %v3518_v44, 5 }
 0x1cf   : > { %v3515_v35 = vor.u32 %v3514_v17, %v3510_v43  ;;  %v11554_v34 = vrot.slane %v19513_v49, 9  ;;  %v3960_v10 = vrot.slane %v19514_v25, 5  ;;  %v3963_v18 = vrot.slane %v15342_v42, 5 }
 0x1d0   : > { %13016 = vmatmul.mubr.bf16.gmra.mxu0 %v11583_v1  ;;  %v3506_v51 = vrot.slane %v3505_v24, 4  ;;  %v3955_v37 = vrot.slane %v3953_v60, 4  ;;  %v3954_v61 = vsel %vm14113_vm9, %v11553_v14, %v3953_v60  ;;  %v11555_v42 = vrot.slane %v19517_v55, 9  ;;  %v15451_v14 = vld [vmem:[#allocation2 + $0x2c] sm:$0x1] }
 0x1d1   : > { %13019 = vmatprep.mubr.bf16.mxu0 %v11584_v5  ;;  %v3516_v3 = vrot.slane %v3515_v35, 4  ;;  %v3962_v2 = vrot.slane %v3960_v10, 4  ;;  %v3961_v30 = vsel %vm14113_vm9, %v11554_v34, %v3960_v10  ;;  %v11612_v29 = vcombine.low %v15391_v9, %v15395_v52 }
 0x1d2   : > { %v3511_v49 = vsel %vm14068_vm4, %v3506_v51, %v3510_v43  ;;  %v3957_v25 = vsel %vm14113_vm9, %v3955_v37, %v3956_v13  ;;  %v3967_v47 = vrot.slane %v19524_v46, 5  ;;  %v1544_v0 = vadd.f32 %v15310_v16, %v15403_v40 }
 0x1d3   : > { %v3521_v11 = vsel %vm14068_vm4, %v3516_v3, %v3520_v32  ;;  %v3964_v53 = vsel %vm14113_vm9, %v3962_v2, %v3963_v18  ;;  %v11585_v31 = vcombine.low %v3954_v61, %v3957_v25  ;;  %v3970_v28 = vrot.slane %v15369_v20, 5  ;;  %v12805_v12 = vpop.f32.mrf.mxu0 }
 0x1d4   : > { %v11531_v55 = vcombine.low %v3511_v49, %v3521_v11  ;;  %v11586_v58 = vcombine.low %v3961_v30, %v3964_v53  ;;  %v3968_v38 = vsel %vm14113_vm9, %v11555_v42, %v3967_v47  ;;  %v3969_v41 = vrot.slane %v3967_v47, 4  ;;  %v15475_v47 = vld [vmem:[#allocation2 + $0x38] sm:$0x1] }
 0x1d5   : > { %v4698_v23 = vshrl.u32 %v15391_v9, 16  ;;  %v4701_v39 = vshll.u32 %v15391_v9, 16  ;;  %v4707_v8 = vshll.u32 %v15395_v52, 16  ;;  %v4711_v16 = vshrl.u32 %v15395_v52, 16  ;;  %v15441_v4 = vpop.f32.mrf.mxu1  ;;  %v2124_v27 = vpop.f32.mrf.mxu0 }
 0x1d6   : > { %12976 = vmatmul.mubr.bf16.gmra.mxu1 %v11531_v55  ;;  %v4717_v46 = vshll.u32 %v15412_v33, 16  ;;  %v11613_v20 = vcombine.low %v15429_v56, %v15431_v6  ;;  %v3971_v22 = vsel %vm14113_vm9, %v3969_v41, %v3970_v28  ;;  %v11614_v26 = vcombine.low %v15423_v62, %v15425_v63  ;;  %v15483_v28 = vld [vmem:[#allocation2 + $0x40] sm:$0xf]  ;;  %v15490_v41 = vld [vmem:[#allocation2 + $0x4c] sm:$0xf] }
 0x1d7   : > { %13043 = vmatprep.mubr.bf16.mxu1 %v11612_v29  ;;  %v4700_v15 = vrot.slane %v4698_v23, 4  ;;  %v1542_v44 = vadd.f32 %v15403_v40, %v15322_v57  ;;  %v4703_v1 = vrot.slane %v4701_v39, 5  ;;  %v4709_v43 = vrot.slane %v4707_v8, 5  ;;  %v15453_v5 = vpop.f32.mrf.mxu1 }
 0x1d8   : > { %13020 = vmatmul.mubr.bf16.gmra.mxu0 %v11585_v31  ;;  %v4713_v17 = vrot.slane %v4711_v16, 4  ;;  %v11587_v24 = vcombine.low %v3968_v38, %v3971_v22  ;;  %v1545_v60 = vadd.f32 %v15339_v36, %v15403_v40  ;;  %v15459_v13 = vadd.f32 %v15403_v40, %v15349_v45  ;;  %v12806_v36 = vpop.f32.mrf.mxu0  ;;  %v13732_v45 = vld [vmem:[%s19363_s5 + $0x230] sm:$0xff]   ;;  %v15488_v38 = vld [vmem:[#allocation2 + $0x48] sm:$0xf] }
 0x1d9   : > { %13023 = vmatprep.mubr.bf16.mxu0 %v11586_v58  ;;  %v15461_v35 = vadd.f32 %v12805_v12, %v1544_v0  ;;  %v4704_v32 = vor.u32 %v4703_v1, %v4700_v15  ;;  %v4719_v57 = vrot.slane %v4717_v46, 5  ;;  %v4722_v10 = vshrl.u32 %v15429_v56, 16  ;;  %v15473_v30 = vpop.f32.mrf.mxu1  ;;  %v15481_v0 = vld [vmem:[#allocation2 + $0x3c] sm:$0xf] }
 0x1da   : > { %v4714_v34 = vor.u32 %v4713_v17, %v4709_v43  ;;  %v4725_v51 = vshll.u32 %v15429_v56, 16  ;;  %v4731_v37 = vshll.u32 %v15431_v6, 16  ;;  %v4735_v18 = vshrl.u32 %v15431_v6, 16  ;;  %v2127_v16 = vpop.f32.mrf.mxu0 }
 0x1db   : > { %v4741_v3 = vshll.u32 %v15451_v14, 16  ;;  %v4705_v61 = vrot.slane %v4704_v32, 4  ;;  %v1548_v49 = vadd.f32 %v15356_v7, %v15403_v40  ;;  %v4724_v25 = vrot.slane %v4722_v10, 4  ;;  %v15498_v15 = vpop.f32.mrf.mxu1 }
 0x1dc   : > { %v4715_v2 = vrot.slane %v4714_v34, 4  ;;  %v4727_v42 = vrot.slane %v4725_v51, 5  ;;  %v4733_v11 = vrot.slane %v4731_v37, 5  ;;  %v4737_v29 = vrot.slane %v4735_v18, 4 }
 0x1dd   : > { %v4743_v53 = vrot.slane %v4741_v3, 5  ;;  %v4710_v55 = vsel %vm14068_vm4, %v4705_v61, %v4709_v43  ;;  %v4746_v7 = vshrl.u32 %v15423_v62, 16  ;;  %v4749_v12 = vshll.u32 %v15423_v62, 16 }
 0x1de   : > { %13044 = vmatmul.mubr.bf16.vlgmr.msra.gmra.mxu1 %v11613_v20  ;;  %v4720_v31 = vsel %vm14068_vm4, %v4715_v2, %v4719_v57  ;;  %v4728_v23 = vor.u32 %v4727_v42, %v4724_v25  ;;  %v4738_v39 = vor.u32 %v4737_v29, %v4733_v11  ;;  %v4755_v8 = vshll.u32 %v15425_v63, 16  ;;  %v15517_v2 = vld [vmem:[#allocation2 + $0x54] sm:$0xf] }
 0x1df   : > { %13124 = vmatpush3.bf16.msra.mxu1 %v15266_v48  ;;  %v11652_v58 = vcombine.low %v4710_v55, %v4720_v31  ;;  %13047 = vmatprep.mubr.bf16.mxu1 %v11614_v26  ;;  %v4748_v46 = vrot.slane %v4746_v7, 4  ;;  %v4751_v20 = vrot.slane %v4749_v12, 5  ;;  %v4759_v22 = vshrl.u32 %v15425_v63, 16  ;;  %v13735_v48 = vld [vmem:[%s19363_s5 + $0x228] sm:$0xff]   ;;  %19525 = vst [vmem:[#allocation9_spill] sm:$0xff] %v15517_v2 }
 0x1e0   : > { %13024 = vmatmul.mubr.bf16.gmra.mxu0 %v11587_v24  ;;  %13125 = vmatprep.subr.bf16.mxu1 %v13732_v45  ;;  %v4765_v62 = vshll.u32 %v15475_v47, 16  ;;  %v4729_v1 = vrot.slane %v4728_v23, 4  ;;  %v4739_v43 = vrot.slane %v4738_v39, 4  ;;  %v4757_v17 = vrot.slane %v4755_v8, 5  ;;  %v15534_v55 = vld [vmem:[#allocation2 + $0x44] sm:$0x1] }
 0x1e1   : > { %13091 = vmatprep.mubr.bf16.mxu0 %v11652_v58  ;;  %v15500_v24 = vadd.f32 %v2124_v27, %v1542_v44  ;;  %v11615_v26 = vcombine.low %v15481_v0, %v15483_v28  ;;  %v11616_v63 = vcombine.low %v15488_v38, %v15490_v41  ;;  %v4752_v32 = vor.u32 %v4751_v20, %v4748_v46  ;;  %v15548_v23 = vld [vmem:[#allocation2 + $0x50] sm:$0x1] }
 0x1e2   : > { %v4761_v34 = vrot.slane %v4759_v22, 4  ;;  %v4734_v57 = vsel %vm14068_vm4, %v4729_v1, %v4733_v11  ;;  %v4744_v10 = vsel %vm14068_vm4, %v4739_v43, %v4743_v53  ;;  %v1546_v51 = vadd.f32 %v15403_v40, %v15377_v59  ;;  %v12809_v44 = vpop.f32.mrf.mxu0  ;;  %v15557_v1 = vld [vmem:[#allocation2 + $0x64] sm:$0xf] }
 0x1e3   : > { %13126 = vmatpush3.bf16.msra.mxu1 %v13732_v45  ;;  %v15512_v27 = vadd.f32 %v12806_v36, %v1545_v60  ;;  %v4753_v37 = vrot.slane %v4752_v32, 4  ;;  %v4767_v3 = vrot.slane %v4765_v62, 5  ;;  %v15515_v61 = vadd.f32 %v2127_v16, %v15459_v13  ;;  %v15519_v45 = vld [vmem:[#allocation2 + $0x58] sm:$0xf]  ;;  %v15521_v25 = vpop.f32.mrf.mxu1  ;;  %v13738_v13 = vld [vmem:[%s19363_s5 + $0x220] sm:$0xff]   ;;  %19528 = vst [vmem:[#allocation8_spill] sm:$0xff] %v15557_v1 }
 0x1e4   : > { %v4762_v18 = vor.u32 %v4761_v34, %v4757_v17  ;;  %13127 = vmatprep.subr.bf16.mxu1 %v13735_v48  ;;  %19526 = vst [vmem:[#allocation10_spill] sm:$0xff] %v15519_v45  ;;  %v11653_v42 = vcombine.low %v4734_v57, %v4744_v10  ;;  %v1549_v59 = vadd.f32 %v15389_v54, %v15403_v40  ;;  %v2140_v11 = vpop.f32.mrf.mxu0  ;;  %v4770_v31 = vshrl.u32 %v15481_v0, 16  ;;  %v15552_v16 = vld [vmem:[#allocation2 + $0x60] sm:$0xf] }
 0x1e5   : > { %v1547_v60 = vadd.f32 %v15403_v40, %v15414_v21  ;;  %v15527_v36 = vadd.f32 %v12809_v44, %v1548_v49  ;;  %v4758_v29 = vsel %vm14068_vm4, %v4753_v37, %v4757_v17  ;;  %v4773_v54 = vshll.u32 %v15481_v0, 16  ;;  %v15538_v7 = vpop.f32.mrf.mxu1  ;;  %19527 = vst [vmem:[#allocation7_spill] sm:$0xff] %v15552_v16 }
 0x1e6   : > { %13048 = vmatmul.mubr.bf16.gmra.mxu1 %v11615_v26  ;;  %v4763_v53 = vrot.slane %v4762_v18, 4  ;;  %v15542_v21 = vadd.f32 %v15441_v4, %v15403_v40  ;;  %v11617_v49 = vcombine.low %v15517_v2, %v15519_v45  ;;  %v4779_v12 = vshll.u32 %v15483_v28, 16  ;;  %v12810_v39 = vpop.f32.mrf.mxu0 }
 0x1e7   : > { %13051 = vmatprep.mubr.bf16.mxu1 %v11616_v63  ;;  %v4783_v58 = vshrl.u32 %v15483_v28, 16  ;;  %13128 = vmatpush3.bf16.msra.mxu1 %v13735_v48  ;;  %v4772_v46 = vrot.slane %v4770_v31, 4  ;;  %v4775_v20 = vrot.slane %v4773_v54, 5  ;;  %v4794_v4 = vshrl.u32 %v15488_v38, 16  ;;  %v15555_v22 = vpop.f32.mrf.mxu1  ;;  %v13741_v48 = vld [vmem:[%s19363_s5 + $0x218] sm:$0xff]  }
 0x1e8   : > { %13092 = vmatmul.mubr.bf16.vlgmr.msra.gmra.mxu0 %v11653_v42  ;;  %v4768_v8 = vsel %vm14068_vm4, %v4763_v53, %v4767_v3  ;;  %v4781_v43 = vrot.slane %v4779_v12, 5  ;;  %v4789_v26 = vshll.u32 %v15534_v55, 16  ;;  %13129 = vmatprep.subr.bf16.mxu1 %v13738_v13  ;;  %v4797_v34 = vshll.u32 %v15488_v38, 16  ;;  %v2143_v42 = vpop.f32.mrf.mxu0 }
 0x1e9   : > { %v11654_v62 = vcombine.low %v4758_v29, %v4768_v8  ;;  %v4785_v17 = vrot.slane %v4783_v58, 4  ;;  %v4776_v63 = vor.u32 %v4775_v20, %v4772_v46  ;;  %v4796_v32 = vrot.slane %v4794_v4, 4  ;;  %v15565_v10 = vpop.f32.mrf.mxu1 }
 0x1ea   : > { %v4803_v57 = vshll.u32 %v15490_v41, 16  ;;  %v4807_v37 = vshrl.u32 %v15490_v41, 16  ;;  %v4813_v18 = vshll.u32 %v15548_v23, 16  ;;  %v15569_v3 = vadd.f32 %v2140_v11, %v1546_v51  ;;  %v13744_v51 = vld [vmem:[%s19363_s5 + $0x210] sm:$0xff]  }
 0x1eb   : > { %13095 = vmatprep.mubr.bf16.mxu0 %v11654_v62  ;;  %v4786_v44 = vor.u32 %v4785_v17, %v4781_v43  ;;  %v11618_v29 = vcombine.low %v15552_v16, %v15557_v1  ;;  %v4777_v53 = vrot.slane %v4776_v63, 4  ;;  %v4799_v31 = vrot.slane %v4797_v34, 5  ;;  %13130 = vmatpush3.bf16.msra.mxu1 %v13738_v13  ;;  %v15575_v20 = vpop.f32.mrf.mxu1  ;;  %v15586_v17 = vld [vmem:[#allocation2 + $0x6c] sm:$0xf]  ;;  %v15592_v63 = vld [vmem:[#allocation2 + $0x70] sm:$0xf] }
 0x1ec   : > { %v4805_v54 = vrot.slane %v4803_v57, 5  ;;  %v4791_v58 = vrot.slane %v4789_v26, 5  ;;  %v4809_v8 = vrot.slane %v4807_v37, 4  ;;  %v15573_v46 = vadd.f32 %v12810_v39, %v1549_v59  ;;  %13131 = vmatprep.subr.bf16.mxu1 %v13741_v48  ;;  %19530 = vst [vmem:[#allocation12_spill] sm:$0xff] %v15586_v17  ;;  %19531 = vst [vmem:[#allocation6_spill] sm:$0xff] %v15592_v63 }
 0x1ed   : > { %v4787_v12 = vrot.slane %v4786_v44, 4  ;;  %v4782_v11 = vsel %vm14068_vm4, %v4777_v53, %v4781_v43  ;;  %v1550_v4 = vadd.f32 %v15403_v40, %v15453_v5  ;;  %v4800_v13 = vor.u32 %v4799_v31, %v4796_v32  ;;  %v15594_v43 = vld [vmem:[#allocation2 + $0x5c] sm:$0x1]  ;;  %v15596_v34 = vpop.f32.mrf.mxu1  ;;  %v13747_v53 = vld [vmem:[%s19363_s5 + $0x208] sm:$0xff]  }
 0x1ee   : > { %13052 = vmatmul.mubr.bf16.gmra.mxu1 %v11617_v49  ;;  %v15584_v62 = vadd.f32 %v2143_v42, %v1547_v60  ;;  %v4810_v39 = vor.u32 %v4809_v8, %v4805_v54  ;;  %v4815_v26 = vrot.slane %v4813_v18, 5  ;;  %v1553_v49 = vadd.f32 %v15473_v30, %v15403_v40  ;;  %19532 = vst [vmem:[#allocation13_spill] sm:$0xff] %v15594_v43 }
 0x1ef   : > { %13055 = vmatprep.mubr.bf16.mxu1 %v11618_v29  ;;  %v4792_v59 = vsel %vm14068_vm4, %v4787_v12, %v4791_v58  ;;  %v4801_v60 = vrot.slane %v4800_v13, 4  ;;  %v11619_v32 = vcombine.low %v15586_v17, %v15592_v63  ;;  %v4818_v57 = vshrl.u32 %v15517_v2, 16  ;;  %13132 = vmatpush3.bf16.msra.mxu1 %v13741_v48  ;;  %v15604_v29 = vpop.f32.mrf.mxu1  ;;  %v15614_v12 = vld [vmem:[#allocation2 + $0x78] sm:$0xf]  ;;  %v15616_v58 = vld [vmem:[#allocation2 + $0x7c] sm:$0xf] }
 0x1f0   : > { %19529 = vst [vmem:[#allocation11_spill] sm:$0xff] %v15584_v62  ;;  %v11655_v5 = vcombine.low %v4782_v11, %v4792_v59  ;;  %v4811_v44 = vrot.slane %v4810_v39, 4  ;;  %v12813_v37 = vpop.f32.mrf.mxu0  ;;  %v4821_v18 = vshll.u32 %v15517_v2, 16  ;;  %v4827_v30 = vshll.u32 %v15519_v45, 16  ;;  %13133 = vmatprep.subr.bf16.mxu1 %v13744_v51  ;;  %19534 = vst [vmem:[#allocation15_spill] sm:$0xff] %v15614_v12 }
 0x1f1   : > { %v4831_v42 = vshrl.u32 %v15519_v45, 16  ;;  %v4806_v31 = vsel %vm14068_vm4, %v4801_v60, %v4805_v54  ;;  %v15612_v48 = vadd.f32 %v12813_v37, %v15542_v21  ;;  %19535 = vst [vmem:[#allocation16_spill] sm:$0xff] %v15616_v58  ;;  %v4820_v8 = vrot.slane %v4818_v57, 4  ;;  %v15623_v54 = vpop.f32.mrf.mxu1 }
 0x1f2   : > { %13096 = vmatmul.mubr.bf16.gmra.mxu0 %v11655_v5  ;;  %v4837_v11 = vshll.u32 %v15594_v43, 16  ;;  %v4816_v13 = vsel %vm14068_vm4, %v4811_v44, %v4815_v26  ;;  %v4823_v59 = vrot.slane %v4821_v18, 5  ;;  %v4829_v39 = vrot.slane %v4827_v30, 5  ;;  %v15621_v5 = vld [vmem:[#allocation2 + $0x68] sm:$0x1]  ;;  %v2156_v45 = vpop.f32.mrf.mxu0  ;;  %19537 = vst [vmem:[#allocation18_spill] sm:$0xff] %v15623_v54 }
 0x1f3   : > { %19533 = vst [vmem:[#allocation14_spill] sm:$0xff] %v15612_v48  ;;  %v4833_v2 = vrot.slane %v4831_v42, 4  ;;  %19536 = vst [vmem:[#allocation17_spill] sm:$0xff] %v15621_v5  ;;  %v11656_v21 = vcombine.low %v4806_v31, %v4816_v13  ;;  %v11620_v60 = vcombine.low %v15614_v12, %v15616_v58  ;;  %v4842_v57 = vshrl.u32 %v15552_v16, 16  ;;  %13134 = vmatpush3.bf16.msra.mxu1 %v13744_v51  ;;  %v13750_v30 = vld [vmem:[%s19363_s5 + $0x200] sm:$0xff]  }
 0x1f4   : > { %v4839_v37 = vrot.slane %v4837_v11, 5  ;;  %v4824_v43 = vor.u32 %v4823_v59, %v4820_v8  ;;  %v4845_v26 = vshll.u32 %v15552_v16, 16  ;;  %v4851_v44 = vshll.u32 %v15557_v1, 16  ;;  %v12814_v18 = vpop.f32.mrf.mxu0  ;;  %13135 = vmatprep.subr.bf16.mxu1 %v13747_v53 }
 0x1f5   : > { %v4834_v48 = vor.u32 %v4833_v2, %v4829_v39  ;;  %13099 = vmatprep.mubr.bf16.mxu0 %v11656_v21  ;;  %v4844_v42 = vrot.slane %v4842_v57, 4  ;;  %v4855_v31 = vshrl.u32 %v15557_v1, 16  ;;  %v4861_v11 = vshll.u32 %v15621_v5, 16  ;;  %v15637_v2 = vpop.f32.mrf.mxu1 }
 0x1f6   : > { %13056 = vmatmul.mubr.bf16.gmra.mxu1 %v11619_v32  ;;  %v15635_v51 = vadd.f32 %v2156_v45, %v1550_v4  ;;  %v4825_v8 = vrot.slane %v4824_v43, 4  ;;  %v4847_v59 = vrot.slane %v4845_v26, 5  ;;  %v4853_v54 = vrot.slane %v4851_v44, 5  ;;  %v2159_v16 = vpop.f32.mrf.mxu0 }
 0x1f7   : > { %13059 = vmatprep.mubr.bf16.mxu1 %v11620_v60  ;;  %v4835_v13 = vrot.slane %v4834_v48, 4  ;;  %v1551_v62 = vadd.f32 %v15403_v40, %v15498_v15  ;;  %v1556_v32 = vadd.f32 %v15521_v25, %v15403_v40  ;;  %v4857_v21 = vrot.slane %v4855_v31, 4  ;;  %v15645_v5 = vpop.f32.mrf.mxu1  ;;  %13136 = vmatpush3.bf16.msra.mxu1 %v13747_v53  ;;  %v15653_v60 = vld [vmem:[#allocation2 + $0x74] sm:$0x1]  ;;  %v15657_v53 = vld [vmem:[#allocation2 + $0x84] sm:$0xf] }
 0x1f8   : > { %19538 = vst [vmem:[#allocation19_spill] sm:$0xff] %v15635_v51  ;;  %v15643_v57 = vadd.f32 %v12814_v18, %v1553_v49  ;;  %v4830_v45 = vsel %vm14068_vm4, %v4825_v8, %v4829_v39  ;;  %v1554_v43 = vadd.f32 %v15403_v40, %v15538_v7  ;;  %v4848_v48 = vor.u32 %v4847_v59, %v4844_v42  ;;  %v12817_v15 = vpop.f32.mrf.mxu0  ;;  %v15659_v18 = vld [vmem:[#allocation2 + $0x88] sm:$0xf]  ;;  %v15669_v8 = vld [vmem:[#allocation2 + $0x90] sm:$0xf] }
 0x1f9   : > { %v4840_v4 = vsel %vm14068_vm4, %v4835_v13, %v4839_v37  ;;  %19540 = vst [vmem:[#allocation21_spill] sm:$0xff] %v15653_v60  ;;  %13137 = vmatprep.subr.bf16.mxu1 %v13750_v30  ;;  %v4858_v49 = vor.u32 %v4857_v21, %v4853_v54  ;;  %v4863_v26 = vrot.slane %v4861_v11, 5  ;;  %v15655_v44 = vadd.f32 %v2159_v16, %v1551_v62  ;;  %v15661_v39 = vpop.f32.mrf.mxu1  ;;  %v15671_v62 = vld [vmem:[#allocation2 + $0x94] sm:$0xf] }
 0x1fa   : > { %19539 = vst [vmem:[#allocation20_spill] sm:$0xff] %v15643_v57  ;;  %v11657_v25 = vcombine.low %v4830_v45, %v4840_v4  ;;  %19542 = vst [vmem:[#allocation23_spill] sm:$0xff] %v15657_v53  ;;  %v4849_v37 = vrot.slane %v4848_v48, 4  ;;  %v1557_v7 = vadd.f32 %v15555_v22, %v15403_v40  ;;  %v11621_v42 = vcombine.low %v15657_v53, %v15659_v18  ;;  %v2172_v11 = vpop.f32.mrf.mxu0 }
 0x1fb   : > { %19541 = vst [vmem:[#allocation22_spill] sm:$0xff] %v15655_v44  ;;  %19543 = vst [vmem:[#allocation24_spill] sm:$0xff] %v15659_v18  ;;  %v15667_v31 = vadd.f32 %v12817_v15, %v1556_v32  ;;  %v4859_v16 = vrot.slane %v4858_v49, 4  ;;  %v4866_v13 = vshrl.u32 %v15586_v17, 16  ;;  %v4869_v59 = vshll.u32 %v15586_v17, 16  ;;  %v15676_v45 = vpop.f32.mrf.mxu1  ;;  %13138 = vmatpush3.bf16.msra.mxu1 %v13750_v30 }
 0x1fc   : > { %19545 = vst [vmem:[#allocation26_spill] sm:$0xff] %v15669_v8  ;;  %13100 = vmatmul.mubr.bf16.gmra.mxu0 %v11657_v25  ;;  %19546 = vst [vmem:[#allocation27_spill] sm:$0xff] %v15671_v62  ;;  %v4875_v21 = vshll.u32 %v15592_v63, 16  ;;  %v4854_v22 = vsel %vm14068_vm4, %v4849_v37, %v4853_v54  ;;  %v11622_v32 = vcombine.low %v15669_v8, %v15671_v62  ;;  %v4879_v4 = vshrl.u32 %v15592_v63, 16  ;;  %v12818_v15 = vpop.f32.mrf.mxu0 }
 0x1fd   : > { %19544 = vst [vmem:[#allocation25_spill] sm:$0xff] %v15667_v31  ;;  %19547 = vst [vmem:[#allocation28_spill] sm:$0xff] %v15676_v45  ;;  %v4885_v48 = vshll.u32 %v15653_v60, 16  ;;  %v4864_v25 = vsel %vm14068_vm4, %v4859_v16, %v4863_v26  ;;  %v4868_v49 = vrot.slane %v4866_v13, 4  ;;  %v4871_v17 = vrot.slane %v4869_v59, 5 }
 0x1fe   : > { %13060 = vmatmul.mubr.bf16.gmra.mxu1 %v11621_v42  ;;  %v4877_v31 = vrot.slane %v4875_v21, 5  ;;  %v15686_v45 = vld [vmem:[#allocation2 + $0x80] sm:$0x1]  ;;  %v11658_v30 = vcombine.low %v4854_v22, %v4864_v25  ;;  %v4881_v54 = vrot.slane %v4879_v4, 4  ;;  %v4890_v44 = vshrl.u32 %v15614_v12, 16  ;;  %v2175_v57 = vpop.f32.mrf.mxu0  ;;  %v15689_v63 = vpop.f32.mrf.mxu1 }
 0x1ff   : > { %19548 = vst [vmem:[#allocation29_spill] sm:$0xff] %v15686_v45  ;;  %13063 = vmatprep.mubr.bf16.mxu1 %v11622_v32  ;;  %v4887_v37 = vrot.slane %v4885_v48, 5  ;;  %v4872_v60 = vor.u32 %v4871_v17, %v4868_v49  ;;  %v4893_v51 = vshll.u32 %v15614_v12, 16  ;;  %v4899_v26 = vshll.u32 %v15616_v58, 16 }
 0x200   : > { %v4903_v42 = vshrl.u32 %v15616_v58, 16  ;;  %13103 = vmatprep.mubr.bf16.mxu0 %v11658_v30  ;;  %v4882_v16 = vor.u32 %v4881_v54, %v4877_v31  ;;  %v4892_v13 = vrot.slane %v4890_v44, 4  ;;  %v4909_v59 = vshll.u32 %v15686_v45, 16  ;;  %v15697_v22 = vpop.f32.mrf.mxu1  ;;  %v15727_v45 = vld [vmem:[#allocation2 + $0xa8] sm:$0xf] }
 0x201   : > { %v15695_v21 = vadd.f32 %v2172_v11, %v1554_v43  ;;  %v4873_v32 = vrot.slane %v4872_v60, 4  ;;  %v4895_v4 = vrot.slane %v4893_v51, 5  ;;  %v4901_v48 = vrot.slane %v4899_v26, 5  ;;  %v12821_v44 = vpop.f32.mrf.mxu0  ;;  %v15709_v26 = vld [vmem:[#allocation2 + $0x9c] sm:$0xf]  ;;  %19557 = vst [vmem:[#allocation38_spill] sm:$0xff] %v15727_v45 }
 0x202   : > { %v4905_v25 = vrot.slane %v4903_v42, 4  ;;  %v1555_v17 = vadd.f32 %v15403_v40, %v15565_v10  ;;  %v1560_v49 = vadd.f32 %v15575_v20, %v15403_v40  ;;  %v4883_v12 = vrot.slane %v4882_v16, 4  ;;  %v15705_v54 = vpop.f32.mrf.mxu1  ;;  %19551 = vst [vmem:[#allocation32_spill] sm:$0xff] %v15709_v26  ;;  %v15711_v42 = vld [vmem:[#allocation2 + $0xa0] sm:$0xf] }
 0x203   : > { %19549 = vst [vmem:[#allocation30_spill] sm:$0xff] %v15695_v21  ;;  %v15703_v30 = vadd.f32 %v12818_v15, %v1557_v7  ;;  %v4878_v43 = vsel %vm14068_vm4, %v4873_v32, %v4877_v31  ;;  %v4896_v11 = vor.u32 %v4895_v4, %v4892_v13  ;;  %v4911_v51 = vrot.slane %v4909_v59, 5  ;;  %19552 = vst [vmem:[#allocation33_spill] sm:$0xff] %v15711_v42  ;;  %v15721_v16 = vld [vmem:[#allocation2 + $0x8c] sm:$0x1]  ;;  %v2188_v31 = vpop.f32.mrf.mxu0 }
 0x204   : > { %v4906_v60 = vor.u32 %v4905_v25, %v4901_v48  ;;  %v4888_v10 = vsel %vm14068_vm4, %v4883_v12, %v4887_v37  ;;  %v1558_v20 = vadd.f32 %v15403_v40, %v15596_v34  ;;  %v15717_v7 = vadd.f32 %v2175_v57, %v1555_v17  ;;  %19554 = vst [vmem:[#allocation35_spill] sm:$0xff] %v15721_v16  ;;  %v15723_v13 = vpop.f32.mrf.mxu1  ;;  %v15729_v12 = vld [vmem:[#allocation2 + $0xac] sm:$0xf] }
 0x205   : > { %19550 = vst [vmem:[#allocation31_spill] sm:$0xff] %v15703_v30  ;;  %v11623_v15 = vcombine.low %v15709_v26, %v15711_v42  ;;  %19555 = vst [vmem:[#allocation36_spill] sm:$0xff] %v15723_v13  ;;  %v11659_v59 = vcombine.low %v4878_v43, %v4888_v10  ;;  %v4897_v32 = vrot.slane %v4896_v11, 4  ;;  %v15725_v25 = vadd.f32 %v12821_v44, %v1560_v49  ;;  %v12822_v13 = vpop.f32.mrf.mxu0 }
 0x206   : > { %19553 = vst [vmem:[#allocation34_spill] sm:$0xff] %v15717_v7  ;;  %v4907_v4 = vrot.slane %v4906_v60, 4  ;;  %19558 = vst [vmem:[#allocation39_spill] sm:$0xff] %v15729_v12  ;;  %v11624_v34 = vcombine.low %v15727_v45, %v15729_v12  ;;  %v4914_v57 = vshrl.u32 %v15657_v53, 16  ;;  %v4917_v37 = vshll.u32 %v15657_v53, 16 }
 0x207   : > { %19556 = vst [vmem:[#allocation37_spill] sm:$0xff] %v15725_v25  ;;  %13064 = vmatmul.mubr.bf16.gmra.mxu1 %v11623_v15  ;;  %v4923_v17 = vshll.u32 %v15659_v18, 16  ;;  %13104 = vmatmul.mubr.bf16.gmra.mxu0 %v11659_v59  ;;  %v4902_v49 = vsel %vm14068_vm4, %v4897_v32, %v4901_v48  ;;  %v4927_v43 = vshrl.u32 %v15659_v18, 16  ;;  %v4933_v11 = vshll.u32 %v15721_v16, 16  ;;  %v15742_v60 = vpop.f32.mrf.mxu1  ;;  %v15744_v7 = vld [vmem:[#allocation2 + $0x98] sm:$0x1]  ;;  %v15746_v59 = vpop.f32.mrf.mxu0 }
 0x208   : > { %v4912_v44 = vsel %vm14068_vm4, %v4907_v4, %v4911_v51  ;;  %13067 = vmatprep.mubr.bf16.mxu1 %v11624_v34  ;;  %v4916_v15 = vrot.slane %v4914_v57, 4  ;;  %v4919_v53 = vrot.slane %v4917_v37, 5  ;;  %19559 = vst [vmem:[#allocation40_spill] sm:$0xff] %v15744_v7  ;;  %19560 = vst [vmem:[#allocation41_spill] sm:$0xff] %v15746_v59  ;;  %v1561_v48 = vadd.f32 %v15604_v29, %v15403_v40 }
 0x209   : > { %v11660_v10 = vcombine.low %v4902_v49, %v4912_v44  ;;  %v4925_v25 = vrot.slane %v4923_v17, 5  ;;  %v4929_v32 = vrot.slane %v4927_v43, 4  ;;  %v4935_v51 = vrot.slane %v4933_v11, 5  ;;  %v15754_v17 = vpop.f32.mrf.mxu1 }
 0x20a   : > { %v4938_v4 = vshrl.u32 %v15669_v8, 16  ;;  %v4920_v16 = vor.u32 %v4919_v53, %v4916_v15  ;;  %v4941_v18 = vshll.u32 %v15669_v8, 16  ;;  %v4947_v34 = vshll.u32 %v15671_v62, 16  ;;  %v12825_v37 = vpop.f32.mrf.mxu0 }
 0x20b   : > { %13107 = vmatprep.mubr.bf16.mxu0 %v11660_v10  ;;  %v4951_v57 = vshrl.u32 %v15671_v62, 16  ;;  %v4930_v49 = vor.u32 %v4929_v32, %v4925_v25  ;;  %v4957_v59 = vshll.u32 %v15744_v7, 16  ;;  %v15757_v29 = vadd.f32 %v2188_v31, %v1558_v20  ;;  %v15765_v7 = vld [vmem:[#allocation2 + $0xb4] sm:$0xf]  ;;  %v15767_v20 = vld [vmem:[#allocation2 + $0xb8] sm:$0xf] }
 0x20c   : > { %v4940_v44 = vrot.slane %v4938_v4, 4  ;;  %v4921_v43 = vrot.slane %v4920_v16, 4  ;;  %v4943_v11 = vrot.slane %v4941_v18, 5  ;;  %v4949_v30 = vrot.slane %v4947_v34, 5  ;;  %v2204_v53 = vpop.f32.mrf.mxu0  ;;  %19563 = vst [vmem:[#allocation44_spill] sm:$0xff] %v15765_v7  ;;  %19564 = vst [vmem:[#allocation45_spill] sm:$0xff] %v15767_v20  ;;  %v15769_v16 = vpop.f32.mrf.mxu1 }
 0x20d   : > { %19561 = vst [vmem:[#allocation42_spill] sm:$0xff] %v15757_v29  ;;  %v4953_v10 = vrot.slane %v4951_v57, 4  ;;  %v1564_v15 = vadd.f32 %v15637_v2, %v15403_v40  ;;  %v4931_v8 = vrot.slane %v4930_v49, 4  ;;  %v15761_v21 = vadd.f32 %v12822_v13, %v1561_v48  ;;  %v15781_v49 = vld [vmem:[#allocation2 + $0xc0] sm:$0xf] }
 0x20e   : > { %v4926_v62 = vsel %vm14068_vm4, %v4921_v43, %v4925_v25  ;;  %v4944_v32 = vor.u32 %v4943_v11, %v4940_v44  ;;  %v4959_v58 = vrot.slane %v4957_v59, 5  ;;  %v12826_v18 = vpop.f32.mrf.mxu0  ;;  %v1562_v2 = vadd.f32 %v15403_v40, %v15645_v5  ;;  %v15777_v25 = vld [vmem:[#allocation2 + $0xa4] sm:$0x1]  ;;  %19567 = vst [vmem:[#allocation48_spill] sm:$0xff] %v15781_v49 }
 0x20f   : > { %19562 = vst [vmem:[#allocation43_spill] sm:$0xff] %v15761_v21  ;;  %v4954_v4 = vor.u32 %v4953_v10, %v4949_v30  ;;  %v4936_v31 = vsel %vm14068_vm4, %v4931_v8, %v4935_v51  ;;  %v11625_v13 = vcombine.low %v15765_v7, %v15767_v20  ;;  %19565 = vst [vmem:[#allocation46_spill] sm:$0xff] %v15777_v25  ;;  %v15783_v44 = vld [vmem:[#allocation2 + $0xc4] sm:$0xf]  ;;  %v4962_v8 = vshrl.u32 %v15709_v26, 16 }
 0x210   : > { %v11661_v48 = vcombine.low %v4926_v62, %v4936_v31  ;;  %v4945_v59 = vrot.slane %v4944_v32, 4  ;;  %v15779_v57 = vadd.f32 %v12825_v37, %v1564_v15  ;;  %19568 = vst [vmem:[#allocation49_spill] sm:$0xff] %v15783_v44  ;;  %v15785_v43 = vpop.f32.mrf.mxu0  ;;  %v11626_v5 = vcombine.low %v15781_v49, %v15783_v44  ;;  %v15798_v32 = vpop.f32.mrf.mxu1 }
 0x211   : > { %v4955_v34 = vrot.slane %v4954_v4, 4  ;;  %19569 = vst [vmem:[#allocation50_spill] sm:$0xff] %v15785_v43  ;;  %13068 = vmatmul.mubr.bf16.gmra.mxu1 %v11625_v13  ;;  %v4965_v51 = vshll.u32 %v15709_v26, 16  ;;  %v4971_v62 = vshll.u32 %v15711_v42, 16  ;;  %v4975_v10 = vshrl.u32 %v15711_v42, 16  ;;  %19570 = vst [vmem:[#allocation51_spill] sm:$0xff] %v15798_v32 }
 0x212   : > { %19566 = vst [vmem:[#allocation47_spill] sm:$0xff] %v15779_v57  ;;  %13108 = vmatmul.mubr.bf16.gmra.mxu0 %v11661_v48  ;;  %v4950_v37 = vsel %vm14068_vm4, %v4945_v59, %v4949_v30  ;;  %v4981_v15 = vshll.u32 %v15777_v25, 16  ;;  %13071 = vmatprep.mubr.bf16.mxu1 %v11626_v5  ;;  %v4964_v31 = vrot.slane %v4962_v8, 4  ;;  %v15800_v26 = vld [vmem:[#allocation2 + $0xb0] sm:$0x1]  ;;  %v1565_v48 = vadd.f32 %v15661_v39, %v15403_v40 }
 0x213   : > { %v4960_v11 = vsel %vm14068_vm4, %v4955_v34, %v4959_v58  ;;  %v4967_v13 = vrot.slane %v4965_v51, 5  ;;  %v4973_v43 = vrot.slane %v4971_v62, 5  ;;  %19571 = vst [vmem:[#allocation52_spill] sm:$0xff] %v15800_v26  ;;  %v4977_v30 = vrot.slane %v4975_v10, 4  ;;  %v15811_v39 = vld [vmem:[#allocation2 + $0xcc] sm:$0xf] }
 0x214   : > { %v11662_v4 = vcombine.low %v4950_v37, %v4960_v11  ;;  %v4983_v59 = vrot.slane %v4981_v15, 5  ;;  %v4986_v58 = vshrl.u32 %v15727_v45, 16  ;;  %v12829_v34 = vpop.f32.mrf.mxu0  ;;  %v4989_v25 = vshll.u32 %v15727_v45, 16  ;;  %v15817_v45 = vld [vmem:[#allocation2 + $0xd0] sm:$0xf] }
 0x215   : > { %v4968_v42 = vor.u32 %v4967_v13, %v4964_v31  ;;  %v4995_v37 = vshll.u32 %v15729_v12, 16  ;;  %v4999_v5 = vshrl.u32 %v15729_v12, 16  ;;  %v4978_v8 = vor.u32 %v4977_v30, %v4973_v43 }
 0x216   : > { %13111 = vmatprep.mubr.bf16.mxu0 %v11662_v4  ;;  %v4988_v51 = vrot.slane %v4986_v58, 4  ;;  %v5005_v62 = vshll.u32 %v15800_v26, 16  ;;  %v15809_v11 = vadd.f32 %v2204_v53, %v1562_v2  ;;  %v15813_v10 = vpop.f32.mrf.mxu0  ;;  %v15815_v15 = vpop.f32.mrf.mxu1  ;;  %v4991_v31 = vrot.slane %v4989_v25, 5 }
 0x217   : > { %v4969_v4 = vrot.slane %v4968_v42, 4  ;;  %v4997_v13 = vrot.slane %v4995_v37, 5  ;;  %v5001_v32 = vrot.slane %v4999_v5, 4  ;;  %v4979_v57 = vrot.slane %v4978_v8, 4 }
 0x218   : > { %19572 = vst [vmem:[#allocation53_spill] sm:$0xff] %v15809_v11  ;;  %v15819_v12 = vadd.f32 %v12826_v18, %v1565_v48  ;;  %v15821_v30 = vpop.f32.mrf.mxu0  ;;  %v15823_v58 = vpop.f32.mrf.mxu1  ;;  %v4992_v2 = vor.u32 %v4991_v31, %v4988_v51  ;;  %v5007_v11 = vrot.slane %v5005_v62, 5  ;;  %v1568_v42 = vadd.f32 %v15689_v63, %v15403_v40  ;;  %v15839_v51 = vld [vmem:[#allocation2 + $0xbc] sm:$0x1] }
 0x219   : > { %v4974_v53 = vsel %vm14068_vm4, %v4969_v4, %v4973_v43  ;;  %v5002_v26 = vor.u32 %v5001_v32, %v4997_v13  ;;  %v4984_v25 = vsel %vm14068_vm4, %v4979_v57, %v4983_v59  ;;  %v11627_v18 = vcombine.low %v15811_v39, %v15817_v45  ;;  %19575 = vst [vmem:[#allocation56_spill] sm:$0xff] %v15839_v51 }
 0x21a   : > { %19573 = vst [vmem:[#allocation54_spill] sm:$0xff] %v15819_v12  ;;  %v15833_v48 = vpop.f32.mrf.mxu0  ;;  %v15835_v37 = vpop.f32.mrf.mxu1  ;;  %v11663_v5 = vcombine.low %v4974_v53, %v4984_v25  ;;  %v1566_v43 = vadd.f32 %v15403_v40, %v15697_v22  ;;  %v4993_v8 = vrot.slane %v4992_v2, 4  ;;  %v1569_v63 = vadd.f32 %v15705_v54, %v15403_v40 }
 0x21b   : > { %19574 = vst [vmem:[#allocation55_spill] sm:$0xff] %v15833_v48  ;;  %v5003_v32 = vrot.slane %v5002_v26, 4  ;;  %v15845_v57 = vadd.f32 %v15742_v60, %v15403_v40  ;;  %13072 = vmatmul.mubr.bf16.gmra.mxu1 %v11627_v18  ;;  %v15847_v59 = vadd.f32 %v12829_v34, %v1568_v42  ;;  %v5010_v62 = vshrl.u32 %v15765_v7, 16 }
 0x21c   : > { %v15850_v4 = vpop.f32.mrf.mxu1  ;;  %13112 = vmatmul.mubr.bf16.gmra.mxu0 %v11663_v5  ;;  %v4998_v22 = vsel %vm14068_vm4, %v4993_v8, %v4997_v13  ;;  %v5013_v54 = vshll.u32 %v15765_v7, 16  ;;  %v5019_v31 = vshll.u32 %v15767_v20, 16  ;;  %v5023_v34 = vshrl.u32 %v15767_v20, 16 }
 0x21d   : > { %19576 = vst [vmem:[#allocation57_spill] sm:$0xff] %v15847_v59  ;;  %v5008_v26 = vsel %vm14068_vm4, %v5003_v32, %v5007_v11  ;;  %v5012_v53 = vrot.slane %v5010_v62, 4  ;;  %v5029_v2 = vshll.u32 %v15839_v51, 16  ;;  %v11676_v13 = vrot.slane %v15391_v9, 9 }
 0x21e   : > { %v11664_v60 = vcombine.low %v4998_v22, %v5008_v26  ;;  %v12833_v42 = vpop.f32.mrf.mxu0  ;;  %v15860_v25 = vpop.f32.mrf.mxu1  ;;  %v5015_v18 = vrot.slane %v5013_v54, 5  ;;  %v5021_v5 = vrot.slane %v5019_v31, 5  ;;  %v5421_v8 = vrot.slane %v15395_v52, 5  ;;  %v15866_v22 = vld [vmem:[#allocation2 + $0xc8] sm:$0x1] }
 0x21f   : > { %v5058_v11 = vshrl.u32 %v15811_v39, 16  ;;  %v5025_v32 = vrot.slane %v5023_v34, 4  ;;  %v5031_v48 = vrot.slane %v5029_v2, 5  ;;  %v5424_v62 = vrot.slane %v15412_v33, 5 }
 0x220   : > { %13115 = vmatprep.mubr.bf16.mxu0 %v11664_v60  ;;  %v15868_v26 = vpop.f32.mrf.mxu0  ;;  %v15870_v51 = vpop.f32.mrf.mxu1  ;;  %v5016_v7 = vor.u32 %v5015_v18, %v5012_v53  ;;  %v5422_v54 = vsel %vm14113_vm9, %v11676_v13, %v5421_v8  ;;  %v5423_v9 = vrot.slane %v5421_v8, 4  ;;  %v5034_v52 = vshrl.u32 %v15781_v49, 16 }
 0x221   : > { %v5026_v31 = vor.u32 %v5025_v32, %v5021_v5  ;;  %v5037_v60 = vshll.u32 %v15781_v49, 16  ;;  %v5043_v34 = vshll.u32 %v15783_v44, 16  ;;  %v5047_v33 = vshrl.u32 %v15783_v44, 16 }
 0x222   : > { %v15878_v2 = vpop.f32.mrf.mxu0  ;;  %v15880_v20 = vpop.f32.mrf.mxu1  ;;  %v5017_v59 = vrot.slane %v5016_v7, 4  ;;  %v5425_v53 = vsel %vm14113_vm9, %v5423_v9, %v5424_v62  ;;  %v5036_v18 = vrot.slane %v5034_v52, 4  ;;  %v5053_v13 = vshll.u32 %v15866_v22, 16 }
 0x223   : > { %19577 = vst [vmem:[#allocation58_spill] sm:$0xff] %v15880_v20  ;;  %v5027_v8 = vrot.slane %v5026_v31, 4  ;;  %v11708_v12 = vcombine.low %v5422_v54, %v5425_v53  ;;  %v5039_v32 = vrot.slane %v5037_v60, 5  ;;  %v5045_v21 = vrot.slane %v5043_v34, 5 }
 0x224   : > { %v15885_v49 = vpop.f32.mrf.mxu0  ;;  %v15887_v29 = vpop.f32.mrf.mxu1  ;;  %v5061_v44 = vshll.u32 %v15811_v39, 16  ;;  %v5022_v1 = vsel %vm14068_vm4, %v5017_v59, %v5021_v5  ;;  %v5049_v7 = vrot.slane %v5047_v33, 4  ;;  %v15893_v20 = vadd.f32 %v15813_v10, %v1566_v43 }
 0x225   : > { %v5071_v62 = vshrl.u32 %v15817_v45, 16  ;;  %v5032_v54 = vsel %vm14068_vm4, %v5027_v8, %v5031_v48  ;;  %13139 = vmatprep.mubr.bf16.mxu1 %v11708_v12  ;;  %v5040_v9 = vor.u32 %v5039_v32, %v5036_v18  ;;  %v15899_v52 = vadd.f32 %v15821_v30, %v1569_v63  ;;  %v15911_v30 = vld [vmem:[#allocation2 + $0xd4] sm:$0x1] }
 0x226   : > { %v15901_v31 = vpop.f32.mrf.mxu0  ;;  %v15903_v60 = vpop.f32.mrf.mxu1  ;;  %v11665_v34 = vcombine.low %v5022_v1, %v5032_v54  ;;  %v1570_v59 = vadd.f32 %v15403_v40, %v15754_v17  ;;  %v5050_v10 = vor.u32 %v5049_v7, %v5045_v21  ;;  %v5055_v43 = vrot.slane %v5053_v13, 5  ;;  %v13878_v54 = vld [vmem:[#allocation2 + $0x30] sm:$0xf] }
 0x227   : > { %v5041_v5 = vrot.slane %v5040_v9, 4  ;;  %v2706_v33 = vadd.f32 %v15815_v15, %v15461_v35  ;;  %v11677_v12 = vrot.slane %v15429_v56, 9  ;;  %v5428_v48 = vrot.slane %v15431_v6, 5 }
 0x228   : > { %v15913_v63 = vpop.f32.mrf.mxu0  ;;  %v15915_v53 = vpop.f32.mrf.mxu1  ;;  %13116 = vmatmul.mubr.bf16.gmra.mxu0 %v11665_v34  ;;  %v5051_v1 = vrot.slane %v5050_v10, 4  ;;  %v5431_v40 = vrot.slane %v15451_v14, 5  ;;  %v15919_v17 = vadd.f32 %v12833_v42, %v15845_v57  ;;  %v5060_v18 = vrot.slane %v5058_v11, 4  ;;  %v15942_v10 = vld [vmem:[%s19364_s6] ss:$0 sm:$0xff] }
 0x229   : > { %v5046_v35 = vsel %vm14068_vm4, %v5041_v5, %v5045_v21  ;;  %v5429_v56 = vsel %vm14113_vm9, %v11677_v12, %v5428_v48  ;;  %v5430_v6 = vrot.slane %v5428_v48, 4  ;;  %v5063_v15 = vrot.slane %v5061_v44, 5  ;;  %v13880_v12 = vld [vmem:[#allocation2 + $0x34] sm:$0xf] }
 0x22a   : > { %v15925_v13 = vpop.f32.mrf.mxu0  ;;  %v15927_v8 = vpop.f32.mrf.mxu1  ;;  %v5056_v32 = vsel %vm14068_vm4, %v5051_v1, %v5055_v43  ;;  %v5067_v14 = vshll.u32 %v15817_v45, 16  ;;  %v5073_v57 = vrot.slane %v5071_v62, 4  ;;  %v5077_v42 = vshll.u32 %v15911_v30, 16 }
 0x22b   : > { %v11666_v11 = vcombine.low %v5046_v35, %v5056_v32  ;;  %v5432_v21 = vsel %vm14113_vm9, %v5430_v6, %v5431_v40  ;;  %v5064_v7 = vor.u32 %v5063_v15, %v5060_v18  ;;  %v11678_v9 = vrot.slane %v13878_v54, 9 }
 0x22c   : > { %v15935_v44 = vpop.f32.mrf.mxu0  ;;  %v15937_v34 = vpop.f32.mrf.mxu1  ;;  %v1573_v62 = vadd.f32 %v15942_v10, %v15769_v16  ;;  %v11709_v43 = vcombine.low %v5429_v56, %v5432_v21  ;;  %v5069_v5 = vrot.slane %v5067_v14, 5  ;;  %v5435_v48 = vrot.slane %v13880_v12, 5 }
 0x22d   : > { %13119 = vmatprep.mubr.bf16.mxu0 %v11666_v11  ;;  %v5065_v1 = vrot.slane %v5064_v7, 4  ;;  %v5079_v40 = vrot.slane %v5077_v42, 5  ;;  %v2704_v18 = vadd.f32 %v15823_v58, %v15500_v24  ;;  %v15949_v35 = vadd.f32 %v15868_v26, %v1570_v59 }
 0x22e   : > { %v12905_v6 = vpop.f32.mrf.mxu0  ;;  %v15951_v15 = vpop.f32.mrf.mxu1  ;;  %13140 = vmatmul.mubr.bf16.vlgmr.msra.gmra.mxu1 %v11709_v43  ;;  %v5074_v32 = vor.u32 %v5073_v57, %v5069_v5  ;;  %v5437_v54 = vrot.slane %v5435_v48, 4  ;;  %v5438_v16 = vrot.slane %v15475_v47, 5  ;;  %v2707_v56 = vadd.f32 %v15835_v37, %v15512_v27 }
 0x22f   : > { %v5436_v14 = vsel %vm14113_vm9, %v11678_v9, %v5435_v48  ;;  %v15959_v42 = vadd.f32 %v15878_v2, %v1573_v62  ;;  %v15963_v24 = vadd.f32 %v15850_v4, %v15515_v61  ;;  %v5070_v59 = vsel %vm14068_vm4, %v5065_v1, %v5069_v5  ;;  %v19579_v48 = vld [vmem:[#allocation11_spill] sm:$0xff] }
 0x230   : > { %v2995_v58 = vpop.f32.mrf.mxu0  ;;  %v15965_v26 = vpop.f32.mrf.mxu1  ;;  %v5075_v47 = vrot.slane %v5074_v32, 4  ;;  %v5439_v27 = vsel %vm14113_vm9, %v5437_v54, %v5438_v16  ;;  %v2710_v37 = vadd.f32 %v15860_v25, %v15527_v36  ;;  %v11679_v2 = vrot.slane %v15481_v0, 9  ;;  %v19580_v32 = vld [vmem:[#allocation14_spill] sm:$0xff] }
 0x231   : > { %v11710_v57 = vcombine.low %v5436_v14, %v5439_v27  ;;  %v5442_v11 = vrot.slane %v15483_v28, 5  ;;  %v15976_v61 = vadd.f32 %v15901_v31, %v2706_v33  ;;  %v11680_v9 = vrot.slane %v15488_v38, 9  ;;  %v19578_v38 = vld [vmem:[#allocation58_spill] sm:$0xff] }
 0x232   : > { %v12906_v4 = vpop.f32.mrf.mxu0  ;;  %v15978_v21 = vpop.f32.mrf.mxu1  ;;  %v5080_v7 = vsel %vm14068_vm4, %v5075_v47, %v5079_v40  ;;  %v5449_v62 = vrot.slane %v15490_v41, 5  ;;  %v5445_v0 = vrot.slane %v15534_v55, 5  ;;  %v2708_v28 = vadd.f32 %v15870_v51, %v15569_v3  ;;  %v19581_v14 = vld [vmem:[#allocation10_spill] sm:$0xff]  ;;  %v19582_v47 = vld [vmem:[#allocation9_spill] sm:$0xff] }
 0x233   : > { %v11667_v43 = vcombine.low %v5070_v59, %v5080_v7  ;;  %13143 = vmatprep.mubr.bf16.mxu1 %v11710_v57  ;;  %v5444_v36 = vrot.slane %v5442_v11, 4  ;;  %v5452_v5 = vrot.slane %v15548_v23, 5  ;;  %v15993_v12 = vadd.f32 %v15913_v63, %v2704_v18  ;;  %v19583_v57 = vld [vmem:[#allocation13_spill] sm:$0xff] }
 0x234   : > { %v15987_v25 = vpop.f32.mrf.mxu0  ;;  %v15989_v31 = vpop.f32.mrf.mxu1  ;;  %v5451_v33 = vrot.slane %v5449_v62, 4  ;;  %v2711_v41 = vadd.f32 %v19578_v38, %v15573_v46  ;;  %v5443_v55 = vsel %vm14113_vm9, %v11679_v2, %v5442_v11  ;;  %v16002_v51 = vadd.f32 %v15925_v13, %v2707_v56  ;;  %v19584_v11 = vld [vmem:[#allocation8_spill] sm:$0xff] }
 0x235   : > { %13120 = vmatmul.mubr.bf16.gmra.mxu0 %v11667_v43  ;;  %v5446_v3 = vsel %vm14113_vm9, %v5444_v36, %v5445_v0  ;;  %v16006_v1 = vadd.f32 %v15887_v29, %v19579_v48  ;;  %v5450_v46 = vsel %vm14113_vm9, %v11680_v9, %v5449_v62  ;;  %v2714_v54 = vadd.f32 %v15903_v60, %v19580_v32  ;;  %v19585_v9 = vld [vmem:[#allocation19_spill] sm:$0xff] }
 0x236   : > { %v12909_v23 = vpop.f32.mrf.mxu0  ;;  %v12869_v63 = vpop.f32.mrf.mxu1  ;;  %v11711_v40 = vcombine.low %v5443_v55, %v5446_v3  ;;  %v5453_v18 = vsel %vm14113_vm9, %v5451_v33, %v5452_v5  ;;  %v5456_v13 = vrot.slane %v19581_v14, 5  ;;  %v16015_v56 = vadd.f32 %v12905_v6, %v2710_v37  ;;  %v19586_v60 = vld [vmem:[#allocation7_spill] sm:$0xff]  ;;  %v19587_v6 = vld [vmem:[#allocation20_spill] sm:$0xff]  ;;  %v19588_v55 = vld [vmem:[#allocation17_spill] sm:$0xff] }
 0x237   : > { %v11712_v16 = vcombine.low %v5450_v46, %v5453_v18  ;;  %v11681_v27 = vrot.slane %v19582_v47, 9  ;;  %v5459_v2 = vrot.slane %v19583_v57, 5  ;;  %v5463_v7 = vrot.slane %v19584_v11, 5  ;;  %v19590_v18 = vld [vmem:[#allocation25_spill] sm:$0xff]  ;;  %v19593_v14 = vld [vmem:[#allocation12_spill] sm:$0xff] }
 0x238   : > { %v3011_v59 = vpop.f32.mrf.mxu0  ;;  %v2641_v29 = vpop.f32.mrf.mxu1  ;;  %13144 = vmatmul.mubr.bf16.gmra.mxu1 %v11711_v40  ;;  %v2712_v62 = vadd.f32 %v15915_v53, %v19585_v9  ;;  %v5458_v43 = vrot.slane %v5456_v13, 4  ;;  %v11682_v36 = vrot.slane %v19586_v60, 9  ;;  %v16023_v0 = vadd.f32 %v2995_v58, %v2708_v28  ;;  %v19589_v40 = vld [vmem:[#allocation22_spill] sm:$0xff] }
 0x239   : > { %13147 = vmatprep.mubr.bf16.mxu1 %v11712_v16  ;;  %v2715_v37 = vadd.f32 %v15927_v8, %v19587_v6  ;;  %v5465_v38 = vrot.slane %v5463_v7, 4  ;;  %v5466_v3 = vrot.slane %v19588_v55, 5  ;;  %v16028_v48 = vadd.f32 %v12906_v4, %v2711_v41  ;;  %v19592_v41 = vld [vmem:[#allocation6_spill] sm:$0xff]  ;;  %v19595_v6 = vld [vmem:[#allocation21_spill] sm:$0xff] }
 0x23a   : > { %v12910_v33 = vpop.f32.mrf.mxu0  ;;  %v12870_v5 = vpop.f32.mrf.mxu1  ;;  %v16032_v46 = vadd.f32 %v15937_v34, %v19589_v40  ;;  %v5460_v53 = vsel %vm14113_vm9, %v5458_v43, %v5459_v2  ;;  %v2718_v58 = vadd.f32 %v15951_v15, %v19590_v18  ;;  %v5457_v32 = vsel %vm14113_vm9, %v11681_v27, %v5456_v13  ;;  %v19594_v15 = vld [vmem:[#allocation16_spill] sm:$0xff]  ;;  %v19596_v27 = vld [vmem:[#allocation30_spill] sm:$0xff] }
 0x23b   : > { %v5467_v4 = vsel %vm14113_vm9, %v5465_v38, %v5466_v3  ;;  %v5470_v16 = vrot.slane %v19592_v41, 5  ;;  %v5464_v34 = vsel %vm14113_vm9, %v11682_v36, %v5463_v7  ;;  %v11683_v47 = vrot.slane %v19593_v14, 9  ;;  %v19597_v3 = vld [vmem:[#allocation15_spill] sm:$0xff]  ;;  %v19599_v14 = vld [vmem:[#allocation29_spill] sm:$0xff] }
 0x23c   : > { %v16038_v28 = vpop.f32.mrf.mxu0  ;;  %v16040_v8 = vpop.f32.mrf.mxu1  ;;  %v16050_v57 = vadd.f32 %v12909_v23, %v2714_v54  ;;  %v5477_v2 = vrot.slane %v19594_v15, 5  ;;  %v11713_v43 = vcombine.low %v5457_v32, %v5460_v53  ;;  %v11714_v60 = vcombine.low %v5464_v34, %v5467_v4  ;;  %v19598_v7 = vld [vmem:[#allocation31_spill] sm:$0xff]  ;;  %v19600_v4 = vld [vmem:[#allocation34_spill] sm:$0xff] }
 0x23d   : > { %19591 = vst [vmem:[#allocation58_spill] sm:$0xff] %v16038_v28  ;;  %v5473_v13 = vrot.slane %v19595_v6, 5  ;;  %v2716_v38 = vadd.f32 %v15965_v26, %v19596_v27  ;;  %v5472_v55 = vrot.slane %v5470_v16, 4  ;;  %v11684_v40 = vrot.slane %v19597_v3, 9  ;;  %v19602_v26 = vld [vmem:[#allocation37_spill] sm:$0xff]  ;;  %v19603_v6 = vld [vmem:[#allocation24_spill] sm:$0xff] }
 0x23e   : > { %v12913_v11 = vpop.f32.mrf.mxu0  ;;  %v12873_v9 = vpop.f32.mrf.mxu1  ;;  %v16057_v18 = vadd.f32 %v3011_v59, %v2712_v62  ;;  %v2719_v23 = vadd.f32 %v15978_v21, %v19598_v7  ;;  %v5479_v41 = vrot.slane %v5477_v2, 4  ;;  %v5480_v53 = vrot.slane %v19599_v14, 5  ;;  %v13752_v21 = vld [vmem:[%s19365_s7 + $0x38] sm:$0xff]  }
 0x23f   : > { %v16062_v32 = vadd.f32 %v12910_v33, %v2715_v37  ;;  %v16066_v34 = vadd.f32 %v15989_v31, %v19600_v4  ;;  %v2722_v15 = vadd.f32 %v12869_v63, %v19602_v26  ;;  %v16073_v27 = vadd.f32 %v12913_v11, %v2718_v58  ;;  %v19604_v63 = vld [vmem:[#allocation42_spill] sm:$0xff]  ;;  %13171 = vmatprep.subr.bf16.mxu0 %v13752_v21  ;;  %v19607_v11 = vld [vmem:[#allocation27_spill] sm:$0xff] }
 0x240   : > { %v3027_v54 = vpop.f32.mrf.mxu0  ;;  %v2657_v36 = vpop.f32.mrf.mxu1  ;;  %13148 = vmatmul.mubr.bf16.gmra.mxu1 %v11713_v43  ;;  %v5484_v43 = vrot.slane %v19603_v6, 5  ;;  %v5471_v37 = vsel %vm14113_vm9, %v11683_v47, %v5470_v16  ;;  %v5474_v31 = vsel %vm14113_vm9, %v5472_v55, %v5473_v13  ;;  %v5478_v33 = vsel %vm14113_vm9, %v11684_v40, %v5477_v2  ;;  %v19608_v16 = vld [vmem:[#allocation43_spill] sm:$0xff]  ;;  %13172 = vmatpush3.bf16.msra.mxu0 %v13752_v21  ;;  %v19613_v21 = vld [vmem:[#allocation40_spill] sm:$0xff] }
 0x241   : > { %19601 = vst [vmem:[#allocation11_spill] sm:$0xff] %v16066_v34  ;;  %13151 = vmatprep.mubr.bf16.mxu1 %v11714_v60  ;;  %v2720_v60 = vadd.f32 %v2641_v29, %v19604_v63  ;;  %v5481_v58 = vsel %vm14113_vm9, %v5479_v41, %v5480_v53  ;;  %v5491_v14 = vrot.slane %v19607_v11, 5  ;;  %v16089_v4 = vadd.f32 %v3027_v54, %v2716_v38  ;;  %v19609_v13 = vld [vmem:[#allocation23_spill] sm:$0xff]  ;;  %v19612_v38 = vld [vmem:[#allocation26_spill] sm:$0xff] }
 0x242   : > { %v12914_v59 = vpop.f32.mrf.mxu0  ;;  %v12874_v62 = vpop.f32.mrf.mxu1  ;;  %v2723_v47 = vadd.f32 %v12870_v5, %v19608_v16  ;;  %v11685_v55 = vrot.slane %v19609_v13, 9  ;;  %v11715_v26 = vcombine.low %v5471_v37, %v5474_v31  ;;  %v5486_v6 = vrot.slane %v5484_v43, 4  ;;  %v19610_v63 = vld [vmem:[#allocation35_spill] sm:$0xff] }
 0x243   : > { %v16093_v2 = vadd.f32 %v12914_v59, %v2719_v23  ;;  %v19611_v34 = vld [vmem:[#allocation47_spill] sm:$0xff]  ;;  %v11716_v41 = vcombine.low %v5478_v33, %v5481_v58  ;;  %v11686_v54 = vrot.slane %v19612_v38, 9  ;;  %v5493_v5 = vrot.slane %v5491_v14, 4  ;;  %v19614_v59 = vld [vmem:[#allocation53_spill] sm:$0xff] }
 0x244   : > { %v16082_v3 = vpop.f32.mrf.mxu0  ;;  %v16084_v7 = vpop.f32.mrf.mxu1  ;;  %v5494_v16 = vrot.slane %v19613_v21, 5  ;;  %v5485_v23 = vsel %vm14113_vm9, %v11685_v55, %v5484_v43  ;;  %v2724_v37 = vadd.f32 %v2657_v36, %v19614_v59  ;;  %v19620_v55 = vld [vmem:[#allocation39_spill] sm:$0xff] }
 0x245   : > { %19605 = vst [vmem:[#allocation14_spill] sm:$0xff] %v16082_v3  ;;  %19606 = vst [vmem:[#allocation10_spill] sm:$0xff] %v16084_v7  ;;  %v5487_v3 = vrot.slane %v19610_v63, 5  ;;  %v2726_v7 = vadd.f32 %v12873_v9, %v19611_v34  ;;  %v19615_v34 = vld [vmem:[#allocation33_spill] sm:$0xff]  ;;  %v5492_v36 = vsel %vm14113_vm9, %v11686_v54, %v5491_v14 }
 0x246   : > { %v12917_v29 = vpop.f32.mrf.mxu0  ;;  %v12877_v40 = vpop.f32.mrf.mxu1  ;;  %v5498_v33 = vrot.slane %v19615_v34, 5  ;;  %v19622_v34 = vld [vmem:[#allocation46_spill] sm:$0xff] }
 0x247   : > { %v16099_v13 = vadd.f32 %v12917_v29, %v2722_v15  ;;  %v5488_v9 = vsel %vm14113_vm9, %v5486_v6, %v5487_v3  ;;  %v19618_v29 = vld [vmem:[#allocation57_spill] sm:$0xff]  ;;  %v5495_v3 = vsel %vm14113_vm9, %v5493_v5, %v5494_v16  ;;  %v5505_v6 = vrot.slane %v19620_v55, 5  ;;  %v19623_v5 = vld [vmem:[#allocation38_spill] sm:$0xff] }
 0x248   : > { %v3043_v53 = vpop.f32.mrf.mxu0  ;;  %v2673_v11 = vpop.f32.mrf.mxu1  ;;  %13152 = vmatmul.mubr.bf16.gmra.mxu1 %v11715_v26  ;;  %v19616_v26 = vld [vmem:[#allocation54_spill] sm:$0xff]  ;;  %v11718_v54 = vcombine.low %v5492_v36, %v5495_v3  ;;  %v11688_v16 = vrot.slane %v19623_v5, 9  ;;  %v5529_v36 = vrot.slane %v15911_v30, 5  ;;  %v19625_v3 = vld [vmem:[#allocation45_spill] sm:$0xff]  ;;  %v19627_v5 = vld [vmem:[#allocation44_spill] sm:$0xff] }
 0x249   : > { %13155 = vmatprep.mubr.bf16.mxu1 %v11716_v41  ;;  %v16107_v58 = vadd.f32 %v3043_v53, %v2720_v60  ;;  %v2727_v38 = vadd.f32 %v12874_v62, %v19616_v26  ;;  %v2730_v41 = vadd.f32 %v12877_v40, %v19618_v29  ;;  %v11717_v60 = vcombine.low %v5485_v23, %v5488_v9  ;;  %v19621_v53 = vld [vmem:[#allocation32_spill] sm:$0xff] }
 0x24a   : > { %v12918_v31 = vpop.f32.mrf.mxu0  ;;  %v12878_v63 = vpop.f32.mrf.mxu1  ;;  %v11687_v59 = vrot.slane %v19621_v53, 9  ;;  %v5500_v40 = vrot.slane %v5498_v33, 4  ;;  %v5501_v26 = vrot.slane %v19622_v34, 5  ;;  %v2728_v14 = vadd.f32 %v2673_v11, %v15893_v20 }
 0x24b   : > { %v16110_v21 = vadd.f32 %v12918_v31, %v2723_v47  ;;  %v13753_v31 = vld [vmem:[%s19365_s7 + $0x30] sm:$0xff]   ;;  %v2731_v23 = vadd.f32 %v12878_v63, %v15899_v52  ;;  %v5507_v53 = vrot.slane %v5505_v6, 4  ;;  %v11691_v20 = vrot.slane %v15811_v39, 9 }
 0x24c   : > { %v16112_v15 = vpop.f32.mrf.mxu0  ;;  %v16115_v43 = vpop.f32.mrf.mxu1  ;;  %13173 = vmatprep.subr.bf16.mxu0 %v13753_v31  ;;  %v5526_v11 = vrot.slane %v15817_v45, 5  ;;  %v5499_v63 = vsel %vm14113_vm9, %v11687_v59, %v5498_v33  ;;  %v5506_v33 = vsel %vm14113_vm9, %v11688_v16, %v5505_v6 }
 0x24d   : > { %19617 = vst [vmem:[#allocation9_spill] sm:$0xff] %v16112_v15  ;;  %19619 = vst [vmem:[#allocation13_spill] sm:$0xff] %v16115_v43  ;;  %v19624_v15 = vld [vmem:[#allocation52_spill] sm:$0xff]  ;;  %13174 = vmatpush3.bf16.msra.mxu0 %v13753_v31 }
 0x24e   : > { %v12921_v62 = vpop.f32.mrf.mxu0  ;;  %v5508_v43 = vrot.slane %v19624_v15, 5  ;;  %v5502_v15 = vsel %vm14113_vm9, %v5500_v40, %v5501_v26  ;;  %v16151_v45 = vsel %vm14113_vm9, %v11691_v20, %v5526_v11  ;;  %v5528_v39 = vrot.slane %v5526_v11, 4  ;;  %v19628_v20 = vld [vmem:[#allocation56_spill] sm:$0xff] }
 0x24f   : > { %v12881_v47 = vpop.f32.mrf.mxu1  ;;  %v16127_v29 = vadd.f32 %v12921_v62, %v2726_v7  ;;  %v11719_v31 = vcombine.low %v5499_v63, %v5502_v15  ;;  %v5522_v15 = vrot.slane %v15866_v22, 5 }
 0x250   : > { %v3059_v55 = vpop.f32.mrf.mxu0  ;;  %13156 = vmatmul.mubr.bf16.gmra.mxu1 %v11717_v60  ;;  %v2734_v34 = vadd.f32 %v12881_v47, %v15919_v17  ;;  %v5512_v60 = vrot.slane %v19625_v3, 5  ;;  %v5530_v40 = vsel %vm14113_vm9, %v5528_v39, %v5529_v36 }
 0x251   : > { %v2689_v9 = vpop.f32.mrf.mxu1  ;;  %v16133_v28 = vadd.f32 %v3059_v55, %v2724_v37  ;;  %13159 = vmatprep.mubr.bf16.mxu1 %v11718_v54  ;;  %v11689_v55 = vrot.slane %v19627_v5, 9 }
 0x252   : > { %v12922_v7 = vpop.f32.mrf.mxu0  ;;  %v2732_v17 = vadd.f32 %v2689_v9, %v15949_v35  ;;  %v19626_v35 = vld [vmem:[#allocation49_spill] sm:$0xff]  ;;  %v5514_v16 = vrot.slane %v5512_v60, 4 }
 0x253   : > { %v12882_v52 = vpop.f32.mrf.mxu1  ;;  %v16143_v37 = vadd.f32 %v12922_v7, %v2727_v38  ;;  %v5509_v38 = vsel %vm14113_vm9, %v5507_v53, %v5508_v43  ;;  %v5519_v59 = vrot.slane %v19626_v35, 5  ;;  %v5515_v43 = vrot.slane %v19628_v20, 5  ;;  %v19629_v53 = vld [vmem:[#allocation48_spill] sm:$0xff] }
 0x254   : > { %v16147_v62 = vpop.f32.mrf.mxu0  ;;  %v2735_v30 = vadd.f32 %v12882_v52, %v15959_v42  ;;  %v11723_v42 = vcombine.low %v16151_v45, %v5530_v40  ;;  %v11720_v6 = vcombine.low %v5506_v33, %v5509_v38  ;;  %v11690_v11 = vrot.slane %v19629_v53, 9 }
 0x255   : > { %v16154_v47 = vpop.f32.mrf.mxu1  ;;  %v5521_v36 = vrot.slane %v5519_v59, 4  ;;  %v5513_v22 = vsel %vm14113_vm9, %v11689_v55, %v5512_v60 }
 0x257   : > { %v12925_v26 = vpop.f32.mrf.mxu0  ;;  %v12949_v54 = vpop.f32.mrf.mxu1 }
 0x258   : > { %v16165_v9 = vadd.f32 %v12925_v26, %v2730_v41  ;;  %v3814_v7 = vadd.f32 %v12949_v54, %v15976_v61  ;;  %13160 = vmatmul.mubr.bf16.gmra.mxu1 %v11719_v31  ;;  %v13754_v61 = vld [vmem:[%s19365_s7 + $0x28] sm:$0xff]   ;;  %v5520_v31 = vsel %vm14113_vm9, %v11690_v11, %v5519_v59 }
 0x259   : > { %v3075_v52 = vpop.f32.mrf.mxu0  ;;  %v3685_v63 = vpop.f32.mrf.mxu1  ;;  %13163 = vmatprep.mubr.bf16.mxu1 %v11720_v6  ;;  %13175 = vmatprep.subr.bf16.mxu0 %v13754_v61 }
 0x25a   : > { %v16171_v3 = vadd.f32 %v3075_v52, %v2728_v14  ;;  %v3812_v45 = vadd.f32 %v3685_v63, %v15993_v12  ;;  %v5516_v14 = vsel %vm14113_vm9, %v5514_v16, %v5515_v43  ;;  %13176 = vmatpush3.bf16.msra.mxu0 %v13754_v61 }
 0x25b   : > { %v12926_v41 = vpop.f32.mrf.mxu0  ;;  %v12950_v39 = vpop.f32.mrf.mxu1  ;;  %v11721_v26 = vcombine.low %v5513_v22, %v5516_v14 }
 0x25c   : > { %v16177_v33 = vadd.f32 %v12926_v41, %v2731_v23  ;;  %v16180_v38 = vadd.f32 %v12950_v39, %v16002_v51  ;;  %v5523_v23 = vsel %vm14113_vm9, %v5521_v36, %v5522_v15 }
 0x25d   : > { %v16186_v12 = vpop.f32.mrf.mxu0  ;;  %v16188_v35 = vpop.f32.mrf.mxu1  ;;  %v11722_v5 = vcombine.low %v5520_v31, %v5523_v23 }
 0x25f   : > { %v12929_v51 = vpop.f32.mrf.mxu0  ;;  %v12953_v40 = vpop.f32.mrf.mxu1 }
 0x260   : > { %v16194_v54 = vadd.f32 %v12929_v51, %v2734_v34  ;;  %v3818_v60 = vadd.f32 %v12953_v40, %v16015_v56  ;;  %13164 = vmatmul.mubr.bf16.gmra.mxu1 %v11721_v26  ;;  %v13755_v56 = vld [vmem:[%s19365_s7 + $0x20] sm:$0xff]  }
 0x261   : > { %v3091_v55 = vpop.f32.mrf.mxu0  ;;  %v3701_v6 = vpop.f32.mrf.mxu1  ;;  %13167 = vmatprep.mubr.bf16.mxu1 %v11722_v5  ;;  %13177 = vmatprep.subr.bf16.mxu0 %v13755_v56 }
 0x262   : > { %v16197_v16 = vadd.f32 %v3091_v55, %v2732_v17  ;;  %v3816_v20 = vadd.f32 %v3701_v6, %v16023_v0  ;;  %13178 = vmatpush3.bf16.msra.mxu0 %v13755_v56 }
 0x263   : > { %v12930_v59 = vpop.f32.mrf.mxu0  ;;  %v12954_v43 = vpop.f32.mrf.mxu1 }
 0x264   : > { %v16200_v53 = vadd.f32 %v12930_v59, %v2735_v30  ;;  %v16203_v11 = vadd.f32 %v12954_v43, %v16028_v48 }
 0x265   : > { %v16205_v34 = vpop.f32.mrf.mxu0  ;;  %v16207_v52 = vpop.f32.mrf.mxu1 }
 0x267   : > { %v12997_v17 = vpop.f32.mrf.mxu0  ;;  %v12957_v63 = vpop.f32.mrf.mxu1 }
 0x268   : > { %v16212_v0 = vadd.f32 %v12997_v17, %v3814_v7  ;;  %v3822_v36 = vadd.f32 %v12957_v63, %v16050_v57  ;;  %13168 = vmatmul.mubr.bf16.gmra.mxu1 %v11723_v42 }
 0x269   : > { %v4135_v30 = vpop.f32.mrf.mxu0  ;;  %v3717_v15 = vpop.f32.mrf.mxu1 }
 0x26a   : > { %v16215_v48 = vadd.f32 %v4135_v30, %v3812_v45  ;;  %v3820_v61 = vadd.f32 %v3717_v15, %v16057_v18  ;;  %v13756_v18 = vld [vmem:[%s19365_s7 + $0x18] sm:$0xff]  }
 0x26b   : > { %v16218_v41 = vpop.f32.mrf.mxu0  ;;  %v12958_v39 = vpop.f32.mrf.mxu1  ;;  %13179 = vmatprep.subr.bf16.mxu0 %v13756_v18 }
 0x26c   : > { %v16221_v22 = vadd.f32 %v12958_v39, %v16062_v32  ;;  %13180 = vmatpush3.bf16.msra.mxu0 %v13756_v18 }
 0x26d   : > { %v16223_v14 = vpop.f32.mrf.mxu0  ;;  %v16225_v7 = vpop.f32.mrf.mxu1 }
 0x26f   : > { %v12961_v57 = vpop.f32.mrf.mxu1 }
 0x270   : > { %v13001_v31 = vpop.f32.mrf.mxu0  ;;  %v3826_v42 = vadd.f32 %v12961_v57, %v16073_v27 }
 0x271   : > { %v16227_v23 = vadd.f32 %v13001_v31, %v3818_v60  ;;  %v3733_v51 = vpop.f32.mrf.mxu1 }
 0x272   : > { %v4151_v45 = vpop.f32.mrf.mxu0  ;;  %v3824_v32 = vadd.f32 %v3733_v51, %v16089_v4 }
 0x273   : > { %v16233_v40 = vadd.f32 %v4151_v45, %v3816_v20  ;;  %v12962_v5 = vpop.f32.mrf.mxu1 }
 0x274   : > { %v16236_v26 = vpop.f32.mrf.mxu0  ;;  %v16239_v55 = vadd.f32 %v12962_v5, %v16093_v2 }
 0x275   : > { %v16243_v27 = vpop.f32.mrf.mxu1 }
 0x276   : > { %v16241_v60 = vpop.f32.mrf.mxu0 }
 0x277   : > { %v12965_v59 = vpop.f32.mrf.mxu1 }
 0x278   : > { %v13005_v6 = vpop.f32.mrf.mxu0  ;;  %v3830_v20 = vadd.f32 %v12965_v59, %v16099_v13 }
 0x279   : > { %v16245_v43 = vadd.f32 %v13005_v6, %v3822_v36  ;;  %v3749_v4 = vpop.f32.mrf.mxu1 }
 0x27a   : > { %v4167_v56 = vpop.f32.mrf.mxu0  ;;  %v3828_v63 = vadd.f32 %v3749_v4, %v16107_v58 }
 0x27b   : > { %v16248_v17 = vadd.f32 %v4167_v56, %v3820_v61  ;;  %v12966_v2 = vpop.f32.mrf.mxu1 }
 0x27c   : > { %v16251_v30 = vpop.f32.mrf.mxu0  ;;  %v3831_v15 = vadd.f32 %v12966_v2, %v16110_v21 }
 0x27d   : > { %v16256_v31 = vpop.f32.mrf.mxu1 }
 0x27e   : > { %v16254_v39 = vpop.f32.mrf.mxu0 }
 0x27f   : > { %v12969_v36 = vpop.f32.mrf.mxu1 }
 0x280   : > { %v13009_v57 = vpop.f32.mrf.mxu0  ;;  %v3834_v13 = vadd.f32 %v12969_v36, %v16127_v29  ;;  %v13758_v29 = vld [vmem:[%s19365_s7 + $0x78] sm:$0xff]  }
 0x281   : > { %v16258_v45 = vadd.f32 %v13009_v57, %v3826_v42  ;;  %v3765_v61 = vpop.f32.mrf.mxu1  ;;  %v13757_v42 = vld [vmem:[%s19365_s7 + $0x10] sm:$0xff]   ;;  %13219 = vmatprep.subr.bf16.mxu1 %v13758_v29 }
 0x282   : > { %v4183_v51 = vpop.f32.mrf.mxu0  ;;  %v3832_v58 = vadd.f32 %v3765_v61, %v16133_v28  ;;  %13181 = vmatprep.subr.bf16.mxu0 %v13757_v42  ;;  %13220 = vmatpush3.bf16.msra.mxu1 %v13758_v29 }
 0x283   : > { %v16261_v18 = vadd.f32 %v4183_v51, %v3824_v32  ;;  %v12970_v6 = vpop.f32.mrf.mxu1  ;;  %13182 = vmatpush3.bf16.msra.mxu0 %v13757_v42 }
 0x284   : > { %v16264_v5 = vpop.f32.mrf.mxu0  ;;  %v3835_v21 = vadd.f32 %v12970_v6, %v16143_v37 }
 0x285   : > { %19630 = vst [vmem:[#allocation8_spill] sm:$0xff] %v16264_v5  ;;  %v16269_v56 = vpop.f32.mrf.mxu1 }
 0x286   : > { %v16267_v59 = vpop.f32.mrf.mxu0 }
 0x287   : > { %19631 = vst [vmem:[#allocation19_spill] sm:$0xff] %v16267_v59 }
 0x288   : > { %v13013_v32 = vpop.f32.mrf.mxu0 }
 0x289   : > { %v16277_v4 = vadd.f32 %v13013_v32, %v3830_v20  ;;  %v13759_v32 = vld [vmem:[%s19365_s7 + $0x70] sm:$0xff]  }
 0x28a   : > { %v4199_v28 = vpop.f32.mrf.mxu0  ;;  %v12973_v2 = vpop.f32.mrf.mxu1  ;;  %13221 = vmatprep.subr.bf16.mxu1 %v13759_v32 }
 0x28b   : > { %v16279_v37 = vadd.f32 %v4199_v28, %v3828_v63  ;;  %v3838_v36 = vadd.f32 %v12973_v2, %v16165_v9  ;;  %13222 = vmatpush3.bf16.msra.mxu1 %v13759_v32  ;;  %v13760_v9 = vld [vmem:[%s19365_s7 + $0x8] sm:$0xff]  }
 0x28c   : > { %v13014_v57 = vpop.f32.mrf.mxu0  ;;  %v3781_v61 = vpop.f32.mrf.mxu1  ;;  %13183 = vmatprep.subr.bf16.mxu0 %v13760_v9 }
 0x28d   : > { %v16282_v51 = vadd.f32 %v13014_v57, %v3831_v15  ;;  %v3836_v19 = vadd.f32 %v3781_v61, %v16171_v3  ;;  %v13761_v3 = vld [vmem:[%s19365_s7 + $0x68] sm:$0xff]   ;;  %13184 = vmatpush3.bf16.msra.mxu0 %v13760_v9  ;;  %v13764_v9 = vld [vmem:[%s19365_s7 + $0x58] sm:$0xff]  }
 0x28e   : > { %v16284_v6 = vpop.f32.mrf.mxu0  ;;  %v12974_v20 = vpop.f32.mrf.mxu1  ;;  %13223 = vmatprep.subr.bf16.mxu1 %v13761_v3 }
 0x28f   : > { %19632 = vst [vmem:[#allocation7_spill] sm:$0xff] %v16284_v6  ;;  %v3839_v63 = vadd.f32 %v12974_v20, %v16177_v33  ;;  %13224 = vmatpush3.bf16.msra.mxu1 %v13761_v3  ;;  %v13762_v20 = vld [vmem:[%s19365_s7 + $0x60] sm:$0xff]  }
 0x290   : > { %v13017_v42 = vpop.f32.mrf.mxu0  ;;  %v16301_v2 = vpop.f32.mrf.mxu1  ;;  %13225 = vmatprep.subr.bf16.mxu1 %v13762_v20 }
 0x291   : > { %v16291_v29 = vadd.f32 %v13017_v42, %v3834_v13  ;;  %19633 = vst [vmem:[#allocation20_spill] sm:$0xff] %v16301_v2 }
 0x292   : > { %v4215_v28 = vpop.f32.mrf.mxu0 }
 0x293   : > { %v16299_v15 = vadd.f32 %v4215_v28, %v3832_v58  ;;  %13226 = vmatpush3.bf16.msra.mxu1 %v13762_v20  ;;  %v13765_v20 = vld [vmem:[%s19365_s7 + $0x50] sm:$0xff]  }
 0x294   : > { %v13018_v57 = vpop.f32.mrf.mxu0  ;;  %13227 = vmatprep.subr.bf16.mxu1 %v13764_v9 }
 0x295   : > { %v16303_v33 = vadd.f32 %v13018_v57, %v3835_v21  ;;  %v13763_v21 = vld [vmem:[%s19365_s7] sm:$0xff]  }
 0x296   : > { %v16305_v13 = vpop.f32.mrf.mxu0  ;;  %v12977_v61 = vpop.f32.mrf.mxu1  ;;  %13185 = vmatprep.subr.bf16.mxu0 %v13763_v21 }
 0x297   : > { %19634 = vst [vmem:[#allocation17_spill] sm:$0xff] %v16305_v13  ;;  %v3842_v32 = vadd.f32 %v12977_v61, %v16194_v54  ;;  %13186 = vmatpush3.bf16.msra.mxu0 %v13763_v21  ;;  %13228 = vmatpush3.bf16.msra.mxu1 %v13764_v9  ;;  %v16337_v21 = vld [vmem:[#allocation2] sm:$0xf]  ;;  %v16344_v9 = vld [vmem:[%s19365_s7 + $0xb8] sm:$0xff]  }
 0x298   : > { %v13021_v58 = vpop.f32.mrf.mxu0  ;;  %v3797_v28 = vpop.f32.mrf.mxu1  ;;  %19638 = vst [vmem:[#allocation12_spill] sm:$0xff] %v16337_v21  ;;  %19640 = vst [vmem:[#allocation21_spill] sm:$0xff] %v16344_v9  ;;  %13229 = vmatprep.subr.bf16.mxu1 %v13765_v20  ;;  %13267 = vmatprep.subr.bf16.mxu0 %v16344_v9 }
 0x299   : > { %v16311_v42 = vadd.f32 %v13021_v58, %v3838_v36  ;;  %v3840_v3 = vadd.f32 %v3797_v28, %v16197_v16 }
 0x29a   : > { %v4231_v57 = vpop.f32.mrf.mxu0  ;;  %v12978_v54 = vpop.f32.mrf.mxu1 }
 0x29b   : > { %v16320_v13 = vadd.f32 %v4231_v57, %v3836_v19  ;;  %v3843_v36 = vadd.f32 %v12978_v54, %v16200_v53  ;;  %13230 = vmatpush3.bf16.msra.mxu1 %v13765_v20 }
 0x29c   : > { %v13022_v61 = vpop.f32.mrf.mxu0  ;;  %v16325_v6 = vpop.f32.mrf.mxu1 }
 0x29d   : > { %v16323_v58 = vadd.f32 %v13022_v61, %v3839_v63  ;;  %19635 = vst [vmem:[#allocation22_spill] sm:$0xff] %v16325_v6  ;;  %v16339_v63 = vld [vmem:[#allocation2 + $0x4] sm:$0xf] }
 0x29e   : > { %v16327_v59 = vpop.f32.mrf.mxu0  ;;  %v13045_v2 = vpop.f32.mrf.mxu1  ;;  %19639 = vst [vmem:[#allocation16_spill] sm:$0xff] %v16339_v63  ;;  %v11781_v57 = vcombine.low %v16337_v21, %v16339_v63 }
 0x29f   : > { %19636 = vst [vmem:[#allocation25_spill] sm:$0xff] %v16327_v59  ;;  %v16330_v16 = vadd.f32 %v13045_v2, %v16212_v0  ;;  %v6713_v59 = vshll.u32 %v16337_v21, 16 }
 0x2a0   : > { %v13025_v19 = vpop.f32.mrf.mxu0  ;;  %v4538_v53 = vpop.f32.mrf.mxu1  ;;  %13187 = vmatprep.mubr.bf16.mxu0 %v11781_v57 }
 0x2a1   : > { %19637 = vst [vmem:[#allocation6_spill] sm:$0xff] %v16330_v16  ;;  %v16335_v28 = vadd.f32 %v13025_v19, %v3842_v32  ;;  %v16347_v0 = vadd.f32 %v4538_v53, %v16215_v48  ;;  %v13770_v32 = vld [vmem:[%s19365_s7 + $0x48] sm:$0xff]   ;;  %v6710_v16 = vshrl.u32 %v16337_v21, 16 }
 0x2a2   : > { %v4247_v2 = vpop.f32.mrf.mxu0  ;;  %v16356_v61 = vpop.f32.mrf.mxu1  ;;  %13231 = vmatprep.subr.bf16.mxu1 %v13770_v32  ;;  %v16381_v21 = vld [vmem:[#allocation2 + $0x8] sm:$0x1] }
 0x2a3   : > { %19641 = vst [vmem:[#allocation30_spill] sm:$0xff] %v16347_v0  ;;  %v16354_v54 = vadd.f32 %v4247_v2, %v3840_v3  ;;  %19642 = vst [vmem:[#allocation15_spill] sm:$0xff] %v16356_v61  ;;  %v6723_v2 = vshrl.u32 %v16339_v63, 16  ;;  %13232 = vmatpush3.bf16.msra.mxu1 %v13770_v32  ;;  %v6715_v61 = vrot.slane %v6713_v59, 5  ;;  %v6719_v32 = vshll.u32 %v16339_v63, 16 }
 0x2a4   : > { %v13026_v19 = vpop.f32.mrf.mxu0  ;;  %v16361_v53 = vpop.f32.mrf.mxu1  ;;  %19649 = vst [vmem:[#allocation27_spill] sm:$0xff] %v16381_v21 }
 0x2a5   : > { %v16359_v48 = vadd.f32 %v13026_v19, %v3843_v36  ;;  %19643 = vst [vmem:[#allocation31_spill] sm:$0xff] %v16361_v53  ;;  %v13771_v36 = vld [vmem:[%s19365_s7 + $0x40] sm:$0xff]   ;;  %v6712_v53 = vrot.slane %v6710_v16, 4 }
 0x2a6   : > { %v16363_v0 = vpop.f32.mrf.mxu0  ;;  %v13049_v3 = vpop.f32.mrf.mxu1  ;;  %13233 = vmatprep.subr.bf16.mxu1 %v13771_v36 }
 0x2a7   : > { %19644 = vst [vmem:[#allocation29_spill] sm:$0xff] %v16363_v0  ;;  %v16369_v20 = vadd.f32 %v13049_v3, %v16227_v23  ;;  %v6725_v3 = vrot.slane %v6723_v2, 4  ;;  %13234 = vmatpush3.bf16.msra.mxu1 %v13771_v36  ;;  %v6716_v6 = vor.u32 %v6715_v61, %v6712_v53 }
 0x2a8   : > { %v16371_v9 = vpop.f32.mrf.mxu0  ;;  %v4554_v57 = vpop.f32.mrf.mxu1 }
 0x2a9   : > { %19645 = vst [vmem:[#allocation34_spill] sm:$0xff] %v16369_v20  ;;  %19646 = vst [vmem:[#allocation37_spill] sm:$0xff] %v16371_v9  ;;  %v16377_v19 = vadd.f32 %v4554_v57, %v16233_v40  ;;  %v6729_v20 = vshll.u32 %v16381_v21, 16  ;;  %v6721_v40 = vrot.slane %v6719_v32, 5 }
 0x2aa   : > { %v16379_v0 = vpop.f32.mrf.mxu0  ;;  %v16384_v23 = vpop.f32.mrf.mxu1 }
 0x2ab   : > { %19647 = vst [vmem:[#allocation24_spill] sm:$0xff] %v16377_v19  ;;  %19648 = vst [vmem:[#allocation42_spill] sm:$0xff] %v16379_v0  ;;  %v6717_v19 = vrot.slane %v6716_v6, 4  ;;  %v6726_v0 = vor.u32 %v6725_v3, %v6721_v40  ;;  %v6731_v5 = vrot.slane %v6729_v20, 5 }
 0x2ac   : > { %19650 = vst [vmem:[#allocation43_spill] sm:$0xff] %v16384_v23  ;;  %v16387_v9 = vpop.f32.mrf.mxu0  ;;  %v16389_v57 = vpop.f32.mrf.mxu1 }
 0x2ad   : > { %v6722_v2 = vsel %vm14068_vm4, %v6717_v19, %v6721_v40  ;;  %v6727_v21 = vrot.slane %v6726_v0, 4 }
 0x2ae   : > { %v16391_v16 = vpop.f32.mrf.mxu0  ;;  %v13053_v59 = vpop.f32.mrf.mxu1 }
 0x2af   : > { %v16394_v63 = vadd.f32 %v13053_v59, %v16245_v43  ;;  %v6732_v61 = vsel %vm14068_vm4, %v6727_v21, %v6731_v5 }
 0x2b0   : > { %v4570_v23 = vpop.f32.mrf.mxu1  ;;  %v11821_v20 = vcombine.low %v6722_v2, %v6732_v61 }
 0x2b1   : > { %v16399_v36 = vadd.f32 %v4570_v23, %v16248_v17 }
 0x2b2   : > { %v16403_v6 = vpop.f32.mrf.mxu0  ;;  %v16405_v53 = vpop.f32.mrf.mxu1  ;;  %13235 = vmatprep.mubr.bf16.mxu1 %v11821_v20 }
 0x2b4   : > { %v16407_v32 = vpop.f32.mrf.mxu0  ;;  %v16409_v43 = vpop.f32.mrf.mxu1 }
 0x2b6   : > { %v16411_v3 = vpop.f32.mrf.mxu0  ;;  %v13057_v0 = vpop.f32.mrf.mxu1 }
 0x2b7   : > { %v16414_v19 = vadd.f32 %v13057_v0, %v16258_v45 }
 0x2b8   : > { %v16416_v17 = vpop.f32.mrf.mxu0  ;;  %v4586_v23 = vpop.f32.mrf.mxu1 }
 0x2b9   : > { %19651 = vst [vmem:[#allocation23_spill] sm:$0xff] %v16414_v19  ;;  %v16419_v5 = vadd.f32 %v4586_v23, %v16261_v18 }
 0x2ba   : > { %v16421_v21 = vpop.f32.mrf.mxu1 }
 0x2bb   : > { %19652 = vst [vmem:[#allocation35_spill] sm:$0xff] %v16419_v5  ;;  %19653 = vst [vmem:[#allocation47_spill] sm:$0xff] %v16421_v21 }
 0x2bc   : > { %v16423_v40 = vpop.f32.mrf.mxu0  ;;  %v16425_v59 = vpop.f32.mrf.mxu1 }
 0x2bd   : > { %19654 = vst [vmem:[#allocation26_spill] sm:$0xff] %v16425_v59 }
 0x2be   : > { %v16427_v2 = vpop.f32.mrf.mxu0  ;;  %v13061_v61 = vpop.f32.mrf.mxu1 }
 0x2bf   : > { %v16430_v20 = vadd.f32 %v13061_v61, %v16277_v4 }
 0x2c0   : > { %v16432_v45 = vpop.f32.mrf.mxu0  ;;  %v4602_v0 = vpop.f32.mrf.mxu1 }
 0x2c1   : > { %19655 = vst [vmem:[#allocation40_spill] sm:$0xff] %v16430_v20  ;;  %v16435_v50 = vadd.f32 %v4602_v0, %v16279_v37 }
 0x2c2   : > { %v13062_v18 = vpop.f32.mrf.mxu1  ;;  %v16440_v5 = vpop.f32.mrf.mxu0 }
 0x2c3   : > { %19656 = vst [vmem:[#allocation53_spill] sm:$0xff] %v16435_v50  ;;  %v16438_v23 = vadd.f32 %v13062_v18, %v16282_v51 }
 0x2c4   : > { %v16442_v19 = vpop.f32.mrf.mxu1 }
 0x2c5   : > { %19657 = vst [vmem:[#allocation33_spill] sm:$0xff] %v16438_v23  ;;  %19658 = vst [vmem:[#allocation54_spill] sm:$0xff] %v16442_v19 }
 0x2c7   : > { %v13065_v59 = vpop.f32.mrf.mxu1  ;;  %v16444_v21 = vpop.f32.mrf.mxu0 }
 0x2c8   : > { %19659 = vst [vmem:[#allocation57_spill] sm:$0xff] %v16444_v21  ;;  %v16447_v4 = vadd.f32 %v13065_v59, %v16291_v29 }
 0x2c9   : > { %v4618_v61 = vpop.f32.mrf.mxu1  ;;  %v16449_v20 = vpop.f32.mrf.mxu0 }
 0x2ca   : > { %19660 = vst [vmem:[#allocation39_spill] sm:$0xff] %v16447_v4  ;;  %v16452_v37 = vadd.f32 %v4618_v61, %v16299_v15 }
 0x2cb   : > { %v13066_v0 = vpop.f32.mrf.mxu1  ;;  %v16454_v50 = vpop.f32.mrf.mxu0 }
 0x2cc   : > { %19661 = vst [vmem:[#allocation32_spill] sm:$0xff] %v16452_v37  ;;  %v16457_v51 = vadd.f32 %v13066_v0, %v16303_v33 }
 0x2cd   : > { %v16459_v18 = vpop.f32.mrf.mxu1  ;;  %v16461_v23 = vpop.f32.mrf.mxu0 }
 0x2ce   : > { %19662 = vst [vmem:[#allocation46_spill] sm:$0xff] %v16457_v51  ;;  %19663 = vst [vmem:[#allocation38_spill] sm:$0xff] %v16461_v23 }
 0x2d1   : > { %v13069_v19 = vpop.f32.mrf.mxu1 }
 0x2d2   : > { %v16463_v21 = vpop.f32.mrf.mxu0  ;;  %v16466_v29 = vadd.f32 %v13069_v19, %v16311_v42 }
 0x2d3   : > { %19664 = vst [vmem:[#allocation52_spill] sm:$0xff] %v16463_v21  ;;  %v4634_v59 = vpop.f32.mrf.mxu1 }
 0x2d4   : > { %19665 = vst [vmem:[#allocation45_spill] sm:$0xff] %v16466_v29  ;;  %v16468_v4 = vpop.f32.mrf.mxu0  ;;  %v16471_v15 = vadd.f32 %v4634_v59, %v16320_v13 }
 0x2d5   : > { %v13070_v61 = vpop.f32.mrf.mxu1 }
 0x2d6   : > { %19666 = vst [vmem:[#allocation49_spill] sm:$0xff] %v16471_v15  ;;  %v16473_v37 = vpop.f32.mrf.mxu0  ;;  %v16476_v33 = vadd.f32 %v13070_v61, %v16323_v58  ;;  %v19676_v61 = vld [vmem:[#allocation18_spill] sm:$0xff] }
 0x2d7   : > { %v16478_v0 = vpop.f32.mrf.mxu1 }
 0x2d8   : > { %19667 = vst [vmem:[#allocation44_spill] sm:$0xff] %v16476_v33  ;;  %19668 = vst [vmem:[#allocation56_spill] sm:$0xff] %v16478_v0  ;;  %v16480_v51 = vpop.f32.mrf.mxu0  ;;  %v1559_v33 = vadd.f32 %v15942_v10, %v19676_v61  ;;  %v3107_v61 = vadd.f32 %v15935_v44, %v15963_v24  ;;  %v19686_v44 = vld [vmem:[#allocation11_spill] sm:$0xff]  ;;  %v19687_v24 = vld [vmem:[#allocation14_spill] sm:$0xff] }
 0x2d9   : > { %19669 = vst [vmem:[#allocation48_spill] sm:$0xff] %v16480_v51  ;;  %v19677_v51 = vld [vmem:[#allocation28_spill] sm:$0xff] }
 0x2db   : > { %v13073_v21 = vpop.f32.mrf.mxu1 }
 0x2dc   : > { %v16482_v23 = vpop.f32.mrf.mxu0  ;;  %v16485_v42 = vadd.f32 %v13073_v21, %v16335_v28  ;;  %v19678_v28 = vld [vmem:[#allocation36_spill] sm:$0xff] }
 0x2dd   : > { %19670 = vst [vmem:[#allocation59_spill] sm:$0xff] %v16482_v23  ;;  %v4650_v19 = vpop.f32.mrf.mxu1  ;;  %v1563_v23 = vadd.f32 %v15942_v10, %v19677_v51  ;;  %v1567_v21 = vadd.f32 %v15942_v10, %v19678_v28  ;;  %v3111_v51 = vadd.f32 %v15987_v25, %v16006_v1  ;;  %v19688_v25 = vld [vmem:[#allocation9_spill] sm:$0xff] }
 0x2de   : > { %19671 = vst [vmem:[#allocation60_spill] sm:$0xff] %v16485_v42  ;;  %v16487_v29 = vpop.f32.mrf.mxu0  ;;  %v16490_v13 = vadd.f32 %v4650_v19, %v16354_v54  ;;  %v19679_v42 = vld [vmem:[#allocation51_spill] sm:$0xff]  ;;  %v19680_v54 = vld [vmem:[#allocation41_spill] sm:$0xff] }
 0x2df   : > { %19672 = vst [vmem:[#allocation61_spill] sm:$0xff] %v16487_v29  ;;  %v13074_v59 = vpop.f32.mrf.mxu1  ;;  %v1571_v29 = vadd.f32 %v15942_v10, %v19679_v42  ;;  %v2268_v19 = vadd.f32 %v19680_v54, %v1559_v33  ;;  %v16519_v10 = vld [vmem:[%s19365_s7 + $0xf8] sm:$0xff]   ;;  %v19683_v33 = vld [vmem:[#allocation58_spill] sm:$0xff]  ;;  %v3119_v54 = vadd.f32 %v19687_v24, %v19686_v44  ;;  %v19698_v24 = vld [vmem:[#allocation29_spill] sm:$0xff] }
 0x2e0   : > { %19673 = vst [vmem:[#allocation62_spill] sm:$0xff] %v16490_v13  ;;  %v16492_v15 = vpop.f32.mrf.mxu0  ;;  %v16495_v58 = vadd.f32 %v13074_v59, %v16359_v48  ;;  %v19682_v48 = vld [vmem:[#allocation55_spill] sm:$0xff]  ;;  %13315 = vmatprep.subr.bf16.mxu1 %v16519_v10 }
 0x2e1   : > { %19674 = vst [vmem:[#allocation63_spill] sm:$0xff] %v16492_v15  ;;  %v19681_v15 = vld [vmem:[#allocation50_spill] sm:$0xff]  ;;  %v2276_v59 = vadd.f32 %v19682_v48, %v1567_v21  ;;  %v2721_v28 = vadd.f32 %v16040_v8, %v2268_v19  ;;  %v19685_v21 = vld [vmem:[#allocation13_spill] sm:$0xff]  ;;  %v3813_v8 = vadd.f32 %v16188_v35, %v3107_v61  ;;  %v3817_v19 = vadd.f32 %v16207_v52, %v3111_v51 }
 0x2e2   : > { %19675 = vst [vmem:[#allocation64_spill] sm:$0xff] %v16495_v58  ;;  %v16506_v13 = vpop.f32.mrf.mxu0  ;;  %v2272_v0 = vadd.f32 %v19681_v15, %v1563_v23  ;;  %v2280_v58 = vadd.f32 %v15885_v49, %v1571_v29  ;;  %v3115_v23 = vadd.f32 %v19683_v33, %v16032_v46  ;;  %v19684_v15 = vld [vmem:[#allocation10_spill] sm:$0xff]  ;;  %v4269_v35 = vadd.f32 %v16236_v26, %v16203_v11  ;;  %v19689_v11 = vld [vmem:[#allocation8_spill] sm:$0xff] }
 0x2e3   : > { %v2729_v49 = vadd.f32 %v19685_v21, %v2276_v59  ;;  %v3123_v1 = vadd.f32 %v19688_v25, %v2721_v28  ;;  %v4267_v61 = vadd.f32 %v16241_v60, %v3817_v19  ;;  %v16546_v28 = vpop.f32.mrf.mxu1  ;;  %v19691_v60 = vld [vmem:[#allocation22_spill] sm:$0xff]  ;;  %v19700_v25 = vld [vmem:[#allocation37_spill] sm:$0xff] }
 0x2e4   : > { %v2725_v42 = vadd.f32 %v19684_v15, %v2272_v0  ;;  %v2733_v29 = vadd.f32 %v16154_v47, %v2280_v58  ;;  %v4265_v47 = vadd.f32 %v16218_v41, %v16180_v38  ;;  %v4263_v58 = vadd.f32 %v16223_v14, %v3813_v8  ;;  %v19701_v19 = vld [vmem:[#allocation30_spill] sm:$0xff] }
 0x2e5   : > { %v3131_v0 = vadd.f32 %v16186_v12, %v2729_v49  ;;  %v3821_v52 = vadd.f32 %v16225_v7, %v3115_v23  ;;  %v3825_v12 = vadd.f32 %v16243_v27, %v3119_v54  ;;  %v3829_v38 = vadd.f32 %v16256_v31, %v3123_v1  ;;  %v19690_v7 = vld [vmem:[#allocation20_spill] sm:$0xff]  ;;  %v19692_v23 = vld [vmem:[#allocation19_spill] sm:$0xff]  ;;  %v19699_v54 = vld [vmem:[#allocation6_spill] sm:$0xff] }
 0x2e6   : > { %v3127_v46 = vadd.f32 %v16147_v62, %v2725_v42  ;;  %v3135_v59 = vadd.f32 %v16205_v34, %v2733_v29  ;;  %v4273_v62 = vadd.f32 %v16251_v30, %v16221_v22  ;;  %v4277_v14 = vadd.f32 %v19689_v11, %v16239_v55  ;;  %v19693_v42 = vld [vmem:[#allocation7_spill] sm:$0xff]  ;;  %v19694_v22 = vld [vmem:[#allocation17_spill] sm:$0xff]  ;;  %v19705_v11 = vld [vmem:[#allocation24_spill] sm:$0xff] }
 0x2e7   : > { %v4271_v41 = vadd.f32 %v16254_v39, %v3821_v52  ;;  %v3837_v26 = vadd.f32 %v19690_v7, %v3131_v0  ;;  %v4275_v15 = vadd.f32 %v19692_v23, %v3825_v12  ;;  %v4279_v21 = vadd.f32 %v19693_v42, %v3829_v38  ;;  %v19695_v27 = vld [vmem:[#allocation15_spill] sm:$0xff] }
 0x2e8   : > { %v16531_v48 = vpop.f32.mrf.mxu0  ;;  %v3833_v34 = vadd.f32 %v16269_v56, %v3127_v46  ;;  %v3841_v33 = vadd.f32 %v19691_v60, %v3135_v59  ;;  %v4668_v49 = vadd.f32 %v19695_v27, %v4265_v47  ;;  %v19696_v56 = vld [vmem:[#allocation25_spill] sm:$0xff]  ;;  %v19697_v39 = vld [vmem:[#allocation31_spill] sm:$0xff]  ;;  %v5373_v1 = vadd.f32 %v19700_v25, %v19699_v54  ;;  %v19702_v46 = vld [vmem:[#allocation42_spill] sm:$0xff] }
 0x2e9   : > { %v4287_v29 = vadd.f32 %v19696_v56, %v3837_v26  ;;  %v4666_v44 = vadd.f32 %v19697_v39, %v4263_v58  ;;  %v5371_v0 = vadd.f32 %v19702_v46, %v19701_v19  ;;  %v19703_v59 = vld [vmem:[#allocation43_spill] sm:$0xff]  ;;  %v4670_v47 = vadd.f32 %v16389_v57, %v4267_v61  ;;  %v19707_v61 = vld [vmem:[#allocation26_spill] sm:$0xff]  ;;  %v19713_v25 = vld [vmem:[#allocation40_spill] sm:$0xff] }
 0x2ea   : > { %v16544_v51 = vpop.f32.mrf.mxu0  ;;  %v4283_v30 = vadd.f32 %v19694_v22, %v3833_v34  ;;  %v4291_v55 = vadd.f32 %v19698_v24, %v3841_v33  ;;  %v4672_v52 = vadd.f32 %v19703_v59, %v4269_v35  ;;  %v5374_v12 = vadd.f32 %v16387_v9, %v4668_v49  ;;  %v19704_v34 = vld [vmem:[#allocation34_spill] sm:$0xff]  ;;  %v19708_v22 = vld [vmem:[#allocation23_spill] sm:$0xff] }
 0x2eb   : > { %v5372_v38 = vadd.f32 %v16391_v16, %v4666_v44  ;;  %v5377_v58 = vadd.f32 %v16403_v6, %v19704_v34  ;;  %v5375_v7 = vadd.f32 %v16407_v32, %v19705_v11  ;;  %v4676_v26 = vadd.f32 %v16405_v53, %v4273_v62  ;;  %v19706_v53 = vld [vmem:[#allocation47_spill] sm:$0xff]  ;;  %v19712_v24 = vld [vmem:[#allocation38_spill] sm:$0xff]  ;;  %v19721_v11 = vld [vmem:[#allocation32_spill] sm:$0xff] }
 0x2ec   : > { %v16562_v31 = vpop.f32.mrf.mxu0  ;;  %v5378_v33 = vadd.f32 %v16411_v3, %v4672_v52  ;;  %v4674_v23 = vadd.f32 %v16409_v43, %v4271_v41  ;;  %v16583_v35 = vadd.f32 %v16416_v17, %v4670_v47  ;;  %v16589_v16 = vadd.f32 %v16423_v40, %v16394_v63  ;;  %v19709_v63 = vld [vmem:[#allocation57_spill] sm:$0xff]  ;;  %v19710_v27 = vld [vmem:[#allocation35_spill] sm:$0xff]  ;;  %v19718_v52 = vld [vmem:[#allocation48_spill] sm:$0xff] }
 0x2ed   : > { %v16593_v6 = vadd.f32 %v16427_v2, %v16399_v36  ;;  %v4680_v32 = vadd.f32 %v19706_v53, %v4277_v14  ;;  %v4678_v3 = vadd.f32 %v19707_v61, %v4275_v15  ;;  %v16598_v43 = vadd.f32 %v16432_v45, %v4676_v26  ;;  %v19711_v14 = vld [vmem:[#allocation54_spill] sm:$0xff]  ;;  %v19719_v47 = vld [vmem:[#allocation39_spill] sm:$0xff]  ;;  %v19722_v26 = vld [vmem:[#allocation61_spill] sm:$0xff] }
 0x2ee   : > { %v13141_v8 = vpop.f32.mrf.mxu1  ;;  %v16585_v9 = vpop.f32.mrf.mxu0  ;;  %v16601_v17 = vadd.f32 %v16440_v5, %v4674_v23  ;;  %v16605_v40 = vadd.f32 %v19709_v63, %v19708_v22  ;;  %v16609_v36 = vadd.f32 %v16449_v20, %v19710_v27  ;;  %v4682_v15 = vadd.f32 %v19711_v14, %v4279_v21  ;;  %v19716_v21 = vld [vmem:[#allocation33_spill] sm:$0xff]  ;;  %v19724_v23 = vld [vmem:[#allocation63_spill] sm:$0xff]  ;;  %v19726_v63 = vld [vmem:[#allocation12_spill] sm:$0xff] }
 0x2ef   : > { %v5823_v57 = vadd.f32 %v13141_v8, %v5373_v1  ;;  %v16612_v2 = vadd.f32 %v16454_v50, %v4680_v32  ;;  %v4686_v49 = vadd.f32 %v16459_v18, %v4283_v30  ;;  %v16619_v54 = vadd.f32 %v19712_v24, %v4678_v3  ;;  %v19714_v1 = vld [vmem:[#allocation52_spill] sm:$0xff]  ;;  %v19715_v8 = vld [vmem:[#allocation53_spill] sm:$0xff] }
 0x2f0   : > { %v5694_v60 = vpop.f32.mrf.mxu1  ;;  %v16623_v20 = vadd.f32 %v19714_v1, %v19713_v25  ;;  %v16627_v50 = vadd.f32 %v16468_v4, %v19715_v8  ;;  %v16631_v19 = vadd.f32 %v16473_v37, %v19716_v21  ;;  %v19717_v18 = vld [vmem:[#allocation56_spill] sm:$0xff]  ;;  %v16643_v4 = vadd.f32 %v19722_v26, %v19721_v11  ;;  %v19729_v25 = vld [vmem:[#allocation27_spill] sm:$0xff] }
 0x2f1   : > { %v5821_v41 = vadd.f32 %v5694_v60, %v5371_v0  ;;  %v5855_v5 = vmax.f32 %v5823_v57, 0.0  ;;  %v4690_v30 = vadd.f32 %v19717_v18, %v4287_v29  ;;  %v19723_v60 = vld [vmem:[#allocation46_spill] sm:$0xff]  ;;  %v16650_v29 = vadd.f32 %v16506_v13, %v4686_v49  ;;  %v19727_v14 = vld [vmem:[#allocation16_spill] sm:$0xff] }
 0x2f2   : > { %v13142_v62 = vpop.f32.mrf.mxu1  ;;  %v16647_v37 = vadd.f32 %v19724_v23, %v19723_v60  ;;  %v4694_v53 = vadd.f32 %v16546_v28, %v4291_v55  ;;  %v11845_v27 = vrot.slane %v19726_v63, 9 }
 0x2f3   : > { %v5824_v42 = vadd.f32 %v13142_v62, %v5374_v12  ;;  %v5853_v46 = vmax.f32 %v5821_v41, 0.0  ;;  %v16635_v12 = vadd.f32 %v19718_v52, %v4682_v15  ;;  %v19725_v62 = vld [vmem:[#allocation45_spill] sm:$0xff]  ;;  %v7433_v15 = vrot.slane %v19727_v14, 5 }
 0x2f4   : > { %v5697_v45 = vpop.f32.mrf.mxu1  ;;  %v16655_v41 = vadd.f32 %v16531_v48, %v19725_v62  ;;  %v7436_v48 = vrot.slane %v19729_v25, 5 }
 0x2f5   : > { %v16616_v56 = vpop.f32.mrf.mxu0  ;;  %v5856_v39 = vmax.f32 %v5824_v42, 0.0  ;;  %v5822_v44 = vadd.f32 %v5697_v45, %v5372_v38  ;;  %v19720_v38 = vld [vmem:[#allocation59_spill] sm:$0xff]  ;;  %v19728_v45 = vld [vmem:[#allocation49_spill] sm:$0xff]  ;;  %v7435_v24 = vrot.slane %v7433_v15, 4 }
 0x2f6   : > { %v16639_v34 = vadd.f32 %v19720_v38, %v19719_v47 }
 0x2f7   : > { %v5886_v0 = vpack.c.bf16 %v5856_v39, %v5855_v5  ;;  %v5854_v59 = vmax.f32 %v5822_v44, 0.0  ;;  %v5356_v32 = vpop.f32.mrf.mxu0  ;;  %v16661_v5 = vadd.f32 %v16544_v51, %v19728_v45 }
 0x2f8   : > { %v13145_v57 = vpop.f32.mrf.mxu1 }
 0x2f9   : > { %v5909_v61 = vshrl.u32 %v5886_v0, 16  ;;  %v5885_v3 = vpack.c.bf16 %v5854_v59, %v5853_v46  ;;  %v5827_v42 = vadd.f32 %v13145_v57, %v5377_v58  ;;  %v5912_v49 = vshll.u32 %v5886_v0, 16  ;;  %v13122_v21 = vpop.f32.mrf.mxu0  ;;  %v19731_v59 = vld [vmem:[#allocation44_spill] sm:$0xff] }
 0x2fa   : > { %v5710_v22 = vpop.f32.mrf.mxu1  ;;  %v16668_v51 = vadd.f32 %v16562_v31, %v19731_v59 }
 0x2fb   : > { %v5911_v13 = vrot.slane %v5909_v61, 7  ;;  %v5902_v28 = vshrl.u32 %v5885_v3, 16  ;;  %v5905_v55 = vshll.u32 %v5885_v3, 16  ;;  %v5825_v39 = vadd.f32 %v5710_v22, %v5375_v7 }
 0x2fc   : > { %v13146_v44 = vpop.f32.mrf.mxu1  ;;  %v5859_v0 = vmax.f32 %v5827_v42, 0.0  ;;  %v16672_v7 = vsel %vm14113_vm9, %v11845_v27, %v7433_v15  ;;  %v5359_v42 = vpop.f32.mrf.mxu0  ;;  %v16683_v27 = vsel %vm14113_vm9, %v7435_v24, %v7436_v48  ;;  %v19734_v24 = vld [vmem:[#allocation62_spill] sm:$0xff]  ;;  %v19735_v48 = vld [vmem:[#allocation64_spill] sm:$0xff] }
 0x2fd   : > { %v5914_v1 = vor.u32 %v5912_v49, %v5911_v13  ;;  %v6062_v8 = vsel %vm14129_vm10, %v5911_v13, 0  ;;  %v5904_v18 = vrot.slane %v5902_v28, 7  ;;  %v5828_v46 = vadd.f32 %v13146_v44, %v5378_v33  ;;  %v19733_v28 = vld [vmem:[#allocation60_spill] sm:$0xff] }
 0x2fe   : > { %v11737_v52 = vcombine.low %v6062_v8, %v6062_v8  ;;  %v5713_v47 = vpop.f32.mrf.mxu1  ;;  %v5857_v22 = vmax.f32 %v5825_v39, 0.0  ;;  %v16687_v49 = vadd.f32 %v16585_v9, %v4690_v30  ;;  %v16695_v25 = vadd.f32 %v5356_v32, %v19734_v24 }
 0x2ff   : > { %v6046_v11 = vsel %vm14129_vm10, 0, %v5914_v1  ;;  %v5907_v26 = vor.u32 %v5905_v55, %v5904_v18  ;;  %v6061_v60 = vsel %vm14129_vm10, %v5904_v18, 0  ;;  %v5860_v23 = vmax.f32 %v5828_v46, 0.0 }
 0x300   : > { %v11735_v33 = vcombine.low %v6046_v11, %v6046_v11  ;;  %v11736_v57 = vcombine.high %v6046_v11, %v6046_v11  ;;  %6258 = vst [vmem:[#allocation2 + $0x20] sm:$0x1] %v11737_v52  ;;  %v11734_v31 = vcombine.low %v6061_v60, %v6061_v60  ;;  %v5826_v61 = vadd.f32 %v5713_v47, %v16583_v35  ;;  %v13149_v3 = vpop.f32.mrf.mxu1 }
 0x301   : > { %v6045_v62 = vsel %vm14129_vm10, 0, %v5907_v26  ;;  %v5888_v63 = vpack.c.bf16 %v5860_v23, %v5859_v0  ;;  %v5831_v13 = vadd.f32 %v13149_v3, %v16589_v16  ;;  %v16691_v55 = vadd.f32 %v16616_v56, %v19733_v28 }
 0x302   : > { %6256 = vst [vmem:[#allocation2 + $0x18] sm:$0xf] %v11735_v33  ;;  %6257 = vst [vmem:[#allocation2 + $0x1c] sm:$0xf] %v11736_v57  ;;  %v11732_v14 = vcombine.low %v6045_v62, %v6045_v62  ;;  %v11733_v15 = vcombine.high %v6045_v62, %v6045_v62  ;;  %v5858_v45 = vmax.f32 %v5826_v61, 0.0  ;;  %v5726_v35 = vpop.f32.mrf.mxu1  ;;  %v16698_v1 = vadd.f32 %v13122_v21, %v19735_v48 }
 0x303   : > { %6255 = vst [vmem:[#allocation2 + $0x14] sm:$0x1] %v11734_v31  ;;  %v5923_v39 = vshrl.u32 %v5888_v63, 16  ;;  %v5829_v44 = vadd.f32 %v5726_v35, %v16593_v6  ;;  %v16700_v16 = vadd.f32 %v5359_v42, %v4694_v53  ;;  %v5926_v18 = vshll.u32 %v5888_v63, 16 }
 0x304   : > { %6253 = vst [vmem:[#allocation2 + $0xc] sm:$0xf] %v11732_v14  ;;  %6254 = vst [vmem:[#allocation2 + $0x10] sm:$0xf] %v11733_v15  ;;  %v5887_v8 = vpack.c.bf16 %v5858_v45, %v5857_v22  ;;  %v13150_v9 = vpop.f32.mrf.mxu1  ;;  %v5863_v32 = vmax.f32 %v5831_v13, 0.0 }
 0x305   : > { %v5925_v30 = vrot.slane %v5923_v39, 7  ;;  %v5832_v56 = vadd.f32 %v13150_v9, %v16598_v43  ;;  %v5861_v52 = vmax.f32 %v5829_v44, 0.0  ;;  %v13772_v9 = vld [vmem:[%s19365_s7 + $0xb0] sm:$0xff]  }
 0x306   : > { %v5916_v6 = vshrl.u32 %v5887_v8, 16  ;;  %v5919_v59 = vshll.u32 %v5887_v8, 16  ;;  %v5729_v0 = vpop.f32.mrf.mxu1 }
 0x307   : > { %v5928_v21 = vor.u32 %v5926_v18, %v5925_v30  ;;  %v6064_v47 = vsel %vm14129_vm10, %v5925_v30, 0  ;;  %v5864_v53 = vmax.f32 %v5832_v56, 0.0  ;;  %v5830_v11 = vadd.f32 %v5729_v0, %v16601_v17  ;;  %v16708_v26 = vld [vmem:[#allocation2 + $0x20] sm:$0x1] }
 0x308   : > { %v11743_v60 = vcombine.low %v6064_v47, %v6064_v47  ;;  %v5918_v23 = vrot.slane %v5916_v6, 7  ;;  %v13153_v43 = vpop.f32.mrf.mxu1  ;;  %v6777_v33 = vshll.u32 %v16708_v26, 16 }
 0x309   : > { %v6048_v31 = vsel %vm14129_vm10, 0, %v5928_v21  ;;  %v5890_v61 = vpack.c.bf16 %v5864_v53, %v5863_v32  ;;  %v5862_v3 = vmax.f32 %v5830_v11, 0.0  ;;  %v5835_v62 = vadd.f32 %v13153_v43, %v16605_v40 }
 0x30a   : > { %v11741_v42 = vcombine.low %v6048_v31, %v6048_v31  ;;  %v11742_v22 = vcombine.high %v6048_v31, %v6048_v31  ;;  %6264 = vst [vmem:[#allocation2 + $0x38] sm:$0x1] %v11743_v60  ;;  %v5921_v17 = vor.u32 %v5919_v59, %v5918_v23  ;;  %v6063_v63 = vsel %vm14129_vm10, %v5918_v23, 0  ;;  %v5742_v14 = vpop.f32.mrf.mxu1  ;;  %v19736_v60 = vld [vmem:[#allocation21_spill] sm:$0xff]  ;;  %v16735_v23 = vld [vmem:[#allocation2 + $0x18] sm:$0xf] }
 0x30b   : > { %v11740_v15 = vcombine.low %v6063_v63, %v6063_v63  ;;  %v5937_v45 = vshrl.u32 %v5890_v61, 16  ;;  %v5940_v13 = vshll.u32 %v5890_v61, 16  ;;  %v5889_v35 = vpack.c.bf16 %v5862_v3, %v5861_v52  ;;  %v16717_v28 = vld [vmem:[#allocation2 + $0xc] sm:$0xf]  ;;  %v16719_v39 = vld [vmem:[#allocation2 + $0x10] sm:$0xf] }
 0x30c   : > { %6262 = vst [vmem:[#allocation2 + $0x30] sm:$0xf] %v11741_v42  ;;  %6263 = vst [vmem:[#allocation2 + $0x34] sm:$0xf] %v11742_v22  ;;  %v6047_v40 = vsel %vm14129_vm10, 0, %v5921_v17  ;;  %v5867_v44 = vmax.f32 %v5835_v62, 0.0  ;;  %v5833_v24 = vadd.f32 %v5742_v14, %v16609_v36  ;;  %v13154_v48 = vpop.f32.mrf.mxu1  ;;  %v11782_v8 = vcombine.low %v16717_v28, %v16719_v39 }
 0x30d   : > { %v11738_v30 = vcombine.low %v6047_v40, %v6047_v40  ;;  %v11739_v18 = vcombine.high %v6047_v40, %v6047_v40  ;;  %6261 = vst [vmem:[#allocation2 + $0x2c] sm:$0x1] %v11740_v15  ;;  %v5939_v56 = vrot.slane %v5937_v45, 7  ;;  %v5930_v6 = vshrl.u32 %v5889_v35, 16  ;;  %v16739_v62 = vld [vmem:[#allocation2 + $0x1c] sm:$0xf] }
 0x30e   : > { %v5933_v59 = vshll.u32 %v5889_v35, 16  ;;  %v5865_v32 = vmax.f32 %v5833_v24, 0.0  ;;  %v5836_v52 = vadd.f32 %v13154_v48, %v16612_v2  ;;  %v5745_v0 = vpop.f32.mrf.mxu1  ;;  %13188 = vmatmul.mubr.bf16.vlgmr.msra.gmra.mxu0 %v11782_v8  ;;  %v6734_v36 = vshrl.u32 %v16717_v28, 16  ;;  %v13775_v42 = vld [vmem:[%s19365_s7 + $0xa8] sm:$0xff]  }
 0x30f   : > { %6259 = vst [vmem:[#allocation2 + $0x24] sm:$0xf] %v11738_v30  ;;  %6260 = vst [vmem:[#allocation2 + $0x28] sm:$0xf] %v11739_v18  ;;  %v5942_v21 = vor.u32 %v5940_v13, %v5939_v56  ;;  %v6066_v47 = vsel %vm14129_vm10, %v5939_v56, 0  ;;  %v5932_v53 = vrot.slane %v5930_v6, 7  ;;  %v5834_v11 = vadd.f32 %v5745_v0, %v16619_v54  ;;  %13268 = vmatpush3.bf16.msra.mxu0 %v19736_v60 }
 0x310   : > { %v11749_v43 = vcombine.low %v6066_v47, %v6066_v47  ;;  %v5868_v31 = vmax.f32 %v5836_v52, 0.0  ;;  %v13157_v2 = vpop.f32.mrf.mxu1  ;;  %v6737_v61 = vshll.u32 %v16717_v28, 16  ;;  %v6747_v3 = vshrl.u32 %v16719_v39, 16  ;;  %13269 = vmatprep.subr.bf16.mxu0 %v13772_v9 }
 0x311   : > { %v6050_v54 = vsel %vm14129_vm10, 0, %v5942_v21  ;;  %v5935_v22 = vor.u32 %v5933_v59, %v5932_v53  ;;  %v6065_v17 = vsel %vm14129_vm10, %v5932_v53, 0  ;;  %v5866_v63 = vmax.f32 %v5834_v11, 0.0 }
 0x312   : > { %v11747_v14 = vcombine.low %v6050_v54, %v6050_v54  ;;  %v11748_v15 = vcombine.high %v6050_v54, %v6050_v54  ;;  %6270 = vst [vmem:[#allocation2 + $0x50] sm:$0x1] %v11749_v43  ;;  %v11746_v45 = vcombine.low %v6065_v17, %v6065_v17  ;;  %v5892_v13 = vpack.c.bf16 %v5868_v31, %v5867_v44  ;;  %v5758_v35 = vpop.f32.mrf.mxu1  ;;  %v13778_v44 = vld [vmem:[%s19365_s7 + $0xa0] sm:$0xff]  }
 0x313   : > { %v6049_v40 = vsel %vm14129_vm10, 0, %v5935_v22  ;;  %v5891_v24 = vpack.c.bf16 %v5866_v63, %v5865_v32  ;;  %v5839_v48 = vadd.f32 %v13157_v2, %v16623_v20  ;;  %v11783_v8 = vcombine.low %v16735_v23, %v16739_v62  ;;  %13270 = vmatpush3.bf16.msra.mxu0 %v13772_v9 }
 0x314   : > { %6268 = vst [vmem:[#allocation2 + $0x48] sm:$0xf] %v11747_v14  ;;  %6269 = vst [vmem:[#allocation2 + $0x4c] sm:$0xf] %v11748_v15  ;;  %v11744_v30 = vcombine.low %v6049_v40, %v6049_v40  ;;  %v11745_v18 = vcombine.high %v6049_v40, %v6049_v40  ;;  %v5951_v56 = vshrl.u32 %v5892_v13, 16  ;;  %v5954_v6 = vshll.u32 %v5892_v13, 16  ;;  %v13158_v59 = vpop.f32.mrf.mxu1  ;;  %13271 = vmatprep.subr.bf16.mxu0 %v13775_v42 }
 0x315   : > { %6267 = vst [vmem:[#allocation2 + $0x44] sm:$0x1] %v11746_v45  ;;  %v5944_v32 = vshrl.u32 %v5891_v24, 16  ;;  %v5947_v52 = vshll.u32 %v5891_v24, 16  ;;  %v5871_v20 = vmax.f32 %v5839_v48, 0.0  ;;  %13191 = vmatprep.mubr.bf16.mxu0 %v11783_v8  ;;  %v6758_v0 = vshrl.u32 %v16735_v23, 16 }
 0x316   : > { %6265 = vst [vmem:[#allocation2 + $0x3c] sm:$0xf] %v11744_v30  ;;  %6266 = vst [vmem:[#allocation2 + $0x40] sm:$0xf] %v11745_v18  ;;  %v5953_v9 = vrot.slane %v5951_v56, 7  ;;  %v6761_v21 = vshll.u32 %v16735_v23, 16  ;;  %v5837_v53 = vadd.f32 %v5758_v35, %v16627_v50  ;;  %v5761_v11 = vpop.f32.mrf.mxu1  ;;  %v5840_v31 = vadd.f32 %v13158_v59, %v16631_v19 }
 0x317   : > { %v6771_v47 = vshrl.u32 %v16739_v62, 16  ;;  %v16760_v60 = vld [vmem:[#allocation2 + $0x24] sm:$0xf]  ;;  %v5946_v43 = vrot.slane %v5944_v32, 7  ;;  %v5838_v2 = vadd.f32 %v5761_v11, %v16635_v12  ;;  %v16764_v54 = vld [vmem:[#allocation2 + $0x28] sm:$0xf]  ;;  %13272 = vmatpush3.bf16.msra.mxu0 %v13775_v42 }
 0x318   : > { %v6782_v22 = vshrl.u32 %v16760_v60, 16  ;;  %v5956_v17 = vor.u32 %v5954_v6, %v5953_v9  ;;  %v6068_v63 = vsel %vm14129_vm10, %v5953_v9, 0  ;;  %v5869_v14 = vmax.f32 %v5837_v53, 0.0  ;;  %v13161_v15 = vpop.f32.mrf.mxu1  ;;  %13273 = vmatprep.subr.bf16.mxu0 %v13778_v44  ;;  %v13781_v19 = vld [vmem:[%s19365_s7 + $0x98] sm:$0xff]   ;;  %v16783_v59 = vld [vmem:[#allocation2 + $0x30] sm:$0xf] }
 0x319   : > { %v11784_v50 = vcombine.low %v16760_v60, %v16764_v54  ;;  %v11755_v12 = vcombine.low %v6068_v63, %v6068_v63  ;;  %v5949_v45 = vor.u32 %v5947_v52, %v5946_v43  ;;  %v6067_v13 = vsel %vm14129_vm10, %v5946_v43, 0  ;;  %v16785_v32 = vld [vmem:[#allocation2 + $0x34] sm:$0xf] }
 0x31a   : > { %v5872_v42 = vmax.f32 %v5840_v31, 0.0  ;;  %v6052_v35 = vsel %vm14129_vm10, 0, %v5956_v17  ;;  %v11752_v40 = vcombine.low %v6067_v13, %v6067_v13  ;;  %v5870_v24 = vmax.f32 %v5838_v2, 0.0  ;;  %v5774_v8 = vpop.f32.mrf.mxu1  ;;  %v13784_v11 = vld [vmem:[%s19365_s7 + $0x90] sm:$0xff]  }
 0x31b   : > { %v16779_v48 = vadd.f32 %v13161_v15, %v16639_v34  ;;  %13192 = vmatmul.mubr.bf16.gmra.mxu0 %v11784_v50  ;;  %v11753_v30 = vcombine.low %v6052_v35, %v6052_v35  ;;  %v11754_v18 = vcombine.high %v6052_v35, %v6052_v35  ;;  %6276 = vst [vmem:[#allocation2 + $0x68] sm:$0x1] %v11755_v12  ;;  %v6051_v56 = vsel %vm14129_vm10, 0, %v5949_v45  ;;  %v16796_v50 = vld [vmem:[#allocation2 + $0x14] sm:$0x1] }
 0x31c   : > { %v5894_v6 = vpack.c.bf16 %v5872_v42, %v5871_v20  ;;  %13274 = vmatpush3.bf16.msra.mxu0 %v13778_v44  ;;  %v11750_v52 = vcombine.low %v6051_v56, %v6051_v56  ;;  %v11751_v9 = vcombine.high %v6051_v56, %v6051_v56  ;;  %6273 = vst [vmem:[#allocation2 + $0x5c] sm:$0x1] %v11752_v40  ;;  %v6785_v31 = vshll.u32 %v16760_v60, 16  ;;  %v13162_v44 = vpop.f32.mrf.mxu1 }
 0x31d   : > { %v5893_v53 = vpack.c.bf16 %v5870_v24, %v5869_v14  ;;  %v5875_v34 = vmax.f32 %v16779_v48, 0.0  ;;  %13275 = vmatprep.subr.bf16.mxu0 %v13781_v19  ;;  %6274 = vst [vmem:[#allocation2 + $0x60] sm:$0xf] %v11753_v30  ;;  %6275 = vst [vmem:[#allocation2 + $0x64] sm:$0xf] %v11754_v18  ;;  %v6795_v2 = vshrl.u32 %v16764_v54, 16  ;;  %v11785_v14 = vcombine.low %v16783_v59, %v16785_v32 }
 0x31e   : > { %v5965_v43 = vshrl.u32 %v5894_v6, 16  ;;  %v5968_v20 = vshll.u32 %v5894_v6, 16  ;;  %6271 = vst [vmem:[#allocation2 + $0x54] sm:$0xf] %v11750_v52  ;;  %6272 = vst [vmem:[#allocation2 + $0x58] sm:$0xf] %v11751_v9  ;;  %v16814_v6 = vadd.f32 %v5774_v8, %v16643_v4  ;;  %v5777_v28 = vpop.f32.mrf.mxu1 }
 0x31f   : > { %v5958_v17 = vshrl.u32 %v5893_v53, 16  ;;  %v5961_v63 = vshll.u32 %v5893_v53, 16  ;;  %v6806_v15 = vshrl.u32 %v16783_v59, 16  ;;  %v6809_v45 = vshll.u32 %v16783_v59, 16  ;;  %13195 = vmatprep.mubr.bf16.mxu0 %v11785_v14  ;;  %v13789_v18 = vld [vmem:[%s19365_s7 + $0x88] sm:$0xff]  }
 0x320   : > { %v5967_v12 = vrot.slane %v5965_v43, 7  ;;  %v6819_v13 = vshrl.u32 %v16785_v32, 16  ;;  %v6736_v42 = vrot.slane %v6734_v36, 4  ;;  %13276 = vmatpush3.bf16.msra.mxu0 %v13781_v19  ;;  %v6739_v40 = vrot.slane %v6737_v61, 5 }
 0x321   : > { %v5960_v35 = vrot.slane %v5958_v17, 7  ;;  %v6743_v24 = vshll.u32 %v16719_v39, 16  ;;  %v6749_v30 = vrot.slane %v6747_v3, 4  ;;  %13277 = vmatprep.subr.bf16.mxu0 %v13784_v11  ;;  %v6753_v19 = vshll.u32 %v16796_v50, 16 }
 0x322   : > { %v5970_v56 = vor.u32 %v5968_v20, %v5967_v12  ;;  %v6070_v36 = vsel %vm14129_vm10, %v5967_v12, 0  ;;  %v6740_v3 = vor.u32 %v6739_v40, %v6736_v42  ;;  %v5873_v40 = vmax.f32 %v16814_v6, 0.0 }
 0x323   : > { %v11761_v61 = vcombine.low %v6070_v36, %v6070_v36  ;;  %v5963_v52 = vor.u32 %v5961_v63, %v5960_v35  ;;  %v6069_v39 = vsel %vm14129_vm10, %v5960_v35, 0  ;;  %v6745_v43 = vrot.slane %v6743_v24, 5  ;;  %v13794_v63 = vld [vmem:[%s19365_s7 + $0x80] sm:$0xff]   ;;  %v13165_v24 = vpop.f32.mrf.mxu1 }
 0x324   : > { %v6054_v9 = vsel %vm14129_vm10, 0, %v5970_v56  ;;  %v11758_v53 = vcombine.low %v6069_v39, %v6069_v39  ;;  %v6755_v20 = vrot.slane %v6753_v19, 5  ;;  %13278 = vmatpush3.bf16.msra.mxu0 %v13784_v11  ;;  %v6741_v8 = vrot.slane %v6740_v3, 4  ;;  %v16826_v11 = vld [vmem:[#allocation2 + $0x3c] sm:$0xf] }
 0x325   : > { %v11759_v17 = vcombine.low %v6054_v9, %v6054_v9  ;;  %v11760_v14 = vcombine.high %v6054_v9, %v6054_v9  ;;  %6282 = vst [vmem:[#allocation2 + $0x80] sm:$0x1] %v11761_v61  ;;  %v6053_v4 = vsel %vm14129_vm10, 0, %v5963_v52  ;;  %13279 = vmatprep.subr.bf16.mxu0 %v13789_v18  ;;  %v6750_v35 = vor.u32 %v6749_v30, %v6745_v43  ;;  %v16835_v39 = vld [vmem:[#allocation2 + $0x40] sm:$0xf] }
 0x326   : > { %v11756_v12 = vcombine.low %v6053_v4, %v6053_v4  ;;  %v11757_v42 = vcombine.high %v6053_v4, %v6053_v4  ;;  %6279 = vst [vmem:[#allocation2 + $0x74] sm:$0x1] %v11758_v53  ;;  %v6746_v36 = vsel %vm14068_vm4, %v6741_v8, %v6745_v43  ;;  %v6760_v19 = vrot.slane %v6758_v0, 4  ;;  %v16849_v43 = vld [vmem:[%s19365_s7 + $0x138] sm:$0xff]   ;;  %v13788_v4 = vld [vmem:[%s19365_s7 + $0xf0] sm:$0xff]  }
 0x327   : > { %6280 = vst [vmem:[#allocation2 + $0x78] sm:$0xf] %v11759_v17  ;;  %6281 = vst [vmem:[#allocation2 + $0x7c] sm:$0xf] %v11760_v14  ;;  %v6763_v61 = vrot.slane %v6761_v21, 5  ;;  %v6767_v52 = vshll.u32 %v16739_v62, 16  ;;  %v5844_v9 = vadd.f32 %v13162_v44, %v16647_v37  ;;  %v5842_v23 = vadd.f32 %v5777_v28, %v16650_v29 }
 0x328   : > { %6277 = vst [vmem:[#allocation2 + $0x6c] sm:$0xf] %v11756_v12  ;;  %6278 = vst [vmem:[#allocation2 + $0x70] sm:$0xf] %v11757_v42  ;;  %v6751_v30 = vrot.slane %v6750_v35, 4  ;;  %v6773_v6 = vrot.slane %v6771_v47, 4  ;;  %13280 = vmatpush3.bf16.msra.mxu0 %v13789_v18  ;;  %v16844_v21 = vadd.f32 %v13165_v24, %v16655_v41  ;;  %v11786_v37 = vcombine.low %v16826_v11, %v16835_v39  ;;  %v5790_v41 = vpop.f32.mrf.mxu1 }
 0x329   : > { %v6779_v3 = vrot.slane %v6777_v33, 5  ;;  %v6764_v0 = vor.u32 %v6763_v61, %v6760_v19  ;;  %v6769_v53 = vrot.slane %v6767_v52, 5  ;;  %13281 = vmatprep.subr.bf16.mxu0 %v13794_v63  ;;  %v5876_v33 = vmax.f32 %v5844_v9, 0.0  ;;  %v16856_v44 = vld [vmem:[#allocation2 + $0x48] sm:$0xf] }
 0x32a   : > { %v6756_v62 = vsel %vm14068_vm4, %v6751_v30, %v6755_v20  ;;  %v6830_v47 = vshrl.u32 %v16826_v11, 16  ;;  %v16858_v29 = vld [vmem:[#allocation2 + $0x4c] sm:$0xf]  ;;  %v5874_v14 = vmax.f32 %v5842_v23, 0.0  ;;  %v5879_v8 = vmax.f32 %v16844_v21, 0.0  ;;  %13196 = vmatmul.mubr.bf16.gmra.mxu0 %v11786_v37 }
 0x32b   : > { %v11822_v18 = vcombine.low %v6746_v36, %v6756_v62  ;;  %v6765_v28 = vrot.slane %v6764_v0, 4  ;;  %v6774_v17 = vor.u32 %v6773_v6, %v6769_v53  ;;  %v5896_v20 = vpack.c.bf16 %v5876_v33, %v5875_v34  ;;  %v16874_v30 = vld [vmem:[#allocation2 + $0x2c] sm:$0x1]  ;;  %v13166_v6 = vpop.f32.mrf.mxu1  ;;  %v16921_v59 = vld [vmem:[#allocation2 + $0x54] sm:$0xf] }
 0x32c   : > { %v6833_v12 = vshll.u32 %v16826_v11, 16  ;;  %v6843_v42 = vshrl.u32 %v16835_v39, 16  ;;  %v5895_v36 = vpack.c.bf16 %v5874_v14, %v5873_v40  ;;  %v11787_v19 = vcombine.low %v16856_v44, %v16858_v29  ;;  %13282 = vmatpush3.bf16.msra.mxu0 %v13794_v63 }
 0x32d   : > { %13236 = vmatmul.mubr.bf16.vlgmr.msra.gmra.mxu1 %v11822_v18  ;;  %v6770_v35 = vsel %vm14068_vm4, %v6765_v28, %v6769_v53  ;;  %v6775_v24 = vrot.slane %v6774_v17, 4  ;;  %v5979_v61 = vshrl.u32 %v5896_v20, 16  ;;  %v5982_v48 = vshll.u32 %v5896_v20, 16  ;;  %13363 = vmatprep.subr.bf16.mxu0 %v16849_v43  ;;  %v13792_v53 = vld [vmem:[%s19365_s7 + $0xe8] sm:$0xff]  }
 0x32e   : > { %v6854_v34 = vshrl.u32 %v16856_v44, 16  ;;  %v6857_v52 = vshll.u32 %v16856_v44, 16  ;;  %13316 = vmatpush3.bf16.msra.mxu1 %v16519_v10  ;;  %v5972_v9 = vshrl.u32 %v5895_v36, 16  ;;  %v5975_v0 = vshll.u32 %v5895_v36, 16  ;;  %13199 = vmatprep.mubr.bf16.mxu0 %v11787_v19 }
 0x32f   : > { %v6780_v40 = vsel %vm14068_vm4, %v6775_v24, %v6779_v3  ;;  %v6867_v63 = vshrl.u32 %v16858_v29, 16  ;;  %13317 = vmatprep.subr.bf16.mxu1 %v13788_v4  ;;  %v5981_v62 = vrot.slane %v5979_v61, 7  ;;  %v6784_v10 = vrot.slane %v6782_v22, 4  ;;  %v5793_v22 = vpop.f32.mrf.mxu1 }
 0x330   : > { %v11823_v23 = vcombine.low %v6770_v35, %v6780_v40  ;;  %v6787_v33 = vrot.slane %v6785_v31, 5  ;;  %v5974_v37 = vrot.slane %v5972_v9, 7  ;;  %v6791_v3 = vshll.u32 %v16764_v54, 16  ;;  %v13793_v54 = vld [vmem:[%s19365_s7 + $0xe0] sm:$0xff]   ;;  %v16904_v9 = vld [vmem:[#allocation2 + $0x38] sm:$0x1] }
 0x331   : > { %v6797_v18 = vrot.slane %v6795_v2, 4  ;;  %v6801_v28 = vshll.u32 %v16874_v30, 16  ;;  %v5984_v17 = vor.u32 %v5982_v48, %v5981_v62  ;;  %v6072_v14 = vsel %vm14129_vm10, %v5981_v62, 0 }
 0x332   : > { %13239 = vmatprep.mubr.bf16.mxu1 %v11823_v23  ;;  %v6788_v20 = vor.u32 %v6787_v33, %v6784_v10  ;;  %v5845_v35 = vadd.f32 %v5790_v41, %v16661_v5  ;;  %13318 = vmatpush3.bf16.msra.mxu1 %v13788_v4  ;;  %v11767_v60 = vcombine.low %v6072_v14, %v6072_v14  ;;  %v6071_v24 = vsel %vm14129_vm10, %v5974_v37, 0  ;;  %v13169_v33 = vpop.f32.mrf.mxu1 }
 0x333   : > { %v5977_v31 = vor.u32 %v5975_v0, %v5974_v37  ;;  %v6793_v36 = vrot.slane %v6791_v3, 5  ;;  %13319 = vmatprep.subr.bf16.mxu1 %v13792_v53  ;;  %v6056_v2 = vsel %vm14129_vm10, 0, %v5984_v17  ;;  %v11764_v19 = vcombine.low %v6071_v24, %v6071_v24  ;;  %v13796_v17 = vld [vmem:[%s19365_s7 + $0xd8] sm:$0xff]  }
 0x334   : > { %v6789_v61 = vrot.slane %v6788_v20, 4  ;;  %v6803_v48 = vrot.slane %v6801_v28, 5  ;;  %v11765_v5 = vcombine.low %v6056_v2, %v6056_v2  ;;  %v11766_v41 = vcombine.high %v6056_v2, %v6056_v2  ;;  %6288 = vst [vmem:[#allocation2 + $0x98] sm:$0x1] %v11767_v60 }
 0x335   : > { %v6055_v4 = vsel %vm14129_vm10, 0, %v5977_v31  ;;  %v6798_v40 = vor.u32 %v6797_v18, %v6793_v36  ;;  %6285 = vst [vmem:[#allocation2 + $0x8c] sm:$0x1] %v11764_v19  ;;  %v5877_v10 = vmax.f32 %v5845_v35, 0.0  ;;  %v6808_v3 = vrot.slane %v6806_v15, 4 }
 0x336   : > { %v11762_v0 = vcombine.low %v6055_v4, %v6055_v4  ;;  %v11763_v23 = vcombine.high %v6055_v4, %v6055_v4  ;;  %v6794_v62 = vsel %vm14068_vm4, %v6789_v61, %v6793_v36  ;;  %13320 = vmatpush3.bf16.msra.mxu1 %v13792_v53  ;;  %6286 = vst [vmem:[#allocation2 + $0x90] sm:$0xf] %v11765_v5  ;;  %6287 = vst [vmem:[#allocation2 + $0x94] sm:$0xf] %v11766_v41 }
 0x337   : > { %v6799_v37 = vrot.slane %v6798_v40, 4  ;;  %v6811_v18 = vrot.slane %v6809_v45, 5  ;;  %v6815_v28 = vshll.u32 %v16785_v32, 16  ;;  %13321 = vmatprep.subr.bf16.mxu1 %v13793_v54  ;;  %v6821_v53 = vrot.slane %v6819_v13, 4  ;;  %v16923_v45 = vld [vmem:[#allocation2 + $0x58] sm:$0xf] }
 0x338   : > { %6283 = vst [vmem:[#allocation2 + $0x84] sm:$0xf] %v11762_v0  ;;  %6284 = vst [vmem:[#allocation2 + $0x88] sm:$0xf] %v11763_v23  ;;  %v6825_v14 = vshll.u32 %v16904_v9, 16  ;;  %v5848_v20 = vadd.f32 %v13166_v6, %v16668_v51  ;;  %v5846_v15 = vadd.f32 %v5793_v22, %v16687_v49  ;;  %v16928_v24 = vadd.f32 %v13169_v33, %v16691_v55  ;;  %v13797_v55 = vld [vmem:[%s19365_s7 + $0xd0] sm:$0xff]  }
 0x339   : > { %v6804_v35 = vsel %vm14068_vm4, %v6799_v37, %v6803_v48  ;;  %v6812_v60 = vor.u32 %v6811_v18, %v6808_v3  ;;  %v6817_v31 = vrot.slane %v6815_v28, 5  ;;  %v16930_v32 = vld [vmem:[#allocation2 + $0x60] sm:$0xf]  ;;  %v16932_v6 = vld [vmem:[#allocation2 + $0x64] sm:$0xf]  ;;  %v11788_v61 = vcombine.low %v16921_v59, %v16923_v45 }
 0x33a   : > { %v11824_v13 = vcombine.low %v6794_v62, %v6804_v35  ;;  %v6827_v36 = vrot.slane %v6825_v14, 5  ;;  %v5880_v2 = vmax.f32 %v5848_v20, 0.0  ;;  %v5878_v51 = vmax.f32 %v5846_v15, 0.0  ;;  %13322 = vmatpush3.bf16.msra.mxu1 %v13793_v54  ;;  %v5806_v62 = vpop.f32.mrf.mxu1  ;;  %v13799_v14 = vld [vmem:[%s19365_s7 + $0xc8] sm:$0xff]  }
 0x33b   : > { %v6813_v49 = vrot.slane %v6812_v60, 4  ;;  %v6822_v22 = vor.u32 %v6821_v53, %v6817_v31  ;;  %v5883_v19 = vmax.f32 %v16928_v24, 0.0  ;;  %13323 = vmatprep.subr.bf16.mxu1 %v13796_v17  ;;  %v6878_v41 = vshrl.u32 %v16921_v59, 16  ;;  %13200 = vmatmul.mubr.bf16.gmra.mxu0 %v11788_v61 }
 0x33c   : > { %13240 = vmatmul.mubr.bf16.gmra.mxu1 %v11824_v13  ;;  %v5898_v48 = vpack.c.bf16 %v5880_v2, %v5879_v8  ;;  %v5897_v5 = vpack.c.bf16 %v5878_v51, %v5877_v10  ;;  %v6881_v54 = vshll.u32 %v16921_v59, 16  ;;  %v6891_v0 = vshrl.u32 %v16923_v45, 16  ;;  %v16949_v10 = vld [vmem:[#allocation2 + $0x44] sm:$0x1]  ;;  %v13170_v2 = vpop.f32.mrf.mxu1 }
 0x33d   : > { %v6818_v4 = vsel %vm14068_vm4, %v6813_v49, %v6817_v31  ;;  %v6823_v40 = vrot.slane %v6822_v22, 4  ;;  %v11789_v23 = vcombine.low %v16930_v32, %v16932_v6  ;;  %v6902_v18 = vshrl.u32 %v16930_v32, 16 }
 0x33e   : > { %v5993_v33 = vshrl.u32 %v5898_v48, 16  ;;  %v5996_v37 = vshll.u32 %v5898_v48, 16  ;;  %v5986_v21 = vshrl.u32 %v5897_v5, 16  ;;  %v5989_v8 = vshll.u32 %v5897_v5, 16  ;;  %13324 = vmatpush3.bf16.msra.mxu1 %v13796_v17 }
 0x33f   : > { %v6828_v3 = vsel %vm14068_vm4, %v6823_v40, %v6827_v36  ;;  %13203 = vmatprep.mubr.bf16.mxu0 %v11789_v23  ;;  %v6905_v28 = vshll.u32 %v16930_v32, 16  ;;  %v6915_v53 = vshrl.u32 %v16932_v6, 16  ;;  %13325 = vmatprep.subr.bf16.mxu1 %v13797_v55  ;;  %v6832_v17 = vrot.slane %v6830_v47, 4 }
 0x340   : > { %v11825_v20 = vcombine.low %v6818_v4, %v6828_v3  ;;  %v5995_v15 = vrot.slane %v5993_v33, 7  ;;  %v5988_v35 = vrot.slane %v5986_v21, 7  ;;  %v6835_v60 = vrot.slane %v6833_v12, 5 }
 0x341   : > { %v6839_v31 = vshll.u32 %v16835_v39, 16  ;;  %v6845_v13 = vrot.slane %v6843_v42, 4  ;;  %v6849_v36 = vshll.u32 %v16949_v10, 16  ;;  %v13801_v42 = vld [vmem:[%s19365_s7 + $0xc0] sm:$0xff]   ;;  %v5849_v33 = vadd.f32 %v5806_v62, %v16695_v25 }
 0x342   : > { %13243 = vmatprep.mubr.bf16.mxu1 %v11825_v20  ;;  %v5998_v51 = vor.u32 %v5996_v37, %v5995_v15  ;;  %v6074_v49 = vsel %vm14129_vm10, %v5995_v15, 0  ;;  %v5991_v22 = vor.u32 %v5989_v8, %v5988_v35  ;;  %v6073_v47 = vsel %vm14129_vm10, %v5988_v35, 0  ;;  %13326 = vmatpush3.bf16.msra.mxu1 %v13797_v55  ;;  %v16979_v37 = vld [vmem:[#allocation2 + $0x50] sm:$0x1]  ;;  %v5809_v20 = vpop.f32.mrf.mxu1  ;;  %v16981_v15 = vld [vmem:[#allocation2 + $0x6c] sm:$0xf] }
 0x343   : > { %v11773_v61 = vcombine.low %v6074_v49, %v6074_v49  ;;  %v11770_v12 = vcombine.low %v6073_v47, %v6073_v47  ;;  %v6836_v48 = vor.u32 %v6835_v60, %v6832_v17  ;;  %v6841_v5 = vrot.slane %v6839_v31, 5  ;;  %13327 = vmatprep.subr.bf16.mxu1 %v13799_v14 }
 0x344   : > { %v6058_v4 = vsel %vm14129_vm10, 0, %v5998_v51  ;;  %v6057_v40 = vsel %vm14129_vm10, 0, %v5991_v22  ;;  %v6851_v23 = vrot.slane %v6849_v36, 5  ;;  %v5881_v60 = vmax.f32 %v5849_v33, 0.0  ;;  %v16985_v36 = vld [vmem:[#allocation2 + $0x70] sm:$0xf] }
 0x345   : > { %v11771_v55 = vcombine.low %v6058_v4, %v6058_v4  ;;  %v11772_v21 = vcombine.high %v6058_v4, %v6058_v4  ;;  %6294 = vst [vmem:[#allocation2 + $0xb0] sm:$0x1] %v11773_v61  ;;  %v11768_v8 = vcombine.low %v6057_v40, %v6057_v40  ;;  %v11769_v3 = vcombine.high %v6057_v40, %v6057_v40  ;;  %v17006_v4 = vld [vmem:[#allocation2 + $0x7c] sm:$0xf] }
 0x346   : > { %6291 = vst [vmem:[#allocation2 + $0xa4] sm:$0x1] %v11770_v12  ;;  %v6837_v35 = vrot.slane %v6836_v48, 4  ;;  %v6846_v17 = vor.u32 %v6845_v13, %v6841_v5  ;;  %v6856_v31 = vrot.slane %v6854_v34, 4  ;;  %13328 = vmatpush3.bf16.msra.mxu1 %v13799_v14  ;;  %v6859_v25 = vrot.slane %v6857_v52, 5  ;;  %v16996_v34 = vld [vmem:[%s19365_s7 + $0x178] sm:$0xff]  }
 0x347   : > { %6292 = vst [vmem:[#allocation2 + $0xa8] sm:$0xf] %v11771_v55  ;;  %6293 = vst [vmem:[#allocation2 + $0xac] sm:$0xf] %v11772_v21  ;;  %v6863_v62 = vshll.u32 %v16858_v29, 16  ;;  %v6869_v51 = vrot.slane %v6867_v63, 4  ;;  %13329 = vmatprep.subr.bf16.mxu1 %v13801_v42  ;;  %v5852_v22 = vadd.f32 %v13170_v2, %v16698_v1  ;;  %v5850_v52 = vadd.f32 %v5809_v20, %v16700_v16 }
 0x348   : > { %6289 = vst [vmem:[#allocation2 + $0x9c] sm:$0xf] %v11768_v8  ;;  %6290 = vst [vmem:[#allocation2 + $0xa0] sm:$0xf] %v11769_v3  ;;  %v6873_v13 = vshll.u32 %v16979_v37, 16  ;;  %v6842_v14 = vsel %vm14068_vm4, %v6837_v35, %v6841_v5  ;;  %v6847_v49 = vrot.slane %v6846_v17, 4  ;;  %v6860_v47 = vor.u32 %v6859_v25, %v6856_v31 }
 0x349   : > { %v6865_v61 = vrot.slane %v6863_v62, 5  ;;  %v11790_v63 = vcombine.low %v16981_v15, %v16985_v36  ;;  %v17004_v48 = vld [vmem:[#allocation2 + $0x78] sm:$0xf]  ;;  %v5884_v33 = vmax.f32 %v5852_v22, 0.0  ;;  %v5882_v5 = vmax.f32 %v5850_v52, 0.0 }
 0x34a   : > { %v6875_v12 = vrot.slane %v6873_v13, 5  ;;  %v6852_v40 = vsel %vm14068_vm4, %v6847_v49, %v6851_v23  ;;  %v6926_v55 = vshrl.u32 %v16981_v15, 16  ;;  %13330 = vmatpush3.bf16.msra.mxu1 %v13801_v42  ;;  %v6861_v16 = vrot.slane %v6860_v47, 4 }
 0x34b   : > { %v11826_v1 = vcombine.low %v6842_v14, %v6852_v40  ;;  %v6870_v2 = vor.u32 %v6869_v51, %v6865_v61  ;;  %13204 = vmatmul.mubr.bf16.gmra.mxu0 %v11790_v63  ;;  %v6929_v21 = vshll.u32 %v16981_v15, 16  ;;  %13411 = vmatprep.subr.bf16.mxu1 %v16996_v34  ;;  %v5900_v8 = vpack.c.bf16 %v5884_v33, %v5883_v19  ;;  %v17022_v19 = vld [vmem:[#allocation2 + $0x5c] sm:$0x1] }
 0x34c   : > { %v5899_v3 = vpack.c.bf16 %v5882_v5, %v5881_v60  ;;  %v6939_v20 = vshrl.u32 %v16985_v36, 16  ;;  %v11791_v23 = vcombine.low %v17004_v48, %v17006_v4  ;;  %v6866_v42 = vsel %vm14068_vm4, %v6861_v16, %v6865_v61 }
 0x34d   : > { %13244 = vmatmul.mubr.bf16.gmra.mxu1 %v11826_v1  ;;  %v6871_v35 = vrot.slane %v6870_v2, 4  ;;  %v6950_v17 = vshrl.u32 %v17004_v48, 16  ;;  %v6953_v31 = vshll.u32 %v17004_v48, 16  ;;  %v6007_v25 = vshrl.u32 %v5900_v8, 16 }
 0x34e   : > { %v6010_v62 = vshll.u32 %v5900_v8, 16  ;;  %v6000_v51 = vshrl.u32 %v5899_v3, 16  ;;  %v6003_v24 = vshll.u32 %v5899_v3, 16  ;;  %13207 = vmatprep.mubr.bf16.mxu0 %v11791_v23  ;;  %v6963_v13 = vshrl.u32 %v17006_v4, 16  ;;  %v17041_v23 = vld [vmem:[#allocation2 + $0x68] sm:$0x1] }
 0x34f   : > { %v6876_v60 = vsel %vm14068_vm4, %v6871_v35, %v6875_v12  ;;  %v6880_v14 = vrot.slane %v6878_v41, 4  ;;  %v6883_v49 = vrot.slane %v6881_v54, 5  ;;  %v6009_v52 = vrot.slane %v6007_v25, 7 }
 0x350   : > { %v11827_v22 = vcombine.low %v6866_v42, %v6876_v60  ;;  %v6002_v47 = vrot.slane %v6000_v51, 7  ;;  %v6887_v61 = vshll.u32 %v16923_v45, 16  ;;  %v6893_v40 = vrot.slane %v6891_v0, 4  ;;  %v17043_v0 = vld [vmem:[#allocation2 + $0x84] sm:$0xf] }
 0x351   : > { %v6884_v63 = vor.u32 %v6883_v49, %v6880_v14  ;;  %v6897_v33 = vshll.u32 %v17022_v19, 16  ;;  %v6904_v12 = vrot.slane %v6902_v18, 4  ;;  %v6012_v5 = vor.u32 %v6010_v62, %v6009_v52  ;;  %v17051_v62 = vld [vmem:[#allocation2 + $0x88] sm:$0xf] }
 0x352   : > { %13247 = vmatprep.mubr.bf16.mxu1 %v11827_v22  ;;  %v6076_v41 = vsel %vm14129_vm10, %v6009_v52, 0  ;;  %v6005_v54 = vor.u32 %v6003_v24, %v6002_v47  ;;  %v6075_v1 = vsel %vm14129_vm10, %v6002_v47, 0  ;;  %v6889_v3 = vrot.slane %v6887_v61, 5  ;;  %v17056_v47 = vld [vmem:[#allocation2 + $0x90] sm:$0xf] }
 0x353   : > { %v11779_v16 = vcombine.low %v6076_v41, %v6076_v41  ;;  %v11776_v2 = vcombine.low %v6075_v1, %v6075_v1  ;;  %v6885_v8 = vrot.slane %v6884_v63, 4  ;;  %v6060_v18 = vsel %vm14129_vm10, 0, %v6012_v5  ;;  %19738 = vst [vmem:[#allocation18_spill] sm:$0xff] %v17056_v47  ;;  %v17058_v61 = vld [vmem:[#allocation2 + $0x94] sm:$0xf] }
 0x354   : > { %v6059_v42 = vsel %vm14129_vm10, 0, %v6005_v54  ;;  %v6899_v35 = vrot.slane %v6897_v33, 5  ;;  %v6907_v25 = vrot.slane %v6905_v28, 5  ;;  %v11777_v51 = vcombine.low %v6060_v18, %v6060_v18  ;;  %19739 = vst [vmem:[#allocation28_spill] sm:$0xff] %v17058_v61 }
 0x355   : > { %v11778_v24 = vcombine.high %v6060_v18, %v6060_v18  ;;  %6300 = vst [vmem:[#allocation2 + $0xc8] sm:$0x1] %v11779_v16  ;;  %v11774_v60 = vcombine.low %v6059_v42, %v6059_v42  ;;  %v11775_v14 = vcombine.high %v6059_v42, %v6059_v42  ;;  %6297 = vst [vmem:[#allocation2 + $0xbc] sm:$0x1] %v11776_v2  ;;  %v6911_v58 = vshll.u32 %v16932_v6, 16 }
 0x356   : > { %v6890_v49 = vsel %vm14068_vm4, %v6885_v8, %v6889_v3  ;;  %v6894_v22 = vor.u32 %v6893_v40, %v6889_v3  ;;  %v6908_v52 = vor.u32 %v6907_v25, %v6904_v12  ;;  %6298 = vst [vmem:[#allocation2 + $0xc0] sm:$0xf] %v11777_v51  ;;  %v6917_v28 = vrot.slane %v6915_v53, 4  ;;  %v17071_v8 = vld [vmem:[#allocation2 + $0x74] sm:$0x1] }
 0x357   : > { %6299 = vst [vmem:[#allocation2 + $0xc4] sm:$0xf] %v11778_v24  ;;  %6295 = vst [vmem:[#allocation2 + $0xb4] sm:$0xf] %v11774_v60  ;;  %v6921_v63 = vshll.u32 %v17041_v23, 16  ;;  %v11792_v33 = vcombine.low %v17043_v0, %v17051_v62  ;;  %v6974_v40 = vshrl.u32 %v17043_v0, 16  ;;  %v11793_v2 = vcombine.low %v17056_v47, %v17058_v61 }
 0x358   : > { %6296 = vst [vmem:[#allocation2 + $0xb8] sm:$0xf] %v11775_v14  ;;  %v6895_v12 = vrot.slane %v6894_v22, 4  ;;  %v6909_v5 = vrot.slane %v6908_v52, 4  ;;  %v6913_v41 = vrot.slane %v6911_v58, 5  ;;  %v6977_v54 = vshll.u32 %v17043_v0, 16 }
 0x359   : > { %v6923_v1 = vrot.slane %v6921_v63, 5  ;;  %13208 = vmatmul.mubr.bf16.gmra.mxu0 %v11792_v33  ;;  %v6987_v16 = vshrl.u32 %v17051_v62, 16  ;;  %v6998_v53 = vshrl.u32 %v17056_v47, 16  ;;  %v7001_v25 = vshll.u32 %v17056_v47, 16  ;;  %v17083_v22 = vld [vmem:[#allocation2 + $0x80] sm:$0x1] }
 0x35a   : > { %v6900_v3 = vsel %vm14068_vm4, %v6895_v12, %v6899_v35  ;;  %v6914_v18 = vsel %vm14068_vm4, %v6909_v5, %v6913_v41  ;;  %v6918_v42 = vor.u32 %v6917_v28, %v6913_v41  ;;  %13211 = vmatprep.mubr.bf16.mxu0 %v11793_v2  ;;  %v6928_v60 = vrot.slane %v6926_v55, 4  ;;  %v17096_v12 = vld [vmem:[#allocation2 + $0xa0] sm:$0xf] }
 0x35b   : > { %v11828_v51 = vcombine.low %v6890_v49, %v6900_v3  ;;  %v6931_v14 = vrot.slane %v6929_v21, 5  ;;  %v6935_v35 = vshll.u32 %v16985_v36, 16  ;;  %v6941_v58 = vrot.slane %v6939_v20, 4  ;;  %v17089_v49 = vld [vmem:[#allocation2 + $0x9c] sm:$0xf] }
 0x35c   : > { %v6919_v52 = vrot.slane %v6918_v42, 4  ;;  %v6945_v28 = vshll.u32 %v17071_v8, 16  ;;  %19740 = vst [vmem:[#allocation36_spill] sm:$0xff] %v17089_v49  ;;  %v6952_v55 = vrot.slane %v6950_v17, 4  ;;  %v6955_v21 = vrot.slane %v6953_v31, 5 }
 0x35d   : > { %13248 = vmatmul.mubr.bf16.gmra.mxu1 %v11828_v51  ;;  %v6932_v63 = vor.u32 %v6931_v14, %v6928_v60  ;;  %v6959_v33 = vshll.u32 %v17006_v4, 16  ;;  %v6937_v20 = vrot.slane %v6935_v35, 5  ;;  %v6965_v2 = vrot.slane %v6963_v13, 4  ;;  %v17102_v17 = vld [vmem:[#allocation2 + $0xa8] sm:$0xf] }
 0x35e   : > { %v6924_v5 = vsel %vm14068_vm4, %v6919_v52, %v6923_v1  ;;  %v6947_v41 = vrot.slane %v6945_v28, 5  ;;  %v6956_v51 = vor.u32 %v6955_v21, %v6952_v55  ;;  %19741 = vst [vmem:[#allocation51_spill] sm:$0xff] %v17102_v17  ;;  %v17104_v14 = vld [vmem:[#allocation2 + $0xac] sm:$0xf]  ;;  %v6969_v57 = vshll.u32 %v17083_v22, 16 }
 0x35f   : > { %v11829_v3 = vcombine.low %v6914_v18, %v6924_v5  ;;  %v6933_v42 = vrot.slane %v6932_v63, 4  ;;  %v6961_v60 = vrot.slane %v6959_v33, 5  ;;  %v6942_v31 = vor.u32 %v6941_v58, %v6937_v20  ;;  %v17134_v24 = vld [vmem:[#allocation2 + $0xb4] sm:$0xf] }
 0x360   : > { %v11794_v46 = vcombine.low %v17089_v49, %v17096_v12  ;;  %v7022_v1 = vshrl.u32 %v17089_v49, 16  ;;  %v6957_v18 = vrot.slane %v6956_v51, 4  ;;  %v7025_v35 = vshll.u32 %v17089_v49, 16  ;;  %v17127_v51 = vld [vmem:[#allocation2 + $0x98] sm:$0x1]  ;;  %19743 = vst [vmem:[#allocation50_spill] sm:$0xff] %v17134_v24 }
 0x361   : > { %13251 = vmatprep.mubr.bf16.mxu1 %v11829_v3  ;;  %v6938_v13 = vsel %vm14068_vm4, %v6933_v42, %v6937_v20  ;;  %v6966_v52 = vor.u32 %v6965_v2, %v6961_v60  ;;  %v6943_v28 = vrot.slane %v6942_v31, 4  ;;  %v6971_v63 = vrot.slane %v6969_v57, 5  ;;  %v17120_v3 = vld [vmem:[#allocation2 + $0x8c] sm:$0x1]  ;;  %19742 = vst [vmem:[#allocation41_spill] sm:$0xff] %v17127_v51 }
 0x362   : > { %13212 = vmatmul.mubr.bf16.gmra.mxu0 %v11794_v46  ;;  %v7035_v58 = vshrl.u32 %v17096_v12, 16  ;;  %v11795_v55 = vcombine.low %v17102_v17, %v17104_v14  ;;  %v6962_v21 = vsel %vm14068_vm4, %v6957_v18, %v6961_v60  ;;  %v7046_v5 = vshrl.u32 %v17102_v17, 16 }
 0x363   : > { %v6967_v33 = vrot.slane %v6966_v52, 4  ;;  %v7049_v20 = vshll.u32 %v17102_v17, 16  ;;  %v6948_v2 = vsel %vm14068_vm4, %v6943_v28, %v6947_v41  ;;  %v7059_v46 = vshrl.u32 %v17104_v14, 16  ;;  %v17136_v41 = vld [vmem:[#allocation2 + $0xb8] sm:$0xf] }
 0x364   : > { %13215 = vmatprep.mubr.bf16.mxu0 %v11795_v55  ;;  %v6976_v57 = vrot.slane %v6974_v40, 4  ;;  %v6979_v42 = vrot.slane %v6977_v54, 5  ;;  %v11830_v60 = vcombine.low %v6938_v13, %v6948_v2  ;;  %v6983_v18 = vshll.u32 %v17051_v62, 16 }
 0x365   : > { %v6972_v31 = vsel %vm14068_vm4, %v6967_v33, %v6971_v63  ;;  %v6989_v52 = vrot.slane %v6987_v16, 4  ;;  %v6993_v40 = vshll.u32 %v17120_v3, 16  ;;  %v7000_v54 = vrot.slane %v6998_v53, 4 }
 0x366   : > { %v11831_v28 = vcombine.low %v6962_v21, %v6972_v31  ;;  %v6980_v55 = vor.u32 %v6979_v42, %v6976_v57  ;;  %13252 = vmatmul.mubr.bf16.gmra.mxu1 %v11830_v60  ;;  %v6985_v13 = vrot.slane %v6983_v18, 5  ;;  %v7003_v63 = vrot.slane %v7001_v25, 5  ;;  %v17150_v18 = vld [vmem:[#allocation2 + $0xa4] sm:$0x1] }
 0x367   : > { %v7007_v33 = vshll.u32 %v17058_v61, 16  ;;  %v19744_v16 = vshrl.u32 %v17058_v61, 16  ;;  %v6995_v49 = vrot.slane %v6993_v40, 5  ;;  %v7017_v21 = vshll.u32 %v17127_v51, 16  ;;  %19745 = vst [vmem:[#allocation55_spill] sm:$0xff] %v17150_v18 }
 0x368   : > { %13255 = vmatprep.mubr.bf16.mxu1 %v11831_v28  ;;  %v6981_v17 = vrot.slane %v6980_v55, 4  ;;  %v11796_v57 = vcombine.low %v17134_v24, %v17136_v41  ;;  %v6990_v42 = vor.u32 %v6989_v52, %v6985_v13  ;;  %v7004_v53 = vor.u32 %v7003_v63, %v7000_v54 }
 0x369   : > { %v7013_v2 = vrot.slane %v19744_v16, 4  ;;  %v7009_v60 = vrot.slane %v7007_v33, 5  ;;  %v7070_v31 = vshrl.u32 %v17134_v24, 16  ;;  %v7019_v61 = vrot.slane %v7017_v21, 5 }
 0x36a   : > { %v6986_v25 = vsel %vm14068_vm4, %v6981_v17, %v6985_v13  ;;  %13216 = vmatmul.mubr.bf16.gmra.mxu0 %v11796_v57  ;;  %v7073_v28 = vshll.u32 %v17134_v24, 16  ;;  %v7083_v55 = vshrl.u32 %v17136_v41, 16  ;;  %v6991_v40 = vrot.slane %v6990_v42, 4  ;;  %v17165_v42 = vld [vmem:[#allocation2 + $0xb0] sm:$0x1] }
 0x36b   : > { %v7005_v16 = vrot.slane %v7004_v53, 4  ;;  %v7014_v51 = vor.u32 %v7013_v2, %v7009_v60  ;;  %v7024_v47 = vrot.slane %v7022_v1, 4  ;;  %v19746_v52 = vcombine.low %v16672_v7, %v16683_v27 }
 0x36c   : > { %v7027_v54 = vrot.slane %v7025_v35, 5  ;;  %v7031_v63 = vshll.u32 %v17096_v12, 16  ;;  %v7037_v33 = vrot.slane %v7035_v58, 4  ;;  %v7041_v17 = vshll.u32 %v17150_v18, 16 }
 0x36d   : > { %13283 = vmatprep.mubr.bf16.mxu0 %v19746_v52  ;;  %v6996_v13 = vsel %vm14068_vm4, %v6991_v40, %v6995_v49  ;;  %v7010_v21 = vsel %vm14068_vm4, %v7005_v16, %v7009_v60  ;;  %v7015_v57 = vrot.slane %v7014_v51, 4  ;;  %v7048_v1 = vrot.slane %v7046_v5, 4  ;;  %v13881_v5 = vld [vmem:[#allocation2 + $0xc] sm:$0xf] }
 0x36e   : > { %v11832_v2 = vcombine.low %v6986_v25, %v6996_v13  ;;  %v7028_v53 = vor.u32 %v7027_v54, %v7024_v47  ;;  %v7033_v7 = vrot.slane %v7031_v63, 5  ;;  %v7043_v27 = vrot.slane %v7041_v17, 5  ;;  %v13882_v47 = vld [vmem:[#allocation2 + $0x10] sm:$0xf] }
 0x36f   : > { %v7020_v35 = vsel %vm14068_vm4, %v7015_v57, %v7019_v61  ;;  %v7051_v58 = vrot.slane %v7049_v20, 5  ;;  %v7055_v52 = vshll.u32 %v17104_v14, 16  ;;  %v7061_v24 = vrot.slane %v7059_v46, 4 }
 0x370   : > { %13256 = vmatmul.mubr.bf16.gmra.mxu1 %v11832_v2  ;;  %v11833_v49 = vcombine.low %v7010_v21, %v7020_v35  ;;  %v7029_v40 = vrot.slane %v7028_v53, 4  ;;  %v7038_v18 = vor.u32 %v7037_v33, %v7033_v7  ;;  %v7065_v51 = vshll.u32 %v17165_v42, 16 }
 0x371   : > { %v7052_v60 = vor.u32 %v7051_v58, %v7048_v1  ;;  %v7057_v16 = vrot.slane %v7055_v52, 5  ;;  %v11846_v25 = vrot.slane %v13881_v5, 9  ;;  %v7440_v54 = vrot.slane %v13882_v47, 5  ;;  %v17178_v1 = vld [vmem:[#allocation2 + $0xbc] sm:$0x1] }
 0x372   : > { %13259 = vmatprep.mubr.bf16.mxu1 %v11833_v49  ;;  %v7034_v61 = vsel %vm14068_vm4, %v7029_v40, %v7033_v7  ;;  %v7039_v20 = vrot.slane %v7038_v18, 4  ;;  %v7067_v63 = vrot.slane %v7065_v51, 5  ;;  %v7443_v46 = vrot.slane %v16796_v50, 5  ;;  %v17185_v58 = vld [vmem:[#allocation2 + $0xc] sm:$0xf] }
 0x373   : > { %v7053_v17 = vrot.slane %v7052_v60, 4  ;;  %v7062_v13 = vor.u32 %v7061_v24, %v7057_v16  ;;  %v7441_v33 = vsel %vm14113_vm9, %v11846_v25, %v7440_v54  ;;  %v7442_v21 = vrot.slane %v7440_v54, 4  ;;  %v17187_v52 = vld [vmem:[#allocation2 + $0x10] sm:$0xf]  ;;  %v13884_v25 = vld [vmem:[#allocation2 + $0x1c] sm:$0xf] }
 0x374   : > { %v7044_v57 = vsel %vm14068_vm4, %v7039_v20, %v7043_v27  ;;  %v7072_v2 = vrot.slane %v7070_v31, 4  ;;  %v7075_v53 = vrot.slane %v7073_v28, 5  ;;  %v7079_v35 = vshll.u32 %v17136_v41, 16  ;;  %v13802_v31 = vld [vmem:[%s19365_s7 + $0x130] sm:$0xff]  }
 0x375   : > { %v11834_v7 = vcombine.low %v7034_v61, %v7044_v57  ;;  %v7058_v18 = vsel %vm14068_vm4, %v7053_v17, %v7057_v16  ;;  %v7063_v50 = vrot.slane %v7062_v13, 4  ;;  %v7444_v24 = vsel %vm14113_vm9, %v7442_v21, %v7443_v46  ;;  %v13883_v16 = vld [vmem:[#allocation2 + $0x18] sm:$0xf] }
 0x376   : > { %v11878_v49 = vcombine.low %v7441_v33, %v7444_v24  ;;  %v7076_v27 = vor.u32 %v7075_v53, %v7072_v2  ;;  %v7081_v40 = vrot.slane %v7079_v35, 5  ;;  %v7085_v51 = vrot.slane %v7083_v55, 4  ;;  %v17205_v53 = vld [vmem:[#allocation2 + $0x18] sm:$0xf]  ;;  %v13886_v24 = vld [vmem:[#allocation2 + $0x28] sm:$0xf] }
 0x377   : > { %v7068_v28 = vsel %vm14068_vm4, %v7063_v50, %v7067_v63  ;;  %v7089_v60 = vshll.u32 %v17178_v1, 16  ;;  %v11847_v5 = vrot.slane %v13883_v16, 9  ;;  %v7447_v47 = vrot.slane %v13884_v25, 5 }
 0x378   : > { %13260 = vmatmul.mubr.bf16.gmra.mxu1 %v11834_v7  ;;  %v11835_v54 = vcombine.low %v7058_v18, %v7068_v28  ;;  %13284 = vmatmul.mubr.bf16.vlgmr.msra.gmra.mxu0 %v11878_v49  ;;  %v7077_v61 = vrot.slane %v7076_v27, 4  ;;  %v7086_v20 = vor.u32 %v7085_v51, %v7081_v40  ;;  %v11917_v55 = vcombine.low %v17185_v58, %v17187_v52  ;;  %v13885_v18 = vld [vmem:[#allocation2 + $0x24] sm:$0xf] }
 0x379   : > { %13364 = vmatpush3.bf16.msra.mxu0 %v16849_v43  ;;  %v7091_v46 = vrot.slane %v7089_v60, 5  ;;  %v7448_v63 = vsel %vm14113_vm9, %v11847_v5, %v7447_v47  ;;  %v7449_v17 = vrot.slane %v7447_v47, 4  ;;  %v8268_v13 = vshrl.u32 %v17185_v58, 16  ;;  %v13805_v43 = vld [vmem:[%s19365_s7 + $0x128] sm:$0xff]   ;;  %v13887_v60 = vld [vmem:[#allocation2 + $0x30] sm:$0xf] }
 0x37a   : > { %13263 = vmatprep.mubr.bf16.mxu1 %v11835_v54  ;;  %v7082_v33 = vsel %vm14068_vm4, %v7077_v61, %v7081_v40  ;;  %v7087_v21 = vrot.slane %v7086_v20, 4  ;;  %v8271_v57 = vshll.u32 %v17185_v58, 16  ;;  %v8281_v2 = vshrl.u32 %v17187_v52, 16  ;;  %13365 = vmatprep.subr.bf16.mxu0 %v13802_v31  ;;  %v17215_v40 = vld [vmem:[#allocation2 + $0x1c] sm:$0xf] }
 0x37b   : > { %v19747_v35 = vrot.slane %v16708_v26, 5  ;;  %v11848_v50 = vrot.slane %v13885_v18, 9  ;;  %v7454_v49 = vrot.slane %v13886_v24, 5  ;;  %v7457_v27 = vrot.slane %v16874_v30, 5  ;;  %v13888_v5 = vld [vmem:[#allocation2 + $0x34] sm:$0xf] }
 0x37c   : > { %v7092_v51 = vsel %vm14068_vm4, %v7087_v21, %v7091_v46  ;;  %v11849_v16 = vrot.slane %v13887_v60, 9  ;;  %v7461_v25 = vrot.slane %v13888_v5, 5  ;;  %v17219_v26 = vld [vmem:[#allocation2 + $0x24] sm:$0xf]  ;;  %v17221_v47 = vld [vmem:[#allocation2 + $0x28] sm:$0xf] }
 0x37d   : > { %v7451_v7 = vsel %vm14113_vm9, %v7449_v17, %v19747_v35  ;;  %v11836_v54 = vcombine.low %v7082_v33, %v7092_v51  ;;  %v7455_v61 = vsel %vm14113_vm9, %v11848_v50, %v7454_v49  ;;  %v7456_v20 = vrot.slane %v7454_v49, 4  ;;  %13366 = vmatpush3.bf16.msra.mxu0 %v13802_v31  ;;  %v13808_v33 = vld [vmem:[%s19365_s7 + $0x120] sm:$0xff]   ;;  %v17244_v51 = vld [vmem:[#allocation2 + $0x30] sm:$0xf]  ;;  %v17428_v60 = vld [vmem:[#allocation2 + $0x94] sm:$0xf] }
 0x37e   : > { %v11879_v28 = vcombine.low %v7448_v63, %v7451_v7  ;;  %v7464_v30 = vrot.slane %v16904_v9, 5  ;;  %v7462_v46 = vsel %vm14113_vm9, %v11849_v16, %v7461_v25  ;;  %v7463_v63 = vrot.slane %v7461_v25, 4  ;;  %13367 = vmatprep.subr.bf16.mxu0 %v13805_v43  ;;  %v17251_v25 = vld [vmem:[#allocation2 + $0x3c] sm:$0xf] }
 0x37f   : > { %v11918_v17 = vcombine.low %v17205_v53, %v17215_v40  ;;  %v8292_v21 = vshrl.u32 %v17205_v53, 16  ;;  %v7458_v31 = vsel %vm14113_vm9, %v7456_v20, %v7457_v27  ;;  %v11919_v7 = vcombine.low %v17219_v26, %v17221_v47 }
 0x380   : > { %13287 = vmatprep.mubr.bf16.mxu0 %v11879_v28  ;;  %13264 = vmatmul.mubr.bf16.gmra.mxu1 %v11836_v54  ;;  %v11880_v18 = vcombine.low %v7455_v61, %v7458_v31  ;;  %v7465_v50 = vsel %vm14113_vm9, %v7463_v63, %v7464_v30  ;;  %v17246_v28 = vld [vmem:[#allocation2 + $0x34] sm:$0xf]  ;;  %v11850_v16 = vrot.slane %v16826_v11, 9  ;;  %v7468_v5 = vrot.slane %v16835_v39, 5  ;;  %v13811_v54 = vld [vmem:[%s19365_s7 + $0x118] sm:$0xff]  }
 0x381   : > { %13331 = vmatprep.mubr.bf16.mxu1 %v11917_v55  ;;  %v11881_v27 = vcombine.low %v7462_v46, %v7465_v50  ;;  %13368 = vmatpush3.bf16.msra.mxu0 %v13805_v43  ;;  %v7471_v61 = vrot.slane %v16949_v10, 5  ;;  %v11851_v20 = vrot.slane %v16856_v44, 9  ;;  %v7475_v55 = vrot.slane %v16858_v29, 5  ;;  %v17260_v46 = vld [vmem:[#allocation2 + $0x40] sm:$0xf] }
 0x382   : > { %13288 = vmatmul.mubr.bf16.gmra.mxu0 %v11880_v18  ;;  %v7478_v30 = vrot.slane %v16979_v37, 5  ;;  %13369 = vmatprep.subr.bf16.mxu0 %v13808_v33  ;;  %v7469_v11 = vsel %vm14113_vm9, %v11850_v16, %v7468_v5  ;;  %v7470_v39 = vrot.slane %v7468_v5, 4  ;;  %v11920_v43 = vcombine.low %v17244_v51, %v17246_v28  ;;  %v17277_v16 = vld [vmem:[#allocation2 + $0x48] sm:$0xf]  ;;  %v17279_v5 = vld [vmem:[#allocation2 + $0x4c] sm:$0xf] }
 0x383   : > { %13291 = vmatprep.mubr.bf16.mxu0 %v11881_v27  ;;  %v7476_v44 = vsel %vm14113_vm9, %v11851_v20, %v7475_v55  ;;  %v7477_v10 = vrot.slane %v7475_v55, 4  ;;  %v11921_v18 = vcombine.low %v17251_v25, %v17260_v46  ;;  %v13814_v27 = vld [vmem:[%s19365_s7 + $0x110] sm:$0xff]   ;;  %v7482_v50 = vrot.slane %v16923_v45, 5  ;;  %v17329_v63 = vld [vmem:[#allocation2 + $0x6c] sm:$0xf] }
 0x384   : > { %v7472_v31 = vsel %vm14113_vm9, %v7470_v39, %v7471_v61  ;;  %v11852_v61 = vrot.slane %v16921_v59, 9  ;;  %v17285_v39 = vld [vmem:[#allocation2 + $0x54] sm:$0xf]  ;;  %v7485_v29 = vrot.slane %v17022_v19, 5  ;;  %v7492_v59 = vrot.slane %v17041_v23, 5  ;;  %19749 = vst [vmem:[#allocation10_spill] sm:$0xff] %v17329_v63 }
 0x385   : > { %13370 = vmatpush3.bf16.msra.mxu0 %v13808_v33  ;;  %v11882_v20 = vcombine.low %v7469_v11, %v7472_v31  ;;  %v7479_v55 = vsel %vm14113_vm9, %v7477_v10, %v7478_v30  ;;  %v11853_v11 = vrot.slane %v16930_v32, 9  ;;  %v17293_v31 = vld [vmem:[#allocation2 + $0x58] sm:$0xf]  ;;  %v7489_v30 = vrot.slane %v16932_v6, 5  ;;  %v13818_v45 = vld [vmem:[%s19365_s7 + $0x170] sm:$0xff]  }
 0x386   : > { %13371 = vmatprep.subr.bf16.mxu0 %v13811_v54  ;;  %v11883_v33 = vcombine.low %v7476_v44, %v7479_v55  ;;  %v11922_v10 = vcombine.low %v17277_v16, %v17279_v5  ;;  %v7483_v32 = vsel %vm14113_vm9, %v11852_v61, %v7482_v50  ;;  %v7484_v19 = vrot.slane %v7482_v50, 4  ;;  %v13819_v50 = vld [vmem:[%s19365_s7 + $0x108] sm:$0xff]  }
 0x387   : > { %v7490_v23 = vsel %vm14113_vm9, %v11853_v11, %v7489_v30  ;;  %v7491_v44 = vrot.slane %v7489_v30, 4  ;;  %v11923_v55 = vcombine.low %v17285_v39, %v17293_v31  ;;  %v11854_v11 = vrot.slane %v16981_v15, 9  ;;  %v17322_v30 = vld [vmem:[#allocation2 + $0x64] sm:$0xf]  ;;  %v17391_v61 = vld [vmem:[#allocation2 + $0x88] sm:$0xf] }
 0x388   : > { %13332 = vmatmul.mubr.bf16.vlgmr.msra.gmra.mxu1 %v11918_v17  ;;  %19748 = vst [vmem:[#allocation58_spill] sm:$0xff] %v17322_v30  ;;  %v7496_v17 = vrot.slane %v16985_v36, 5  ;;  %v8277_v35 = vshll.u32 %v17187_v52, 16 }
 0x389   : > { %13335 = vmatprep.mubr.bf16.mxu1 %v11919_v7  ;;  %13372 = vmatpush3.bf16.msra.mxu0 %v13811_v54  ;;  %v17312_v7 = vld [vmem:[#allocation2 + $0x60] sm:$0xf]  ;;  %v7486_v54 = vsel %vm14113_vm9, %v7484_v19, %v7485_v29  ;;  %v7493_v6 = vsel %vm14113_vm9, %v7491_v44, %v7492_v59  ;;  %v13821_v29 = vld [vmem:[%s19365_s7 + $0x168] sm:$0xff]   ;;  %v11855_v19 = vrot.slane %v17004_v48, 9  ;;  %v7513_v44 = vrot.slane %v17120_v3, 5  ;;  %v19756_v3 = vld [vmem:[#allocation51_spill] sm:$0xff] }
 0x38a   : > { %13292 = vmatmul.mubr.bf16.gmra.mxu0 %v11882_v20  ;;  %13373 = vmatprep.subr.bf16.mxu0 %v13814_v27  ;;  %v11884_v37 = vcombine.low %v7483_v32, %v7486_v54  ;;  %v11885_v15 = vcombine.low %v7490_v23, %v7493_v6  ;;  %v7506_v32 = vrot.slane %v17083_v22, 5  ;;  %v17337_v54 = vld [vmem:[#allocation2 + $0x70] sm:$0xf]  ;;  %v17341_v36 = vsel %vm14113_vm9, %v11854_v11, %v7496_v17  ;;  %v13824_v48 = vld [vmem:[%s19365_s7 + $0x100] sm:$0xff]   ;;  %v17371_v6 = vld [vmem:[#allocation2 + $0x7c] sm:$0xf] }
 0x38b   : > { %13295 = vmatprep.mubr.bf16.mxu0 %v11883_v33  ;;  %13412 = vmatpush3.bf16.msra.mxu1 %v16996_v34  ;;  %v7499_v33 = vrot.slane %v17071_v8, 5  ;;  %v7503_v34 = vrot.slane %v17006_v4, 5  ;;  %19750 = vst [vmem:[#allocation13_spill] sm:$0xff] %v17337_v54  ;;  %v7498_v8 = vrot.slane %v7496_v17, 4  ;;  %v11924_v59 = vcombine.low %v17312_v7, %v17322_v30  ;;  %v13823_v17 = vld [vmem:[%s19365_s7 + $0x160] sm:$0xff]  }
 0x38c   : > { %13413 = vmatprep.subr.bf16.mxu1 %v13818_v45  ;;  %v11925_v11 = vcombine.low %v17329_v63, %v17337_v54  ;;  %v19754_v20 = vld [vmem:[#allocation36_spill] sm:$0xff] }
 0x38d   : > { %13374 = vmatpush3.bf16.msra.mxu0 %v13814_v27  ;;  %v17351_v4 = vsel %vm14113_vm9, %v11855_v19, %v7503_v34  ;;  %v7505_v22 = vrot.slane %v7503_v34, 4  ;;  %v17363_v23 = vsel %vm14113_vm9, %v7498_v8, %v7499_v33  ;;  %v11856_v34 = vrot.slane %v17043_v0, 9  ;;  %v17384_v19 = vld [vmem:[#allocation2 + $0x84] sm:$0xf]  ;;  %v17396_v0 = vld [vmem:[%s19365_s7 + $0x1b8] sm:$0xff]  }
 0x38e   : > { %13375 = vmatprep.subr.bf16.mxu0 %v13819_v50 }
 0x38f   : > { %13414 = vmatpush3.bf16.msra.mxu1 %v13818_v45  ;;  %v17369_v45 = vld [vmem:[#allocation2 + $0x78] sm:$0xf]  ;;  %v17380_v33 = vsel %vm14113_vm9, %v7505_v22, %v7506_v32  ;;  %v19753_v32 = vld [vmem:[#allocation41_spill] sm:$0xff] }
 0x390   : > { %13336 = vmatmul.mubr.bf16.gmra.mxu1 %v11920_v43  ;;  %13415 = vmatprep.subr.bf16.mxu1 %v13821_v29  ;;  %v11886_v43 = vcombine.low %v17341_v36, %v17363_v23  ;;  %v11887_v27 = vcombine.low %v17351_v4, %v17380_v33  ;;  %v19751_v36 = vld [vmem:[#allocation18_spill] sm:$0xff]  ;;  %v7520_v22 = vrot.slane %v19753_v32, 5 }
 0x391   : > { %13339 = vmatprep.mubr.bf16.mxu1 %v11921_v18  ;;  %13376 = vmatpush3.bf16.msra.mxu0 %v13819_v50  ;;  %v7510_v18 = vrot.slane %v17051_v62, 5  ;;  %v11857_v23 = vrot.slane %v19751_v36, 9  ;;  %v19752_v50 = vld [vmem:[#allocation28_spill] sm:$0xff]  ;;  %v17439_v36 = vld [vmem:[#allocation2 + $0x9c] sm:$0xf]  ;;  %v7531_v62 = vrot.slane %v17104_v14, 5 }
 0x392   : > { %13296 = vmatmul.mubr.bf16.gmra.mxu0 %v11884_v37  ;;  %13377 = vmatprep.subr.bf16.mxu0 %v13824_v48  ;;  %v7517_v37 = vrot.slane %v19752_v50, 5  ;;  %v17526_v14 = vld [vmem:[#allocation2 + $0x20] sm:$0x1] }
 0x393   : > { %13299 = vmatprep.mubr.bf16.mxu0 %v11885_v15  ;;  %13416 = vmatpush3.bf16.msra.mxu1 %v13821_v29  ;;  %v17405_v4 = vsel %vm14113_vm9, %v11856_v34, %v7510_v18  ;;  %v7512_v33 = vrot.slane %v7510_v18, 4  ;;  %v13826_v15 = vld [vmem:[%s19365_s7 + $0x158] sm:$0xff]   ;;  %v17419_v18 = vld [vmem:[#allocation2 + $0x90] sm:$0xf]  ;;  %v11859_v29 = vrot.slane %v19756_v3, 9  ;;  %v7533_v49 = vrot.slane %v7531_v62, 4 }
 0x394   : > { %13417 = vmatprep.subr.bf16.mxu1 %v13823_v17  ;;  %v17414_v50 = vsel %vm14113_vm9, %v11857_v23, %v7517_v37  ;;  %v7519_v32 = vrot.slane %v7517_v37, 4  ;;  %v11858_v23 = vrot.slane %v19754_v20, 9  ;;  %v17464_v3 = vld [vmem:[#allocation2 + $0xa8] sm:$0xf]  ;;  %v19761_v20 = vshrl.u32 %v17219_v26, 16 }
 0x395   : > { %13378 = vmatpush3.bf16.msra.mxu0 %v13824_v48  ;;  %v17423_v8 = vsel %vm14113_vm9, %v7512_v33, %v7513_v44  ;;  %v7524_v44 = vrot.slane %v17096_v12, 5  ;;  %v19755_v33 = vld [vmem:[#allocation55_spill] sm:$0xff]  ;;  %v13828_v12 = vld [vmem:[%s19365_s7 + $0x150] sm:$0xff]  }
 0x396   : > { %13459 = vmatprep.subr.bf16.mxu0 %v17396_v0  ;;  %v11888_v37 = vcombine.low %v17405_v4, %v17423_v8  ;;  %v17435_v48 = vsel %vm14113_vm9, %v7519_v32, %v7520_v22  ;;  %v7527_v34 = vrot.slane %v19755_v33, 5  ;;  %v7534_v22 = vrot.slane %v17165_v42, 5  ;;  %v17449_v32 = vld [vmem:[#allocation2 + $0xa0] sm:$0xf] }
 0x397   : > { %13418 = vmatpush3.bf16.msra.mxu1 %v13823_v17  ;;  %v7526_v17 = vrot.slane %v7524_v44, 4  ;;  %v17468_v33 = vsel %vm14113_vm9, %v11859_v29, %v7531_v62  ;;  %v7538_v29 = vrot.slane %v17136_v41, 5  ;;  %v7541_v42 = vrot.slane %v17178_v1, 5 }
 0x398   : > { %13340 = vmatmul.mubr.bf16.gmra.mxu1 %v11922_v10  ;;  %13419 = vmatprep.subr.bf16.mxu1 %v13826_v15  ;;  %v17459_v10 = vsel %vm14113_vm9, %v11858_v23, %v7524_v44  ;;  %v17472_v23 = vld [vmem:[#allocation2 + $0xac] sm:$0xf]  ;;  %v17486_v24 = vsel %vm14113_vm9, %v7533_v49, %v7534_v22  ;;  %v17501_v22 = vld [vmem:[#allocation2 + $0xb4] sm:$0xf]  ;;  %v8273_v49 = vrot.slane %v8271_v57, 5  ;;  %v8283_v62 = vrot.slane %v8281_v2, 4 }
 0x399   : > { %13343 = vmatprep.mubr.bf16.mxu1 %v11923_v55  ;;  %v17476_v44 = vsel %vm14113_vm9, %v7526_v17, %v7527_v34  ;;  %v19757_v55 = vld [vmem:[#allocation50_spill] sm:$0xff]  ;;  %v7540_v1 = vrot.slane %v7538_v29, 4  ;;  %v13832_v57 = vld [vmem:[%s19365_s7 + $0x140] sm:$0xff]   ;;  %v8301_v8 = vshll.u32 %v17215_v40, 16  ;;  %v19760_v4 = vshrl.u32 %v17215_v40, 16 }
 0x39a   : > { %13300 = vmatmul.mubr.bf16.gmra.mxu0 %v11886_v43  ;;  %v11860_v34 = vrot.slane %v19757_v55, 9  ;;  %v17490_v17 = vld [vmem:[#allocation2 + $0x14] sm:$0x1]  ;;  %v13831_v43 = vld [vmem:[%s19365_s7 + $0x148] sm:$0xff]   ;;  %v17503_v55 = vld [vmem:[#allocation2 + $0xb8] sm:$0xf] }
 0x39b   : > { %13303 = vmatprep.mubr.bf16.mxu0 %v11887_v27  ;;  %13420 = vmatpush3.bf16.msra.mxu1 %v13826_v15  ;;  %v8270_v15 = vrot.slane %v8268_v13, 4  ;;  %v8287_v13 = vshll.u32 %v17490_v17, 16  ;;  %v17536_v2 = vsel %vm14113_vm9, %v7540_v1, %v7541_v42  ;;  %v8294_v42 = vrot.slane %v8292_v21, 4 }
 0x39c   : > { %13421 = vmatprep.subr.bf16.mxu1 %v13828_v12  ;;  %v17512_v41 = vsel %vm14113_vm9, %v11860_v34, %v7538_v29  ;;  %v17539_v29 = vld [vmem:[#allocation2 + $0xc0] sm:$0xf]  ;;  %v17541_v34 = vld [vmem:[#allocation2 + $0xc4] sm:$0xf]  ;;  %v19759_v1 = vshll.u32 %v17205_v53, 16  ;;  %v8318_v9 = vrot.slane %v19761_v20, 4 }
 0x39e   : > { %v8297_v27 = vrot.slane %v19759_v1, 5 }
 0x39f   : > { %13422 = vmatpush3.bf16.msra.mxu1 %v13828_v12  ;;  %v8279_v12 = vrot.slane %v8277_v35, 5  ;;  %v19758_v35 = vcombine.low %v17414_v50, %v17435_v48  ;;  %v17566_v50 = vld [vmem:[%s19365_s7 + $0x1f8] sm:$0xff]  }
 0x3a0   : > { %13344 = vmatmul.mubr.bf16.gmra.mxu1 %v11924_v59  ;;  %13423 = vmatprep.subr.bf16.mxu1 %v13831_v43  ;;  %v8274_v59 = vor.u32 %v8273_v49, %v8270_v15 }
 0x3a1   : > { %13347 = vmatprep.mubr.bf16.mxu1 %v11925_v11  ;;  %v8289_v11 = vrot.slane %v8287_v13, 5  ;;  %v8284_v49 = vor.u32 %v8283_v62, %v8279_v12  ;;  %v8311_v13 = vshll.u32 %v17526_v14, 16  ;;  %v8298_v62 = vor.u32 %v8297_v27, %v8294_v42 }
 0x3a2   : > { %13304 = vmatmul.mubr.bf16.gmra.mxu0 %v11888_v37  ;;  %v8275_v15 = vrot.slane %v8274_v59, 4  ;;  %v8307_v37 = vrot.slane %v19760_v4, 4  ;;  %v8303_v59 = vrot.slane %v8301_v8, 5  ;;  %v19763_v27 = vcombine.low %v17369_v45, %v17371_v6 }
 0x3a3   : > { %13307 = vmatprep.mubr.bf16.mxu0 %v19758_v35  ;;  %13424 = vmatpush3.bf16.msra.mxu1 %v13831_v43  ;;  %v8285_v43 = vrot.slane %v8284_v49, 4  ;;  %v17570_v35 = vld [vmem:[#allocation2 + $0x2c] sm:$0x1]  ;;  %v8313_v1 = vrot.slane %v8311_v13, 5  ;;  %v8299_v63 = vrot.slane %v8298_v62, 4  ;;  %v8325_v49 = vshll.u32 %v17221_v47, 16 }
 0x3a4   : > { %13425 = vmatprep.subr.bf16.mxu1 %v13832_v57  ;;  %v8280_v48 = vsel %vm14068_vm4, %v8275_v15, %v8279_v12  ;;  %v8308_v30 = vor.u32 %v8307_v37, %v8303_v59  ;;  %v19762_v12 = vshll.u32 %v17219_v26, 16  ;;  %v19764_v8 = vshrl.u32 %v17221_v47, 16 }
 0x3a5   : > { %v8290_v54 = vsel %vm14068_vm4, %v8285_v43, %v8289_v11  ;;  %v8335_v20 = vshll.u32 %v17570_v35, 16  ;;  %v19765_v11 = vcombine.low %v17384_v19, %v17391_v61  ;;  %v8327_v62 = vrot.slane %v8325_v49, 5 }
 0x3a6   : > { %v8321_v15 = vrot.slane %v19762_v12, 5  ;;  %v11957_v42 = vcombine.low %v8280_v48, %v8290_v54  ;;  %v8331_v13 = vrot.slane %v19764_v8, 4  ;;  %v8309_v37 = vrot.slane %v8308_v30, 4  ;;  %v17604_v30 = vld [vmem:[#allocation2 + $0x38] sm:$0x1] }
 0x3a7   : > { %13426 = vmatpush3.bf16.msra.mxu1 %v13832_v57  ;;  %v8304_v57 = vsel %vm14068_vm4, %v8299_v63, %v8303_v59  ;;  %v11981_v54 = vrot.slane %v17185_v58, 9  ;;  %v19766_v48 = vcombine.low %v17459_v10, %v17476_v44  ;;  %v8337_v12 = vrot.slane %v8335_v20, 5 }
 0x3a8   : > { %13348 = vmatmul.mubr.bf16.gmra.mxu1 %v19763_v27  ;;  %13507 = vmatprep.subr.bf16.mxu1 %v17566_v50  ;;  %v8322_v43 = vor.u32 %v8321_v15, %v8318_v9  ;;  %v8991_v27 = vrot.slane %v17187_v52, 5  ;;  %v8994_v8 = vrot.slane %v17490_v17, 5  ;;  %v8314_v63 = vsel %vm14068_vm4, %v8309_v37, %v8313_v1 }
 0x3a9   : > { %13351 = vmatprep.mubr.bf16.mxu1 %v19765_v11  ;;  %v19767_v11 = vcombine.low %v17468_v33, %v17486_v24  ;;  %v19768_v58 = vshrl.u32 %v17244_v51, 16  ;;  %v19769_v44 = vshll.u32 %v17244_v51, 16  ;;  %v17610_v15 = vcombine.low %v8304_v57, %v8314_v63  ;;  %v17630_v63 = vld [vmem:[#allocation2 + $0x44] sm:$0x1] }
 0x3aa   : > { %13308 = vmatmul.mubr.bf16.gmra.mxu0 %v19766_v48  ;;  %v8323_v9 = vrot.slane %v8322_v43, 4  ;;  %v8332_v52 = vor.u32 %v8331_v13, %v8327_v62  ;;  %v17614_v17 = vsel %vm14113_vm9, %v11981_v54, %v8991_v27  ;;  %v8993_v24 = vrot.slane %v8991_v27, 4 }
 0x3ab   : > { %13311 = vmatprep.mubr.bf16.mxu0 %v19767_v11  ;;  %v8342_v10 = vrot.slane %v19768_v58, 4  ;;  %v8345_v59 = vrot.slane %v19769_v44, 5  ;;  %v8349_v49 = vshll.u32 %v17246_v28, 16  ;;  %v19770_v20 = vshrl.u32 %v17246_v28, 16 }
 0x3ac   : > { %v8328_v33 = vsel %vm14068_vm4, %v8323_v9, %v8327_v62  ;;  %v8333_v43 = vrot.slane %v8332_v52, 4  ;;  %v17623_v57 = vsel %vm14113_vm9, %v8993_v24, %v8994_v8  ;;  %v8359_v13 = vshll.u32 %v17604_v30, 16 }
 0x3ad   : > { %v8346_v1 = vor.u32 %v8345_v59, %v8342_v10  ;;  %v8355_v37 = vrot.slane %v19770_v20, 4  ;;  %v19771_v54 = vshrl.u32 %v17251_v25, 16  ;;  %v12013_v27 = vcombine.low %v17614_v17, %v17623_v57 }
 0x3ae   : > { %v8351_v11 = vrot.slane %v8349_v49, 5  ;;  %v19772_v9 = vshll.u32 %v17251_v25, 16  ;;  %v19773_v10 = vcombine.low %v17419_v18, %v17428_v60  ;;  %v8338_v8 = vsel %vm14068_vm4, %v8333_v43, %v8337_v12 }
 0x3af   : > { %v8366_v48 = vrot.slane %v19771_v54, 4  ;;  %v8347_v62 = vrot.slane %v8346_v1, 4  ;;  %v8361_v44 = vrot.slane %v8359_v13, 5  ;;  %v8373_v59 = vshll.u32 %v17260_v46, 16 }
 0x3b0   : > { %v8369_v58 = vrot.slane %v19772_v9, 5  ;;  %13352 = vmatmul.mubr.bf16.gmra.mxu1 %v19773_v10  ;;  %v19774_v52 = vshrl.u32 %v17260_v46, 16  ;;  %v19775_v1 = vcombine.low %v17439_v36, %v17449_v32  ;;  %v11959_v49 = vcombine.low %v8328_v33, %v8338_v8 }
 0x3b1   : > { %v8352_v20 = vsel %vm14068_vm4, %v8347_v62, %v8351_v11  ;;  %v8356_v54 = vor.u32 %v8355_v37, %v8351_v11  ;;  %v19776_v10 = vcombine.low %v17512_v41, %v17536_v2  ;;  %v8375_v12 = vrot.slane %v8373_v59, 5 }
 0x3b2   : > { %v8379_v24 = vrot.slane %v19774_v52, 4  ;;  %13355 = vmatprep.mubr.bf16.mxu1 %v19775_v1  ;;  %v8370_v9 = vor.u32 %v8369_v58, %v8366_v48  ;;  %v8383_v43 = vshll.u32 %v17630_v63, 16  ;;  %v11982_v13 = vrot.slane %v17205_v53, 9 }
 0x3b3   : > { %13312 = vmatmul.mubr.bf16.gmra.mxu0 %v19776_v10  ;;  %v8998_v52 = vrot.slane %v17215_v40, 5  ;;  %v8357_v21 = vrot.slane %v8356_v54, 4  ;;  %v9001_v33 = vrot.slane %v17526_v14, 5  ;;  %v11983_v62 = vrot.slane %v17219_v26, 9  ;;  %v17665_v14 = vld [vmem:[#allocation2 + $0x50] sm:$0x1] }
 0x3b4   : > { %13379 = vmatprep.mubr.bf16.mxu0 %v11957_v42  ;;  %v8371_v1 = vrot.slane %v8370_v9, 4  ;;  %v8380_v37 = vor.u32 %v8379_v24, %v8375_v12  ;;  %v8385_v48 = vrot.slane %v8383_v43, 5  ;;  %v9005_v40 = vrot.slane %v17221_v47, 5  ;;  %v13833_v9 = vld [vmem:[%s19365_s7 + $0x1b0] sm:$0xff]  }
 0x3b5   : > { %v17657_v41 = vsel %vm14113_vm9, %v11982_v13, %v8998_v52  ;;  %v9000_v2 = vrot.slane %v8998_v52, 4  ;;  %v8362_v11 = vsel %vm14068_vm4, %v8357_v21, %v8361_v44  ;;  %v9008_v42 = vrot.slane %v17570_v35, 5 }
 0x3b6   : > { %v8376_v53 = vsel %vm14068_vm4, %v8371_v1, %v8375_v12  ;;  %v17667_v26 = vcombine.low %v8352_v20, %v8362_v11  ;;  %v8381_v58 = vrot.slane %v8380_v37, 4  ;;  %v19777_v59 = vshrl.u32 %v17277_v16, 16  ;;  %v17695_v1 = vld [vmem:[#allocation2 + $0x5c] sm:$0x1] }
 0x3b7   : > { %v17671_v8 = vsel %vm14113_vm9, %v9000_v2, %v9001_v33  ;;  %v17679_v47 = vsel %vm14113_vm9, %v11983_v62, %v9005_v40  ;;  %v9007_v35 = vrot.slane %v9005_v40, 4  ;;  %v19778_v44 = vshll.u32 %v17277_v16, 16 }
 0x3b8   : > { %v8390_v24 = vrot.slane %v19777_v59, 4  ;;  %v12014_v21 = vcombine.low %v17657_v41, %v17671_v8  ;;  %v19779_v54 = vcombine.low %v17464_v3, %v17472_v23  ;;  %v8386_v10 = vsel %vm14068_vm4, %v8381_v58, %v8385_v48 }
 0x3b9   : > { %v8393_v20 = vrot.slane %v19778_v44, 5  ;;  %v8397_v12 = vshll.u32 %v17279_v5, 16  ;;  %v19780_v43 = vshrl.u32 %v17279_v5, 16  ;;  %v8407_v52 = vshll.u32 %v17665_v14, 16 }
 0x3ba   : > { %13356 = vmatmul.mubr.bf16.gmra.mxu1 %v19779_v54  ;;  %v19781_v33 = vcombine.low %v17501_v22, %v17503_v55  ;;  %v11961_v62 = vcombine.low %v8376_v53, %v8386_v10  ;;  %v17702_v37 = vsel %vm14113_vm9, %v9007_v35, %v9008_v42  ;;  %v19782_v48 = vshrl.u32 %v17285_v39, 16 }
 0x3bb   : > { %v8403_v13 = vrot.slane %v19780_v43, 4  ;;  %v8394_v2 = vor.u32 %v8393_v20, %v8390_v24  ;;  %13380 = vmatmul.mubr.bf16.vlgmr.msra.gmra.mxu0 %v17610_v15  ;;  %v12015_v40 = vcombine.low %v17679_v47, %v17702_v37  ;;  %v8399_v58 = vrot.slane %v8397_v12, 5  ;;  %v13834_v15 = vld [vmem:[%s19365_s7 + $0x1a8] sm:$0xff]  }
 0x3bc   : > { %13359 = vmatprep.mubr.bf16.mxu1 %v19781_v33  ;;  %v8414_v11 = vrot.slane %v19782_v48, 4  ;;  %v8409_v59 = vrot.slane %v8407_v52, 5  ;;  %v19783_v44 = vshll.u32 %v17285_v39, 16  ;;  %13460 = vmatpush3.bf16.msra.mxu0 %v17396_v0  ;;  %v8421_v42 = vshll.u32 %v17293_v31, 16 }
 0x3bd   : > { %13383 = vmatprep.mubr.bf16.mxu0 %v11959_v49  ;;  %v8395_v53 = vrot.slane %v8394_v2, 4  ;;  %v19784_v24 = vshrl.u32 %v17293_v31, 16  ;;  %v8431_v20 = vshll.u32 %v17695_v1, 16  ;;  %13461 = vmatprep.subr.bf16.mxu0 %v13833_v9  ;;  %v8404_v10 = vor.u32 %v8403_v13, %v8399_v58 }
 0x3be   : > { %v8417_v54 = vrot.slane %v19783_v44, 5  ;;  %v11984_v43 = vrot.slane %v17244_v51, 9  ;;  %v9012_v0 = vrot.slane %v17246_v28, 5  ;;  %v8423_v52 = vrot.slane %v8421_v42, 5 }
 0x3bf   : > { %v8427_v35 = vrot.slane %v19784_v24, 4  ;;  %v8400_v49 = vsel %vm14068_vm4, %v8395_v53, %v8399_v58  ;;  %v8433_v33 = vrot.slane %v8431_v20, 5  ;;  %v9015_v2 = vrot.slane %v17604_v30, 5 }
 0x3c0   : > { %v8418_v12 = vor.u32 %v8417_v54, %v8414_v11  ;;  %v8405_v48 = vrot.slane %v8404_v10, 4  ;;  %v17726_v24 = vsel %vm14113_vm9, %v11984_v43, %v9012_v0  ;;  %v9014_v4 = vrot.slane %v9012_v0, 4  ;;  %13462 = vmatpush3.bf16.msra.mxu0 %v13833_v9  ;;  %v19788_v43 = vld [vmem:[#allocation58_spill] sm:$0xff] }
 0x3c1   : > { %v8428_v13 = vor.u32 %v8427_v35, %v8423_v52  ;;  %v11985_v51 = vrot.slane %v17251_v25, 9  ;;  %v9019_v28 = vrot.slane %v17260_v46, 5  ;;  %v9022_v11 = vrot.slane %v17630_v63, 5  ;;  %13463 = vmatprep.subr.bf16.mxu0 %v13834_v15  ;;  %v13835_v25 = vld [vmem:[%s19365_s7 + $0x1a0] sm:$0xff]   ;;  %v17745_v46 = vld [vmem:[#allocation2 + $0x68] sm:$0x1] }
 0x3c2   : > { %v8419_v44 = vrot.slane %v8418_v12, 4  ;;  %v19785_v58 = vcombine.low %v17539_v29, %v17541_v34  ;;  %v8410_v30 = vsel %vm14068_vm4, %v8405_v48, %v8409_v59  ;;  %v17740_v9 = vsel %vm14113_vm9, %v9014_v4, %v9015_v2  ;;  %v19790_v2 = vld [vmem:[#allocation10_spill] sm:$0xff] }
 0x3c3   : > { %v19786_v63 = vshrl.u32 %v17312_v7, 16  ;;  %v11962_v59 = vcombine.low %v8400_v49, %v8410_v30  ;;  %v8429_v42 = vrot.slane %v8428_v13, 4  ;;  %v12016_v35 = vcombine.low %v17726_v24, %v17740_v9  ;;  %13384 = vmatmul.mubr.bf16.gmra.mxu0 %v17667_v26 }
 0x3c4   : > { %13360 = vmatmul.mubr.bf16.gmra.mxu1 %v19785_v58  ;;  %v8424_v54 = vsel %vm14068_vm4, %v8419_v44, %v8423_v52  ;;  %v17756_v4 = vsel %vm14113_vm9, %v11985_v51, %v9019_v28  ;;  %v9021_v20 = vrot.slane %v9019_v28, 4  ;;  %v19787_v10 = vshll.u32 %v17312_v7, 16  ;;  %13387 = vmatprep.mubr.bf16.mxu0 %v11961_v62  ;;  %v17767_v52 = vld [vmem:[#allocation2 + $0x74] sm:$0x1] }
 0x3c5   : > { %v8438_v53 = vrot.slane %v19786_v63, 4  ;;  %13427 = vmatprep.mubr.bf16.mxu1 %v12013_v27  ;;  %v8445_v0 = vshll.u32 %v19788_v43, 16  ;;  %v19789_v17 = vshrl.u32 %v19788_v43, 16  ;;  %13464 = vmatpush3.bf16.msra.mxu0 %v13834_v15  ;;  %v8434_v27 = vsel %vm14068_vm4, %v8429_v42, %v8433_v33  ;;  %v13836_v33 = vld [vmem:[%s19365_s7 + $0x198] sm:$0xff]   ;;  %v19793_v42 = vld [vmem:[#allocation13_spill] sm:$0xff] }
 0x3c6   : > { %v8441_v12 = vrot.slane %v19787_v10, 5  ;;  %v8455_v49 = vshll.u32 %v17745_v46, 16  ;;  %v19791_v26 = vshrl.u32 %v19790_v2, 16  ;;  %v19792_v44 = vshll.u32 %v19790_v2, 16  ;;  %13465 = vmatprep.subr.bf16.mxu0 %v13835_v25 }
 0x3c7   : > { %v8451_v57 = vrot.slane %v19789_v17, 4  ;;  %v11963_v51 = vcombine.low %v8424_v54, %v8434_v27  ;;  %v17775_v28 = vsel %vm14113_vm9, %v9021_v20, %v9022_v11  ;;  %v8447_v15 = vrot.slane %v8445_v0, 5 }
 0x3c8   : > { %v8462_v48 = vrot.slane %v19791_v26, 4  ;;  %v8465_v13 = vrot.slane %v19792_v44, 5  ;;  %v8442_v62 = vor.u32 %v8441_v12, %v8438_v53  ;;  %v12017_v58 = vcombine.low %v17756_v4, %v17775_v28  ;;  %v13839_v53 = vld [vmem:[%s19365_s7 + $0x1f0] sm:$0xff]   ;;  %v13845_v4 = vld [vmem:[%s19365_s7 + $0x1d8] sm:$0xff]  }
 0x3c9   : > { %v8457_v30 = vrot.slane %v8455_v49, 5  ;;  %v8469_v10 = vshll.u32 %v19793_v42, 16  ;;  %v8452_v54 = vor.u32 %v8451_v57, %v8447_v15  ;;  %v19794_v27 = vshrl.u32 %v19793_v42, 16  ;;  %13466 = vmatpush3.bf16.msra.mxu0 %v13835_v25  ;;  %v13837_v25 = vld [vmem:[%s19365_s7 + $0x190] sm:$0xff]  }
 0x3ca   : > { %v8466_v63 = vor.u32 %v8465_v13, %v8462_v48  ;;  %v8443_v17 = vrot.slane %v8442_v62, 4  ;;  %v8479_v20 = vshll.u32 %v17767_v52, 16  ;;  %v11986_v26 = vrot.slane %v17277_v16, 9  ;;  %13467 = vmatprep.subr.bf16.mxu0 %v13836_v33  ;;  %v13841_v62 = vld [vmem:[%s19365_s7 + $0x1e8] sm:$0xff]  }
 0x3cb   : > { %v8475_v11 = vrot.slane %v19794_v27, 4  ;;  %v8471_v0 = vrot.slane %v8469_v10, 5  ;;  %v9026_v49 = vrot.slane %v17279_v5, 5  ;;  %v8453_v48 = vrot.slane %v8452_v54, 4  ;;  %13388 = vmatmul.mubr.bf16.gmra.mxu0 %v11962_v59 }
 0x3cc   : > { %v8467_v12 = vrot.slane %v8466_v63, 4  ;;  %13428 = vmatmul.mubr.bf16.vlgmr.msra.gmra.mxu1 %v12014_v21  ;;  %v8448_v57 = vsel %vm14068_vm4, %v8443_v17, %v8447_v15  ;;  %v8481_v44 = vrot.slane %v8479_v20, 5  ;;  %v9029_v13 = vrot.slane %v17665_v14, 5  ;;  %13391 = vmatprep.mubr.bf16.mxu0 %v11963_v51  ;;  %v13840_v17 = vld [vmem:[%s19365_s7 + $0x188] sm:$0xff]  }
 0x3cd   : > { %13431 = vmatprep.mubr.bf16.mxu1 %v12015_v40  ;;  %v8476_v5 = vor.u32 %v8475_v11, %v8471_v0  ;;  %v17807_v41 = vsel %vm14113_vm9, %v11986_v26, %v9026_v49  ;;  %v9028_v8 = vrot.slane %v9026_v49, 4  ;;  %13508 = vmatpush3.bf16.msra.mxu1 %v17566_v50  ;;  %v8458_v14 = vsel %vm14068_vm4, %v8453_v48, %v8457_v30  ;;  %v17815_v40 = vld [vmem:[#allocation2 + $0x80] sm:$0x1] }
 0x3ce   : > { %v8472_v16 = vsel %vm14068_vm4, %v8467_v12, %v8471_v0  ;;  %v11987_v21 = vrot.slane %v17285_v39, 9  ;;  %v9033_v47 = vrot.slane %v17293_v31, 5  ;;  %v9036_v37 = vrot.slane %v17695_v1, 5  ;;  %13509 = vmatprep.subr.bf16.mxu1 %v13839_v53  ;;  %13468 = vmatpush3.bf16.msra.mxu0 %v13836_v33  ;;  %v17843_v12 = vld [vmem:[#allocation2 + $0x8c] sm:$0x1] }
 0x3cf   : > { %v11964_v15 = vcombine.low %v8448_v57, %v8458_v14  ;;  %v8477_v50 = vrot.slane %v8476_v5, 4  ;;  %v17822_v59 = vsel %vm14113_vm9, %v9028_v8, %v9029_v13  ;;  %v19795_v39 = vshrl.u32 %v17369_v45, 16  ;;  %13469 = vmatprep.subr.bf16.mxu0 %v13837_v25  ;;  %v17858_v14 = vpop.f32.mrf.mxu0 }
 0x3d0   : > { %v12018_v31 = vcombine.low %v17807_v41, %v17822_v59  ;;  %v17830_v1 = vsel %vm14113_vm9, %v11987_v21, %v9033_v47  ;;  %v9035_v63 = vrot.slane %v9033_v47, 4  ;;  %v19796_v51 = vshll.u32 %v17369_v45, 16 }
 0x3d1   : > { %v8486_v30 = vrot.slane %v19795_v39, 4  ;;  %v8482_v54 = vsel %vm14068_vm4, %v8477_v50, %v8481_v44  ;;  %v8493_v33 = vshll.u32 %v17371_v6, 16  ;;  %v19797_v27 = vshrl.u32 %v17371_v6, 16  ;;  %13510 = vmatpush3.bf16.msra.mxu1 %v13839_v53  ;;  %v13842_v44 = vld [vmem:[%s19365_s7 + $0x1e0] sm:$0xff]  }
 0x3d2   : > { %v8489_v10 = vrot.slane %v19796_v51, 5  ;;  %v8503_v20 = vshll.u32 %v17815_v40, 16  ;;  %v11965_v0 = vcombine.low %v8472_v16, %v8482_v54  ;;  %v17847_v26 = vsel %vm14113_vm9, %v9035_v63, %v9036_v37  ;;  %13511 = vmatprep.subr.bf16.mxu1 %v13841_v62  ;;  %13470 = vmatpush3.bf16.msra.mxu0 %v13837_v25  ;;  %v17875_v63 = vpop.f32.mrf.mxu0 }
 0x3d3   : > { %v8499_v11 = vrot.slane %v19797_v27, 4  ;;  %v19798_v57 = vshrl.u32 %v17384_v19, 16  ;;  %v12019_v13 = vcombine.low %v17830_v1, %v17847_v26  ;;  %v8495_v5 = vrot.slane %v8493_v33, 5  ;;  %13471 = vmatprep.subr.bf16.mxu0 %v13840_v17  ;;  %13392 = vmatmul.mubr.bf16.gmra.mxu0 %v11964_v15  ;;  %v13850_v1 = vld [vmem:[%s19365_s7 + $0x1c8] sm:$0xff]  }
 0x3d4   : > { %v8490_v49 = vor.u32 %v8489_v10, %v8486_v30  ;;  %v8505_v8 = vrot.slane %v8503_v20, 5  ;;  %v19799_v53 = vshll.u32 %v17384_v19, 16  ;;  %13432 = vmatmul.mubr.bf16.gmra.mxu1 %v12016_v35  ;;  %v8517_v47 = vshll.u32 %v17391_v61, 16  ;;  %v13843_v30 = vld [vmem:[%s19365_s7 + $0x180] sm:$0xff]   ;;  %13395 = vmatprep.mubr.bf16.mxu0 %v11965_v0 }
 0x3d5   : > { %v8510_v48 = vrot.slane %v19798_v57, 4  ;;  %v19800_v37 = vshrl.u32 %v17391_v61, 16  ;;  %v8527_v39 = vshll.u32 %v17843_v12, 16  ;;  %13435 = vmatprep.mubr.bf16.mxu1 %v12017_v58  ;;  %v8500_v25 = vor.u32 %v8499_v11, %v8495_v5  ;;  %13512 = vmatpush3.bf16.msra.mxu1 %v13841_v62  ;;  %v17893_v11 = vld [vmem:[%s19365_s7 + $0x238] sm:$0xff]  }
 0x3d6   : > { %v8513_v16 = vrot.slane %v19799_v53, 5  ;;  %v8491_v21 = vrot.slane %v8490_v49, 4  ;;  %v11988_v9 = vrot.slane %v17312_v7, 9  ;;  %v9040_v35 = vrot.slane %v19788_v43, 5  ;;  %13513 = vmatprep.subr.bf16.mxu1 %v13842_v44  ;;  %13472 = vmatpush3.bf16.msra.mxu0 %v13840_v17  ;;  %v17907_v49 = vpop.f32.mrf.mxu0  ;;  %v13846_v53 = vld [vmem:[%s19365_s7 + $0x1d0] sm:$0xff]  }
 0x3d7   : > { %v8523_v50 = vrot.slane %v19800_v37, 4  ;;  %v8519_v10 = vrot.slane %v8517_v47, 5  ;;  %v8529_v54 = vrot.slane %v8527_v39, 5  ;;  %v9043_v33 = vrot.slane %v17745_v46, 5  ;;  %13473 = vmatprep.subr.bf16.mxu0 %v13843_v30 }
 0x3d8   : > { %v8514_v24 = vor.u32 %v8513_v16, %v8510_v48  ;;  %v8496_v51 = vsel %vm14068_vm4, %v8491_v21, %v8495_v5  ;;  %v8501_v7 = vrot.slane %v8500_v25, 4  ;;  %v17885_v43 = vsel %vm14113_vm9, %v11988_v9, %v9040_v35 }
 0x3d9   : > { %v9042_v58 = vrot.slane %v9040_v35, 4  ;;  %v8524_v62 = vor.u32 %v8523_v50, %v8519_v10  ;;  %v11989_v15 = vrot.slane %v19790_v2, 9  ;;  %v9047_v27 = vrot.slane %v19793_v42, 5  ;;  %v17903_v2 = vld [vmem:[#allocation2 + $0x98] sm:$0x1]  ;;  %13514 = vmatpush3.bf16.msra.mxu1 %v13842_v44 }
 0x3da   : > { %v8515_v28 = vrot.slane %v8514_v24, 4  ;;  %v9050_v46 = vrot.slane %v17767_v52, 5  ;;  %v8506_v20 = vsel %vm14068_vm4, %v8501_v7, %v8505_v8  ;;  %v19801_v52 = vshrl.u32 %v17419_v18, 16  ;;  %13515 = vmatprep.subr.bf16.mxu1 %v13845_v4  ;;  %13474 = vmatpush3.bf16.msra.mxu0 %v13843_v30  ;;  %v17927_v24 = vld [vmem:[#allocation2 + $0xa4] sm:$0x1] }
 0x3db   : > { %v17901_v17 = vsel %vm14113_vm9, %v9042_v58, %v9043_v33  ;;  %v11966_v57 = vcombine.low %v8496_v51, %v8506_v20  ;;  %v8525_v48 = vrot.slane %v8524_v62, 4  ;;  %v9048_v8 = vsel %vm14113_vm9, %v11989_v15, %v9047_v27  ;;  %13555 = vmatprep.subr.bf16.mxu0 %v17893_v11 }
 0x3dc   : > { %v8520_v0 = vsel %vm14068_vm4, %v8515_v28, %v8519_v10  ;;  %v8534_v42 = vrot.slane %v19801_v52, 4  ;;  %v12020_v5 = vcombine.low %v17885_v43, %v17901_v17  ;;  %v9049_v16 = vrot.slane %v9047_v27, 4  ;;  %13436 = vmatmul.mubr.bf16.gmra.mxu1 %v12018_v31 }
 0x3dd   : > { %v19802_v21 = vshll.u32 %v17419_v18, 16  ;;  %v8541_v44 = vshll.u32 %v17428_v60, 16  ;;  %v19803_v37 = vshrl.u32 %v17428_v60, 16  ;;  %v8530_v39 = vsel %vm14068_vm4, %v8525_v48, %v8529_v54  ;;  %13439 = vmatprep.mubr.bf16.mxu1 %v12019_v13  ;;  %13516 = vmatpush3.bf16.msra.mxu1 %v13845_v4  ;;  %v17939_v54 = vpop.f32.mrf.mxu0 }
 0x3de   : > { %v8551_v25 = vshll.u32 %v17903_v2, 16  ;;  %v19804_v9 = vshrl.u32 %v17439_v36, 16  ;;  %v19805_v51 = vshll.u32 %v17439_v36, 16  ;;  %v11967_v41 = vcombine.low %v8520_v0, %v8530_v39  ;;  %13396 = vmatmul.mubr.bf16.gmra.mxu0 %v11966_v57  ;;  %13517 = vmatprep.subr.bf16.mxu1 %v13846_v53 }
 0x3df   : > { %v8537_v47 = vrot.slane %v19802_v21, 5  ;;  %v8547_v50 = vrot.slane %v19803_v37, 4  ;;  %v9051_v59 = vsel %vm14113_vm9, %v9049_v16, %v9050_v46  ;;  %v8543_v30 = vrot.slane %v8541_v44, 5  ;;  %v17953_v57 = vpop.f32.mrf.mxu0  ;;  %v17967_v44 = vld [vmem:[#allocation2 + $0xb0] sm:$0x1] }
 0x3e0   : > { %v8558_v35 = vrot.slane %v19804_v9, 4  ;;  %v8561_v10 = vrot.slane %v19805_v51, 5  ;;  %v12021_v33 = vcombine.low %v9048_v8, %v9051_v59  ;;  %v8553_v7 = vrot.slane %v8551_v25, 5  ;;  %13399 = vmatprep.mubr.bf16.mxu0 %v11967_v41 }
 0x3e1   : > { %v8538_v31 = vor.u32 %v8537_v47, %v8534_v42  ;;  %v8565_v43 = vshll.u32 %v17449_v32, 16  ;;  %v8548_v13 = vor.u32 %v8547_v50, %v8543_v30  ;;  %v19806_v58 = vshrl.u32 %v17449_v32, 16  ;;  %13518 = vmatpush3.bf16.msra.mxu1 %v13846_v53 }
 0x3e2   : > { %v8562_v28 = vor.u32 %v8561_v10, %v8558_v35  ;;  %v8575_v4 = vshll.u32 %v17927_v24, 16  ;;  %v11990_v46 = vrot.slane %v17369_v45, 9  ;;  %v9054_v20 = vrot.slane %v17371_v6, 5  ;;  %13519 = vmatprep.subr.bf16.mxu1 %v13850_v1  ;;  %v13851_v6 = vld [vmem:[%s19365_s7 + $0x1c0] sm:$0xff]   ;;  %v17977_v10 = vpop.f32.mrf.mxu0 }
 0x3e3   : > { %v8539_v26 = vrot.slane %v8538_v31, 4  ;;  %v8571_v62 = vrot.slane %v19806_v58, 4  ;;  %v8567_v27 = vrot.slane %v8565_v43, 5  ;;  %v8549_v17 = vrot.slane %v8548_v13, 4 }
 0x3e4   : > { %v8563_v15 = vrot.slane %v8562_v28, 4  ;;  %v8577_v52 = vrot.slane %v8575_v4, 5  ;;  %v9057_v42 = vrot.slane %v17815_v40, 5  ;;  %v9055_v16 = vsel %vm14113_vm9, %v11990_v46, %v9054_v20  ;;  %13440 = vmatmul.mubr.bf16.gmra.mxu1 %v12020_v5 }
 0x3e5   : > { %v8544_v0 = vsel %vm14068_vm4, %v8539_v26, %v8543_v30  ;;  %v8572_v8 = vor.u32 %v8571_v62, %v8567_v27  ;;  %v9056_v45 = vrot.slane %v9054_v20, 4  ;;  %v8554_v21 = vsel %vm14068_vm4, %v8549_v17, %v8553_v7  ;;  %13443 = vmatprep.mubr.bf16.mxu1 %v12021_v33  ;;  %13520 = vmatpush3.bf16.msra.mxu1 %v13850_v1  ;;  %v17985_v33 = vld [vmem:[#allocation2 + $0xbc] sm:$0x1] }
 0x3e6   : > { %v8568_v48 = vsel %vm14068_vm4, %v8563_v15, %v8567_v27  ;;  %v11991_v40 = vrot.slane %v17384_v19, 9  ;;  %v9061_v53 = vrot.slane %v17391_v61, 5  ;;  %v9064_v47 = vrot.slane %v17843_v12, 5  ;;  %13521 = vmatprep.subr.bf16.mxu1 %v13851_v6 }
 0x3e7   : > { %v11968_v37 = vcombine.low %v8544_v0, %v8554_v21  ;;  %v8573_v50 = vrot.slane %v8572_v8, 4  ;;  %v9058_v39 = vsel %vm14113_vm9, %v9056_v45, %v9057_v42  ;;  %v19807_v25 = vshrl.u32 %v17464_v3, 16 }
 0x3e8   : > { %v12022_v35 = vcombine.low %v9055_v16, %v9058_v39  ;;  %v9062_v19 = vsel %vm14113_vm9, %v11991_v40, %v9061_v53  ;;  %v9063_v51 = vrot.slane %v9061_v53, 4  ;;  %v19808_v61 = vshll.u32 %v17464_v3, 16 }
 0x3e9   : > { %v8582_v9 = vrot.slane %v19807_v25, 4  ;;  %13400 = vmatmul.mubr.bf16.gmra.mxu0 %v11968_v37  ;;  %v8578_v5 = vsel %vm14068_vm4, %v8573_v50, %v8577_v52  ;;  %v8589_v41 = vshll.u32 %v17472_v23, 16  ;;  %v19809_v59 = vshrl.u32 %v17472_v23, 16  ;;  %13522 = vmatpush3.bf16.msra.mxu1 %v13851_v6  ;;  %v17997_v52 = vpop.f32.mrf.mxu0 }
 0x3ea   : > { %v8585_v12 = vrot.slane %v19808_v61, 5  ;;  %v8599_v30 = vshll.u32 %v17967_v44, 16  ;;  %v11969_v7 = vcombine.low %v8568_v48, %v8578_v5  ;;  %v9065_v28 = vsel %vm14113_vm9, %v9063_v51, %v9064_v47  ;;  %v18017_v51 = vld [vmem:[#allocation2 + $0xc8] sm:$0x1] }
 0x3eb   : > { %v8595_v31 = vrot.slane %v19809_v59, 4  ;;  %v19810_v1 = vshrl.u32 %v17501_v22, 16  ;;  %v12023_v13 = vcombine.low %v9062_v19, %v9065_v28  ;;  %v8591_v58 = vrot.slane %v8589_v41, 5 }
 0x3ec   : > { %v8586_v43 = vor.u32 %v8585_v12, %v8582_v9  ;;  %v8601_v62 = vrot.slane %v8599_v30, 5  ;;  %v19811_v4 = vshll.u32 %v17501_v22, 16  ;;  %13403 = vmatprep.mubr.bf16.mxu0 %v11969_v7  ;;  %v8613_v46 = vshll.u32 %v17503_v55, 16  ;;  %13444 = vmatmul.mubr.bf16.gmra.mxu1 %v12022_v35  ;;  %v18009_v9 = vpop.f32.mrf.mxu0 }
 0x3ed   : > { %v8606_v26 = vrot.slane %v19810_v1, 4  ;;  %v19812_v20 = vshrl.u32 %v17503_v55, 16  ;;  %v8623_v17 = vshll.u32 %v17985_v33, 16  ;;  %v8596_v42 = vor.u32 %v8595_v31, %v8591_v58  ;;  %13447 = vmatprep.mubr.bf16.mxu1 %v12023_v13 }
 0x3ee   : > { %v8609_v15 = vrot.slane %v19811_v4, 5  ;;  %v8587_v27 = vrot.slane %v8586_v43, 4  ;;  %v11992_v8 = vrot.slane %v17419_v18, 9  ;;  %v9068_v16 = vrot.slane %v17428_v60, 5  ;;  %v18028_v43 = vld [vmem:[#allocation2 + $0x18] sm:$0xf]  ;;  %v18037_v4 = vpop.f32.mrf.mxu1 }
 0x3ef   : > { %v8619_v0 = vrot.slane %v19812_v20, 4  ;;  %v8615_v21 = vrot.slane %v8613_v46, 5  ;;  %v8625_v40 = vrot.slane %v8623_v17, 5  ;;  %v9071_v53 = vrot.slane %v17903_v2, 5 }
 0x3f0   : > { %v8610_v48 = vor.u32 %v8609_v15, %v8606_v26  ;;  %v8592_v45 = vsel %vm14068_vm4, %v8587_v27, %v8591_v58  ;;  %v8597_v47 = vrot.slane %v8596_v42, 4  ;;  %v9069_v6 = vsel %vm14113_vm9, %v11992_v8, %v9068_v16  ;;  %v18039_v15 = vpop.f32.mrf.mxu0 }
 0x3f1   : > { %v9070_v50 = vrot.slane %v9068_v16, 4  ;;  %v8620_v39 = vor.u32 %v8619_v0, %v8615_v21  ;;  %v11993_v18 = vrot.slane %v17439_v36, 9  ;;  %v9075_v60 = vrot.slane %v17449_v32, 5 }
 0x3f2   : > { %v8611_v37 = vrot.slane %v8610_v48, 4  ;;  %v9078_v25 = vrot.slane %v17927_v24, 5  ;;  %v8602_v2 = vsel %vm14068_vm4, %v8597_v47, %v8601_v62  ;;  %v19813_v61 = vshrl.u32 %v17539_v29, 16  ;;  %v18035_v62 = vld [vmem:[#allocation2 + $0x1c] sm:$0xf] }
 0x3f3   : > { %v9072_v19 = vsel %vm14113_vm9, %v9070_v50, %v9071_v53  ;;  %v11970_v12 = vcombine.low %v8592_v45, %v8602_v2  ;;  %v8621_v32 = vrot.slane %v8620_v39, 4  ;;  %v9076_v24 = vsel %vm14113_vm9, %v11993_v18, %v9075_v60  ;;  %v18055_v53 = vld [vmem:[#allocation2 + $0x28] sm:$0xf]  ;;  %v18061_v39 = vpop.f32.mrf.mxu1  ;;  %v18063_v18 = vpop.f32.mrf.mxu0 }
 0x3f4   : > { %v8616_v35 = vsel %vm14068_vm4, %v8611_v37, %v8615_v21  ;;  %v8630_v36 = vrot.slane %v19813_v61, 4  ;;  %v12024_v5 = vcombine.low %v9069_v6, %v9072_v19  ;;  %v9077_v41 = vrot.slane %v9075_v60, 4 }
 0x3f5   : > { %v19814_v59 = vshll.u32 %v17539_v29, 16  ;;  %v8637_v30 = vshll.u32 %v17541_v34, 16  ;;  %v19815_v7 = vshrl.u32 %v17541_v34, 16  ;;  %13404 = vmatmul.mubr.bf16.gmra.mxu0 %v11970_v12  ;;  %v8626_v1 = vsel %vm14068_vm4, %v8621_v32, %v8625_v40  ;;  %v18053_v40 = vld [vmem:[#allocation2 + $0x24] sm:$0xf] }
 0x3f6   : > { %v8647_v26 = vshll.u32 %v18017_v51, 16  ;;  %v11994_v13 = vrot.slane %v17464_v3, 9  ;;  %v9082_v58 = vrot.slane %v17472_v23, 5  ;;  %v11971_v27 = vcombine.low %v8616_v35, %v8626_v1  ;;  %v18048_v23 = vld [vmem:[%s19366_s8] ss:$0 sm:$0xff]  ;;  %13448 = vmatmul.mubr.bf16.gmra.mxu1 %v12024_v5 }
 0x3f7   : > { %v8633_v31 = vrot.slane %v19814_v59, 5  ;;  %v8643_v28 = vrot.slane %v19815_v7, 4  ;;  %v9079_v46 = vsel %vm14113_vm9, %v9077_v41, %v9078_v25  ;;  %v8639_v0 = vrot.slane %v8637_v30, 5  ;;  %v18077_v12 = vld [vmem:[#allocation2 + $0x34] sm:$0xf]  ;;  %v18089_v30 = vpop.f32.mrf.mxu0 }
 0x3f8   : > { %v12025_v17 = vcombine.low %v9076_v24, %v9079_v46  ;;  %v8649_v42 = vrot.slane %v8647_v26, 5  ;;  %v9083_v48 = vsel %vm14113_vm9, %v11994_v13, %v9082_v58  ;;  %v9084_v3 = vrot.slane %v9082_v58, 4  ;;  %13407 = vmatprep.mubr.bf16.mxu0 %v11971_v27  ;;  %v18097_v13 = vld [vmem:[#allocation2 + $0x20] sm:$0x1] }
 0x3f9   : > { %v8634_v20 = vor.u32 %v8633_v31, %v8630_v36  ;;  %v8644_v16 = vor.u32 %v8643_v28, %v8639_v0  ;;  %v9085_v45 = vrot.slane %v17967_v44, 5  ;;  %v12053_v21 = vcombine.low %v18028_v43, %v18035_v62  ;;  %v18075_v36 = vld [vmem:[#allocation2 + $0x30] sm:$0xf]  ;;  %v18087_v31 = vpop.f32.mrf.mxu1 }
 0x3fa   : > { %13451 = vmatprep.mubr.bf16.mxu1 %v12025_v17  ;;  %v9826_v47 = vshrl.u32 %v18028_v43, 16  ;;  %v9829_v37 = vshll.u32 %v18028_v43, 16  ;;  %v9839_v6 = vshrl.u32 %v18035_v62, 16  ;;  %v11995_v50 = vrot.slane %v17501_v22, 9  ;;  %v18108_v17 = vld [vmem:[#allocation2 + $0x3c] sm:$0xf] }
 0x3fb   : > { %v8635_v8 = vrot.slane %v8634_v20, 4  ;;  %v8645_v60 = vrot.slane %v8644_v16, 4  ;;  %v9086_v25 = vsel %vm14113_vm9, %v9084_v3, %v9085_v45  ;;  %v9089_v2 = vrot.slane %v17503_v55, 5  ;;  %v18112_v16 = vld [vmem:[#allocation2 + $0x40] sm:$0xf]  ;;  %v18114_v45 = vpop.f32.mrf.mxu1 }
 0x3fc   : > { %v12026_v35 = vcombine.low %v9083_v48, %v9086_v25  ;;  %v9092_v19 = vrot.slane %v17985_v33, 5  ;;  %v6679_v61 = vadd.f32 %v17858_v14, %v18048_v23  ;;  %v12054_v22 = vcombine.low %v18053_v40, %v18055_v53 }
 0x3fd   : > { %v8640_v44 = vsel %vm14068_vm4, %v8635_v8, %v8639_v0  ;;  %v8650_v32 = vsel %vm14068_vm4, %v8645_v60, %v8649_v42  ;;  %v9090_v5 = vsel %vm14113_vm9, %v11995_v50, %v9089_v2  ;;  %v9091_v55 = vrot.slane %v9089_v2, 4  ;;  %v18130_v50 = vld [vmem:[#allocation2 + $0x48] sm:$0xf] }
 0x3fe   : > { %v9850_v24 = vshrl.u32 %v18053_v40, 16  ;;  %v11972_v33 = vcombine.low %v8640_v44, %v8650_v32  ;;  %v9853_v41 = vshll.u32 %v18053_v40, 16  ;;  %v9863_v14 = vshrl.u32 %v18055_v53, 16  ;;  %13452 = vmatmul.mubr.bf16.gmra.mxu1 %v12026_v35  ;;  %v18132_v44 = vld [vmem:[#allocation2 + $0x4c] sm:$0xf] }
 0x3ff   : > { %v11996_v59 = vrot.slane %v17539_v29, 9  ;;  %v9093_v7 = vsel %vm14113_vm9, %v9091_v55, %v9092_v19  ;;  %v9096_v28 = vrot.slane %v17541_v34, 5  ;;  %v9099_v1 = vrot.slane %v18017_v51, 5  ;;  %v18170_v40 = vld [vmem:[#allocation2 + $0x38] sm:$0x1] }
 0x400   : > { %v12055_v26 = vcombine.low %v18075_v36, %v18077_v12  ;;  %13408 = vmatmul.mubr.bf16.gmra.mxu0 %v11972_v33  ;;  %v12027_v58 = vcombine.low %v9090_v5, %v9093_v7  ;;  %v9874_v29 = vshrl.u32 %v18075_v36, 16  ;;  %v9877_v27 = vshll.u32 %v18075_v36, 16  ;;  %v13852_v5 = vld [vmem:[%s19365_s7 + $0x230] sm:$0xff]   ;;  %v18149_v7 = vpop.f32.mrf.mxu1 }
 0x401   : > { %v9887_v46 = vshrl.u32 %v18077_v12, 16  ;;  %13475 = vmatprep.mubr.bf16.mxu0 %v12053_v21  ;;  %v9097_v34 = vsel %vm14113_vm9, %v11996_v59, %v9096_v28  ;;  %v9098_v20 = vrot.slane %v9096_v28, 4  ;;  %v18106_v51 = vadd.f32 %v18048_v23, %v17875_v63  ;;  %v18116_v21 = vpop.f32.mrf.mxu0  ;;  %v18147_v59 = vld [vmem:[#allocation2 + $0x2c] sm:$0x1] }
 0x402   : > { %v9828_v0 = vrot.slane %v9826_v47, 4  ;;  %13455 = vmatprep.mubr.bf16.mxu1 %v12027_v58  ;;  %v9831_v42 = vrot.slane %v9829_v37, 5  ;;  %v9835_v48 = vshll.u32 %v18035_v62, 16  ;;  %v9841_v3 = vrot.slane %v9839_v6, 4 }
 0x403   : > { %v9845_v8 = vshll.u32 %v18097_v13, 16  ;;  %v9100_v63 = vsel %vm14113_vm9, %v9098_v20, %v9099_v1  ;;  %v6680_v47 = vadd.f32 %v17907_v49, %v18048_v23  ;;  %v18124_v37 = vadd.f32 %v18048_v23, %v17939_v54  ;;  %v18151_v28 = vpop.f32.mrf.mxu0 }
 0x404   : > { %v18128_v6 = vadd.f32 %v17953_v57, %v18048_v23  ;;  %v12028_v60 = vcombine.low %v9097_v34, %v9100_v63  ;;  %v9832_v25 = vor.u32 %v9831_v42, %v9828_v0  ;;  %v9837_v2 = vrot.slane %v9835_v48, 5 }
 0x405   : > { %v9847_v35 = vrot.slane %v9845_v8, 5  ;;  %v12056_v19 = vcombine.low %v18108_v17, %v18112_v16  ;;  %v9898_v49 = vshrl.u32 %v18108_v17, 16  ;;  %v9901_v54 = vshll.u32 %v18108_v17, 16  ;;  %v18162_v48 = vpop.f32.mrf.mxu0 }
 0x406   : > { %v9911_v36 = vshrl.u32 %v18112_v16, 16  ;;  %v9833_v32 = vrot.slane %v9832_v25, 4  ;;  %v9842_v57 = vor.u32 %v9841_v3, %v9837_v2  ;;  %v18143_v55 = vadd.f32 %v18037_v4, %v6679_v61  ;;  %13456 = vmatmul.mubr.bf16.gmra.mxu1 %v12028_v60 }
 0x407   : > { %v12057_v33 = vcombine.low %v18130_v50, %v18132_v44  ;;  %v9922_v1 = vshrl.u32 %v18130_v50, 16  ;;  %v9925_v58 = vshll.u32 %v18130_v50, 16  ;;  %v9935_v34 = vshrl.u32 %v18132_v44, 16 }
 0x408   : > { %v9852_v20 = vrot.slane %v9850_v24, 4  ;;  %13476 = vmatmul.mubr.bf16.vlgmr.msra.gmra.mxu0 %v12054_v22  ;;  %v9838_v4 = vsel %vm14068_vm4, %v9833_v32, %v9837_v2  ;;  %v9843_v61 = vrot.slane %v9842_v57, 4  ;;  %v9855_v0 = vrot.slane %v9853_v41, 5 }
 0x409   : > { %v9859_v42 = vshll.u32 %v18055_v53, 16  ;;  %13556 = vmatpush3.bf16.msra.mxu0 %v17893_v11  ;;  %v9865_v3 = vrot.slane %v9863_v14, 4  ;;  %v9869_v8 = vshll.u32 %v18147_v59, 16  ;;  %v18168_v24 = vadd.f32 %v18048_v23, %v17977_v10  ;;  %13479 = vmatprep.mubr.bf16.mxu0 %v12055_v26  ;;  %v13855_v11 = vld [vmem:[%s19365_s7 + $0x228] sm:$0xff]   ;;  %v18177_v14 = vpop.f32.mrf.mxu1 }
 0x40a   : > { %v9876_v22 = vrot.slane %v9874_v29, 4  ;;  %v9848_v41 = vsel %vm14068_vm4, %v9843_v61, %v9847_v35  ;;  %13557 = vmatprep.subr.bf16.mxu0 %v13852_v5  ;;  %v9856_v53 = vor.u32 %v9855_v0, %v9852_v20  ;;  %v9879_v25 = vrot.slane %v9877_v27, 5  ;;  %v18183_v20 = vpop.f32.mrf.mxu0  ;;  %v18198_v0 = vld [vmem:[#allocation2 + $0x58] sm:$0xf] }
 0x40b   : > { %v9861_v63 = vrot.slane %v9859_v42, 5  ;;  %v12093_v60 = vcombine.low %v9838_v4, %v9848_v41  ;;  %v9871_v10 = vrot.slane %v9869_v8, 5  ;;  %v9883_v2 = vshll.u32 %v18077_v12, 16  ;;  %v18217_v41 = vld [vmem:[#allocation2 + $0x60] sm:$0xf] }
 0x40c   : > { %v9889_v26 = vrot.slane %v9887_v46, 4  ;;  %v9857_v29 = vrot.slane %v9856_v53, 4  ;;  %v9880_v35 = vor.u32 %v9879_v25, %v9876_v22  ;;  %v9893_v57 = vshll.u32 %v18170_v40, 16  ;;  %v18196_v46 = vld [vmem:[#allocation2 + $0x54] sm:$0xf] }
 0x40d   : > { %v9866_v32 = vor.u32 %v9865_v3, %v9861_v63  ;;  %13523 = vmatprep.mubr.bf16.mxu1 %v12093_v60  ;;  %13558 = vmatpush3.bf16.msra.mxu0 %v13852_v5  ;;  %v9885_v27 = vrot.slane %v9883_v2, 5  ;;  %v18187_v61 = vadd.f32 %v18061_v39, %v18106_v51  ;;  %v18191_v4 = vadd.f32 %v17997_v52, %v18048_v23  ;;  %v13242_v39 = vpop.f32.mrf.mxu1  ;;  %v13858_v52 = vld [vmem:[%s19365_s7 + $0x220] sm:$0xff]  }
 0x40e   : > { %v18194_v12 = vadd.f32 %v18087_v31, %v6680_v47  ;;  %v9862_v42 = vsel %vm14068_vm4, %v9857_v29, %v9861_v63  ;;  %v9881_v3 = vrot.slane %v9880_v35, 4  ;;  %v9895_v8 = vrot.slane %v9893_v57, 5  ;;  %13559 = vmatprep.subr.bf16.mxu0 %v13855_v11  ;;  %v18219_v53 = vld [vmem:[#allocation2 + $0x64] sm:$0xf]  ;;  %v13861_v57 = vld [vmem:[%s19365_s7 + $0x218] sm:$0xff]  }
 0x40f   : > { %v9867_v5 = vrot.slane %v9866_v32, 4  ;;  %v9890_v51 = vor.u32 %v9889_v26, %v9885_v27  ;;  %v18207_v31 = vadd.f32 %v18048_v23, %v18009_v9  ;;  %v18211_v47 = vadd.f32 %v18114_v45, %v18124_v37  ;;  %19816 = vst [vmem:[#allocation11_spill] sm:$0xff] %v18219_v53  ;;  %v18231_v37 = vpop.f32.mrf.mxu0  ;;  %v18238_v2 = vld [vmem:[#allocation2 + $0x44] sm:$0x1]  ;;  %v7275_v35 = vpop.f32.mrf.mxu1 }
 0x410   : > { %v18215_v22 = vadd.f32 %v18039_v15, %v18048_v23  ;;  %13480 = vmatmul.mubr.bf16.gmra.mxu0 %v12056_v19  ;;  %v9886_v63 = vsel %vm14068_vm4, %v9881_v3, %v9885_v27  ;;  %v12058_v45 = vcombine.low %v18196_v46, %v18198_v0  ;;  %v9946_v15 = vshrl.u32 %v18196_v46, 16 }
 0x411   : > { %v9872_v9 = vsel %vm14068_vm4, %v9867_v5, %v9871_v10  ;;  %13483 = vmatprep.mubr.bf16.mxu0 %v12057_v33  ;;  %v9891_v60 = vrot.slane %v9890_v51, 4  ;;  %v9949_v19 = vshll.u32 %v18196_v46, 16  ;;  %v9959_v10 = vshrl.u32 %v18198_v0, 16  ;;  %13560 = vmatpush3.bf16.msra.mxu0 %v13855_v11 }
 0x412   : > { %v12094_v25 = vcombine.low %v9862_v42, %v9872_v9  ;;  %v18242_v26 = vadd.f32 %v18149_v7, %v18128_v6  ;;  %v12059_v29 = vcombine.low %v18217_v41, %v18219_v53  ;;  %v9970_v32 = vshrl.u32 %v18217_v41, 16  ;;  %13561 = vmatprep.subr.bf16.mxu0 %v13858_v52  ;;  %v18262_v9 = vld [vmem:[#allocation2 + $0x50] sm:$0x1] }
 0x413   : > { %v9973_v33 = vshll.u32 %v18217_v41, 16  ;;  %v9896_v11 = vsel %vm14068_vm4, %v9891_v60, %v9895_v8  ;;  %v9983_v6 = vshrl.u32 %v18219_v53, 16  ;;  %v9900_v7 = vrot.slane %v9898_v49, 4 }
 0x414   : > { %13524 = vmatmul.mubr.bf16.vlgmr.msra.gmra.mxu1 %v12094_v25  ;;  %v9903_v27 = vrot.slane %v9901_v54, 5  ;;  %v12095_v42 = vcombine.low %v9886_v63, %v9896_v11  ;;  %v9907_v5 = vshll.u32 %v18112_v16, 16  ;;  %v9913_v3 = vrot.slane %v9911_v36, 4  ;;  %v18264_v25 = vpop.f32.mrf.mxu0  ;;  %v13245_v11 = vpop.f32.mrf.mxu1 }
 0x415   : > { %v9917_v51 = vshll.u32 %v18238_v2, 16  ;;  %v18268_v60 = vadd.f32 %v18048_v23, %v18063_v18  ;;  %v9924_v17 = vrot.slane %v9922_v1, 4  ;;  %v9927_v49 = vrot.slane %v9925_v58, 5  ;;  %13562 = vmatpush3.bf16.msra.mxu0 %v13858_v52  ;;  %v13864_v18 = vld [vmem:[%s19365_s7 + $0x210] sm:$0xff]  }
 0x416   : > { %v9904_v8 = vor.u32 %v9903_v27, %v9900_v7  ;;  %13527 = vmatprep.mubr.bf16.mxu1 %v12095_v42  ;;  %v9909_v16 = vrot.slane %v9907_v5, 5  ;;  %v9931_v36 = vshll.u32 %v18132_v44, 16  ;;  %v9937_v63 = vrot.slane %v9935_v34, 4  ;;  %13563 = vmatprep.subr.bf16.mxu0 %v13861_v57  ;;  %v18277_v7 = vpop.f32.mrf.mxu0  ;;  %v18294_v5 = vld [vmem:[#allocation2 + $0x6c] sm:$0xf] }
 0x417   : > { %v9919_v54 = vrot.slane %v9917_v51, 5  ;;  %v9928_v50 = vor.u32 %v9927_v49, %v9924_v17  ;;  %v9941_v58 = vshll.u32 %v18262_v9, 16  ;;  %v18285_v52 = vadd.f32 %v18177_v14, %v18168_v24  ;;  %19817 = vst [vmem:[#allocation14_spill] sm:$0xff] %v18294_v5  ;;  %v18296_v51 = vld [vmem:[#allocation2 + $0x70] sm:$0xf]  ;;  %v7288_v49 = vpop.f32.mrf.mxu1 }
 0x418   : > { %v9905_v1 = vrot.slane %v9904_v8, 4  ;;  %13484 = vmatmul.mubr.bf16.gmra.mxu0 %v12058_v45  ;;  %v9914_v27 = vor.u32 %v9913_v3, %v9909_v16  ;;  %v9933_v44 = vrot.slane %v9931_v36, 5  ;;  %v18289_v34 = vadd.f32 %v18089_v30, %v18048_v23  ;;  %19818 = vst [vmem:[#allocation9_spill] sm:$0xff] %v18296_v51  ;;  %v18313_v17 = vld [vmem:[#allocation2 + $0x7c] sm:$0xf] }
 0x419   : > { %v18292_v42 = vadd.f32 %v13242_v39, %v18191_v4  ;;  %13487 = vmatprep.mubr.bf16.mxu0 %v12059_v29  ;;  %v9929_v24 = vrot.slane %v9928_v50, 4  ;;  %v9943_v14 = vrot.slane %v9941_v58, 5  ;;  %v18302_v45 = vadd.f32 %v18048_v23, %v18116_v21  ;;  %13564 = vmatpush3.bf16.msra.mxu0 %v13861_v57  ;;  %v18311_v29 = vld [vmem:[#allocation2 + $0x78] sm:$0xf]  ;;  %19820 = vst [vmem:[#allocation20_spill] sm:$0xff] %v18313_v17  ;;  %v13867_v21 = vld [vmem:[%s19365_s7 + $0x208] sm:$0xff]  }
 0x41a   : > { %v9910_v8 = vsel %vm14068_vm4, %v9905_v1, %v9909_v16  ;;  %v9915_v30 = vrot.slane %v9914_v27, 4  ;;  %v9938_v3 = vor.u32 %v9937_v63, %v9933_v44  ;;  %v18305_v4 = vadd.f32 %v7275_v35, %v18207_v31  ;;  %19819 = vst [vmem:[#allocation8_spill] sm:$0xff] %v18311_v29  ;;  %v18315_v16 = vpop.f32.mrf.mxu0  ;;  %13565 = vmatprep.subr.bf16.mxu0 %v13864_v18  ;;  %v18332_v58 = vld [vmem:[#allocation2 + $0x5c] sm:$0x1] }
 0x41b   : > { %v18309_v39 = vadd.f32 %v18151_v28, %v18048_v23  ;;  %v9934_v31 = vsel %vm14068_vm4, %v9929_v24, %v9933_v44  ;;  %v12060_v35 = vcombine.low %v18294_v5, %v18296_v51  ;;  %v18330_v50 = vadd.f32 %v13245_v11, %v18215_v22  ;;  %19821 = vst [vmem:[#allocation22_spill] sm:$0xff] %v18332_v58 }
 0x41c   : > { %v9920_v36 = vsel %vm14068_vm4, %v9915_v30, %v9919_v54  ;;  %v9939_v63 = vrot.slane %v9938_v3, 4  ;;  %v12061_v44 = vcombine.low %v18311_v29, %v18313_v17  ;;  %v9948_v22 = vrot.slane %v9946_v15, 4  ;;  %v18345_v3 = vpop.f32.mrf.mxu0  ;;  %v13870_v15 = vld [vmem:[%s19365_s7 + $0x200] sm:$0xff]  }
 0x41d   : > { %v12096_v27 = vcombine.low %v9910_v8, %v9920_v36  ;;  %13566 = vmatpush3.bf16.msra.mxu0 %v13864_v18  ;;  %v9951_v11 = vrot.slane %v9949_v19, 5  ;;  %v13246_v8 = vpop.f32.mrf.mxu1  ;;  %v9955_v28 = vshll.u32 %v18198_v0, 16  ;;  %v9961_v18 = vrot.slane %v9959_v10, 4 }
 0x41e   : > { %v9944_v54 = vsel %vm14068_vm4, %v9939_v63, %v9943_v14  ;;  %13567 = vmatprep.subr.bf16.mxu0 %v13867_v21  ;;  %v9965_v14 = vshll.u32 %v18332_v58, 16  ;;  %v18351_v63 = vld [vmem:[#allocation2 + $0x68] sm:$0x1]  ;;  %v18358_v30 = vadd.f32 %v18048_v23, %v18162_v48  ;;  %v9975_v10 = vrot.slane %v9973_v33, 5  ;;  %v18371_v57 = vpop.f32.mrf.mxu0 }
 0x41f   : > { %13528 = vmatmul.mubr.bf16.gmra.mxu1 %v12096_v27  ;;  %v12097_v36 = vcombine.low %v9934_v31, %v9944_v54  ;;  %19822 = vst [vmem:[#allocation19_spill] sm:$0xff] %v18351_v63  ;;  %v9952_v19 = vor.u32 %v9951_v11, %v9948_v22  ;;  %v9972_v31 = vrot.slane %v9970_v32, 4  ;;  %v9957_v27 = vrot.slane %v9955_v28, 5  ;;  %v7291_v32 = vpop.f32.mrf.mxu1 }
 0x420   : > { %13488 = vmatmul.mubr.bf16.gmra.mxu0 %v12060_v35  ;;  %v9967_v54 = vrot.slane %v9965_v14, 5  ;;  %v9979_v24 = vshll.u32 %v18219_v53, 16  ;;  %v9985_v35 = vrot.slane %v9983_v6, 4  ;;  %v9989_v48 = vshll.u32 %v18351_v63, 16  ;;  %v18380_v6 = vld [vmem:[#allocation2 + $0x84] sm:$0xf] }
 0x421   : > { %13531 = vmatprep.mubr.bf16.mxu1 %v12097_v36  ;;  %13491 = vmatprep.mubr.bf16.mxu0 %v12061_v44  ;;  %v9953_v22 = vrot.slane %v9952_v19, 4  ;;  %v9976_v11 = vor.u32 %v9975_v10, %v9972_v31  ;;  %v18369_v1 = vadd.f32 %v7288_v49, %v18268_v60  ;;  %v9962_v33 = vor.u32 %v9961_v18, %v9957_v27  ;;  %v18382_v14 = vld [vmem:[#allocation2 + $0x88] sm:$0xf]  ;;  %v18399_v31 = vld [vmem:[#allocation2 + $0x90] sm:$0xf] }
 0x422   : > { %13568 = vmatpush3.bf16.msra.mxu0 %v13867_v21  ;;  %v9981_v44 = vrot.slane %v9979_v24, 5  ;;  %v18375_v28 = vadd.f32 %v18183_v20, %v18048_v23  ;;  %v18378_v36 = vadd.f32 %v13246_v8, %v18289_v34  ;;  %19825 = vst [vmem:[#allocation15_spill] sm:$0xff] %v18380_v6  ;;  %19826 = vst [vmem:[#allocation25_spill] sm:$0xff] %v18382_v14  ;;  %v9991_v19 = vrot.slane %v9989_v48, 5  ;;  %v18390_v24 = vpop.f32.mrf.mxu0  ;;  %v18401_v10 = vld [vmem:[#allocation2 + $0x94] sm:$0xf] }
 0x423   : > { %19823 = vst [vmem:[#allocation7_spill] sm:$0xff] %v18369_v1  ;;  %13569 = vmatprep.subr.bf16.mxu0 %v13870_v15  ;;  %v9958_v60 = vsel %vm14068_vm4, %v9953_v22, %v9957_v27  ;;  %v9977_v49 = vrot.slane %v9976_v11, 4  ;;  %v18388_v21 = vadd.f32 %v18048_v23, %v18231_v37  ;;  %v9963_v20 = vrot.slane %v9962_v33, 4  ;;  %19828 = vst [vmem:[#allocation29_spill] sm:$0xff] %v18401_v10 }
 0x424   : > { %19824 = vst [vmem:[#allocation17_spill] sm:$0xff] %v18378_v36  ;;  %v9986_v18 = vor.u32 %v9985_v35, %v9981_v44  ;;  %v18393_v34 = vadd.f32 %v7291_v32, %v18302_v45  ;;  %v18397_v8 = vadd.f32 %v18264_v25, %v18048_v23  ;;  %v12062_v37 = vcombine.low %v18380_v6, %v18382_v14  ;;  %v13249_v45 = vpop.f32.mrf.mxu1  ;;  %v18409_v11 = vpop.f32.mrf.mxu0 }
 0x425   : > { %v9982_v27 = vsel %vm14068_vm4, %v9977_v49, %v9981_v44  ;;  %v9968_v25 = vsel %vm14068_vm4, %v9963_v20, %v9967_v54  ;;  %v18415_v33 = vadd.f32 %v13249_v45, %v18309_v39  ;;  %v18417_v44 = vld [vmem:[#allocation2 + $0x74] sm:$0x1]  ;;  %v12063_v35 = vcombine.low %v18399_v31, %v18401_v10 }
 0x426   : > { %19827 = vst [vmem:[#allocation31_spill] sm:$0xff] %v18393_v34  ;;  %13570 = vmatpush3.bf16.msra.mxu0 %v13870_v15  ;;  %v9987_v48 = vrot.slane %v9986_v18, 4  ;;  %19830 = vst [vmem:[#allocation37_spill] sm:$0xff] %v18417_v44  ;;  %v12098_v49 = vcombine.low %v9958_v60, %v9968_v25  ;;  %v7304_v34 = vpop.f32.mrf.mxu1  ;;  %v18423_v36 = vpop.f32.mrf.mxu0  ;;  %v19831_v20 = vshrl.u32 %v18294_v5, 16  ;;  %v19832_v60 = vshll.u32 %v18294_v5, 16 }
 0x427   : > { %19829 = vst [vmem:[#allocation6_spill] sm:$0xff] %v18415_v33  ;;  %v10003_v25 = vshll.u32 %v18296_v51, 16  ;;  %v19833_v15 = vshrl.u32 %v18296_v51, 16  ;;  %v10013_v32 = vshll.u32 %v18417_v44, 16  ;;  %v18436_v33 = vld [vmem:[#allocation2 + $0x80] sm:$0x1] }
 0x428   : > { %13492 = vmatmul.mubr.bf16.gmra.mxu0 %v12062_v37  ;;  %v9992_v54 = vsel %vm14068_vm4, %v9987_v48, %v9991_v19  ;;  %v9996_v18 = vrot.slane %v19831_v20, 4  ;;  %v9999_v37 = vrot.slane %v19832_v60, 5  ;;  %13532 = vmatmul.mubr.bf16.gmra.mxu1 %v12098_v49  ;;  %19834 = vst [vmem:[#allocation30_spill] sm:$0xff] %v18436_v33  ;;  %v13250_v19 = vpop.f32.mrf.mxu1  ;;  %v18440_v20 = vadd.f32 %v18048_v23, %v18277_v7 }
 0x429   : > { %v12099_v45 = vcombine.low %v9982_v27, %v9992_v54  ;;  %13495 = vmatprep.mubr.bf16.mxu0 %v12063_v35  ;;  %v10009_v22 = vrot.slane %v19833_v15, 4  ;;  %v19835_v60 = vshrl.u32 %v18311_v29, 16  ;;  %v19836_v27 = vshll.u32 %v18311_v29, 16  ;;  %v18446_v54 = vpop.f32.mrf.mxu0 }
 0x42a   : > { %v10000_v48 = vor.u32 %v9999_v37, %v9996_v18  ;;  %v10005_v15 = vrot.slane %v10003_v25, 5  ;;  %v10015_v39 = vrot.slane %v10013_v32, 5  ;;  %v10027_v44 = vshll.u32 %v18313_v17, 16  ;;  %v7307_v37 = vpop.f32.mrf.mxu1  ;;  %v18466_v25 = vld [vmem:[#allocation2 + $0xa0] sm:$0xf] }
 0x42b   : > { %v10020_v49 = vrot.slane %v19835_v60, 4  ;;  %v10023_v35 = vrot.slane %v19836_v27, 5  ;;  %13535 = vmatprep.mubr.bf16.mxu1 %v12099_v45  ;;  %v19837_v5 = vshrl.u32 %v18313_v17, 16  ;;  %v10037_v1 = vshll.u32 %v18436_v33, 16  ;;  %v18455_v29 = vpop.f32.mrf.mxu0  ;;  %19841 = vst [vmem:[#allocation24_spill] sm:$0xff] %v18466_v25 }
 0x42c   : > { %v10001_v51 = vrot.slane %v10000_v48, 4  ;;  %v18453_v60 = vadd.f32 %v7304_v34, %v18358_v30  ;;  %v10010_v27 = vor.u32 %v10009_v22, %v10005_v15  ;;  %v10029_v63 = vrot.slane %v10027_v44, 5 }
 0x42d   : > { %v10033_v18 = vrot.slane %v19837_v5, 4  ;;  %v10024_v7 = vor.u32 %v10023_v35, %v10020_v49  ;;  %v18459_v32 = vadd.f32 %v18315_v16, %v18048_v23  ;;  %v18462_v45 = vadd.f32 %v13250_v19, %v18375_v28  ;;  %v18464_v5 = vld [vmem:[#allocation2 + $0x9c] sm:$0xf]  ;;  %v18474_v44 = vpop.f32.mrf.mxu0  ;;  %v13253_v35 = vpop.f32.mrf.mxu1 }
 0x42e   : > { %19838 = vst [vmem:[#allocation42_spill] sm:$0xff] %v18453_v60  ;;  %19840 = vst [vmem:[#allocation34_spill] sm:$0xff] %v18464_v5  ;;  %v10006_v48 = vsel %vm14068_vm4, %v10001_v51, %v10005_v15  ;;  %v10039_v34 = vrot.slane %v10037_v1, 5  ;;  %v18472_v22 = vadd.f32 %v18048_v23, %v18345_v3  ;;  %v10011_v16 = vrot.slane %v10010_v27, 4  ;;  %v18485_v51 = vld [vmem:[#allocation2 + $0xac] sm:$0xf] }
 0x42f   : > { %19839 = vst [vmem:[#allocation43_spill] sm:$0xff] %v18462_v45  ;;  %v10025_v30 = vrot.slane %v10024_v7, 4  ;;  %v10034_v49 = vor.u32 %v10033_v18, %v10029_v63  ;;  %v18477_v28 = vadd.f32 %v7307_v37, %v18388_v21  ;;  %v18481_v19 = vadd.f32 %v18371_v57, %v18048_v23  ;;  %v18483_v45 = vld [vmem:[#allocation2 + $0xa8] sm:$0xf]  ;;  %19844 = vst [vmem:[#allocation23_spill] sm:$0xff] %v18485_v51  ;;  %v18493_v18 = vpop.f32.mrf.mxu0 }
 0x430   : > { %19843 = vst [vmem:[#allocation26_spill] sm:$0xff] %v18483_v45  ;;  %v12064_v3 = vcombine.low %v18464_v5, %v18466_v25  ;;  %v10016_v57 = vsel %vm14068_vm4, %v10011_v16, %v10015_v39  ;;  %v18499_v27 = vadd.f32 %v13253_v35, %v18397_v8  ;;  %v12065_v15 = vcombine.low %v18483_v45, %v18485_v51 }
 0x431   : > { %19842 = vst [vmem:[#allocation47_spill] sm:$0xff] %v18477_v28  ;;  %v10030_v1 = vsel %vm14068_vm4, %v10025_v30, %v10029_v63  ;;  %v10035_v37 = vrot.slane %v10034_v49, 4  ;;  %v18501_v28 = vld [vmem:[#allocation2 + $0x8c] sm:$0x1]  ;;  %v7320_v63 = vpop.f32.mrf.mxu1  ;;  %v12100_v30 = vcombine.low %v10006_v48, %v10016_v57  ;;  %v18507_v60 = vpop.f32.mrf.mxu0  ;;  %v19847_v16 = vshrl.u32 %v18380_v6, 16 }
 0x432   : > { %19845 = vst [vmem:[#allocation57_spill] sm:$0xff] %v18499_v27  ;;  %19846 = vst [vmem:[#allocation35_spill] sm:$0xff] %v18501_v28  ;;  %13496 = vmatmul.mubr.bf16.gmra.mxu0 %v12064_v3  ;;  %v19848_v48 = vshll.u32 %v18380_v6, 16  ;;  %v10051_v21 = vshll.u32 %v18382_v14, 16  ;;  %v19849_v33 = vshrl.u32 %v18382_v14, 16  ;;  %v10061_v27 = vshll.u32 %v18501_v28, 16 }
 0x433   : > { %v10040_v39 = vsel %vm14068_vm4, %v10035_v37, %v10039_v34  ;;  %v10044_v49 = vrot.slane %v19847_v16, 4  ;;  %v13254_v3 = vpop.f32.mrf.mxu1  ;;  %13536 = vmatmul.mubr.bf16.gmra.mxu1 %v12100_v30  ;;  %13499 = vmatprep.mubr.bf16.mxu0 %v12065_v15  ;;  %v18520_v34 = vld [vmem:[#allocation2 + $0x98] sm:$0x1]  ;;  %v18522_v37 = vpop.f32.mrf.mxu0  ;;  %v18526_v16 = vadd.f32 %v18048_v23, %v18390_v24  ;;  %v19851_v30 = vshrl.u32 %v18399_v31, 16 }
 0x434   : > { %v10047_v35 = vrot.slane %v19848_v48, 5  ;;  %v12101_v57 = vcombine.low %v10030_v1, %v10040_v39  ;;  %v10057_v7 = vrot.slane %v19849_v33, 4  ;;  %19850 = vst [vmem:[#allocation54_spill] sm:$0xff] %v18520_v34  ;;  %v19852_v15 = vshll.u32 %v18399_v31, 16 }
 0x435   : > { %v10068_v1 = vrot.slane %v19851_v30, 4  ;;  %v7323_v48 = vpop.f32.mrf.mxu1  ;;  %v10053_v33 = vrot.slane %v10051_v21, 5  ;;  %v10063_v6 = vrot.slane %v10061_v27, 5  ;;  %v10075_v28 = vshll.u32 %v18401_v10, 16  ;;  %v18546_v27 = vld [vmem:[#allocation2 + $0xb4] sm:$0xf] }
 0x436   : > { %v10048_v8 = vor.u32 %v10047_v35, %v10044_v49  ;;  %v10071_v39 = vrot.slane %v19852_v15, 5  ;;  %13539 = vmatprep.mubr.bf16.mxu1 %v12101_v57  ;;  %v19853_v14 = vshrl.u32 %v18401_v10, 16  ;;  %v10085_v24 = vshll.u32 %v18520_v34, 16  ;;  %19856 = vst [vmem:[#allocation52_spill] sm:$0xff] %v18546_v27  ;;  %v18548_v57 = vld [vmem:[#allocation2 + $0xb8] sm:$0xf] }
 0x437   : > { %v18537_v58 = vadd.f32 %v7320_v63, %v18440_v20  ;;  %v10058_v30 = vor.u32 %v10057_v7, %v10053_v33  ;;  %v10077_v53 = vrot.slane %v10075_v28, 5  ;;  %v18541_v15 = vadd.f32 %v18409_v11, %v18048_v23  ;;  %19857 = vst [vmem:[#allocation53_spill] sm:$0xff] %v18548_v57  ;;  %v18567_v34 = vld [vmem:[#allocation2 + $0xc4] sm:$0xf] }
 0x438   : > { %v10081_v17 = vrot.slane %v19853_v14, 4  ;;  %v10049_v49 = vrot.slane %v10048_v8, 4  ;;  %v10072_v35 = vor.u32 %v10071_v39, %v10068_v1  ;;  %v18544_v21 = vadd.f32 %v13254_v3, %v18459_v32  ;;  %v13257_v14 = vpop.f32.mrf.mxu1  ;;  %v18550_v8 = vpop.f32.mrf.mxu0  ;;  %v18565_v39 = vld [vmem:[#allocation2 + $0xc0] sm:$0xf]  ;;  %19860 = vst [vmem:[#allocation48_spill] sm:$0xff] %v18567_v34 }
 0x439   : > { %19854 = vst [vmem:[#allocation38_spill] sm:$0xff] %v18537_v58  ;;  %v10087_v7 = vrot.slane %v10085_v24, 5  ;;  %v18556_v28 = vadd.f32 %v18048_v23, %v18423_v36  ;;  %v10059_v11 = vrot.slane %v10058_v30, 4  ;;  %v18559_v32 = vadd.f32 %v7323_v48, %v18472_v22  ;;  %19859 = vst [vmem:[#allocation56_spill] sm:$0xff] %v18565_v39  ;;  %v18581_v30 = vld [vmem:[#allocation2 + $0xa4] sm:$0x1] }
 0x43a   : > { %19855 = vst [vmem:[#allocation40_spill] sm:$0xff] %v18544_v21  ;;  %v10054_v20 = vsel %vm14068_vm4, %v10049_v49, %v10053_v33  ;;  %v10073_v63 = vrot.slane %v10072_v35, 4  ;;  %v10082_v1 = vor.u32 %v10081_v17, %v10077_v53  ;;  %v18563_v3 = vadd.f32 %v18446_v54, %v18048_v23  ;;  %v7336_v33 = vpop.f32.mrf.mxu1  ;;  %19862 = vst [vmem:[#allocation59_spill] sm:$0xff] %v18581_v30 }
 0x43b   : > { %19858 = vst [vmem:[#allocation33_spill] sm:$0xff] %v18559_v32  ;;  %v12066_v36 = vcombine.low %v18546_v27, %v18548_v57  ;;  %v10064_v48 = vsel %vm14068_vm4, %v10059_v11, %v10063_v6  ;;  %v18579_v24 = vadd.f32 %v13257_v14, %v18481_v19  ;;  %v12067_v17 = vcombine.low %v18565_v39, %v18567_v34 }
 0x43c   : > { %v10078_v49 = vsel %vm14068_vm4, %v10073_v63, %v10077_v53  ;;  %v10083_v54 = vrot.slane %v10082_v1, 4  ;;  %v13258_v32 = vpop.f32.mrf.mxu1  ;;  %v18583_v53 = vpop.f32.mrf.mxu0  ;;  %v12102_v63 = vcombine.low %v10054_v20, %v10064_v48  ;;  %v19863_v14 = vshrl.u32 %v18464_v5, 16 }
 0x43d   : > { %19861 = vst [vmem:[#allocation39_spill] sm:$0xff] %v18579_v24  ;;  %13500 = vmatmul.mubr.bf16.gmra.mxu0 %v12066_v36  ;;  %v19864_v35 = vshll.u32 %v18464_v5, 16  ;;  %v10099_v48 = vshll.u32 %v18466_v25, 16  ;;  %v19865_v22 = vshrl.u32 %v18466_v25, 16  ;;  %v10109_v21 = vshll.u32 %v18581_v30, 16 }
 0x43e   : > { %v10088_v11 = vsel %vm14068_vm4, %v10083_v54, %v10087_v7  ;;  %v10092_v1 = vrot.slane %v19863_v14, 4  ;;  %v7339_v20 = vpop.f32.mrf.mxu1  ;;  %13540 = vmatmul.mubr.bf16.gmra.mxu1 %v12102_v63  ;;  %13503 = vmatprep.mubr.bf16.mxu0 %v12067_v17  ;;  %v18600_v7 = vld [vmem:[#allocation2 + $0xb0] sm:$0x1]  ;;  %v18604_v14 = vadd.f32 %v18048_v23, %v18455_v29  ;;  %v10123_v30 = vshll.u32 %v18485_v51, 16 }
 0x43f   : > { %v10095_v24 = vrot.slane %v19864_v35, 5  ;;  %v12103_v36 = vcombine.low %v10078_v49, %v10088_v11  ;;  %v10105_v6 = vrot.slane %v19865_v22, 4  ;;  %19866 = vst [vmem:[#allocation32_spill] sm:$0xff] %v18600_v7  ;;  %v19867_v35 = vshrl.u32 %v18483_v45, 16  ;;  %v18610_v11 = vpop.f32.mrf.mxu0 }
 0x440   : > { %v19868_v49 = vshll.u32 %v18483_v45, 16  ;;  %v13261_v63 = vpop.f32.mrf.mxu1  ;;  %v10101_v22 = vrot.slane %v10099_v48, 5  ;;  %v10111_v5 = vrot.slane %v10109_v21, 5  ;;  %v10133_v58 = vshll.u32 %v18600_v7, 16 }
 0x441   : > { %v10096_v54 = vor.u32 %v10095_v24, %v10092_v1  ;;  %v10116_v19 = vrot.slane %v19867_v35, 4  ;;  %13543 = vmatprep.mubr.bf16.mxu1 %v12103_v36  ;;  %v19869_v24 = vshrl.u32 %v18485_v51, 16  ;;  %v18617_v35 = vadd.f32 %v7336_v33, %v18526_v16 }
 0x442   : > { %v10119_v17 = vrot.slane %v19868_v49, 5  ;;  %v18619_v45 = vpop.f32.mrf.mxu1  ;;  %v18621_v49 = vpop.f32.mrf.mxu0  ;;  %v10106_v10 = vor.u32 %v10105_v6, %v10101_v22  ;;  %v10125_v36 = vrot.slane %v10123_v30, 5  ;;  %v18625_v21 = vadd.f32 %v18474_v44, %v18048_v23 }
 0x443   : > { %v10129_v1 = vrot.slane %v19869_v24, 4  ;;  %v10097_v25 = vrot.slane %v10096_v54, 4  ;;  %19870 = vst [vmem:[#allocation61_spill] sm:$0xff] %v18617_v35  ;;  %v18628_v48 = vadd.f32 %v13258_v32, %v18541_v15  ;;  %v18630_v54 = vld [vmem:[#allocation2 + $0xcc] sm:$0xf]  ;;  %v18638_v6 = vadd.f32 %v18048_v23, %v18493_v18 }
 0x444   : > { %v10120_v29 = vor.u32 %v10119_v17, %v10116_v19  ;;  %19872 = vst [vmem:[#allocation63_spill] sm:$0xff] %v18630_v54  ;;  %v18632_v19 = vld [vmem:[#allocation2 + $0xd0] sm:$0xf]  ;;  %v10135_v17 = vrot.slane %v10133_v58, 5  ;;  %v18640_v30 = vpop.f32.mrf.mxu1  ;;  %v18642_v44 = vpop.f32.mrf.mxu0  ;;  %v10107_v24 = vrot.slane %v10106_v10, 4  ;;  %v18645_v32 = vadd.f32 %v7339_v20, %v18556_v28 }
 0x445   : > { %19871 = vst [vmem:[#allocation46_spill] sm:$0xff] %v18628_v48  ;;  %v10102_v16 = vsel %vm14068_vm4, %v10097_v25, %v10101_v22  ;;  %v10130_v15 = vor.u32 %v10129_v1, %v10125_v36  ;;  %v18649_v7 = vadd.f32 %v18507_v60, %v18048_v23  ;;  %v12068_v25 = vcombine.low %v18630_v54, %v18632_v19 }
 0x446   : > { %v10121_v33 = vrot.slane %v10120_v29, 4  ;;  %19873 = vst [vmem:[#allocation45_spill] sm:$0xff] %v18645_v32  ;;  %v18657_v29 = vld [vmem:[#allocation2 + $0xbc] sm:$0x1]  ;;  %v7355_v10 = vpop.f32.mrf.mxu1  ;;  %v18659_v1 = vpop.f32.mrf.mxu0  ;;  %v10112_v28 = vsel %vm14068_vm4, %v10107_v24, %v10111_v5  ;;  %v19875_v18 = vshrl.u32 %v18546_v27, 16  ;;  %v19876_v22 = vshll.u32 %v18546_v27, 16 }
 0x447   : > { %19874 = vst [vmem:[#allocation12_spill] sm:$0xff] %v18657_v29  ;;  %v10131_v60 = vrot.slane %v10130_v15, 4  ;;  %13504 = vmatmul.mubr.bf16.gmra.mxu0 %v12068_v25  ;;  %v10147_v35 = vshll.u32 %v18548_v57, 16  ;;  %v19877_v24 = vshrl.u32 %v18548_v57, 16 }
 0x448   : > { %v10126_v58 = vsel %vm14068_vm4, %v10121_v33, %v10125_v36  ;;  %v18665_v36 = vadd.f32 %v13261_v63, %v18563_v3  ;;  %v12104_v33 = vcombine.low %v10102_v16, %v10112_v28  ;;  %v10140_v32 = vrot.slane %v19875_v18, 4  ;;  %v13265_v51 = vpop.f32.mrf.mxu1  ;;  %v18683_v27 = vpop.f32.mrf.mxu0 }
 0x449   : > { %v10143_v48 = vrot.slane %v19876_v22, 5  ;;  %v10136_v5 = vsel %vm14068_vm4, %v10131_v60, %v10135_v17  ;;  %v10153_v15 = vrot.slane %v19877_v24, 4  ;;  %v10157_v3 = vshll.u32 %v18657_v29, 16  ;;  %v18679_v22 = vld [vmem:[#allocation2 + $0xc8] sm:$0x1] }
 0x44a   : > { %v12117_v63 = vrot.slane %v18028_v43, 9  ;;  %13544 = vmatmul.mubr.bf16.gmra.mxu1 %v12104_v33  ;;  %v12105_v16 = vcombine.low %v10126_v58, %v10136_v5  ;;  %v10149_v18 = vrot.slane %v10147_v35, 5  ;;  %v10549_v28 = vrot.slane %v18035_v62, 5  ;;  %19878 = vst [vmem:[#allocation16_spill] sm:$0xff] %v18679_v22  ;;  %v18681_v20 = vpop.f32.mrf.mxu1  ;;  %v18696_v5 = vpop.f32.mrf.mxu0 }
 0x44b   : > { %v10144_v25 = vor.u32 %v10143_v48, %v10140_v32  ;;  %v10159_v17 = vrot.slane %v10157_v3, 5  ;;  %v10552_v60 = vrot.slane %v18097_v13, 5  ;;  %v18688_v24 = vadd.f32 %v18048_v23, %v18522_v37 }
 0x44c   : > { %v19879_v43 = vshrl.u32 %v18565_v39, 16  ;;  %13547 = vmatprep.mubr.bf16.mxu1 %v12105_v16  ;;  %v10154_v48 = vor.u32 %v10153_v15, %v10149_v18  ;;  %v10550_v62 = vsel %vm14113_vm9, %v12117_v63, %v10549_v28  ;;  %v10551_v32 = vrot.slane %v10549_v28, 4  ;;  %v18694_v33 = vpop.f32.mrf.mxu1 }
 0x44d   : > { %v10145_v35 = vrot.slane %v10144_v25, 4  ;;  %v19880_v13 = vshll.u32 %v18565_v39, 16  ;;  %v10171_v23 = vshll.u32 %v18567_v34, 16  ;;  %v19881_v37 = vshrl.u32 %v18567_v34, 16 }
 0x44e   : > { %v10164_v58 = vrot.slane %v19879_v43, 4  ;;  %v10181_v16 = vshll.u32 %v18679_v22, 16  ;;  %v10155_v25 = vrot.slane %v10154_v48, 4  ;;  %v10553_v63 = vsel %vm14113_vm9, %v10551_v32, %v10552_v60  ;;  %v18712_v43 = vpop.f32.mrf.mxu1 }
 0x44f   : > { %v10167_v3 = vrot.slane %v19880_v13, 5  ;;  %v10177_v29 = vrot.slane %v19881_v37, 4  ;;  %v10150_v15 = vsel %vm14068_vm4, %v10145_v35, %v10149_v18  ;;  %v18710_v28 = vadd.f32 %v18619_v45, %v18604_v14  ;;  %v18714_v13 = vpop.f32.mrf.mxu0  ;;  %v13889_v18 = vld [vmem:[%s19366_s8] ss:$0 sm:$0xff] }
 0x450   : > { %v12149_v39 = vcombine.low %v10550_v62, %v10553_v63  ;;  %v10173_v37 = vrot.slane %v10171_v23, 5  ;;  %v10183_v57 = vrot.slane %v10181_v16, 5  ;;  %v10160_v22 = vsel %vm14068_vm4, %v10155_v25, %v10159_v17  ;;  %v18727_v35 = vpop.f32.mrf.mxu1  ;;  %v18737_v16 = vld [vmem:[#allocation2 + $0xd4] sm:$0x1] }
 0x451   : > { %v10168_v34 = vor.u32 %v10167_v3, %v10164_v58  ;;  %v6708_v60 = vadd.f32 %v13889_v18, %v18550_v8  ;;  %v18724_v45 = vadd.f32 %v18640_v30, %v18625_v21  ;;  %v6706_v14 = vadd.f32 %v13889_v18, %v18583_v53  ;;  %v18729_v58 = vpop.f32.mrf.mxu0  ;;  %v13890_v3 = vld [vmem:[#allocation2 + $0x24] sm:$0xf]  ;;  %v13891_v21 = vld [vmem:[#allocation2 + $0x28] sm:$0xf]  ;;  %19884 = vst [vmem:[#allocation5_spill] sm:$0xff] %v18737_v16 }
 0x452   : > { %v12106_v48 = vcombine.low %v10150_v15, %v10160_v22  ;;  %13571 = vmatprep.mubr.bf16.mxu0 %v12149_v39  ;;  %v10178_v17 = vor.u32 %v10177_v29, %v10173_v37  ;;  %v18732_v32 = vadd.f32 %v7355_v10, %v18638_v6  ;;  %v7835_v8 = vadd.f32 %v18610_v11, %v18143_v55  ;;  %v18739_v25 = vpop.f32.mrf.mxu1 }
 0x453   : > { %19882 = vst [vmem:[#allocation49_spill] sm:$0xff] %v18724_v45  ;;  %v10169_v62 = vrot.slane %v10168_v34, 4  ;;  %v12118_v23 = vrot.slane %v13890_v3, 9  ;;  %v10556_v30 = vrot.slane %v13891_v21, 5  ;;  %v10559_v53 = vrot.slane %v18147_v59, 5  ;;  %v18741_v22 = vpop.f32.mrf.mxu0 }
 0x454   : > { %19883 = vst [vmem:[#allocation27_spill] sm:$0xff] %v18732_v32  ;;  %13548 = vmatmul.mubr.bf16.gmra.mxu1 %v12106_v48  ;;  %v10179_v39 = vrot.slane %v10178_v17, 4  ;;  %v18746_v6 = vadd.f32 %v13265_v51, %v18649_v7  ;;  %v19886_v55 = vshrl.u32 %v18630_v54, 16  ;;  %v19887_v10 = vshll.u32 %v18630_v54, 16  ;;  %v18755_v18 = vpop.f32.mrf.mxu1  ;;  %v13892_v17 = vld [vmem:[#allocation2 + $0x30] sm:$0xf] }
 0x455   : > { %v10174_v34 = vsel %vm14068_vm4, %v10169_v62, %v10173_v37  ;;  %v10557_v59 = vsel %vm14113_vm9, %v12118_v23, %v10556_v30  ;;  %v10558_v29 = vrot.slane %v10556_v30, 4  ;;  %v10195_v63 = vshll.u32 %v18632_v19, 16  ;;  %v18757_v48 = vpop.f32.mrf.mxu0  ;;  %v13893_v45 = vld [vmem:[#allocation2 + $0x34] sm:$0xf] }
 0x456   : > { %19885 = vst [vmem:[#allocation44_spill] sm:$0xff] %v18746_v6  ;;  %v10188_v11 = vrot.slane %v19886_v55, 4  ;;  %v10191_v15 = vrot.slane %v19887_v10, 5  ;;  %v10184_v51 = vsel %vm14068_vm4, %v10179_v39, %v10183_v57  ;;  %v19888_v7 = vshrl.u32 %v18632_v19, 16  ;;  %v8111_v10 = vpop.f32.mrf.mxu1 }
 0x457   : > { %v10205_v62 = vshll.u32 %v18737_v16, 16  ;;  %v12119_v3 = vrot.slane %v13892_v17, 9  ;;  %v12107_v23 = vcombine.low %v10174_v34, %v10184_v51  ;;  %v10560_v21 = vsel %vm14113_vm9, %v10558_v29, %v10559_v53  ;;  %v18766_v54 = vpop.f32.mrf.mxu0 }
 0x458   : > { %v10201_v37 = vrot.slane %v19888_v7, 4  ;;  %v10192_v30 = vor.u32 %v10191_v15, %v10188_v11  ;;  %v10197_v55 = vrot.slane %v10195_v63, 5  ;;  %v12150_v6 = vcombine.low %v10557_v59, %v10560_v21  ;;  %v13337_v11 = vpop.f32.mrf.mxu1  ;;  %v13897_v21 = vld [vmem:[#allocation2 + $0x4c] sm:$0xf] }
 0x459   : > { %v10207_v32 = vrot.slane %v10205_v62, 5  ;;  %v10563_v57 = vrot.slane %v13893_v45, 5  ;;  %v10566_v39 = vrot.slane %v18170_v40, 5  ;;  %13551 = vmatprep.mubr.bf16.mxu1 %v12107_v23  ;;  %v7833_v34 = vadd.f32 %v18621_v49, %v18187_v61  ;;  %v18775_v29 = vpop.f32.mrf.mxu0  ;;  %v13896_v23 = vld [vmem:[#allocation2 + $0x48] sm:$0xf] }
 0x45a   : > { %v10193_v7 = vrot.slane %v10192_v30, 4  ;;  %v10202_v16 = vor.u32 %v10201_v37, %v10197_v55  ;;  %v18773_v53 = vadd.f32 %v18681_v20, %v18688_v24  ;;  %13572 = vmatmul.mubr.bf16.vlgmr.msra.gmra.mxu0 %v12150_v6  ;;  %v7836_v40 = vadd.f32 %v18642_v44, %v18194_v12  ;;  %v8124_v6 = vpop.f32.mrf.mxu1  ;;  %v13894_v44 = vld [vmem:[#allocation2 + $0x3c] sm:$0xf] }
 0x45b   : > { %v10564_v59 = vsel %vm14113_vm9, %v12119_v3, %v10563_v57  ;;  %v10565_v45 = vrot.slane %v10563_v57, 4  ;;  %v18782_v15 = vadd.f32 %v18694_v33, %v6708_v60  ;;  %v7834_v20 = vadd.f32 %v18659_v1, %v18211_v47  ;;  %v18791_v63 = vpop.f32.mrf.mxu0  ;;  %v13895_v60 = vld [vmem:[#allocation2 + $0x40] sm:$0xf] }
 0x45c   : > { %v10198_v61 = vsel %vm14068_vm4, %v10193_v7, %v10197_v55  ;;  %v10203_v49 = vrot.slane %v10202_v16, 4  ;;  %v18789_v24 = vadd.f32 %v18712_v43, %v6706_v14  ;;  %v7839_v12 = vadd.f32 %v18683_v27, %v18242_v26  ;;  %v13338_v43 = vpop.f32.mrf.mxu1 }
 0x45d   : > { %v10567_v51 = vsel %vm14113_vm9, %v10565_v45, %v10566_v39  ;;  %v12120_v33 = vrot.slane %v13894_v44, 9  ;;  %v10570_v37 = vrot.slane %v13895_v60, 5  ;;  %v18800_v1 = vadd.f32 %v18727_v35, %v7835_v8  ;;  %v18802_v14 = vpop.f32.mrf.mxu0  ;;  %v19891_v44 = vld [vmem:[#allocation19_spill] sm:$0xff] }
 0x45e   : > { %v10208_v16 = vsel %vm14068_vm4, %v10203_v49, %v10207_v32  ;;  %v12151_v47 = vcombine.low %v10564_v59, %v10567_v51  ;;  %v10573_v3 = vrot.slane %v18238_v2, 5  ;;  %v12121_v26 = vrot.slane %v13896_v23, 9  ;;  %v8127_v8 = vpop.f32.mrf.mxu1  ;;  %v19892_v60 = vld [vmem:[#allocation7_spill] sm:$0xff] }
 0x45f   : > { %v12108_v62 = vcombine.low %v10198_v61, %v10208_v16  ;;  %v10572_v17 = vrot.slane %v10570_v37, 4  ;;  %v10571_v27 = vsel %vm14113_vm9, %v12120_v33, %v10570_v37  ;;  %v10577_v56 = vrot.slane %v13897_v21, 5  ;;  %v13298_v30 = vpop.f32.mrf.mxu0 }
 0x460   : > { %13575 = vmatprep.mubr.bf16.mxu0 %v12151_v47  ;;  %v7837_v32 = vadd.f32 %v18696_v5, %v18285_v52  ;;  %v18810_v35 = vadd.f32 %v18739_v25, %v7833_v34  ;;  %v7840_v55 = vadd.f32 %v18714_v13, %v18292_v42  ;;  %v18817_v57 = vadd.f32 %v18755_v18, %v7836_v40  ;;  %v13341_v34 = vpop.f32.mrf.mxu1  ;;  %v19893_v47 = vld [vmem:[#allocation17_spill] sm:$0xff] }
 0x461   : > { %13552 = vmatmul.mubr.bf16.gmra.mxu1 %v12108_v62  ;;  %v10574_v2 = vsel %vm14113_vm9, %v10572_v17, %v10573_v3  ;;  %v7838_v39 = vadd.f32 %v18729_v58, %v18305_v4  ;;  %v10579_v52 = vrot.slane %v10577_v56, 4  ;;  %v10580_v5 = vrot.slane %v18262_v9, 5  ;;  %v7757_v59 = vpop.f32.mrf.mxu0  ;;  %v19894_v3 = vld [vmem:[#allocation31_spill] sm:$0xff] }
 0x462   : > { %v12152_v7 = vcombine.low %v10571_v27, %v10574_v2  ;;  %v18822_v25 = vadd.f32 %v8111_v10, %v7834_v20  ;;  %v10578_v45 = vsel %vm14113_vm9, %v12121_v26, %v10577_v56  ;;  %v7843_v42 = vadd.f32 %v18741_v22, %v18330_v50  ;;  %v19889_v10 = vld [vmem:[#allocation11_spill] sm:$0xff]  ;;  %v8140_v61 = vpop.f32.mrf.mxu1  ;;  %v19895_v27 = vld [vmem:[#allocation6_spill] sm:$0xff] }
 0x463   : > { %v12122_v13 = vrot.slane %v18196_v46, 9  ;;  %v10584_v18 = vrot.slane %v18198_v0, 5  ;;  %v10581_v4 = vsel %vm14113_vm9, %v10579_v52, %v10580_v5  ;;  %v18832_v58 = vadd.f32 %v13337_v11, %v7839_v12  ;;  %v13301_v49 = vpop.f32.mrf.mxu0  ;;  %v19890_v46 = vld [vmem:[#allocation22_spill] sm:$0xff]  ;;  %v19898_v5 = vld [vmem:[#allocation8_spill] sm:$0xff] }
 0x464   : > { %13576 = vmatmul.mubr.bf16.gmra.mxu0 %v12152_v7  ;;  %v12123_v9 = vrot.slane %v18217_v41, 9  ;;  %v10591_v40 = vrot.slane %v19889_v10, 5  ;;  %v12153_v20 = vcombine.low %v10578_v45, %v10581_v4  ;;  %v10587_v51 = vrot.slane %v19890_v46, 5  ;;  %v13342_v41 = vpop.f32.mrf.mxu1  ;;  %v19897_v7 = vld [vmem:[#allocation14_spill] sm:$0xff] }
 0x465   : > { %v10585_v50 = vsel %vm14113_vm9, %v12122_v13, %v10584_v18  ;;  %v10586_v22 = vrot.slane %v10584_v18, 4  ;;  %v10594_v33 = vrot.slane %v19891_v44, 5  ;;  %v7841_v11 = vadd.f32 %v18757_v48, %v19892_v60  ;;  %v7770_v37 = vpop.f32.mrf.mxu0  ;;  %v19899_v13 = vld [vmem:[#allocation20_spill] sm:$0xff]  ;;  %v19904_v60 = vld [vmem:[#allocation47_spill] sm:$0xff] }
 0x466   : > { %v10593_v0 = vrot.slane %v10591_v40, 4  ;;  %v18842_v12 = vadd.f32 %v8124_v6, %v7837_v32  ;;  %13579 = vmatprep.mubr.bf16.mxu0 %v12153_v20  ;;  %v7844_v62 = vadd.f32 %v18766_v54, %v19893_v47  ;;  %v18848_v17 = vadd.f32 %v13338_v43, %v7840_v55  ;;  %v8143_v56 = vpop.f32.mrf.mxu1  ;;  %v19896_v43 = vld [vmem:[#allocation9_spill] sm:$0xff] }
 0x467   : > { %v10588_v16 = vsel %vm14113_vm9, %v10586_v22, %v10587_v51  ;;  %v7842_v23 = vadd.f32 %v18775_v29, %v19894_v3  ;;  %v10592_v26 = vsel %vm14113_vm9, %v12123_v9, %v10591_v40  ;;  %v18856_v6 = vadd.f32 %v8127_v8, %v7838_v39  ;;  %v13302_v32 = vpop.f32.mrf.mxu0  ;;  %v19900_v9 = vld [vmem:[#allocation37_spill] sm:$0xff]  ;;  %v19902_v22 = vld [vmem:[#allocation30_spill] sm:$0xff] }
 0x468   : > { %v10595_v48 = vsel %vm14113_vm9, %v10593_v0, %v10594_v33  ;;  %v7847_v21 = vadd.f32 %v18791_v63, %v19895_v27  ;;  %v12154_v2 = vcombine.low %v10585_v50, %v10588_v16  ;;  %v10598_v55 = vrot.slane %v19896_v43, 5  ;;  %v13345_v4 = vpop.f32.mrf.mxu1  ;;  %v19901_v63 = vld [vmem:[#allocation42_spill] sm:$0xff] }
 0x469   : > { %v12155_v54 = vcombine.low %v10592_v26, %v10595_v48  ;;  %v12124_v52 = vrot.slane %v19897_v7, 9  ;;  %v18862_v29 = vadd.f32 %v13341_v34, %v7843_v42  ;;  %v12125_v45 = vrot.slane %v19898_v5, 9  ;;  %v7773_v8 = vpop.f32.mrf.mxu0  ;;  %v19903_v34 = vld [vmem:[#allocation43_spill] sm:$0xff] }
 0x46a   : > { %v10605_v18 = vrot.slane %v19899_v13, 5  ;;  %v10600_v39 = vrot.slane %v10598_v55, 4  ;;  %v10601_v10 = vrot.slane %v19900_v9, 5  ;;  %v7845_v40 = vadd.f32 %v18802_v14, %v19901_v63  ;;  %v8156_v0 = vpop.f32.mrf.mxu1  ;;  %v19905_v14 = vld [vmem:[#allocation57_spill] sm:$0xff]  ;;  %v19912_v63 = vld [vmem:[#allocation54_spill] sm:$0xff] }
 0x46b   : > { %v18869_v20 = vadd.f32 %v8140_v61, %v7841_v11  ;;  %v10608_v46 = vrot.slane %v19902_v22, 5  ;;  %v7848_v42 = vadd.f32 %v13298_v30, %v19903_v34  ;;  %v18873_v51 = vadd.f32 %v13342_v41, %v7844_v62  ;;  %v13305_v44 = vpop.f32.mrf.mxu0  ;;  %v19906_v41 = vld [vmem:[#allocation25_spill] sm:$0xff] }
 0x46c   : > { %13580 = vmatmul.mubr.bf16.gmra.mxu0 %v12154_v2  ;;  %v10607_v50 = vrot.slane %v10605_v18, 4  ;;  %v10602_v33 = vsel %vm14113_vm9, %v10600_v39, %v10601_v10  ;;  %v7846_v16 = vadd.f32 %v7757_v59, %v19904_v60  ;;  %v18878_v47 = vadd.f32 %v8143_v56, %v7842_v23  ;;  %v13346_v3 = vpop.f32.mrf.mxu1  ;;  %v19907_v2 = vld [vmem:[#allocation15_spill] sm:$0xff]  ;;  %v19911_v39 = vld [vmem:[#allocation40_spill] sm:$0xff]  ;;  %v19913_v22 = vld [vmem:[#allocation33_spill] sm:$0xff] }
 0x46d   : > { %13583 = vmatprep.mubr.bf16.mxu0 %v12155_v54  ;;  %v7851_v61 = vadd.f32 %v13301_v49, %v19905_v14  ;;  %v10599_v11 = vsel %vm14113_vm9, %v12124_v52, %v10598_v55  ;;  %v10606_v30 = vsel %vm14113_vm9, %v12125_v45, %v10605_v18  ;;  %v10612_v62 = vrot.slane %v19906_v41, 5  ;;  %v7786_v26 = vpop.f32.mrf.mxu0  ;;  %v19908_v49 = vld [vmem:[#allocation35_spill] sm:$0xff]  ;;  %v19909_v55 = vld [vmem:[#allocation29_spill] sm:$0xff]  ;;  %v19910_v45 = vld [vmem:[#allocation38_spill] sm:$0xff] }
 0x46e   : > { %v12156_v48 = vcombine.low %v10599_v11, %v10602_v33  ;;  %v10609_v27 = vsel %vm14113_vm9, %v10607_v50, %v10608_v46  ;;  %v12126_v59 = vrot.slane %v19907_v2, 9  ;;  %v18889_v23 = vadd.f32 %v13345_v4, %v7847_v21  ;;  %v8159_v52 = vpop.f32.mrf.mxu1  ;;  %v19918_v2 = vld [vmem:[#allocation61_spill] sm:$0xff] }
 0x46f   : > { %v10614_v56 = vrot.slane %v10612_v62, 4  ;;  %v10615_v54 = vrot.slane %v19908_v49, 5  ;;  %v12127_v43 = vrot.slane %v18399_v31, 9  ;;  %v10619_v7 = vrot.slane %v19909_v55, 5  ;;  %v13306_v5 = vpop.f32.mrf.mxu0  ;;  %v19919_v55 = vld [vmem:[#allocation59_spill] sm:$0xff] }
 0x470   : > { %v7849_v13 = vadd.f32 %v7770_v37, %v19910_v45  ;;  %v18895_v18 = vadd.f32 %v8156_v0, %v7845_v40  ;;  %v7852_v9 = vadd.f32 %v13302_v32, %v19911_v39  ;;  %v18898_v10 = vadd.f32 %v13346_v3, %v7848_v42  ;;  %v13349_v46 = vpop.f32.mrf.mxu1  ;;  %v19914_v37 = vld [vmem:[#allocation39_spill] sm:$0xff]  ;;  %v19915_v0 = vld [vmem:[#allocation24_spill] sm:$0xff]  ;;  %v19920_v45 = vld [vmem:[#allocation46_spill] sm:$0xff] }
 0x471   : > { %v10616_v21 = vsel %vm14113_vm9, %v10614_v56, %v10615_v54  ;;  %v10621_v4 = vrot.slane %v10619_v7, 4  ;;  %v10622_v50 = vrot.slane %v19912_v63, 5  ;;  %v7850_v31 = vadd.f32 %v7773_v8, %v19913_v22  ;;  %v7789_v34 = vpop.f32.mrf.mxu0 }
 0x472   : > { %v12157_v33 = vcombine.low %v10606_v30, %v10609_v27  ;;  %v18904_v60 = vadd.f32 %v8159_v52, %v7846_v16  ;;  %v7855_v40 = vadd.f32 %v13305_v44, %v19914_v37  ;;  %v10613_v32 = vsel %vm14113_vm9, %v12126_v59, %v10612_v62  ;;  %v8172_v41 = vpop.f32.mrf.mxu1  ;;  %v19916_v30 = vld [vmem:[#allocation23_spill] sm:$0xff]  ;;  %v19924_v37 = vld [vmem:[#allocation32_spill] sm:$0xff] }
 0x473   : > { %v10623_v42 = vsel %vm14113_vm9, %v10621_v4, %v10622_v50  ;;  %v10626_v14 = vrot.slane %v19915_v0, 5  ;;  %v18912_v11 = vadd.f32 %v13349_v46, %v7851_v61  ;;  %v13309_v8 = vpop.f32.mrf.mxu0  ;;  %v12158_v3 = vcombine.low %v10613_v32, %v10616_v21  ;;  %v19922_v4 = vld [vmem:[#allocation45_spill] sm:$0xff]  ;;  %v19923_v46 = vld [vmem:[#allocation52_spill] sm:$0xff] }
 0x474   : > { %13584 = vmatmul.mubr.bf16.gmra.mxu0 %v12156_v48  ;;  %v10620_v16 = vsel %vm14113_vm9, %v12127_v43, %v10619_v7  ;;  %v19470_v44 = vrot.slane %v19916_v30, 5  ;;  %v19917_v48 = vld [vmem:[#allocation34_spill] sm:$0xff]  ;;  %v7853_v59 = vadd.f32 %v7786_v26, %v19918_v2  ;;  %v18921_v56 = vadd.f32 %v8172_v41, %v7849_v13  ;;  %v13350_v61 = vpop.f32.mrf.mxu1  ;;  %v19927_v2 = vld [vmem:[#allocation56_spill] sm:$0xff] }
 0x475   : > { %13587 = vmatprep.mubr.bf16.mxu0 %v12157_v33  ;;  %v12128_v27 = vrot.slane %v19917_v48, 9  ;;  %v10628_v62 = vrot.slane %v10626_v14, 4  ;;  %v7802_v49 = vpop.f32.mrf.mxu0  ;;  %v12159_v54 = vcombine.low %v10620_v16, %v10623_v42  ;;  %v10629_v52 = vrot.slane %v19919_v55, 5  ;;  %v19921_v43 = vld [vmem:[#allocation26_spill] sm:$0xff]  ;;  %v19926_v16 = vld [vmem:[#allocation12_spill] sm:$0xff] }
 0x476   : > { %v7856_v39 = vadd.f32 %v13306_v5, %v19920_v45  ;;  %v18925_v21 = vadd.f32 %v13350_v61, %v7852_v9  ;;  %v12129_v7 = vrot.slane %v19921_v43, 9  ;;  %v7854_v63 = vadd.f32 %v7789_v34, %v19922_v4  ;;  %v8175_v50 = vpop.f32.mrf.mxu1  ;;  %v19925_v5 = vld [vmem:[#allocation53_spill] sm:$0xff] }
 0x477   : > { %v7859_v22 = vadd.f32 %v13309_v8, %v18665_v36  ;;  %v12130_v26 = vrot.slane %v19923_v46, 9  ;;  %v13310_v13 = vpop.f32.mrf.mxu0  ;;  %v10635_v33 = vrot.slane %v19470_v44, 4  ;;  %v10636_v32 = vrot.slane %v19924_v37, 5  ;;  %v19928_v8 = vld [vmem:[#allocation48_spill] sm:$0xff] }
 0x478   : > { %v18934_v42 = vadd.f32 %v8175_v50, %v7850_v31  ;;  %v10640_v9 = vrot.slane %v19925_v5, 5  ;;  %v10630_v41 = vsel %vm14113_vm9, %v10628_v62, %v10629_v52  ;;  %v10643_v34 = vrot.slane %v19926_v16, 5  ;;  %v13353_v48 = vpop.f32.mrf.mxu1  ;;  %v19929_v31 = vld [vmem:[#allocation16_spill] sm:$0xff]  ;;  %v19930_v5 = vld [vmem:[#allocation49_spill] sm:$0xff] }
 0x479   : > { %v12131_v36 = vrot.slane %v19927_v2, 9  ;;  %v10647_v61 = vrot.slane %v19928_v8, 5  ;;  %v7805_v55 = vpop.f32.mrf.mxu0  ;;  %v18944_v4 = vadd.f32 %v13353_v48, %v7855_v40  ;;  %v10650_v50 = vrot.slane %v19929_v31, 5  ;;  %v19931_v40 = vld [vmem:[#allocation27_spill] sm:$0xff]  ;;  %v19932_v8 = vld [vmem:[#allocation44_spill] sm:$0xff] }
 0x47a   : > { %v10641_v45 = vsel %vm14113_vm9, %v12130_v26, %v10640_v9  ;;  %v10642_v43 = vrot.slane %v10640_v9, 4  ;;  %v7857_v46 = vadd.f32 %v7802_v49, %v18710_v28  ;;  %v8188_v37 = vpop.f32.mrf.mxu1  ;;  %v7860_v16 = vadd.f32 %v13310_v13, %v19930_v5  ;;  %v19933_v28 = vld [vmem:[#allocation63_spill] sm:$0xff] }
 0x47b   : > { %v10648_v62 = vsel %vm14113_vm9, %v12131_v36, %v10647_v61  ;;  %v10649_v52 = vrot.slane %v10647_v61, 4  ;;  %v13313_v2 = vpop.f32.mrf.mxu0  ;;  %v18953_v9 = vadd.f32 %v8188_v37, %v7853_v59  ;;  %v7858_v48 = vadd.f32 %v7805_v55, %v19931_v40 }
 0x47c   : > { %13588 = vmatmul.mubr.bf16.gmra.mxu0 %v12158_v3  ;;  %v10644_v26 = vsel %vm14113_vm9, %v10642_v43, %v10643_v34  ;;  %v7863_v3 = vadd.f32 %v13313_v2, %v19932_v8  ;;  %v13354_v61 = vpop.f32.mrf.mxu1  ;;  %v12132_v49 = vrot.slane %v19933_v28, 9  ;;  %v10654_v13 = vrot.slane %v18632_v19, 5  ;;  %v19934_v34 = vld [vmem:[#allocation5_spill] sm:$0xff] }
 0x47d   : > { %13591 = vmatprep.mubr.bf16.mxu0 %v12159_v54  ;;  %v12162_v31 = vcombine.low %v10641_v45, %v10644_v26  ;;  %v10651_v36 = vsel %vm14113_vm9, %v10649_v52, %v10650_v50  ;;  %v7818_v5 = vpop.f32.mrf.mxu0  ;;  %v18961_v44 = vadd.f32 %v13354_v61, %v7856_v39  ;;  %v10657_v59 = vrot.slane %v19934_v34, 5 }
 0x47e   : > { %v12163_v54 = vcombine.low %v10648_v62, %v10651_v36  ;;  %v7861_v43 = vadd.f32 %v7818_v5, %v18773_v53  ;;  %v10637_v55 = vsel %vm14113_vm9, %v10635_v33, %v10636_v32  ;;  %v8191_v45 = vpop.f32.mrf.mxu1  ;;  %v10655_v50 = vsel %vm14113_vm9, %v12132_v49, %v10654_v13 }
 0x47f   : > { %v10656_v52 = vrot.slane %v10654_v13, 4  ;;  %v13314_v37 = vpop.f32.mrf.mxu0  ;;  %v10627_v19 = vsel %vm14113_vm9, %v12128_v27, %v10626_v14  ;;  %v18973_v39 = vadd.f32 %v8191_v45, %v7854_v63  ;;  %v19935_v53 = vrot.slane %v19916_v30, 5 }
 0x480   : > { %v7864_v62 = vadd.f32 %v13314_v37, %v18782_v15  ;;  %v12160_v2 = vcombine.low %v10627_v19, %v10630_v41  ;;  %v13357_v26 = vpop.f32.mrf.mxu1 }
 0x481   : > { %v10634_v33 = vsel %vm14113_vm9, %v12129_v7, %v19935_v53  ;;  %v10658_v32 = vsel %vm14113_vm9, %v10656_v52, %v10657_v59  ;;  %v7821_v40 = vpop.f32.mrf.mxu0  ;;  %v18982_v36 = vadd.f32 %v13357_v26, %v7859_v22 }
 0x482   : > { %v12161_v8 = vcombine.low %v10634_v33, %v10637_v55  ;;  %v12164_v0 = vcombine.low %v10655_v50, %v10658_v32  ;;  %v7862_v14 = vadd.f32 %v7821_v40, %v18789_v24  ;;  %v8204_v27 = vpop.f32.mrf.mxu1 }
 0x483   : > { %v13381_v15 = vpop.f32.mrf.mxu0  ;;  %v18985_v63 = vadd.f32 %v8204_v27, %v7857_v46 }
 0x484   : > { %13592 = vmatmul.mubr.bf16.gmra.mxu0 %v12160_v2  ;;  %v8943_v30 = vadd.f32 %v13381_v15, %v18800_v1  ;;  %v13358_v7 = vpop.f32.mrf.mxu1 }
 0x485   : > { %13595 = vmatprep.mubr.bf16.mxu0 %v12161_v8  ;;  %v8814_v41 = vpop.f32.mrf.mxu0  ;;  %v18988_v38 = vadd.f32 %v13358_v7, %v7860_v16 }
 0x486   : > { %v8941_v61 = vadd.f32 %v8814_v41, %v18810_v35  ;;  %v8207_v28 = vpop.f32.mrf.mxu1 }
 0x487   : > { %v13382_v49 = vpop.f32.mrf.mxu0  ;;  %v18991_v22 = vadd.f32 %v8207_v28, %v7858_v48 }
 0x488   : > { %v8944_v24 = vadd.f32 %v13382_v49, %v18817_v57  ;;  %v13361_v13 = vpop.f32.mrf.mxu1 }
 0x489   : > { %v8817_v5 = vpop.f32.mrf.mxu0  ;;  %v18994_v34 = vadd.f32 %v13361_v13, %v7863_v3 }
 0x48a   : > { %v18997_v46 = vadd.f32 %v8817_v5, %v18822_v25  ;;  %v8220_v1 = vpop.f32.mrf.mxu1 }
 0x48b   : > { %v13385_v59 = vpop.f32.mrf.mxu0  ;;  %v18999_v16 = vadd.f32 %v8220_v1, %v7861_v43 }
 0x48c   : > { %13596 = vmatmul.mubr.bf16.gmra.mxu0 %v12162_v31  ;;  %v8947_v35 = vadd.f32 %v13385_v59, %v18832_v58  ;;  %v13362_v55 = vpop.f32.mrf.mxu1 }
 0x48d   : > { %13599 = vmatprep.mubr.bf16.mxu0 %v12163_v54  ;;  %v8830_v48 = vpop.f32.mrf.mxu0  ;;  %v19002_v45 = vadd.f32 %v13362_v55, %v7864_v62 }
 0x48e   : > { %v19005_v57 = vadd.f32 %v8830_v48, %v18842_v12  ;;  %v8223_v3 = vpop.f32.mrf.mxu1 }
 0x48f   : > { %v13386_v50 = vpop.f32.mrf.mxu0  ;;  %v19007_v52 = vadd.f32 %v8223_v3, %v7862_v14 }
 0x490   : > { %v8948_v25 = vadd.f32 %v13386_v50, %v18848_v17  ;;  %v13429_v31 = vpop.f32.mrf.mxu1 }
 0x491   : > { %v8833_v37 = vpop.f32.mrf.mxu0  ;;  %v19010_v54 = vadd.f32 %v13429_v31, %v8943_v30 }
 0x492   : > { %v19013_v43 = vadd.f32 %v8833_v37, %v18856_v6  ;;  %v9264_v58 = vpop.f32.mrf.mxu1 }
 0x493   : > { %v13389_v19 = vpop.f32.mrf.mxu0  ;;  %v19015_v62 = vadd.f32 %v9264_v58, %v8941_v61 }
 0x494   : > { %13600 = vmatmul.mubr.bf16.gmra.mxu0 %v12164_v0  ;;  %v8951_v12 = vadd.f32 %v13389_v19, %v18862_v29  ;;  %v13430_v2 = vpop.f32.mrf.mxu1 }
 0x495   : > { %v8846_v53 = vpop.f32.mrf.mxu0  ;;  %v19018_v33 = vadd.f32 %v13430_v2, %v8944_v24 }
 0x496   : > { %v19021_v17 = vadd.f32 %v8846_v53, %v18869_v20  ;;  %v19023_v32 = vpop.f32.mrf.mxu1 }
 0x497   : > { %v13390_v26 = vpop.f32.mrf.mxu0 }
 0x498   : > { %v8952_v6 = vadd.f32 %v13390_v26, %v18873_v51  ;;  %v13433_v40 = vpop.f32.mrf.mxu1 }
 0x499   : > { %v8849_v8 = vpop.f32.mrf.mxu0  ;;  %v19026_v0 = vadd.f32 %v13433_v40, %v8947_v35 }
 0x49a   : > { %v19029_v14 = vadd.f32 %v8849_v8, %v18878_v47  ;;  %v19031_v29 = vpop.f32.mrf.mxu1 }
 0x49b   : > { %v13393_v27 = vpop.f32.mrf.mxu0 }
 0x49c   : > { %v8955_v15 = vadd.f32 %v13393_v27, %v18889_v23  ;;  %v13434_v30 = vpop.f32.mrf.mxu1 }
 0x49d   : > { %v8862_v20 = vpop.f32.mrf.mxu0  ;;  %v19034_v7 = vadd.f32 %v13434_v30, %v8948_v25 }
 0x49e   : > { %v19037_v41 = vadd.f32 %v8862_v20, %v18895_v18  ;;  %v19039_v51 = vpop.f32.mrf.mxu1 }
 0x49f   : > { %v13394_v61 = vpop.f32.mrf.mxu0 }
 0x4a0   : > { %v8956_v28 = vadd.f32 %v13394_v61, %v18898_v10  ;;  %v13437_v49 = vpop.f32.mrf.mxu1 }
 0x4a1   : > { %v8865_v47 = vpop.f32.mrf.mxu0  ;;  %v19042_v24 = vadd.f32 %v13437_v49, %v8951_v12 }
 0x4a2   : > { %v19045_v13 = vadd.f32 %v8865_v47, %v18904_v60  ;;  %v19047_v23 = vpop.f32.mrf.mxu1 }
 0x4a3   : > { %v13397_v5 = vpop.f32.mrf.mxu0 }
 0x4a4   : > { %v8959_v1 = vadd.f32 %v13397_v5, %v18912_v11  ;;  %v13438_v59 = vpop.f32.mrf.mxu1 }
 0x4a5   : > { %v8878_v18 = vpop.f32.mrf.mxu0  ;;  %v19050_v35 = vadd.f32 %v13438_v59, %v8952_v6 }
 0x4a6   : > { %v19053_v55 = vadd.f32 %v8878_v18, %v18921_v56  ;;  %v19055_v10 = vpop.f32.mrf.mxu1 }
 0x4a7   : > { %v13398_v48 = vpop.f32.mrf.mxu0 }
 0x4a8   : > { %v8960_v3 = vadd.f32 %v13398_v48, %v18925_v21  ;;  %v13441_v50 = vpop.f32.mrf.mxu1 }
 0x4a9   : > { %v8881_v60 = vpop.f32.mrf.mxu0  ;;  %v19058_v25 = vadd.f32 %v13441_v50, %v8955_v15 }
 0x4aa   : > { %v19061_v31 = vadd.f32 %v8881_v60, %v18934_v42  ;;  %v19063_v11 = vpop.f32.mrf.mxu1 }
 0x4ab   : > { %v13401_v37 = vpop.f32.mrf.mxu0 }
 0x4ac   : > { %19936 = vst [vmem:[#allocation4_spill] sm:$0xff] %v19061_v31  ;;  %v8963_v58 = vadd.f32 %v13401_v37, %v18944_v4  ;;  %v13442_v19 = vpop.f32.mrf.mxu1 }
 0x4ad   : > { %v8894_v56 = vpop.f32.mrf.mxu0  ;;  %v19066_v12 = vadd.f32 %v13442_v19, %v8956_v28 }
 0x4ae   : > { %v19069_v2 = vadd.f32 %v8894_v56, %v18953_v9  ;;  %v19071_v21 = vpop.f32.mrf.mxu1 }
 0x4af   : > { %v13402_v53 = vpop.f32.mrf.mxu0 }
 0x4b0   : > { %19937 = vst [vmem:[#allocation60_spill] sm:$0xff] %v19069_v2  ;;  %v8964_v26 = vadd.f32 %v13402_v53, %v18961_v44  ;;  %v13445_v6 = vpop.f32.mrf.mxu1 }
 0x4b1   : > { %v8897_v42 = vpop.f32.mrf.mxu0  ;;  %v19074_v40 = vadd.f32 %v13445_v6, %v8959_v1 }
 0x4b2   : > { %v19077_v8 = vadd.f32 %v8897_v42, %v18973_v39  ;;  %v19079_v4 = vpop.f32.mrf.mxu1 }
 0x4b4   : > { %19938 = vst [vmem:[#allocation62_spill] sm:$0xff] %v19077_v8  ;;  %v13446_v27 = vpop.f32.mrf.mxu1 }
 0x4b5   : > { %v19081_v15 = vadd.f32 %v13446_v27, %v8960_v3  ;;  %v13405_v30 = vpop.f32.mrf.mxu0 }
 0x4b6   : > { %v19083_v9 = vpop.f32.mrf.mxu1  ;;  %v8967_v20 = vadd.f32 %v13405_v30, %v18982_v36 }
 0x4b7   : > { %19939 = vst [vmem:[#allocation64_spill] sm:$0xff] %v19083_v9  ;;  %v8910_v61 = vpop.f32.mrf.mxu0 }
 0x4b8   : > { %v13449_v28 = vpop.f32.mrf.mxu1  ;;  %v19087_v44 = vadd.f32 %v8910_v61, %v18985_v63 }
 0x4b9   : > { %v19089_v49 = vadd.f32 %v13449_v28, %v8963_v58  ;;  %v13406_v47 = vpop.f32.mrf.mxu0 }
 0x4ba   : > { %19940 = vst [vmem:[#allocation21_spill] sm:$0xff] %v19087_v44  ;;  %v19091_v39 = vpop.f32.mrf.mxu1  ;;  %v8968_v5 = vadd.f32 %v13406_v47, %v18988_v38 }
 0x4bb   : > { %19941 = vst [vmem:[#allocation3_spill] sm:$0xff] %v19091_v39  ;;  %v8913_v1 = vpop.f32.mrf.mxu0 }
 0x4bc   : > { %v13450_v59 = vpop.f32.mrf.mxu1  ;;  %v19095_v18 = vadd.f32 %v8913_v1, %v18991_v22 }
 0x4bd   : > { %v19097_v48 = vadd.f32 %v13450_v59, %v8964_v26 }
 0x4be   : > { %19942 = vst [vmem:[#allocation18_spill] sm:$0xff] %v19095_v18  ;;  %v19099_v36 = vpop.f32.mrf.mxu1 }
 0x4bf   : > { %19943 = vst [vmem:[#allocation28_spill] sm:$0xff] %v19099_v36 }
 0x4c0   : > { %v13409_v3 = vpop.f32.mrf.mxu0  ;;  %v13453_v50 = vpop.f32.mrf.mxu1 }
 0x4c1   : > { %v8971_v63 = vadd.f32 %v13409_v3, %v18994_v34  ;;  %v19102_v60 = vadd.f32 %v13453_v50, %v8967_v20 }
 0x4c2   : > { %v8926_v37 = vpop.f32.mrf.mxu0  ;;  %v19107_v38 = vpop.f32.mrf.mxu1 }
 0x4c3   : > { %v19105_v58 = vadd.f32 %v8926_v37, %v18999_v16  ;;  %19945 = vst [vmem:[#allocation36_spill] sm:$0xff] %v19107_v38 }
 0x4c4   : > { %v13410_v19 = vpop.f32.mrf.mxu0  ;;  %v13454_v56 = vpop.f32.mrf.mxu1 }
 0x4c5   : > { %19944 = vst [vmem:[#allocation41_spill] sm:$0xff] %v19105_v58  ;;  %v8972_v22 = vadd.f32 %v13410_v19, %v19002_v45  ;;  %v9418_v53 = vadd.f32 %v13454_v56, %v8968_v5 }
 0x4c6   : > { %v8929_v26 = vpop.f32.mrf.mxu0  ;;  %v19113_v42 = vpop.f32.mrf.mxu1 }
 0x4c7   : > { %v19111_v6 = vadd.f32 %v8929_v26, %v19007_v52  ;;  %19947 = vst [vmem:[#allocation51_spill] sm:$0xff] %v19113_v42 }
 0x4c8   : > { %v13477_v34 = vpop.f32.mrf.mxu0  ;;  %v13457_v30 = vpop.f32.mrf.mxu1 }
 0x4c9   : > { %19946 = vst [vmem:[#allocation55_spill] sm:$0xff] %v19111_v6  ;;  %v19116_v27 = vadd.f32 %v13477_v34, %v19010_v54  ;;  %v9421_v16 = vadd.f32 %v13457_v30, %v8971_v63 }
 0x4ca   : > { %v9666_v20 = vpop.f32.mrf.mxu0  ;;  %v19121_v28 = vpop.f32.mrf.mxu1 }
 0x4cb   : > { %v19119_v61 = vadd.f32 %v9666_v20, %v19015_v62  ;;  %19948 = vst [vmem:[#allocation50_spill] sm:$0xff] %v19121_v28 }
 0x4cc   : > { %v13478_v45 = vpop.f32.mrf.mxu0  ;;  %v13458_v52 = vpop.f32.mrf.mxu1 }
 0x4cd   : > { %v19124_v47 = vadd.f32 %v13478_v45, %v19018_v33  ;;  %v9422_v5 = vadd.f32 %v13458_v52, %v8972_v22 }
 0x4ce   : > { %v19126_v1 = vpop.f32.mrf.mxu0  ;;  %v19133_v63 = vpop.f32.mrf.mxu1 }
 0x4cf   : > { %19949 = vst [vmem:[#allocation58_spill] sm:$0xff] %v19133_v63 }
 0x4d0   : > { %v13481_v59 = vpop.f32.mrf.mxu0 }
 0x4d1   : > { %v19129_v54 = vadd.f32 %v13481_v59, %v19026_v0 }
 0x4d2   : > { %v19131_v3 = vpop.f32.mrf.mxu0 }
 0x4d4   : > { %v13482_v62 = vpop.f32.mrf.mxu0  ;;  %v13525_v33 = vpop.f32.mrf.mxu1 }
 0x4d5   : > { %v19136_v50 = vadd.f32 %v13482_v62, %v19034_v7 }
 0x4d6   : > { %v19138_v37 = vpop.f32.mrf.mxu0  ;;  %v10372_v26 = vpop.f32.mrf.mxu1 }
 0x4d8   : > { %v13485_v19 = vpop.f32.mrf.mxu0  ;;  %v13526_v20 = vpop.f32.mrf.mxu1 }
 0x4d9   : > { %v19141_v22 = vadd.f32 %v13485_v19, %v19042_v24  ;;  %v10502_v9 = vadd.f32 %v13526_v20, %v19124_v47  ;;  %v9396_v20 = vadd.f32 %v19039_v51, %v19013_v43 }
 0x4da   : > { %v19143_v56 = vpop.f32.mrf.mxu0  ;;  %v10375_v59 = vpop.f32.mrf.mxu1 }
 0x4dc   : > { %v13486_v0 = vpop.f32.mrf.mxu0 }
 0x4dd   : > { %v19146_v34 = vadd.f32 %v13486_v0, %v19050_v35 }
 0x4de   : > { %v19148_v30 = vpop.f32.mrf.mxu0 }
 0x4df   : > { %v19160_v63 = vpop.f32.mrf.mxu1 }
 0x4e0   : > { %v13489_v45 = vpop.f32.mrf.mxu0 }
 0x4e1   : > { %v19151_v7 = vadd.f32 %v13489_v45, %v19058_v25  ;;  %v19167_v28 = vpop.f32.mrf.mxu1 }
 0x4e2   : > { %v19153_v52 = vpop.f32.mrf.mxu0 }
 0x4e4   : > { %v13490_v62 = vpop.f32.mrf.mxu0 }
 0x4e5   : > { %v19156_v24 = vadd.f32 %v13490_v62, %v19066_v12  ;;  %v19174_v12 = vpop.f32.mrf.mxu1 }
 0x4e6   : > { %v19158_v19 = vpop.f32.mrf.mxu0 }
 0x4e7   : > { %v19176_v42 = vpop.f32.mrf.mxu1 }
 0x4e8   : > { %v13493_v35 = vpop.f32.mrf.mxu0 }
 0x4e9   : > { %v19163_v0 = vadd.f32 %v13493_v35, %v19074_v40  ;;  %v19183_v38 = vpop.f32.mrf.mxu1 }
 0x4ea   : > { %v19165_v6 = vpop.f32.mrf.mxu0 }
 0x4eb   : > { %19950 = vst [vmem:[#allocation10_spill] sm:$0xff] %v19163_v0  ;;  %19951 = vst [vmem:[#allocation13_spill] sm:$0xff] %v19165_v6 }
 0x4ec   : > { %v13494_v25 = vpop.f32.mrf.mxu0 }
 0x4ed   : > { %v19170_v45 = vadd.f32 %v13494_v25, %v19081_v15  ;;  %v19190_v25 = vpop.f32.mrf.mxu1 }
 0x4ee   : > { %v19172_v58 = vpop.f32.mrf.mxu0 }
 0x4ef   : > { %19952 = vst [vmem:[#allocation11_spill] sm:$0xff] %v19170_v45  ;;  %19953 = vst [vmem:[#allocation22_spill] sm:$0xff] %v19172_v58  ;;  %v19195_v45 = vpop.f32.mrf.mxu1 }
 0x4f2   : > { %v13497_v62 = vpop.f32.mrf.mxu0 }
 0x4f3   : > { %v19179_v18 = vadd.f32 %v13497_v62, %v19089_v49 }
 0x4f4   : > { %v19181_v40 = vpop.f32.mrf.mxu0 }
 0x4f5   : > { %19954 = vst [vmem:[#allocation19_spill] sm:$0xff] %v19179_v18  ;;  %19955 = vst [vmem:[#allocation7_spill] sm:$0xff] %v19181_v40  ;;  %v19201_v40 = vpop.f32.mrf.mxu1 }
 0x4f6   : > { %v13498_v35 = vpop.f32.mrf.mxu0 }
 0x4f7   : > { %v19186_v44 = vadd.f32 %v13498_v35, %v19097_v48  ;;  %v19205_v35 = vpop.f32.mrf.mxu1 }
 0x4f8   : > { %v19188_v15 = vpop.f32.mrf.mxu0 }
 0x4f9   : > { %19956 = vst [vmem:[#allocation17_spill] sm:$0xff] %v19186_v44  ;;  %19957 = vst [vmem:[#allocation31_spill] sm:$0xff] %v19188_v15 }
 0x4fd   : > { %v13501_v36 = vpop.f32.mrf.mxu0 }
 0x4fe   : > { %v19193_v8 = vadd.f32 %v13501_v36, %v19102_v60  ;;  %v19211_v36 = vpop.f32.mrf.mxu1 }
 0x4ff   : > { %v19197_v49 = vpop.f32.mrf.mxu0 }
 0x500   : > { %19958 = vst [vmem:[#allocation6_spill] sm:$0xff] %v19193_v8  ;;  %19959 = vst [vmem:[#allocation9_spill] sm:$0xff] %v19197_v49  ;;  %v19215_v49 = vpop.f32.mrf.mxu1 }
 0x501   : > { %v13502_v62 = vpop.f32.mrf.mxu0 }
 0x502   : > { %v19199_v18 = vadd.f32 %v13502_v62, %v9418_v53  ;;  %v19217_v53 = vpop.f32.mrf.mxu1 }
 0x503   : > { %v19203_v48 = vpop.f32.mrf.mxu0  ;;  %19965 = vst [vmem:[#allocation30_spill] sm:$0xff] %v19217_v53 }
 0x504   : > { %19960 = vst [vmem:[#allocation14_spill] sm:$0xff] %v19199_v18  ;;  %19961 = vst [vmem:[#allocation8_spill] sm:$0xff] %v19203_v48  ;;  %v19221_v18 = vpop.f32.mrf.mxu1  ;;  %v10501_v48 = vadd.f32 %v13525_v33, %v19116_v27 }
 0x505   : > { %19967 = vst [vmem:[#allocation47_spill] sm:$0xff] %v19221_v18 }
 0x507   : > { %v13505_v44 = vpop.f32.mrf.mxu0 }
 0x508   : > { %v19207_v15 = vadd.f32 %v13505_v44, %v9421_v16  ;;  %v12178_v16 = vld [vmem:[%s19228_s13] sm:$0xff]  }
 0x509   : > { %v19209_v0 = vpop.f32.mrf.mxu0  ;;  %v12179_v58 = vunpack.c.l.bf16 %v12178_v16 }
 0x50a   : > { %19962 = vst [vmem:[#allocation20_spill] sm:$0xff] %v19207_v15  ;;  %19963 = vst [vmem:[#allocation37_spill] sm:$0xff] %v19209_v0  ;;  %v19235_v15 = vpop.f32.mrf.mxu1 }
 0x50b   : > { %v13506_v60 = vpop.f32.mrf.mxu0  ;;  %19968 = vst [vmem:[#allocation57_spill] sm:$0xff] %v19235_v15 }
 0x50c   : > { %v19213_v8 = vadd.f32 %v13506_v60, %v9422_v5  ;;  %v9392_v5 = vadd.f32 %v19023_v32, %v18997_v46  ;;  %v10499_v60 = vadd.f32 %v10372_v26, %v19119_v61  ;;  %v12180_v46 = vunpack.c.h.bf16 %v12178_v16  ;;  %v19242_v61 = vpop.f32.mrf.mxu1 }
 0x50d   : > { %v19219_v62 = vpop.f32.mrf.mxu0  ;;  %v9395_v32 = vadd.f32 %v19031_v29, %v19005_v57  ;;  %v12243_v57 = vld [vmem:[%s19228_s13 + $0x18] sm:$0xff]  }
 0x50e   : > { %19964 = vst [vmem:[#allocation42_spill] sm:$0xff] %v19213_v8  ;;  %19966 = vst [vmem:[#allocation43_spill] sm:$0xff] %v19219_v62  ;;  %v12241_v8 = vld [vmem:[%s19228_s13 + $0x8] sm:$0xff]   ;;  %v9794_v0 = vadd.f32 %v19126_v1, %v9392_v5 }
 0x50f   : > { %v12183_v39 = vunpack.c.l.bf16 %v12241_v8  ;;  %v12184_v27 = vunpack.c.h.bf16 %v12241_v8 }
 0x510   : > { %v10500_v31 = vadd.f32 %v10375_v59, %v9794_v0  ;;  %v19249_v0 = vpop.f32.mrf.mxu1 }
 0x512   : > { %v19260_v16 = vpop.f32.mrf.mxu1 }
 0x51a   : > { %v13573_v44 = vpop.f32.mrf.mxu0 }
 0x51b   : > { %v10951_v6 = vadd.f32 %v13573_v44, %v10501_v48  ;;  %v10506_v44 = vadd.f32 %v19174_v12, %v19136_v50 }
 0x51c   : > { %v10822_v62 = vpop.f32.mrf.mxu0 }
 0x51d   : > { %v10949_v18 = vadd.f32 %v10822_v62, %v10499_v60  ;;  %v12242_v62 = vld [vmem:[%s19228_s13 + $0x10] sm:$0xff]   ;;  %v9797_v60 = vadd.f32 %v19131_v3, %v9395_v32  ;;  %v11047_v15 = vsub.f32 %v10951_v6, %v12183_v39  ;;  %v10505_v39 = vadd.f32 %v19160_v63, %v19129_v54  ;;  %v12244_v54 = vld [vmem:[%s19228_s13 + $0x20] sm:$0xff]  }
 0x51e   : > { %v13574_v2 = vpop.f32.mrf.mxu0  ;;  %v12187_v29 = vunpack.c.l.bf16 %v12242_v62  ;;  %v12191_v6 = vunpack.c.l.bf16 %v12243_v57  ;;  %v12188_v3 = vunpack.c.h.bf16 %v12242_v62 }
 0x51f   : > { %v11045_v1 = vsub.f32 %v10949_v18, %v12179_v58  ;;  %v10952_v5 = vadd.f32 %v13574_v2, %v10502_v9  ;;  %v10503_v59 = vadd.f32 %v19167_v28, %v9797_v60  ;;  %v9798_v9 = vadd.f32 %v19138_v37, %v9396_v20 }
 0x520   : > { %v10825_v26 = vpop.f32.mrf.mxu0  ;;  %v11079_v51 = vmul.f32 %v11047_v15, %v11047_v15  ;;  %v12195_v20 = vunpack.c.l.bf16 %v12244_v54 }
 0x521   : > { %v10950_v33 = vadd.f32 %v10825_v26, %v10500_v31  ;;  %v11077_v48 = vmul.f32 %v11045_v1, %v11045_v1  ;;  %v11048_v18 = vsub.f32 %v10952_v5, %v12184_v27  ;;  %v9399_v31 = vadd.f32 %v19047_v23, %v19021_v17 }
 0x522   : > { %v12192_v26 = vunpack.c.h.bf16 %v12243_v57  ;;  %v9400_v5 = vadd.f32 %v19055_v10, %v19029_v14  ;;  %v10509_v14 = vadd.f32 %v19183_v38, %v19141_v22 }
 0x523   : > { %v11046_v53 = vsub.f32 %v10950_v33, %v12180_v46  ;;  %v11080_v37 = vmul.f32 %v11048_v18, %v11048_v18  ;;  %v9801_v63 = vadd.f32 %v19143_v56, %v9399_v31  ;;  %v19267_v33 = vpop.f32.mrf.mxu1  ;;  %v9403_v56 = vadd.f32 %v19063_v11, %v19037_v41 }
 0x524   : > { %v13577_v47 = vpop.f32.mrf.mxu0  ;;  %v10510_v18 = vadd.f32 %v19195_v45, %v19146_v34 }
 0x525   : > { %v11078_v2 = vmul.f32 %v11046_v53, %v11046_v53  ;;  %v10504_v53 = vadd.f32 %v19176_v42, %v9798_v9  ;;  %v10955_v17 = vadd.f32 %v13577_v47, %v10505_v39  ;;  %v10507_v27 = vadd.f32 %v19190_v25, %v9801_v63  ;;  %v12245_v47 = vld [vmem:[%s19228_s13 + $0x28] sm:$0xff]   ;;  %v19278_v41 = vpop.f32.mrf.mxu1 }
 0x526   : > { %v10838_v8 = vpop.f32.mrf.mxu0  ;;  %v12196_v9 = vunpack.c.h.bf16 %v12244_v54  ;;  %v9805_v38 = vadd.f32 %v19153_v52, %v9403_v56  ;;  %v12200_v22 = vunpack.c.h.bf16 %v12245_v47  ;;  %v9407_v54 = vadd.f32 %v19079_v4, %v19053_v55 }
 0x527   : > { %v10953_v43 = vadd.f32 %v10838_v8, %v10503_v59  ;;  %v11141_v58 = vadd.f32 %v11078_v2, %v11077_v48  ;;  %v11051_v62 = vsub.f32 %v10955_v17, %v12191_v6  ;;  %v9802_v59 = vadd.f32 %v19148_v30, %v9400_v5  ;;  %v19285_v17 = vpop.f32.mrf.mxu1 }
 0x528   : > { %v13578_v28 = vpop.f32.mrf.mxu0  ;;  %v12199_v8 = vunpack.c.l.bf16 %v12245_v47  ;;  %v10514_v5 = vadd.f32 %v19215_v49, %v19156_v24  ;;  %v19970_v47 = vld [vmem:[#allocation13_spill] sm:$0xff] }
 0x529   : > { %v11049_v23 = vsub.f32 %v10953_v43, %v12187_v29  ;;  %v11142_v46 = vadd.f32 %v11141_v58, %v11079_v51  ;;  %v10956_v15 = vadd.f32 %v13578_v28, %v10506_v44  ;;  %v10508_v2 = vadd.f32 %v19201_v40, %v9802_v59  ;;  %v12246_v51 = vld [vmem:[%s19228_s13 + $0x30] sm:$0xff]   ;;  %v19296_v55 = vpop.f32.mrf.mxu1 }
 0x52a   : > { %v10841_v32 = vpop.f32.mrf.mxu0  ;;  %v11083_v11 = vmul.f32 %v11051_v62, %v11051_v62  ;;  %v9404_v40 = vadd.f32 %v19071_v21, %v19045_v13  ;;  %v12204_v62 = vunpack.c.h.bf16 %v12246_v51 }
 0x52b   : > { %v10954_v1 = vadd.f32 %v10841_v32, %v10504_v53  ;;  %v11081_v50 = vmul.f32 %v11049_v23, %v11049_v23  ;;  %v11143_v12 = vadd.f32 %v11142_v46, %v11080_v37  ;;  %v11052_v10 = vsub.f32 %v10956_v15, %v12192_v26  ;;  %v12247_v32 = vld [vmem:[%s19228_s13 + $0x38] sm:$0xff]  }
 0x52c   : > { %v13581_v42 = vpop.f32.mrf.mxu0  ;;  %v12203_v53 = vunpack.c.l.bf16 %v12246_v51  ;;  %v9806_v63 = vadd.f32 %v19158_v19, %v9404_v40  ;;  %v10513_v15 = vadd.f32 %v19205_v35, %v19151_v7  ;;  %v12248_v35 = vld [vmem:[%s19228_s13 + $0x40] sm:$0xff]   ;;  %v12208_v56 = vunpack.c.h.bf16 %v12247_v32 }
 0x52d   : > { %v11050_v60 = vsub.f32 %v10954_v1, %v12188_v3  ;;  %v11144_v57 = vadd.f32 %v11143_v12, %v11081_v50  ;;  %v10959_v39 = vadd.f32 %v13581_v42, %v10509_v14  ;;  %v11084_v6 = vmul.f32 %v11052_v10, %v11052_v10  ;;  %v19969_v50 = vld [vmem:[#allocation30_spill] sm:$0xff]  ;;  %v19971_v14 = vld [vmem:[#allocation4_spill] sm:$0xff] }
 0x52e   : > { %v10854_v29 = vpop.f32.mrf.mxu0  ;;  %v10511_v3 = vadd.f32 %v19211_v36, %v9805_v38  ;;  %v10512_v12 = vadd.f32 %v19969_v50, %v9806_v63  ;;  %v12207_v42 = vunpack.c.l.bf16 %v12247_v32  ;;  %v19972_v10 = vld [vmem:[#allocation64_spill] sm:$0xff]  ;;  %v19975_v38 = vld [vmem:[#allocation3_spill] sm:$0xff]  ;;  %v12212_v63 = vunpack.c.h.bf16 %v12248_v35 }
 0x52f   : > { %v11082_v48 = vmul.f32 %v11050_v60, %v11050_v60  ;;  %v10957_v25 = vadd.f32 %v10854_v29, %v10507_v27  ;;  %v11055_v23 = vsub.f32 %v10959_v39, %v12199_v8  ;;  %v12211_v8 = vunpack.c.l.bf16 %v12248_v35  ;;  %v19974_v51 = vld [vmem:[#allocation60_spill] sm:$0xff] }
 0x530   : > { %v13582_v31 = vpop.f32.mrf.mxu0 }
 0x531   : > { %v11145_v30 = vadd.f32 %v11144_v57, %v11082_v48  ;;  %v11053_v43 = vsub.f32 %v10957_v25, %v12195_v20  ;;  %v10960_v34 = vadd.f32 %v13582_v31, %v10510_v18  ;;  %v11087_v4 = vmul.f32 %v11055_v23, %v11055_v23  ;;  %v19973_v25 = vld [vmem:[#allocation57_spill] sm:$0xff]  ;;  %v19303_v31 = vpop.f32.mrf.mxu1 }
 0x532   : > { %v10857_v58 = vpop.f32.mrf.mxu0  ;;  %v9809_v20 = vadd.f32 %v19970_v47, %v9407_v54  ;;  %v9408_v48 = vadd.f32 %v19972_v10, %v19971_v14  ;;  %v19984_v14 = vld [vmem:[#allocation36_spill] sm:$0xff] }
 0x533   : > { %v11146_v28 = vadd.f32 %v11145_v30, %v11083_v11  ;;  %v10958_v45 = vadd.f32 %v10857_v58, %v10508_v2  ;;  %v11085_v37 = vmul.f32 %v11053_v43, %v11053_v43  ;;  %v11056_v36 = vsub.f32 %v10960_v34, %v12200_v22  ;;  %v12249_v43 = vld [vmem:[%s19228_s13 + $0x48] sm:$0xff]   ;;  %v19976_v58 = vld [vmem:[#allocation22_spill] sm:$0xff]  ;;  %v19978_v34 = vld [vmem:[#allocation47_spill] sm:$0xff] }
 0x534   : > { %v13585_v44 = vpop.f32.mrf.mxu0  ;;  %v10515_v18 = vadd.f32 %v19973_v25, %v9809_v20  ;;  %v9411_v22 = vadd.f32 %v19975_v38, %v19974_v51  ;;  %v12215_v32 = vunpack.c.l.bf16 %v12249_v43 }
 0x535   : > { %v11147_v46 = vadd.f32 %v11146_v28, %v11084_v6  ;;  %v11054_v52 = vsub.f32 %v10958_v45, %v12196_v9  ;;  %v10963_v60 = vadd.f32 %v13585_v44, %v10513_v15  ;;  %v11088_v57 = vmul.f32 %v11056_v36, %v11056_v36  ;;  %v19977_v28 = vld [vmem:[#allocation10_spill] sm:$0xff]  ;;  %v19314_v15 = vpop.f32.mrf.mxu1 }
 0x536   : > { %v10870_v13 = vpop.f32.mrf.mxu0  ;;  %v9810_v6 = vadd.f32 %v19976_v58, %v9408_v48  ;;  %v10517_v45 = vadd.f32 %v19978_v34, %v19977_v28  ;;  %v19985_v48 = vld [vmem:[#allocation31_spill] sm:$0xff] }
 0x537   : > { %v11148_v21 = vadd.f32 %v11147_v46, %v11085_v37  ;;  %v11086_v26 = vmul.f32 %v11054_v52, %v11054_v52  ;;  %v10961_v1 = vadd.f32 %v10870_v13, %v10511_v3  ;;  %v11059_v9 = vsub.f32 %v10963_v60, %v12207_v42  ;;  %v19979_v37 = vld [vmem:[#allocation11_spill] sm:$0xff]  ;;  %v10471_v20 = vpop.f32.mrf.mxu1 }
 0x538   : > { %v13586_v27 = vpop.f32.mrf.mxu0  ;;  %v10518_v46 = vadd.f32 %v19242_v61, %v19979_v37  ;;  %v10516_v52 = vadd.f32 %v19249_v0, %v9810_v6  ;;  %v19981_v0 = vld [vmem:[#allocation62_spill] sm:$0xff] }
 0x539   : > { %v11149_v19 = vadd.f32 %v11148_v21, %v11086_v26  ;;  %v11057_v7 = vsub.f32 %v10961_v1, %v12203_v53  ;;  %v10964_v24 = vadd.f32 %v13586_v27, %v10514_v5  ;;  %v11091_v13 = vmul.f32 %v11059_v9, %v11059_v9  ;;  %v12250_v1 = vld [vmem:[%s19228_s13 + $0x50] sm:$0xff]   ;;  %v19980_v5 = vld [vmem:[#allocation7_spill] sm:$0xff]  ;;  %v13553_v6 = vpop.f32.mrf.mxu1 }
 0x53a   : > { %v10873_v59 = vpop.f32.mrf.mxu0  ;;  %v9813_v50 = vadd.f32 %v19980_v5, %v9411_v22  ;;  %v12219_v47 = vunpack.c.l.bf16 %v12250_v1  ;;  %v12220_v58 = vunpack.c.h.bf16 %v12250_v1 }
 0x53b   : > { %v11150_v29 = vadd.f32 %v11149_v19, %v11087_v4  ;;  %v10962_v49 = vadd.f32 %v10873_v59, %v10512_v12  ;;  %v11089_v11 = vmul.f32 %v11057_v7, %v11057_v7  ;;  %v11060_v44 = vsub.f32 %v10964_v24, %v12208_v56  ;;  %v19982_v19 = vld [vmem:[#allocation28_spill] sm:$0xff]  ;;  %v12251_v24 = vld [vmem:[%s19228_s13 + $0x58] sm:$0xff]  }
 0x53c   : > { %v13589_v2 = vpop.f32.mrf.mxu0  ;;  %v12216_v12 = vunpack.c.h.bf16 %v12249_v43  ;;  %v9412_v60 = vadd.f32 %v19982_v19, %v19981_v0  ;;  %v10519_v7 = vadd.f32 %v19267_v33, %v9813_v50  ;;  %v12223_v38 = vunpack.c.l.bf16 %v12251_v24  ;;  %v19994_v0 = vld [vmem:[#allocation6_spill] sm:$0xff] }
 0x53d   : > { %v11151_v30 = vadd.f32 %v11150_v29, %v11088_v57  ;;  %v11058_v39 = vsub.f32 %v10962_v49, %v12204_v62  ;;  %v10967_v36 = vadd.f32 %v13589_v2, %v10517_v45  ;;  %v11092_v27 = vmul.f32 %v11060_v44, %v11060_v44  ;;  %v19983_v49 = vld [vmem:[#allocation21_spill] sm:$0xff] }
 0x53e   : > { %v10886_v40 = vpop.f32.mrf.mxu0  ;;  %v9415_v10 = vadd.f32 %v19984_v14, %v19983_v49  ;;  %v9814_v25 = vadd.f32 %v19985_v48, %v9412_v60  ;;  %v10525_v19 = vadd.f32 %v19296_v55, %v19994_v0  ;;  %v19996_v55 = vld [vmem:[#allocation37_spill] sm:$0xff] }
 0x53f   : > { %v11152_v3 = vadd.f32 %v11151_v30, %v11089_v11  ;;  %v11090_v53 = vmul.f32 %v11058_v39, %v11058_v39  ;;  %v10965_v23 = vadd.f32 %v10886_v40, %v10515_v18  ;;  %v11063_v56 = vsub.f32 %v10967_v36, %v12215_v32  ;;  %v19986_v18 = vld [vmem:[#allocation19_spill] sm:$0xff]  ;;  %v19987_v39 = vld [vmem:[#allocation17_spill] sm:$0xff]  ;;  %v19989_v32 = vld [vmem:[#allocation18_spill] sm:$0xff]  ;;  %v10484_v36 = vpop.f32.mrf.mxu1 }
 0x540   : > { %v13590_v54 = vpop.f32.mrf.mxu0  ;;  %v10521_v2 = vadd.f32 %v19260_v16, %v19986_v18  ;;  %v10522_v43 = vadd.f32 %v19278_v41, %v19987_v39  ;;  %v10520_v51 = vadd.f32 %v19285_v17, %v9814_v25  ;;  %v12252_v16 = vld [vmem:[%s19228_s13 + $0x60] sm:$0xff]   ;;  %v19990_v17 = vld [vmem:[#allocation51_spill] sm:$0xff] }
 0x541   : > { %v11153_v21 = vadd.f32 %v11152_v3, %v11090_v53  ;;  %v11061_v26 = vsub.f32 %v10965_v23, %v12211_v8  ;;  %v10968_v61 = vadd.f32 %v13590_v54, %v10518_v46  ;;  %v11095_v28 = vmul.f32 %v11063_v56, %v11063_v56  ;;  %v19988_v3 = vld [vmem:[#allocation9_spill] sm:$0xff]  ;;  %v19995_v56 = vld [vmem:[#allocation14_spill] sm:$0xff]  ;;  %v13554_v14 = vpop.f32.mrf.mxu1 }
 0x542   : > { %v10889_v42 = vpop.f32.mrf.mxu0  ;;  %v9817_v44 = vadd.f32 %v19988_v3, %v9415_v10  ;;  %v12224_v53 = vunpack.c.h.bf16 %v12251_v24  ;;  %v9416_v54 = vadd.f32 %v19990_v17, %v19989_v32  ;;  %v12228_v49 = vunpack.c.h.bf16 %v12252_v16  ;;  %v12255_v3 = vld [vmem:[%s19228_s13 + $0x78] sm:$0xff]  }
 0x543   : > { %v11154_v62 = vadd.f32 %v11153_v21, %v11091_v13  ;;  %v10966_v4 = vadd.f32 %v10889_v42, %v10516_v52  ;;  %v11093_v59 = vmul.f32 %v11061_v26, %v11061_v26  ;;  %v11064_v33 = vsub.f32 %v10968_v61, %v12216_v12  ;;  %v12253_v12 = vld [vmem:[%s19228_s13 + $0x68] sm:$0xff]   ;;  %v19993_v61 = vld [vmem:[#allocation8_spill] sm:$0xff] }
 0x544   : > { %v13593_v35 = vpop.f32.mrf.mxu0  ;;  %v12227_v21 = vunpack.c.l.bf16 %v12252_v16  ;;  %v19991_v42 = vld [vmem:[#allocation41_spill] sm:$0xff] }
 0x545   : > { %v11155_v57 = vadd.f32 %v11154_v62, %v11092_v27  ;;  %v11062_v29 = vsub.f32 %v10966_v4, %v12212_v63  ;;  %v10971_v45 = vadd.f32 %v13593_v35, %v10521_v2  ;;  %v11096_v37 = vmul.f32 %v11064_v33, %v11064_v33  ;;  %v19992_v27 = vld [vmem:[#allocation50_spill] sm:$0xff] }
 0x546   : > { %v10902_v8 = vpop.f32.mrf.mxu0  ;;  %v10523_v63 = vadd.f32 %v19303_v31, %v9817_v44  ;;  %v9419_v62 = vadd.f32 %v19992_v27, %v19991_v42  ;;  %v9818_v4 = vadd.f32 %v19993_v61, %v9416_v54  ;;  %v12254_v2 = vld [vmem:[%s19228_s13 + $0x70] sm:$0xff]   ;;  %v19999_v44 = vld [vmem:[#allocation43_spill] sm:$0xff]  ;;  %v12240_v42 = vunpack.c.h.bf16 %v12255_v3 }
 0x547   : > { %v11156_v9 = vadd.f32 %v11155_v57, %v11093_v59  ;;  %v11094_v11 = vmul.f32 %v11062_v29, %v11062_v29  ;;  %v10969_v30 = vadd.f32 %v10902_v8, %v10519_v7  ;;  %v11067_v26 = vsub.f32 %v10971_v45, %v12223_v38  ;;  %v20001_v54 = vld [vmem:[#allocation42_spill] sm:$0xff] }
 0x548   : > { %v13594_v22 = vpop.f32.mrf.mxu0  ;;  %v10526_v59 = vadd.f32 %v19314_v15, %v19995_v56  ;;  %v10524_v57 = vadd.f32 %v10471_v20, %v9818_v4  ;;  %v12231_v29 = vunpack.c.l.bf16 %v12253_v12  ;;  %v9821_v8 = vadd.f32 %v19996_v55, %v9419_v62  ;;  %v19997_v15 = vld [vmem:[#allocation55_spill] sm:$0xff]  ;;  %v19998_v20 = vld [vmem:[#allocation58_spill] sm:$0xff] }
 0x549   : > { %v11157_v34 = vadd.f32 %v11156_v9, %v11094_v11  ;;  %v11065_v40 = vsub.f32 %v10969_v30, %v12219_v47  ;;  %v10972_v52 = vadd.f32 %v13594_v22, %v10522_v43  ;;  %v11099_v10 = vmul.f32 %v11067_v26, %v11067_v26 }
 0x54a   : > { %v10905_v23 = vpop.f32.mrf.mxu0  ;;  %v12232_v9 = vunpack.c.h.bf16 %v12253_v12  ;;  %v10527_v38 = vadd.f32 %v10484_v36, %v9821_v8  ;;  %v12236_v26 = vunpack.c.h.bf16 %v12254_v2 }
 0x54b   : > { %v11158_v46 = vadd.f32 %v11157_v34, %v11095_v28  ;;  %v10970_v41 = vadd.f32 %v10905_v23, %v10520_v51  ;;  %v11097_v1 = vmul.f32 %v11065_v40, %v11065_v40  ;;  %v11068_v31 = vsub.f32 %v10972_v52, %v12224_v53  ;;  %v10487_v28 = vpop.f32.mrf.mxu1  ;;  %v20000_v23 = vld [vmem:[#allocation20_spill] sm:$0xff] }
 0x54c   : > { %v13597_v13 = vpop.f32.mrf.mxu0  ;;  %v9420_v51 = vadd.f32 %v19998_v20, %v19997_v15 }
 0x54d   : > { %v11159_v5 = vadd.f32 %v11158_v46, %v11096_v37  ;;  %v11066_v50 = vsub.f32 %v10970_v41, %v12220_v58  ;;  %v10975_v25 = vadd.f32 %v13597_v13, %v10525_v19  ;;  %v11100_v11 = vmul.f32 %v11068_v31, %v11068_v31 }
 0x54e   : > { %v10918_v60 = vpop.f32.mrf.mxu0  ;;  %v12235_v58 = vunpack.c.l.bf16 %v12254_v2  ;;  %v9822_v53 = vadd.f32 %v19999_v44, %v9420_v51  ;;  %v10529_v37 = vadd.f32 %v13553_v6, %v20000_v23 }
 0x54f   : > { %v11160_v7 = vadd.f32 %v11159_v5, %v11097_v1  ;;  %v11098_v35 = vmul.f32 %v11066_v50, %v11066_v50  ;;  %v10973_v47 = vadd.f32 %v10918_v60, %v10523_v63  ;;  %v11071_v34 = vsub.f32 %v10975_v25, %v12231_v29 }
 0x550   : > { %v13598_v24 = vpop.f32.mrf.mxu0  ;;  %v10530_v63 = vadd.f32 %v13554_v14, %v20001_v54  ;;  %v10528_v13 = vadd.f32 %v10487_v28, %v9822_v53 }
 0x551   : > { %v11161_v48 = vadd.f32 %v11160_v7, %v11098_v35  ;;  %v11069_v18 = vsub.f32 %v10973_v47, %v12227_v21  ;;  %v10976_v39 = vadd.f32 %v13598_v24, %v10526_v59  ;;  %v12239_v21 = vunpack.c.l.bf16 %v12255_v3 }
 0x552   : > { %v10921_v33 = vpop.f32.mrf.mxu0  ;;  %v11103_v1 = vmul.f32 %v11071_v34, %v11071_v34 }
 0x553   : > { %v11162_v30 = vadd.f32 %v11161_v48, %v11099_v10  ;;  %v10974_v43 = vadd.f32 %v10921_v33, %v10524_v57  ;;  %v11101_v45 = vmul.f32 %v11069_v18, %v11069_v18  ;;  %v11072_v41 = vsub.f32 %v10976_v39, %v12232_v9 }
 0x554   : > { %v13601_v22 = vpop.f32.mrf.mxu0 }
 0x555   : > { %v11163_v40 = vadd.f32 %v11162_v30, %v11100_v11  ;;  %v11070_v16 = vsub.f32 %v10974_v43, %v12228_v49  ;;  %v10979_v50 = vadd.f32 %v13601_v22, %v10529_v37  ;;  %v11104_v62 = vmul.f32 %v11072_v41, %v11072_v41 }
 0x556   : > { %v10934_v46 = vpop.f32.mrf.mxu0 }
 0x557   : > { %v11164_v52 = vadd.f32 %v11163_v40, %v11101_v45  ;;  %v11102_v32 = vmul.f32 %v11070_v16, %v11070_v16  ;;  %v10977_v17 = vadd.f32 %v10934_v46, %v10527_v38  ;;  %v11075_v0 = vsub.f32 %v10979_v50, %v12239_v21 }
 0x558   : > { %v13602_v36 = vpop.f32.mrf.mxu0 }
 0x559   : > { %v11165_v5 = vadd.f32 %v11164_v52, %v11102_v32  ;;  %v11073_v12 = vsub.f32 %v10977_v17, %v12235_v58  ;;  %v10980_v61 = vadd.f32 %v13602_v36, %v10530_v63  ;;  %v11107_v56 = vmul.f32 %v11075_v0, %v11075_v0 }
 0x55a   : > { %v10937_v27 = vpop.f32.mrf.mxu0 }
 0x55b   : > { %v11166_v6 = vadd.f32 %v11165_v5, %v11103_v1  ;;  %v10978_v4 = vadd.f32 %v10937_v27, %v10528_v13  ;;  %v11105_v19 = vmul.f32 %v11073_v12, %v11073_v12  ;;  %v11076_v35 = vsub.f32 %v10980_v61, %v12240_v42 }
 0x55d   : > { %v11167_v60 = vadd.f32 %v11166_v6, %v11104_v62  ;;  %v11074_v7 = vsub.f32 %v10978_v4, %v12236_v26  ;;  %v11108_v57 = vmul.f32 %v11076_v35, %v11076_v35 }
 0x55f   : > { %v11168_v31 = vadd.f32 %v11167_v60, %v11105_v19  ;;  %v11106_v47 = vmul.f32 %v11074_v7, %v11074_v7 }
 0x561   : > { %v11169_v59 = vadd.f32 %v11168_v31, %v11106_v47 }
 0x563   : > { %v11170_v29 = vadd.f32 %v11169_v59, %v11107_v56 }
 0x565   : > { %v11171_v24 = vadd.f32 %v11170_v29, %v11108_v57 }
 0x567   : > { %11172 = vst [vmem:[%s364_s17] sm:$0xff] %v11171_v24 }
 0x568 PF: > { %s19_s30 = sadd.s32 1, %s13904_s30  }
 0x569   : > { %p16_p4 = scmp.ge.s32.totalorder %s19_s30, 4  }
 0x56b   :  { %18 = sbr.rel (!%p16_p4) target bundleno = 1 (0x1), region = 111 }

</bundles_post_ra>
